<compile_context>
chip_gen: v7x
topology: tpu7x:2x2x1
jax: 0.10.0
libtpu: 0.0.40
codegen_flags: <defaults>
</compile_context>

<pallas_src>
import functools

import jax
import jax.numpy as jnp
from jax import lax
from jax.experimental import pallas as pl
from jax.experimental.pallas import tpu as pltpu

EPS = 1e-5
_LEFT_PAD = 8                      # sublane-aligns the big interior pad store
_FALLBACK_VMEM = 48 * 1024 * 1024


# ----------------------------------------------------------------------------
# Per-generation sizing helpers
# ----------------------------------------------------------------------------
def _vmem_limit_bytes():
    """~85% of physical VMEM (~109 MiB v5e/v6e, ~54 MiB v7x)."""
    try:
        cap = int(pltpu.get_tpu_info().vmem_capacity_bytes)
        return max(32 * 1024 * 1024, int(cap * 0.85))
    except Exception:
        return _FALLBACK_VMEM


def _pick_row_tile(H, W, Cin, Cout, vmem_limit, use_col):
    """Largest divisor-of-H row tile whose conv working set fits the budget."""
    if W % 8 != 0:
        return H   # halo row blocks need W % 8 == 0; fall back to whole-image tiles

    def cost(tr):
        m = tr * W
        pad = (tr + 2) * (W + _LEFT_PAD + 1) * Cin * 2            # bf16 padded tile
        col = m * 9 * Cin * 2 if use_col else 0                   # bf16 im2col
        io = 2 * m * Cin * 4 + 4 * m * Cout * 2 + m * Cout * 4    # dbl-buffered IO + f32 acc
        return pad + col + io

    divisors = [d for d in range(1, H + 1) if H % d == 0]
    fitting = [d for d in divisors if cost(d) <= vmem_limit // 3]
    return max(fitting) if fitting else min(divisors)


# ----------------------------------------------------------------------------
# Kernels
# ----------------------------------------------------------------------------
def _conv3x3_kernel(*refs, apply_act, TR, W, use_col, has_halo):
    """3x3 'same' conv over one (image, row-tile) grid step.

    refs (in order):
      scale (1,Cin) f32, shift (1,Cin) f32          folded BN of the previous block
      x     (1,TR*W,Cin)                            main rows of this tile
      [xt   (1,W,Cin), xb (1,W,Cin)]                halo rows (only if has_halo)
      w     (9*Cin,Cout) bf16                       im2col weights
      y     (1,TR*W,Cout) bf16 out                  raw conv output (bias cancelled by BN)
      stat  (1,1,2,Cout)  f32 out                   packed per-tile (sum, sumsq)
      pad   (TR+2, W+LP+1, Cin) bf16 scratch
      [col  (TR*W, 9*Cin) bf16 scratch]             only if use_col
    """
    if has_halo:
        (scale_ref, shift_ref, x_ref, xt_ref, xb_ref, w_ref,
         y_ref, stat_ref, *scratch) = refs
    else:
        (scale_ref, shift_ref, x_ref, w_ref,
         y_ref, stat_ref, *scratch) = refs
        xt_ref = xb_ref = None
    pad_ref = scratch[0]
    col_ref = scratch[1] if use_col else None

    Cin = x_ref.shape[2]
    Cout = w_ref.shape[1]
    M = TR * W
    LP = _LEFT_PAD

    def prep(v):
        # previous block's BN folded to per-channel scale/shift + ReLU, then ONE
        # cast to bf16 (feeds both the pad scratch and the MXU operands).
        if apply_act:
            v = jnp.maximum(v.astype(jnp.float32) * scale_ref[...] + shift_ref[...], 0.0)
        return v.astype(jnp.bfloat16)

    body = prep(x_ref[0])                                   # (M, Cin) bf16

    if has_halo:
        r = pl.program_id(1)
        R = pl.num_programs(1)
        zero_row = jnp.zeros((W, Cin), jnp.bfloat16)
        top = jnp.where(r > 0, prep(xt_ref[0]), zero_row)       # row above tile (or pad)
        bot = jnp.where(r < R - 1, prep(xb_ref[0]), zero_row)   # row below tile (or pad)
    else:
        top = jnp.zeros((W, Cin), jnp.bfloat16)
        bot = jnp.zeros((W, Cin), jnp.bfloat16)

    # ---- 'same' padding: zero only the pad columns (left over-pad keeps the
    # big interior store sublane-aligned); halo rows are stored (pre-masked).
    pad_ref[:, 0:LP, :] = jnp.zeros((TR + 2, LP, Cin), jnp.bfloat16)
    pad_ref[:, LP + W:LP + W + 1, :] = jnp.zeros((TR + 2, 1, Cin), jnp.bfloat16)
    pad_ref[0:1, LP:LP + W, :] = top.reshape(1, W, Cin)
    pad_ref[TR + 1:TR + 2, LP:LP + W, :] = bot.reshape(1, W, Cin)
    pad_ref[1:TR + 1, LP:LP + W, :] = body.reshape(TR, W, Cin)

    x0 = LP - 1
    if use_col:
        # im2col: 9 shifted taps side by side -> ONE MXU matmul with K = 9*Cin.
        for t in range(9):
            ky, kx = divmod(t, 3)
            col_ref[:, t * Cin:(t + 1) * Cin] = (
                pad_ref[ky:ky + TR, x0 + kx:x0 + kx + W, :].reshape(M, Cin))
        acc = jnp.dot(col_ref[...], w_ref[...],
                      preferred_element_type=jnp.float32)          # (M, Cout) f32
    else:
        # Cin >= 128: accumulate 9 K=Cin matmuls straight from shifted pad views
        # (no 9x-expanded scratch; MXU stays fed at K=Cin).
        acc = jnp.zeros((M, Cout), jnp.float32)
        for t in range(9):
            ky, kx = divmod(t, 3)
            tap = pad_ref[ky:ky + TR, x0 + kx:x0 + kx + W, :].reshape(M, Cin)
            acc = acc + jnp.dot(tap, w_ref[t * Cin:(t + 1) * Cin, :],
                                preferred_element_type=jnp.float32)

    # ---- packed per-tile BatchNorm partial statistics (single pass, f32 acc)
    stat_ref[0, 0, 0:1, :] = jnp.sum(acc, axis=0, keepdims=True)
    stat_ref[0, 0, 1:2, :] = jnp.sum(acc * acc, axis=0, keepdims=True)

    y_ref[0] = acc.astype(y_ref.dtype)                      # bf16 intermediate to HBM


def _bn_relu_kernel(scale_ref, shift_ref, y_ref, out_ref):
    """Finalize: relu(y * scale + shift).  scale/shift (1,C) f32; y (1,TM,C) bf16."""
    y = y_ref[0].astype(jnp.float32)
    out_ref[0] = jnp.maximum(y * scale_ref[...] + shift_ref[...], 0.0)


# ----------------------------------------------------------------------------
# pallas_call wrappers
# ----------------------------------------------------------------------------
def _conv_block(x, w_c, scale, shift, *, apply_act, H, W, row_tile, vmem_limit):
    """3x3 'same' conv (+ optional fused input BN/ReLU) + packed BN partials."""
    N, M, Cin = x.shape
    Cout = w_c.shape[1]
    TR = row_tile
    R = H // TR
    TM = TR * W
    use_col = Cin < 128
    has_halo = R > 1

    kernel = functools.partial(_conv3x3_kernel, apply_act=apply_act, TR=TR, W=W,
                               use_col=use_col, has_halo=has_halo)

    full2 = lambda n, r: (0, 0)
    in_specs = [
        pl.BlockSpec((1, Cin), full2),                     # scale (prev-block BN)
        pl.BlockSpec((1, Cin), full2),                     # shift
        pl.BlockSpec((1, TM, Cin), lambda n, r: (n, r, 0)),  # main row tile
    ]
    args = [scale, shift, x]
    if has_halo:
        in_specs += [
            # one row above / below the tile, clamped at the image boundary
            pl.BlockSpec((1, W, Cin), lambda n, r: (n, jnp.maximum(r * TR - 1, 0), 0)),
            pl.BlockSpec((1, W, Cin), lambda n, r: (n, jnp.minimum(r * TR + TR, H - 1), 0)),
        ]
        args += [x, x]
    in_specs.append(pl.BlockSpec((9 * Cin, Cout), full2))  # bf16 im2col weights
    args.append(w_c)

    scratch = [pltpu.VMEM((TR + 2, W + _LEFT_PAD + 1, Cin), jnp.bfloat16)]
    if use_col:
        scratch.append(pltpu.VMEM((TM, 9 * Cin), jnp.bfloat16))

    y, stats = pl.pallas_call(
        kernel,
        grid=(N, R),
        in_specs=in_specs,
        out_specs=(
            pl.BlockSpec((1, TM, Cout), lambda n, r: (n, r, 0)),
            pl.BlockSpec((1, 1, 2, Cout), lambda n, r: (n, r, 0, 0)),
        ),
        out_shape=(
            jax.ShapeDtypeStruct((N, M, Cout), jnp.bfloat16),   # bf16 intermediate
            jax.ShapeDtypeStruct((N, R, 2, Cout), jnp.float32),  # packed (sum, sumsq)
        ),
        scratch_shapes=scratch,
        compiler_params=pltpu.CompilerParams(
            dimension_semantics=("parallel", "parallel"),   # megacore over (N, rows)
            vmem_limit_bytes=vmem_limit),
    )(*args)
    return y, stats


def _bn_relu(y, scale, shift, *, H, W, row_tile, vmem_limit):
    N, M, C = y.shape
    TR = row_tile
    R = H // TR
    TM = TR * W
    full2 = lambda n, r: (0, 0)
    blk = lambda n, r: (n, r, 0)
    return pl.pallas_call(
        _bn_relu_kernel,
        grid=(N, R),
        in_specs=[pl.BlockSpec((1, C), full2),
                  pl.BlockSpec((1, C), full2),
                  pl.BlockSpec((1, TM, C), blk)],
        out_specs=pl.BlockSpec((1, TM, C), blk),
        out_shape=jax.ShapeDtypeStruct((N, M, C), jnp.float32),
        compiler_params=pltpu.CompilerParams(
            dimension_semantics=("parallel", "parallel"),
            vmem_limit_bytes=vmem_limit),
    )(scale, shift, y)


def _bn_scale_shift(stats, gamma, beta, count):
    """Fold training-mode BatchNorm into per-channel scale/shift (tiny, plain JAX)."""
    s = jnp.sum(stats[:, :, 0, :], axis=(0, 1))              # (C,)
    ss = jnp.sum(stats[:, :, 1, :], axis=(0, 1))             # (C,)
    mean = s / count
    var = jnp.maximum(ss / count - mean * mean, 0.0)          # biased variance (training)
    scale = gamma * lax.rsqrt(var + EPS)
    shift = beta - mean * scale
    return (scale.reshape(1, -1).astype(jnp.float32),
            shift.reshape(1, -1).astype(jnp.float32))


def double_conv(x_nchw, params, *, row_tile=None):
    """x_nchw: (N, Cin, H, W) float32. Returns (N, Cout, H, W) float32."""
    w1, b1, g1, be1, w2, b2, g2, be2 = params   # b1/b2 unused in-kernel: cancelled by BN
    N, Cin, H, W = x_nchw.shape
    Cout = w1.shape[-1]
    M = H * W
    vmem_limit = _vmem_limit_bytes()

    # TODO(synk): fuse these layout transposes into the Pallas passes.
    x = jnp.transpose(x_nchw, (0, 2, 3, 1)).reshape(N, M, Cin).astype(jnp.float32)
    # (3,3,Ci,Co) -> (9*Ci, Co) im2col weights, cast to bf16 once (MXU bf16 path)
    w1_c = w1.reshape(9 * Cin, Cout).astype(jnp.bfloat16)
    w2_c = w2.reshape(9 * Cout, Cout).astype(jnp.bfloat16)

    if row_tile is None:
        tr1 = _pick_row_tile(H, W, Cin, Cout, vmem_limit, Cin < 128)
        tr2 = _pick_row_tile(H, W, Cout, Cout, vmem_limit, Cout < 128)
    else:
        rt = row_tile
        if rt >= H or W % 8 != 0 or H % rt != 0:
            rt = H                                   # safe fallback: whole-image tiles
        tr1 = tr2 = rt

    one_in = jnp.ones((1, Cin), jnp.float32)      # dummies (apply_act=False path)
    zero_in = jnp.zeros((1, Cin), jnp.float32)

    # block 1: conv1 + global BN1 statistics
    y1, st1 = _conv_block(x, w1_c, one_in, zero_in, apply_act=False,
                          H=H, W=W, row_tile=tr1, vmem_limit=vmem_limit)
    sc1, sh1 = _bn_scale_shift(st1, g1, be1, N * M)

    # block 2: BN1+ReLU fused into conv2's input path, conv2 + global BN2 statistics
    y2, st2 = _conv_block(y1, w2_c, sc1, sh1, apply_act=True,
                          H=H, W=W, row_tile=tr2, vmem_limit=vmem_limit)
    sc2, sh2 = _bn_scale_shift(st2, g2, be2, N * M)

    # finalize: BN2 + ReLU
    out = _bn_relu(y2, sc2, sh2, H=H, W=W, row_tile=tr2, vmem_limit=vmem_limit)
    return jnp.transpose(out.reshape(N, H, W, Cout), (0, 3, 1, 2))


# ----------------------------------------------------------------------------
# Pure-JAX reference (PyTorch semantics: conv bias + training-mode BatchNorm)
# ----------------------------------------------------------------------------
def reference_double_conv(x_nchw, params):
    w1, b1, g1, be1, w2, b2, g2, be2 = params
    x = jnp.transpose(x_nchw, (0, 2, 3, 1)).astype(jnp.float32)

    def block(x, w, b, g, be):
        y = lax.conv_general_dilated(
            x, w, window_strides=(1, 1), padding="SAME",
            dimension_numbers=("NHWC", "HWIO", "NHWC"))
        y = y + b.reshape(1, 1, 1, -1)
        mean = jnp.mean(y, axis=(0, 1, 2), keepdims=True)
        var = jnp.mean((y - mean) ** 2, axis=(0, 1, 2), keepdims=True)
        y = (y - mean) / jnp.sqrt(var + EPS)
        y = y * g.reshape(1, 1, 1, -1) + be.reshape(1, 1, 1, -1)
        return jnp.maximum(y, 0.0)

    y = block(x, w1, b1, g1, be1)
    y = block(y, w2, b2, g2, be2)
    return jnp.transpose(y, (0, 3, 1, 2))


def init_params(key, in_channels, out_channels):
    # Deterministic synthetic init (weights kept as (kh,kw,Cin,Cout) == HWIO).
    k1, k2, k3, k4 = jax.random.split(key, 4)
    s1 = 1.0 / jnp.sqrt(in_channels * 9.0)
    s2 = 1.0 / jnp.sqrt(out_channels * 9.0)
    w1 = jax.random.normal(k1, (3, 3, in_channels, out_channels), jnp.float32) * s1
    b1 = jax.random.normal(k2, (out_channels,), jnp.float32) * 0.1
    w2 = jax.random.normal(k3, (3, 3, out_channels, out_channels), jnp.float32) * s2
    b2 = jax.random.normal(k4, (out_channels,), jnp.float32) * 0.1
    g1 = jnp.ones((out_channels,), jnp.float32)
    be1 = jnp.zeros((out_channels,), jnp.float32)
    g2 = jnp.ones((out_channels,), jnp.float32)
    be2 = jnp.zeros((out_channels,), jnp.float32)
    return (w1, b1, g1, be1, w2, b2, g2, be2)


if __name__ == "__main__":
    key = jax.random.PRNGKey(0)
    kxa, kpa, kxb, kpb = jax.random.split(key, 4)

    # Config A: auto row tile (whole image per grid step -> no-halo path).
    N, Cin, Cout, H, W = 2, 4, 8, 16, 16
    xa = jax.random.normal(kxa, (N, Cin, H, W), jnp.float32)
    pa = init_params(kpa, Cin, Cout)
    out_a = jax.block_until_ready(jax.jit(double_conv)(xa, pa))
    ref_a = reference_double_conv(xa, pa)
    assert out_a.shape == (N, Cout, H, W)
    err_a = jnp.max(jnp.abs(out_a - ref_a))
    assert jnp.allclose(out_a, ref_a, rtol=3e-2, atol=5e-2), f"A: max abs err {err_a}"

    # Config B: forced 4-row tiles (exercises the halo path), UNet-stem Cin=3.
    N2, Cin2, Cout2 = 2, 3, 8
    xb = jax.random.normal(kxb, (N2, Cin2, H, W), jnp.float32)
    pb = init_params(kpb, Cin2, Cout2)
    dc_tiled = jax.jit(functools.partial(double_conv, row_tile=4))
    out_b = jax.block_until_ready(dc_tiled(xb, pb))
    ref_b = reference_double_conv(xb, pb)
    err_b = jnp.max(jnp.abs(out_b - ref_b))
    assert jnp.allclose(out_b, ref_b, rtol=3e-2, atol=5e-2), f"B: max abs err {err_b}"

    print("KERNEL_OK")
</pallas_src>

<mosaic_0001>
module attributes {stable_mosaic.version = 11 : i64} {
  func.func @_conv3x3_kernel(%arg0: i32, %arg1: i32, %arg2: memref<1x4xf32, #tpu.memory_space<vmem>>, %arg3: memref<1x4xf32, #tpu.memory_space<vmem>>, %arg4: memref<1x256x4xf32, #tpu.memory_space<vmem>>, %arg5: memref<36x8xbf16, #tpu.memory_space<vmem>>, %arg6: memref<1x256x8xbf16, #tpu.memory_space<vmem>>, %arg7: memref<1x1x2x8xf32, #tpu.memory_space<vmem>>, %arg8: memref<18x25x4xbf16, #tpu.memory_space<vmem>>, %arg9: memref<256x36xbf16, #tpu.memory_space<vmem>>) attributes {dimension_semantics = [#tpu.dimension_semantics<parallel>, #tpu.dimension_semantics<parallel>], iteration_bounds = array<i64: 2, 1>, scalar_prefetch = 0 : i64, scratch_operands = 2 : i64, tpu.core_type = #tpu.core_type<tc>, window_params = [{pipeline_mode = #tpu.pipeline_mode<synchronous>, transform_indices = @transform_0, window_bounds = array<i64: 1, 4>}, {pipeline_mode = #tpu.pipeline_mode<synchronous>, transform_indices = @transform_1, window_bounds = array<i64: 1, 4>}, {transform_indices = @transform_2, window_bounds = array<i64: 1, 256, 4>}, {pipeline_mode = #tpu.pipeline_mode<synchronous>, transform_indices = @transform_3, window_bounds = array<i64: 36, 8>}, {transform_indices = @transform_4, window_bounds = array<i64: 1, 256, 8>}, {transform_indices = @transform_5, window_bounds = array<i64: 1, 1, 2, 8>}]} {
    %c0 = arith.constant 0 : index
    %c0_0 = arith.constant 0 : index
    %c0_1 = arith.constant 0 : index
    %0 = vector.load %arg4[%c0, %c0_0, %c0_1] : memref<1x256x4xf32, #tpu.memory_space<vmem>>, vector<1x256x4xf32>
    %1 = vector.shape_cast %0 : vector<1x256x4xf32> to vector<256x4xf32>
    %2 = arith.truncf %1 : vector<256x4xf32> to vector<256x4xbf16>
    %cst = arith.constant 0.000000e+00 : bf16
    %3 = vector.broadcast %cst : bf16 to vector<16x4xbf16>
    %cst_2 = arith.constant 0.000000e+00 : bf16
    %4 = vector.broadcast %cst_2 : bf16 to vector<16x4xbf16>
    %cst_3 = arith.constant 0.000000e+00 : bf16
    %5 = vector.broadcast %cst_3 : bf16 to vector<18x8x4xbf16>
    %c0_4 = arith.constant 0 : index
    %c0_5 = arith.constant 0 : index
    %c0_6 = arith.constant 0 : index
    %6 = vector.load %arg8[%c0_4, %c0_5, %c0_6] : memref<18x25x4xbf16, #tpu.memory_space<vmem>>, vector<18x8x4xbf16>
    tpu.vector_store %arg8[%c0_4, %c0_5, %c0_6], %5 {strides = array<i32>} : memref<18x25x4xbf16, #tpu.memory_space<vmem>>, vector<18x8x4xbf16>,
    %cst_7 = arith.constant 0.000000e+00 : bf16
    %7 = vector.broadcast %cst_7 : bf16 to vector<18x1x4xbf16>
    %c0_8 = arith.constant 0 : index
    %c24 = arith.constant 24 : index
    %c0_9 = arith.constant 0 : index
    %8 = vector.load %arg8[%c0_8, %c24, %c0_9] : memref<18x25x4xbf16, #tpu.memory_space<vmem>>, vector<18x1x4xbf16>
    tpu.vector_store %arg8[%c0_8, %c24, %c0_9], %7 {strides = array<i32>} : memref<18x25x4xbf16, #tpu.memory_space<vmem>>, vector<18x1x4xbf16>,
    %9 = vector.shape_cast %3 : vector<16x4xbf16> to vector<1x16x4xbf16>
    %c0_10 = arith.constant 0 : index
    %c8 = arith.constant 8 : index
    %c0_11 = arith.constant 0 : index
    %10 = vector.load %arg8[%c0_10, %c8, %c0_11] : memref<18x25x4xbf16, #tpu.memory_space<vmem>>, vector<1x16x4xbf16>
    tpu.vector_store %arg8[%c0_10, %c8, %c0_11], %9 {strides = array<i32>} : memref<18x25x4xbf16, #tpu.memory_space<vmem>>, vector<1x16x4xbf16>,
    %11 = vector.shape_cast %4 : vector<16x4xbf16> to vector<1x16x4xbf16>
    %c17 = arith.constant 17 : index
    %c8_12 = arith.constant 8 : index
    %c0_13 = arith.constant 0 : index
    %12 = vector.load %arg8[%c17, %c8_12, %c0_13] : memref<18x25x4xbf16, #tpu.memory_space<vmem>>, vector<1x16x4xbf16>
    tpu.vector_store %arg8[%c17, %c8_12, %c0_13], %11 {strides = array<i32>} : memref<18x25x4xbf16, #tpu.memory_space<vmem>>, vector<1x16x4xbf16>,
    %13 = vector.shape_cast %2 : vector<256x4xbf16> to vector<16x16x4xbf16>
    %c1 = arith.constant 1 : index
    %c8_14 = arith.constant 8 : index
    %c0_15 = arith.constant 0 : index
    %14 = vector.load %arg8[%c1, %c8_14, %c0_15] : memref<18x25x4xbf16, #tpu.memory_space<vmem>>, vector<16x16x4xbf16>
    tpu.vector_store %arg8[%c1, %c8_14, %c0_15], %13 {strides = array<i32>} : memref<18x25x4xbf16, #tpu.memory_space<vmem>>, vector<16x16x4xbf16>,
    %c0_16 = arith.constant 0 : index
    %c7 = arith.constant 7 : index
    %c0_17 = arith.constant 0 : index
    %15 = vector.load %arg8[%c0_16, %c7, %c0_17] : memref<18x25x4xbf16, #tpu.memory_space<vmem>>, vector<16x16x4xbf16>
    %16 = vector.shape_cast %15 : vector<16x16x4xbf16> to vector<256x4xbf16>
    %c0_18 = arith.constant 0 : index
    %c0_19 = arith.constant 0 : index
    %17 = vector.load %arg9[%c0_18, %c0_19] : memref<256x36xbf16, #tpu.memory_space<vmem>>, vector<256x4xbf16>
    tpu.vector_store %arg9[%c0_18, %c0_19], %16 {strides = array<i32>} : memref<256x36xbf16, #tpu.memory_space<vmem>>, vector<256x4xbf16>,
    %c0_20 = arith.constant 0 : index
    %c8_21 = arith.constant 8 : index
    %c0_22 = arith.constant 0 : index
    %18 = vector.load %arg8[%c0_20, %c8_21, %c0_22] : memref<18x25x4xbf16, #tpu.memory_space<vmem>>, vector<16x16x4xbf16>
    %19 = vector.shape_cast %18 : vector<16x16x4xbf16> to vector<256x4xbf16>
    %c0_23 = arith.constant 0 : index
    %c4 = arith.constant 4 : index
    %20 = vector.load %arg9[%c0_23, %c4] : memref<256x36xbf16, #tpu.memory_space<vmem>>, vector<256x4xbf16>
    tpu.vector_store %arg9[%c0_23, %c4], %19 {strides = array<i32>} : memref<256x36xbf16, #tpu.memory_space<vmem>>, vector<256x4xbf16>,
    %c0_24 = arith.constant 0 : index
    %c9 = arith.constant 9 : index
    %c0_25 = arith.constant 0 : index
    %21 = vector.load %arg8[%c0_24, %c9, %c0_25] : memref<18x25x4xbf16, #tpu.memory_space<vmem>>, vector<16x16x4xbf16>
    %22 = vector.shape_cast %21 : vector<16x16x4xbf16> to vector<256x4xbf16>
    %c0_26 = arith.constant 0 : index
    %c8_27 = arith.constant 8 : index
    %23 = vector.load %arg9[%c0_26, %c8_27] : memref<256x36xbf16, #tpu.memory_space<vmem>>, vector<256x4xbf16>
    tpu.vector_store %arg9[%c0_26, %c8_27], %22 {strides = array<i32>} : memref<256x36xbf16, #tpu.memory_space<vmem>>, vector<256x4xbf16>,
    %c1_28 = arith.constant 1 : index
    %c7_29 = arith.constant 7 : index
    %c0_30 = arith.constant 0 : index
    %24 = vector.load %arg8[%c1_28, %c7_29, %c0_30] : memref<18x25x4xbf16, #tpu.memory_space<vmem>>, vector<16x16x4xbf16>
    %25 = vector.shape_cast %24 : vector<16x16x4xbf16> to vector<256x4xbf16>
    %c0_31 = arith.constant 0 : index
    %c12 = arith.constant 12 : index
    %26 = vector.load %arg9[%c0_31, %c12] : memref<256x36xbf16, #tpu.memory_space<vmem>>, vector<256x4xbf16>
    tpu.vector_store %arg9[%c0_31, %c12], %25 {strides = array<i32>} : memref<256x36xbf16, #tpu.memory_space<vmem>>, vector<256x4xbf16>,
    %c1_32 = arith.constant 1 : index
    %c8_33 = arith.constant 8 : index
    %c0_34 = arith.constant 0 : index
    %27 = vector.load %arg8[%c1_32, %c8_33, %c0_34] : memref<18x25x4xbf16, #tpu.memory_space<vmem>>, vector<16x16x4xbf16>
    %28 = vector.shape_cast %27 : vector<16x16x4xbf16> to vector<256x4xbf16>
    %c0_35 = arith.constant 0 : index
    %c16 = arith.constant 16 : index
    %29 = vector.load %arg9[%c0_35, %c16] : memref<256x36xbf16, #tpu.memory_space<vmem>>, vector<256x4xbf16>
    tpu.vector_store %arg9[%c0_35, %c16], %28 {strides = array<i32>} : memref<256x36xbf16, #tpu.memory_space<vmem>>, vector<256x4xbf16>,
    %c1_36 = arith.constant 1 : index
    %c9_37 = arith.constant 9 : index
    %c0_38 = arith.constant 0 : index
    %30 = vector.load %arg8[%c1_36, %c9_37, %c0_38] : memref<18x25x4xbf16, #tpu.memory_space<vmem>>, vector<16x16x4xbf16>
    %31 = vector.shape_cast %30 : vector<16x16x4xbf16> to vector<256x4xbf16>
    %c0_39 = arith.constant 0 : index
    %c20 = arith.constant 20 : index
    %32 = vector.load %arg9[%c0_39, %c20] : memref<256x36xbf16, #tpu.memory_space<vmem>>, vector<256x4xbf16>
    tpu.vector_store %arg9[%c0_39, %c20], %31 {strides = array<i32>} : memref<256x36xbf16, #tpu.memory_space<vmem>>, vector<256x4xbf16>,
    %c2 = arith.constant 2 : index
    %c7_40 = arith.constant 7 : index
    %c0_41 = arith.constant 0 : index
    %33 = vector.load %arg8[%c2, %c7_40, %c0_41] : memref<18x25x4xbf16, #tpu.memory_space<vmem>>, vector<16x16x4xbf16>
    %34 = vector.shape_cast %33 : vector<16x16x4xbf16> to vector<256x4xbf16>
    %c0_42 = arith.constant 0 : index
    %c24_43 = arith.constant 24 : index
    %35 = vector.load %arg9[%c0_42, %c24_43] : memref<256x36xbf16, #tpu.memory_space<vmem>>, vector<256x4xbf16>
    tpu.vector_store %arg9[%c0_42, %c24_43], %34 {strides = array<i32>} : memref<256x36xbf16, #tpu.memory_space<vmem>>, vector<256x4xbf16>,
    %c2_44 = arith.constant 2 : index
    %c8_45 = arith.constant 8 : index
    %c0_46 = arith.constant 0 : index
    %36 = vector.load %arg8[%c2_44, %c8_45, %c0_46] : memref<18x25x4xbf16, #tpu.memory_space<vmem>>, vector<16x16x4xbf16>
    %37 = vector.shape_cast %36 : vector<16x16x4xbf16> to vector<256x4xbf16>
    %c0_47 = arith.constant 0 : index
    %c28 = arith.constant 28 : index
    %38 = vector.load %arg9[%c0_47, %c28] : memref<256x36xbf16, #tpu.memory_space<vmem>>, vector<256x4xbf16>
    tpu.vector_store %arg9[%c0_47, %c28], %37 {strides = array<i32>} : memref<256x36xbf16, #tpu.memory_space<vmem>>, vector<256x4xbf16>,
    %c2_48 = arith.constant 2 : index
    %c9_49 = arith.constant 9 : index
    %c0_50 = arith.constant 0 : index
    %39 = vector.load %arg8[%c2_48, %c9_49, %c0_50] : memref<18x25x4xbf16, #tpu.memory_space<vmem>>, vector<16x16x4xbf16>
    %40 = vector.shape_cast %39 : vector<16x16x4xbf16> to vector<256x4xbf16>
    %c0_51 = arith.constant 0 : index
    %c32 = arith.constant 32 : index
    %41 = vector.load %arg9[%c0_51, %c32] : memref<256x36xbf16, #tpu.memory_space<vmem>>, vector<256x4xbf16>
    tpu.vector_store %arg9[%c0_51, %c32], %40 {strides = array<i32>} : memref<256x36xbf16, #tpu.memory_space<vmem>>, vector<256x4xbf16>,
    %c0_52 = arith.constant 0 : index
    %c0_53 = arith.constant 0 : index
    %42 = vector.load %arg9[%c0_52, %c0_53] : memref<256x36xbf16, #tpu.memory_space<vmem>>, vector<256x36xbf16>
    %c0_54 = arith.constant 0 : index
    %c0_55 = arith.constant 0 : index
    %43 = vector.load %arg5[%c0_54, %c0_55] : memref<36x8xbf16, #tpu.memory_space<vmem>>, vector<36x8xbf16>
    %cst_56 = arith.constant dense<0.000000e+00> : vector<256x8xf32>
    %44 = tpu.matmul %42, %43, %cst_56 {dimension_numbers = #tpu.dot_dimension_numbers<[1], [0], [0], [1], [0, 0, 1, 1], [], []>} : vector<256x36xbf16>, vector<36x8xbf16>, vector<256x8xf32> -> vector<256x8xf32>
    %cst_57 = arith.constant dense<0.000000e+00> : vector<8xf32>
    %45 = vector.multi_reduction <add>, %44, %cst_57 [0] : vector<256x8xf32> to vector<8xf32>
    %46 = vector.shape_cast %45 : vector<8xf32> to vector<1x8xf32>
    %c0_58 = arith.constant 0 : index
    %c0_59 = arith.constant 0 : index
    %c0_60 = arith.constant 0 : index
    %c0_61 = arith.constant 0 : index
    %47 = vector.load %arg7[%c0_58, %c0_59, %c0_60, %c0_61] : memref<1x1x2x8xf32, #tpu.memory_space<vmem>>, vector<1x1x1x8xf32>
    %48 = vector.shape_cast %47 : vector<1x1x1x8xf32> to vector<1x8xf32>
    %49 = vector.shape_cast %46 : vector<1x8xf32> to vector<1x1x1x8xf32>
    tpu.vector_store %arg7[%c0_58, %c0_59, %c0_60, %c0_61], %49 {strides = array<i32>} : memref<1x1x2x8xf32, #tpu.memory_space<vmem>>, vector<1x1x1x8xf32>,
    %50 = arith.mulf %44, %44 : vector<256x8xf32>
    %cst_62 = arith.constant dense<0.000000e+00> : vector<8xf32>
    %51 = vector.multi_reduction <add>, %50, %cst_62 [0] : vector<256x8xf32> to vector<8xf32>
    %52 = vector.shape_cast %51 : vector<8xf32> to vector<1x8xf32>
    %c0_63 = arith.constant 0 : index
    %c0_64 = arith.constant 0 : index
    %c1_65 = arith.constant 1 : index
    %c0_66 = arith.constant 0 : index
    %53 = vector.load %arg7[%c0_63, %c0_64, %c1_65, %c0_66] : memref<1x1x2x8xf32, #tpu.memory_space<vmem>>, vector<1x1x1x8xf32>
    %54 = vector.shape_cast %53 : vector<1x1x1x8xf32> to vector<1x8xf32>
    %55 = vector.shape_cast %52 : vector<1x8xf32> to vector<1x1x1x8xf32>
    tpu.vector_store %arg7[%c0_63, %c0_64, %c1_65, %c0_66], %55 {strides = array<i32>} : memref<1x1x2x8xf32, #tpu.memory_space<vmem>>, vector<1x1x1x8xf32>,
    %56 = arith.truncf %44 : vector<256x8xf32> to vector<256x8xbf16>
    %c0_67 = arith.constant 0 : index
    %c0_68 = arith.constant 0 : index
    %c0_69 = arith.constant 0 : index
    %57 = vector.load %arg6[%c0_67, %c0_68, %c0_69] : memref<1x256x8xbf16, #tpu.memory_space<vmem>>, vector<1x256x8xbf16>
    %58 = vector.shape_cast %57 : vector<1x256x8xbf16> to vector<256x8xbf16>
    %59 = vector.shape_cast %56 : vector<256x8xbf16> to vector<1x256x8xbf16>
    tpu.vector_store %arg6[%c0_67, %c0_68, %c0_69], %59 {strides = array<i32>} : memref<1x256x8xbf16, #tpu.memory_space<vmem>>, vector<1x256x8xbf16>,
    return
  }
  func.func @transform_0(%arg0: i32, %arg1: i32) -> (i32, i32) {
    %c0_i32 = arith.constant 0 : i32
    %c0_i32_0 = arith.constant 0 : i32
    %c0_i32_1 = arith.constant 0 : i32
    return %c0_i32, %c0_i32_0 : i32, i32
  }
  func.func @transform_1(%arg0: i32, %arg1: i32) -> (i32, i32) {
    %c0_i32 = arith.constant 0 : i32
    %c0_i32_0 = arith.constant 0 : i32
    %c0_i32_1 = arith.constant 0 : i32
    return %c0_i32, %c0_i32_0 : i32, i32
  }
  func.func @transform_2(%arg0: i32, %arg1: i32) -> (i32, i32, i32) {
    %c0_i32 = arith.constant 0 : i32
    %c0_i32_0 = arith.constant 0 : i32
    return %arg0, %arg1, %c0_i32 : i32, i32, i32
  }
  func.func @transform_3(%arg0: i32, %arg1: i32) -> (i32, i32) {
    %c0_i32 = arith.constant 0 : i32
    %c0_i32_0 = arith.constant 0 : i32
    %c0_i32_1 = arith.constant 0 : i32
    return %c0_i32, %c0_i32_0 : i32, i32
  }
  func.func @transform_4(%arg0: i32, %arg1: i32) -> (i32, i32, i32) {
    %c0_i32 = arith.constant 0 : i32
    %c0_i32_0 = arith.constant 0 : i32
    return %arg0, %arg1, %c0_i32 : i32, i32, i32
  }
  func.func @transform_5(%arg0: i32, %arg1: i32) -> (i32, i32, i32, i32) {
    %c0_i32 = arith.constant 0 : i32
    %c0_i32_0 = arith.constant 0 : i32
    %c0_i32_1 = arith.constant 0 : i32
    return %arg0, %arg1, %c0_i32, %c0_i32_0 : i32, i32, i32, i32
  }
}

module attributes {stable_mosaic.version = 11 : i64} {
  func.func @_bn_relu_kernel(%arg0: i32, %arg1: i32, %arg2: memref<1x8xf32, #tpu.memory_space<vmem>>, %arg3: memref<1x8xf32, #tpu.memory_space<vmem>>, %arg4: memref<1x256x8xbf16, #tpu.memory_space<vmem>>, %arg5: memref<1x256x8xf32, #tpu.memory_space<vmem>>) attributes {dimension_semantics = [#tpu.dimension_semantics<parallel>, #tpu.dimension_semantics<parallel>], iteration_bounds = array<i64: 2, 1>, scalar_prefetch = 0 : i64, scratch_operands = 0 : i64, tpu.core_type = #tpu.core_type<tc>, window_params = [{pipeline_mode = #tpu.pipeline_mode<synchronous>, transform_indices = @transform_0, window_bounds = array<i64: 1, 8>}, {pipeline_mode = #tpu.pipeline_mode<synchronous>, transform_indices = @transform_1, window_bounds = array<i64: 1, 8>}, {transform_indices = @transform_2, window_bounds = array<i64: 1, 256, 8>}, {transform_indices = @transform_3, window_bounds = array<i64: 1, 256, 8>}]} {
    %c0 = arith.constant 0 : index
    %c0_0 = arith.constant 0 : index
    %c0_1 = arith.constant 0 : index
    %0 = vector.load %arg4[%c0, %c0_0, %c0_1] : memref<1x256x8xbf16, #tpu.memory_space<vmem>>, vector<1x256x8xbf16>
    %1 = vector.shape_cast %0 : vector<1x256x8xbf16> to vector<256x8xbf16>
    %2 = arith.extf %1 : vector<256x8xbf16> to vector<256x8xf32>
    %c0_2 = arith.constant 0 : index
    %c0_3 = arith.constant 0 : index
    %3 = vector.load %arg2[%c0_2, %c0_3] : memref<1x8xf32, #tpu.memory_space<vmem>>, vector<1x8xf32>
    %4 = vector.broadcast %3 : vector<1x8xf32> to vector<256x8xf32>
    %5 = arith.mulf %2, %4 : vector<256x8xf32>
    %c0_4 = arith.constant 0 : index
    %c0_5 = arith.constant 0 : index
    %6 = vector.load %arg3[%c0_4, %c0_5] : memref<1x8xf32, #tpu.memory_space<vmem>>, vector<1x8xf32>
    %7 = vector.broadcast %6 : vector<1x8xf32> to vector<256x8xf32>
    %8 = arith.addf %5, %7 : vector<256x8xf32>
    %cst = arith.constant 0.000000e+00 : f32
    %9 = vector.broadcast %cst : f32 to vector<256x8xf32>
    %10 = arith.maximumf %8, %9 : vector<256x8xf32>
    %c0_6 = arith.constant 0 : index
    %c0_7 = arith.constant 0 : index
    %c0_8 = arith.constant 0 : index
    %11 = vector.load %arg5[%c0_6, %c0_7, %c0_8] : memref<1x256x8xf32, #tpu.memory_space<vmem>>, vector<1x256x8xf32>
    %12 = vector.shape_cast %11 : vector<1x256x8xf32> to vector<256x8xf32>
    %13 = vector.shape_cast %10 : vector<256x8xf32> to vector<1x256x8xf32>
    tpu.vector_store %arg5[%c0_6, %c0_7, %c0_8], %13 {strides = array<i32>} : memref<1x256x8xf32, #tpu.memory_space<vmem>>, vector<1x256x8xf32>,
    return
  }
  func.func @transform_0(%arg0: i32, %arg1: i32) -> (i32, i32) {
    %c0_i32 = arith.constant 0 : i32
    %c0_i32_0 = arith.constant 0 : i32
    %c0_i32_1 = arith.constant 0 : i32
    return %c0_i32, %c0_i32_0 : i32, i32
  }
  func.func @transform_1(%arg0: i32, %arg1: i32) -> (i32, i32) {
    %c0_i32 = arith.constant 0 : i32
    %c0_i32_0 = arith.constant 0 : i32
    %c0_i32_1 = arith.constant 0 : i32
    return %c0_i32, %c0_i32_0 : i32, i32
  }
  func.func @transform_2(%arg0: i32, %arg1: i32) -> (i32, i32, i32) {
    %c0_i32 = arith.constant 0 : i32
    %c0_i32_0 = arith.constant 0 : i32
    return %arg0, %arg1, %c0_i32 : i32, i32, i32
  }
  func.func @transform_3(%arg0: i32, %arg1: i32) -> (i32, i32, i32) {
    %c0_i32 = arith.constant 0 : i32
    %c0_i32_0 = arith.constant 0 : i32
    return %arg0, %arg1, %c0_i32 : i32, i32, i32
  }
}

module attributes {stable_mosaic.version = 11 : i64} {
  func.func @_conv3x3_kernel(%arg0: i32, %arg1: i32, %arg2: memref<1x8xf32, #tpu.memory_space<vmem>>, %arg3: memref<1x8xf32, #tpu.memory_space<vmem>>, %arg4: memref<1x256x8xbf16, #tpu.memory_space<vmem>>, %arg5: memref<72x8xbf16, #tpu.memory_space<vmem>>, %arg6: memref<1x256x8xbf16, #tpu.memory_space<vmem>>, %arg7: memref<1x1x2x8xf32, #tpu.memory_space<vmem>>, %arg8: memref<18x25x8xbf16, #tpu.memory_space<vmem>>, %arg9: memref<256x72xbf16, #tpu.memory_space<vmem>>) attributes {dimension_semantics = [#tpu.dimension_semantics<parallel>, #tpu.dimension_semantics<parallel>], iteration_bounds = array<i64: 2, 1>, scalar_prefetch = 0 : i64, scratch_operands = 2 : i64, tpu.core_type = #tpu.core_type<tc>, window_params = [{pipeline_mode = #tpu.pipeline_mode<synchronous>, transform_indices = @transform_0, window_bounds = array<i64: 1, 8>}, {pipeline_mode = #tpu.pipeline_mode<synchronous>, transform_indices = @transform_1, window_bounds = array<i64: 1, 8>}, {transform_indices = @transform_2, window_bounds = array<i64: 1, 256, 8>}, {pipeline_mode = #tpu.pipeline_mode<synchronous>, transform_indices = @transform_3, window_bounds = array<i64: 72, 8>}, {transform_indices = @transform_4, window_bounds = array<i64: 1, 256, 8>}, {transform_indices = @transform_5, window_bounds = array<i64: 1, 1, 2, 8>}]} {
    %c0 = arith.constant 0 : index
    %c0_0 = arith.constant 0 : index
    %c0_1 = arith.constant 0 : index
    %0 = vector.load %arg4[%c0, %c0_0, %c0_1] : memref<1x256x8xbf16, #tpu.memory_space<vmem>>, vector<1x256x8xbf16>
    %1 = vector.shape_cast %0 : vector<1x256x8xbf16> to vector<256x8xbf16>
    %2 = arith.extf %1 : vector<256x8xbf16> to vector<256x8xf32>
    %c0_2 = arith.constant 0 : index
    %c0_3 = arith.constant 0 : index
    %3 = vector.load %arg2[%c0_2, %c0_3] : memref<1x8xf32, #tpu.memory_space<vmem>>, vector<1x8xf32>
    %4 = vector.broadcast %3 : vector<1x8xf32> to vector<256x8xf32>
    %5 = arith.mulf %2, %4 : vector<256x8xf32>
    %c0_4 = arith.constant 0 : index
    %c0_5 = arith.constant 0 : index
    %6 = vector.load %arg3[%c0_4, %c0_5] : memref<1x8xf32, #tpu.memory_space<vmem>>, vector<1x8xf32>
    %7 = vector.broadcast %6 : vector<1x8xf32> to vector<256x8xf32>
    %8 = arith.addf %5, %7 : vector<256x8xf32>
    %cst = arith.constant 0.000000e+00 : f32
    %9 = vector.broadcast %cst : f32 to vector<256x8xf32>
    %10 = arith.maximumf %8, %9 : vector<256x8xf32>
    %11 = arith.truncf %10 : vector<256x8xf32> to vector<256x8xbf16>
    %cst_6 = arith.constant 0.000000e+00 : bf16
    %12 = vector.broadcast %cst_6 : bf16 to vector<16x8xbf16>
    %cst_7 = arith.constant 0.000000e+00 : bf16
    %13 = vector.broadcast %cst_7 : bf16 to vector<16x8xbf16>
    %cst_8 = arith.constant 0.000000e+00 : bf16
    %14 = vector.broadcast %cst_8 : bf16 to vector<18x8x8xbf16>
    %c0_9 = arith.constant 0 : index
    %c0_10 = arith.constant 0 : index
    %c0_11 = arith.constant 0 : index
    %15 = vector.load %arg8[%c0_9, %c0_10, %c0_11] : memref<18x25x8xbf16, #tpu.memory_space<vmem>>, vector<18x8x8xbf16>
    tpu.vector_store %arg8[%c0_9, %c0_10, %c0_11], %14 {strides = array<i32>} : memref<18x25x8xbf16, #tpu.memory_space<vmem>>, vector<18x8x8xbf16>,
    %cst_12 = arith.constant 0.000000e+00 : bf16
    %16 = vector.broadcast %cst_12 : bf16 to vector<18x1x8xbf16>
    %c0_13 = arith.constant 0 : index
    %c24 = arith.constant 24 : index
    %c0_14 = arith.constant 0 : index
    %17 = vector.load %arg8[%c0_13, %c24, %c0_14] : memref<18x25x8xbf16, #tpu.memory_space<vmem>>, vector<18x1x8xbf16>
    tpu.vector_store %arg8[%c0_13, %c24, %c0_14], %16 {strides = array<i32>} : memref<18x25x8xbf16, #tpu.memory_space<vmem>>, vector<18x1x8xbf16>,
    %18 = vector.shape_cast %12 : vector<16x8xbf16> to vector<1x16x8xbf16>
    %c0_15 = arith.constant 0 : index
    %c8 = arith.constant 8 : index
    %c0_16 = arith.constant 0 : index
    %19 = vector.load %arg8[%c0_15, %c8, %c0_16] : memref<18x25x8xbf16, #tpu.memory_space<vmem>>, vector<1x16x8xbf16>
    tpu.vector_store %arg8[%c0_15, %c8, %c0_16], %18 {strides = array<i32>} : memref<18x25x8xbf16, #tpu.memory_space<vmem>>, vector<1x16x8xbf16>,
    %20 = vector.shape_cast %13 : vector<16x8xbf16> to vector<1x16x8xbf16>
    %c17 = arith.constant 17 : index
    %c8_17 = arith.constant 8 : index
    %c0_18 = arith.constant 0 : index
    %21 = vector.load %arg8[%c17, %c8_17, %c0_18] : memref<18x25x8xbf16, #tpu.memory_space<vmem>>, vector<1x16x8xbf16>
    tpu.vector_store %arg8[%c17, %c8_17, %c0_18], %20 {strides = array<i32>} : memref<18x25x8xbf16, #tpu.memory_space<vmem>>, vector<1x16x8xbf16>,
    %22 = vector.shape_cast %11 : vector<256x8xbf16> to vector<16x16x8xbf16>
    %c1 = arith.constant 1 : index
    %c8_19 = arith.constant 8 : index
    %c0_20 = arith.constant 0 : index
    %23 = vector.load %arg8[%c1, %c8_19, %c0_20] : memref<18x25x8xbf16, #tpu.memory_space<vmem>>, vector<16x16x8xbf16>
    tpu.vector_store %arg8[%c1, %c8_19, %c0_20], %22 {strides = array<i32>} : memref<18x25x8xbf16, #tpu.memory_space<vmem>>, vector<16x16x8xbf16>,
    %c0_21 = arith.constant 0 : index
    %c7 = arith.constant 7 : index
    %c0_22 = arith.constant 0 : index
    %24 = vector.load %arg8[%c0_21, %c7, %c0_22] : memref<18x25x8xbf16, #tpu.memory_space<vmem>>, vector<16x16x8xbf16>
    %25 = vector.shape_cast %24 : vector<16x16x8xbf16> to vector<256x8xbf16>
    %c0_23 = arith.constant 0 : index
    %c0_24 = arith.constant 0 : index
    %26 = vector.load %arg9[%c0_23, %c0_24] : memref<256x72xbf16, #tpu.memory_space<vmem>>, vector<256x8xbf16>
    tpu.vector_store %arg9[%c0_23, %c0_24], %25 {strides = array<i32>} : memref<256x72xbf16, #tpu.memory_space<vmem>>, vector<256x8xbf16>,
    %c0_25 = arith.constant 0 : index
    %c8_26 = arith.constant 8 : index
    %c0_27 = arith.constant 0 : index
    %27 = vector.load %arg8[%c0_25, %c8_26, %c0_27] : memref<18x25x8xbf16, #tpu.memory_space<vmem>>, vector<16x16x8xbf16>
    %28 = vector.shape_cast %27 : vector<16x16x8xbf16> to vector<256x8xbf16>
    %c0_28 = arith.constant 0 : index
    %c8_29 = arith.constant 8 : index
    %29 = vector.load %arg9[%c0_28, %c8_29] : memref<256x72xbf16, #tpu.memory_space<vmem>>, vector<256x8xbf16>
    tpu.vector_store %arg9[%c0_28, %c8_29], %28 {strides = array<i32>} : memref<256x72xbf16, #tpu.memory_space<vmem>>, vector<256x8xbf16>,
    %c0_30 = arith.constant 0 : index
    %c9 = arith.constant 9 : index
    %c0_31 = arith.constant 0 : index
    %30 = vector.load %arg8[%c0_30, %c9, %c0_31] : memref<18x25x8xbf16, #tpu.memory_space<vmem>>, vector<16x16x8xbf16>
    %31 = vector.shape_cast %30 : vector<16x16x8xbf16> to vector<256x8xbf16>
    %c0_32 = arith.constant 0 : index
    %c16 = arith.constant 16 : index
    %32 = vector.load %arg9[%c0_32, %c16] : memref<256x72xbf16, #tpu.memory_space<vmem>>, vector<256x8xbf16>
    tpu.vector_store %arg9[%c0_32, %c16], %31 {strides = array<i32>} : memref<256x72xbf16, #tpu.memory_space<vmem>>, vector<256x8xbf16>,
    %c1_33 = arith.constant 1 : index
    %c7_34 = arith.constant 7 : index
    %c0_35 = arith.constant 0 : index
    %33 = vector.load %arg8[%c1_33, %c7_34, %c0_35] : memref<18x25x8xbf16, #tpu.memory_space<vmem>>, vector<16x16x8xbf16>
    %34 = vector.shape_cast %33 : vector<16x16x8xbf16> to vector<256x8xbf16>
    %c0_36 = arith.constant 0 : index
    %c24_37 = arith.constant 24 : index
    %35 = vector.load %arg9[%c0_36, %c24_37] : memref<256x72xbf16, #tpu.memory_space<vmem>>, vector<256x8xbf16>
    tpu.vector_store %arg9[%c0_36, %c24_37], %34 {strides = array<i32>} : memref<256x72xbf16, #tpu.memory_space<vmem>>, vector<256x8xbf16>,
    %c1_38 = arith.constant 1 : index
    %c8_39 = arith.constant 8 : index
    %c0_40 = arith.constant 0 : index
    %36 = vector.load %arg8[%c1_38, %c8_39, %c0_40] : memref<18x25x8xbf16, #tpu.memory_space<vmem>>, vector<16x16x8xbf16>
    %37 = vector.shape_cast %36 : vector<16x16x8xbf16> to vector<256x8xbf16>
    %c0_41 = arith.constant 0 : index
    %c32 = arith.constant 32 : index
    %38 = vector.load %arg9[%c0_41, %c32] : memref<256x72xbf16, #tpu.memory_space<vmem>>, vector<256x8xbf16>
    tpu.vector_store %arg9[%c0_41, %c32], %37 {strides = array<i32>} : memref<256x72xbf16, #tpu.memory_space<vmem>>, vector<256x8xbf16>,
    %c1_42 = arith.constant 1 : index
    %c9_43 = arith.constant 9 : index
    %c0_44 = arith.constant 0 : index
    %39 = vector.load %arg8[%c1_42, %c9_43, %c0_44] : memref<18x25x8xbf16, #tpu.memory_space<vmem>>, vector<16x16x8xbf16>
    %40 = vector.shape_cast %39 : vector<16x16x8xbf16> to vector<256x8xbf16>
    %c0_45 = arith.constant 0 : index
    %c40 = arith.constant 40 : index
    %41 = vector.load %arg9[%c0_45, %c40] : memref<256x72xbf16, #tpu.memory_space<vmem>>, vector<256x8xbf16>
    tpu.vector_store %arg9[%c0_45, %c40], %40 {strides = array<i32>} : memref<256x72xbf16, #tpu.memory_space<vmem>>, vector<256x8xbf16>,
    %c2 = arith.constant 2 : index
    %c7_46 = arith.constant 7 : index
    %c0_47 = arith.constant 0 : index
    %42 = vector.load %arg8[%c2, %c7_46, %c0_47] : memref<18x25x8xbf16, #tpu.memory_space<vmem>>, vector<16x16x8xbf16>
    %43 = vector.shape_cast %42 : vector<16x16x8xbf16> to vector<256x8xbf16>
    %c0_48 = arith.constant 0 : index
    %c48 = arith.constant 48 : index
    %44 = vector.load %arg9[%c0_48, %c48] : memref<256x72xbf16, #tpu.memory_space<vmem>>, vector<256x8xbf16>
    tpu.vector_store %arg9[%c0_48, %c48], %43 {strides = array<i32>} : memref<256x72xbf16, #tpu.memory_space<vmem>>, vector<256x8xbf16>,
    %c2_49 = arith.constant 2 : index
    %c8_50 = arith.constant 8 : index
    %c0_51 = arith.constant 0 : index
    %45 = vector.load %arg8[%c2_49, %c8_50, %c0_51] : memref<18x25x8xbf16, #tpu.memory_space<vmem>>, vector<16x16x8xbf16>
    %46 = vector.shape_cast %45 : vector<16x16x8xbf16> to vector<256x8xbf16>
    %c0_52 = arith.constant 0 : index
    %c56 = arith.constant 56 : index
    %47 = vector.load %arg9[%c0_52, %c56] : memref<256x72xbf16, #tpu.memory_space<vmem>>, vector<256x8xbf16>
    tpu.vector_store %arg9[%c0_52, %c56], %46 {strides = array<i32>} : memref<256x72xbf16, #tpu.memory_space<vmem>>, vector<256x8xbf16>,
    %c2_53 = arith.constant 2 : index
    %c9_54 = arith.constant 9 : index
    %c0_55 = arith.constant 0 : index
    %48 = vector.load %arg8[%c2_53, %c9_54, %c0_55] : memref<18x25x8xbf16, #tpu.memory_space<vmem>>, vector<16x16x8xbf16>
    %49 = vector.shape_cast %48 : vector<16x16x8xbf16> to vector<256x8xbf16>
    %c0_56 = arith.constant 0 : index
    %c64 = arith.constant 64 : index
    %50 = vector.load %arg9[%c0_56, %c64] : memref<256x72xbf16, #tpu.memory_space<vmem>>, vector<256x8xbf16>
    tpu.vector_store %arg9[%c0_56, %c64], %49 {strides = array<i32>} : memref<256x72xbf16, #tpu.memory_space<vmem>>, vector<256x8xbf16>,
    %c0_57 = arith.constant 0 : index
    %c0_58 = arith.constant 0 : index
    %51 = vector.load %arg9[%c0_57, %c0_58] : memref<256x72xbf16, #tpu.memory_space<vmem>>, vector<256x72xbf16>
    %c0_59 = arith.constant 0 : index
    %c0_60 = arith.constant 0 : index
    %52 = vector.load %arg5[%c0_59, %c0_60] : memref<72x8xbf16, #tpu.memory_space<vmem>>, vector<72x8xbf16>
    %cst_61 = arith.constant dense<0.000000e+00> : vector<256x8xf32>
    %53 = tpu.matmul %51, %52, %cst_61 {dimension_numbers = #tpu.dot_dimension_numbers<[1], [0], [0], [1], [0, 0, 1, 1], [], []>} : vector<256x72xbf16>, vector<72x8xbf16>, vector<256x8xf32> -> vector<256x8xf32>
    %cst_62 = arith.constant dense<0.000000e+00> : vector<8xf32>
    %54 = vector.multi_reduction <add>, %53, %cst_62 [0] : vector<256x8xf32> to vector<8xf32>
    %55 = vector.shape_cast %54 : vector<8xf32> to vector<1x8xf32>
    %c0_63 = arith.constant 0 : index
    %c0_64 = arith.constant 0 : index
    %c0_65 = arith.constant 0 : index
    %c0_66 = arith.constant 0 : index
    %56 = vector.load %arg7[%c0_63, %c0_64, %c0_65, %c0_66] : memref<1x1x2x8xf32, #tpu.memory_space<vmem>>, vector<1x1x1x8xf32>
    %57 = vector.shape_cast %56 : vector<1x1x1x8xf32> to vector<1x8xf32>
    %58 = vector.shape_cast %55 : vector<1x8xf32> to vector<1x1x1x8xf32>
    tpu.vector_store %arg7[%c0_63, %c0_64, %c0_65, %c0_66], %58 {strides = array<i32>} : memref<1x1x2x8xf32, #tpu.memory_space<vmem>>, vector<1x1x1x8xf32>,
    %59 = arith.mulf %53, %53 : vector<256x8xf32>
    %cst_67 = arith.constant dense<0.000000e+00> : vector<8xf32>
    %60 = vector.multi_reduction <add>, %59, %cst_67 [0] : vector<256x8xf32> to vector<8xf32>
    %61 = vector.shape_cast %60 : vector<8xf32> to vector<1x8xf32>
    %c0_68 = arith.constant 0 : index
    %c0_69 = arith.constant 0 : index
    %c1_70 = arith.constant 1 : index
    %c0_71 = arith.constant 0 : index
    %62 = vector.load %arg7[%c0_68, %c0_69, %c1_70, %c0_71] : memref<1x1x2x8xf32, #tpu.memory_space<vmem>>, vector<1x1x1x8xf32>
    %63 = vector.shape_cast %62 : vector<1x1x1x8xf32> to vector<1x8xf32>
    %64 = vector.shape_cast %61 : vector<1x8xf32> to vector<1x1x1x8xf32>
    tpu.vector_store %arg7[%c0_68, %c0_69, %c1_70, %c0_71], %64 {strides = array<i32>} : memref<1x1x2x8xf32, #tpu.memory_space<vmem>>, vector<1x1x1x8xf32>,
    %65 = arith.truncf %53 : vector<256x8xf32> to vector<256x8xbf16>
    %c0_72 = arith.constant 0 : index
    %c0_73 = arith.constant 0 : index
    %c0_74 = arith.constant 0 : index
    %66 = vector.load %arg6[%c0_72, %c0_73, %c0_74] : memref<1x256x8xbf16, #tpu.memory_space<vmem>>, vector<1x256x8xbf16>
    %67 = vector.shape_cast %66 : vector<1x256x8xbf16> to vector<256x8xbf16>
    %68 = vector.shape_cast %65 : vector<256x8xbf16> to vector<1x256x8xbf16>
    tpu.vector_store %arg6[%c0_72, %c0_73, %c0_74], %68 {strides = array<i32>} : memref<1x256x8xbf16, #tpu.memory_space<vmem>>, vector<1x256x8xbf16>,
    return
  }
  func.func @transform_0(%arg0: i32, %arg1: i32) -> (i32, i32) {
    %c0_i32 = arith.constant 0 : i32
    %c0_i32_0 = arith.constant 0 : i32
    %c0_i32_1 = arith.constant 0 : i32
    return %c0_i32, %c0_i32_0 : i32, i32
  }
  func.func @transform_1(%arg0: i32, %arg1: i32) -> (i32, i32) {
    %c0_i32 = arith.constant 0 : i32
    %c0_i32_0 = arith.constant 0 : i32
    %c0_i32_1 = arith.constant 0 : i32
    return %c0_i32, %c0_i32_0 : i32, i32
  }
  func.func @transform_2(%arg0: i32, %arg1: i32) -> (i32, i32, i32) {
    %c0_i32 = arith.constant 0 : i32
    %c0_i32_0 = arith.constant 0 : i32
    return %arg0, %arg1, %c0_i32 : i32, i32, i32
  }
  func.func @transform_3(%arg0: i32, %arg1: i32) -> (i32, i32) {
    %c0_i32 = arith.constant 0 : i32
    %c0_i32_0 = arith.constant 0 : i32
    %c0_i32_1 = arith.constant 0 : i32
    return %c0_i32, %c0_i32_0 : i32, i32
  }
  func.func @transform_4(%arg0: i32, %arg1: i32) -> (i32, i32, i32) {
    %c0_i32 = arith.constant 0 : i32
    %c0_i32_0 = arith.constant 0 : i32
    return %arg0, %arg1, %c0_i32 : i32, i32, i32
  }
  func.func @transform_5(%arg0: i32, %arg1: i32) -> (i32, i32, i32, i32) {
    %c0_i32 = arith.constant 0 : i32
    %c0_i32_0 = arith.constant 0 : i32
    %c0_i32_1 = arith.constant 0 : i32
    return %arg0, %arg1, %c0_i32, %c0_i32_0 : i32, i32, i32, i32
  }
}

</mosaic_0001>

<bundles_post_ra>
// kernel: double_conv.5
= control target key start
LH: loop header
LB: loop body
LE: loop exit
PB: predicated region body
PF: predicated region fallthrough
CT: control target
= control target key end

     0   :  { %s666_s12 = smov 0   ;;  %s668_s13 = smov 0   ;;  %s861_s0 = inlined_call_operand.vmem [shape: f32[1,8], index: 0, kind: input, shape index: {}]   ;;  %s862_s1 = inlined_call_operand.vmem [shape: f32[1,8], index: 1, kind: input, shape index: {}]   ;;  %s863_s2 = inlined_call_operand.vmem [shape: bf16[2,256,8], index: 2, kind: input, shape index: {}]   ;;  %s864_s3 = inlined_call_operand.vmem [shape: f32[2,256,8], index: 3, kind: output, shape index: {}]  }
   0x1   :  { %s670_s14 = smov 0  }
   0x2 LB: > { %s25_s15 = sadd.s32 1, %s640_s13  ;;  %p508_p0 = scmp.ge.s32.totalorder %s644_s14, 1  ;;  %s644_s14 = sphi %s670_s14, %s13_s14   ;;  %s640_s13 = sphi %s668_s13, %s866_s13   ;;  %s636_s12 = sphi %s666_s12, %s865_s12  }
   0x3   : > { %p27_p1 = scmp.ge.s32.totalorder %s25_s15, 2  ;;  %p158_p2 = scmp.lt.s32.totalorder %s644_s14, 3 }
   0x5   : > { %s868_s15 = smov (%p27_p1, %s25_s15), 0  ;;  %p159_p3 = pnand %p508_p0, %p158_p2 }
   0x6   : > { %p191_p4 = scmp.lt.s32.totalorder (!%p159_p3), %s636_s12, 1  ;;  %v695_v0 = vld [vmem:[%s861_s0] ss:$0 sm:$0xff] (!%p159_p3)  ;;  %vm384_vm0 = vcmask (!%p159_p3), 64512  }
   0x7   : > { %162 = sbr.rel (%p159_p3) target bundleno = 54 (0x36), region = 32  ;;  %v704_v9 = vld [vmem:[%s862_s1] ss:$0 sm:$0xff] (!%p159_p3) }
   0xe   : > { %s870_s12 = smov (!%p191_p4, %s636_s12), 1 }
   0xf   : > { %s517_s16 = sshll.u32 %s870_s12, 7  ;;  %s518_s24 = sshll.u32 %s870_s12, 8 }
  0x10   : > { %s690_s19 = scalar_lea.vmem %s863_s2, %s517_s16  ;;  %s722_s27 = scalar_lea.vmem %s864_s3, %s518_s24 }
  0x11   : > { %v520_v1 = vld [vmem:[%s690_s19] sm:$0xff]   ;;  %v583_v2 = vld [vmem:[%s690_s19 + $0x8] sm:$0xff]   ;;  %v584_v3 = vld [vmem:[%s690_s19 + $0x10] sm:$0xff]  }
  0x12   : > { %v521_v4 = vunpack.c.l.bf16 %v520_v1  ;;  %v522_v5 = vunpack.c.h.bf16 %v520_v1  ;;  %v525_v6 = vunpack.c.l.bf16 %v583_v2  ;;  %v526_v7 = vunpack.c.h.bf16 %v583_v2  ;;  %v585_v8 = vld [vmem:[%s690_s19 + $0x18] sm:$0xff]   ;;  %v586_v30 = vld [vmem:[%s690_s19 + $0x20] sm:$0xff]   ;;  %v587_v31 = vld [vmem:[%s690_s19 + $0x28] sm:$0xff]  }
  0x13   : > { %v529_v10 = vunpack.c.l.bf16 %v584_v3  ;;  %v530_v11 = vunpack.c.h.bf16 %v584_v3  ;;  %v533_v12 = vunpack.c.l.bf16 %v585_v8  ;;  %v534_v13 = vunpack.c.h.bf16 %v585_v8  ;;  %v588_v36 = vld [vmem:[%s690_s19 + $0x30] sm:$0xff]   ;;  %v589_v37 = vld [vmem:[%s690_s19 + $0x38] sm:$0xff]   ;;  %v590_v3 = vld [vmem:[%s690_s19 + $0x40] sm:$0xff]  }
  0x14   : > { %v281_v14 = vmul.f32 %v521_v4, %v695_v0  ;;  %v282_v15 = vmul.f32 %v522_v5, %v695_v0  ;;  %v283_v16 = vmul.f32 %v525_v6, %v695_v0  ;;  %v284_v17 = vmul.f32 %v526_v7, %v695_v0  ;;  %v591_v4 = vld [vmem:[%s690_s19 + $0x48] sm:$0xff]  }
  0x15   : > { %v285_v18 = vmul.f32 %v529_v10, %v695_v0  ;;  %v286_v19 = vmul.f32 %v530_v11, %v695_v0  ;;  %v287_v20 = vmul.f32 %v533_v12, %v695_v0  ;;  %v288_v21 = vmul.f32 %v534_v13, %v695_v0  ;;  %v592_v10 = vld [vmem:[%s690_s19 + $0x50] sm:$0xff]   ;;  %v593_v11 = vld [vmem:[%s690_s19 + $0x58] sm:$0xff]  }
  0x16   : > { %v320_v22 = vadd.f32 %v704_v9, %v281_v14  ;;  %v321_v23 = vadd.f32 %v704_v9, %v282_v15  ;;  %v322_v24 = vadd.f32 %v704_v9, %v283_v16  ;;  %v323_v25 = vadd.f32 %v704_v9, %v284_v17 }
  0x17   : > { %v324_v26 = vadd.f32 %v704_v9, %v285_v18  ;;  %v325_v27 = vadd.f32 %v704_v9, %v286_v19  ;;  %v326_v28 = vadd.f32 %v704_v9, %v287_v20  ;;  %v327_v29 = vadd.f32 %v704_v9, %v288_v21 }
  0x18   : > { %v352_v32 = vmax.f32 %v320_v22, 0.0  ;;  %v353_v33 = vmax.f32 %v321_v23, 0.0  ;;  %v354_v34 = vmax.f32 %v322_v24, 0.0  ;;  %v355_v35 = vmax.f32 %v323_v25, 0.0 }
  0x19   : > { %v356_v38 = vmax.f32 %v324_v26, 0.0  ;;  %v357_v39 = vmax.f32 %v325_v27, 0.0  ;;  %v358_v40 = vmax.f32 %v326_v28, 0.0  ;;  %v359_v41 = vmax.f32 %v327_v29, 0.0 }
  0x1a   : > { %385 = vst.msk [vmem:[%s722_s27] sm:$0xff] %vm384_vm0, %v352_v32  ;;  %386 = vst.msk [vmem:[%s722_s27 + $0x8] sm:$0xff] %vm384_vm0, %v353_v33  ;;  %v537_v42 = vunpack.c.l.bf16 %v586_v30  ;;  %v538_v43 = vunpack.c.h.bf16 %v586_v30  ;;  %v541_v44 = vunpack.c.l.bf16 %v587_v31  ;;  %v542_v45 = vunpack.c.h.bf16 %v587_v31 }
  0x1b   : > { %387 = vst.msk [vmem:[%s722_s27 + $0x10] sm:$0xff] %vm384_vm0, %v354_v34  ;;  %388 = vst.msk [vmem:[%s722_s27 + $0x18] sm:$0xff] %vm384_vm0, %v355_v35  ;;  %v545_v46 = vunpack.c.l.bf16 %v588_v36  ;;  %v546_v47 = vunpack.c.h.bf16 %v588_v36  ;;  %v549_v48 = vunpack.c.l.bf16 %v589_v37  ;;  %v550_v49 = vunpack.c.h.bf16 %v589_v37 }
  0x1c   : > { %389 = vst.msk [vmem:[%s722_s27 + $0x20] sm:$0xff] %vm384_vm0, %v356_v38  ;;  %390 = vst.msk [vmem:[%s722_s27 + $0x28] sm:$0xff] %vm384_vm0, %v357_v39  ;;  %v289_v50 = vmul.f32 %v537_v42, %v695_v0  ;;  %v290_v51 = vmul.f32 %v538_v43, %v695_v0  ;;  %v291_v52 = vmul.f32 %v541_v44, %v695_v0  ;;  %v553_v16 = vunpack.c.l.bf16 %v590_v3 }
  0x1d   : > { %391 = vst.msk [vmem:[%s722_s27 + $0x30] sm:$0xff] %vm384_vm0, %v358_v40  ;;  %392 = vst.msk [vmem:[%s722_s27 + $0x38] sm:$0xff] %vm384_vm0, %v359_v41  ;;  %v292_v53 = vmul.f32 %v542_v45, %v695_v0  ;;  %v293_v54 = vmul.f32 %v545_v46, %v695_v0  ;;  %v294_v55 = vmul.f32 %v546_v47, %v695_v0  ;;  %v554_v17 = vunpack.c.h.bf16 %v590_v3  ;;  %v594_v40 = vld [vmem:[%s690_s19 + $0x60] sm:$0xff]   ;;  %v595_v41 = vld [vmem:[%s690_s19 + $0x68] sm:$0xff]  }
  0x1e   : > { %v295_v56 = vmul.f32 %v549_v48, %v695_v0  ;;  %v296_v57 = vmul.f32 %v550_v49, %v695_v0  ;;  %v328_v58 = vadd.f32 %v704_v9, %v289_v50  ;;  %v329_v59 = vadd.f32 %v704_v9, %v290_v51  ;;  %v596_v46 = vld [vmem:[%s690_s19 + $0x70] sm:$0xff]   ;;  %v597_v47 = vld [vmem:[%s690_s19 + $0x78] sm:$0xff]  }
  0x1f   : > { %v330_v60 = vadd.f32 %v704_v9, %v291_v52  ;;  %v331_v61 = vadd.f32 %v704_v9, %v292_v53  ;;  %v332_v62 = vadd.f32 %v704_v9, %v293_v54  ;;  %v333_v63 = vadd.f32 %v704_v9, %v294_v55 }
  0x20   : > { %v334_v1 = vadd.f32 %v704_v9, %v295_v56  ;;  %v335_v2 = vadd.f32 %v704_v9, %v296_v57  ;;  %v360_v5 = vmax.f32 %v328_v58, 0.0  ;;  %v361_v6 = vmax.f32 %v329_v59, 0.0 }
  0x21   : > { %v362_v7 = vmax.f32 %v330_v60, 0.0  ;;  %v363_v8 = vmax.f32 %v331_v61, 0.0  ;;  %v364_v12 = vmax.f32 %v332_v62, 0.0  ;;  %v365_v13 = vmax.f32 %v333_v63, 0.0 }
  0x22   : > { %v366_v14 = vmax.f32 %v334_v1, 0.0  ;;  %v367_v15 = vmax.f32 %v335_v2, 0.0  ;;  %393 = vst.msk [vmem:[%s722_s27 + $0x40] sm:$0xff] %vm384_vm0, %v360_v5  ;;  %394 = vst.msk [vmem:[%s722_s27 + $0x48] sm:$0xff] %vm384_vm0, %v361_v6  ;;  %v557_v18 = vunpack.c.l.bf16 %v591_v4  ;;  %v558_v19 = vunpack.c.h.bf16 %v591_v4 }
  0x23   : > { %395 = vst.msk [vmem:[%s722_s27 + $0x50] sm:$0xff] %vm384_vm0, %v362_v7  ;;  %396 = vst.msk [vmem:[%s722_s27 + $0x58] sm:$0xff] %vm384_vm0, %v363_v8  ;;  %v561_v20 = vunpack.c.l.bf16 %v592_v10  ;;  %v562_v21 = vunpack.c.h.bf16 %v592_v10  ;;  %v565_v22 = vunpack.c.l.bf16 %v593_v11  ;;  %v566_v23 = vunpack.c.h.bf16 %v593_v11 }
  0x24   : > { %397 = vst.msk [vmem:[%s722_s27 + $0x60] sm:$0xff] %vm384_vm0, %v364_v12  ;;  %398 = vst.msk [vmem:[%s722_s27 + $0x68] sm:$0xff] %vm384_vm0, %v365_v13  ;;  %v297_v24 = vmul.f32 %v553_v16, %v695_v0  ;;  %v298_v25 = vmul.f32 %v554_v17, %v695_v0  ;;  %v299_v26 = vmul.f32 %v557_v18, %v695_v0  ;;  %v569_v52 = vunpack.c.l.bf16 %v594_v40 }
  0x25   : > { %399 = vst.msk [vmem:[%s722_s27 + $0x70] sm:$0xff] %vm384_vm0, %v366_v14  ;;  %400 = vst.msk [vmem:[%s722_s27 + $0x78] sm:$0xff] %vm384_vm0, %v367_v15  ;;  %v300_v27 = vmul.f32 %v558_v19, %v695_v0  ;;  %v301_v28 = vmul.f32 %v561_v20, %v695_v0  ;;  %v302_v29 = vmul.f32 %v562_v21, %v695_v0  ;;  %v570_v53 = vunpack.c.h.bf16 %v594_v40 }
  0x26   : > { %v303_v30 = vmul.f32 %v565_v22, %v695_v0  ;;  %v304_v31 = vmul.f32 %v566_v23, %v695_v0  ;;  %v336_v32 = vadd.f32 %v704_v9, %v297_v24  ;;  %v337_v33 = vadd.f32 %v704_v9, %v298_v25 }
  0x27   : > { %v338_v34 = vadd.f32 %v704_v9, %v299_v26  ;;  %v339_v35 = vadd.f32 %v704_v9, %v300_v27  ;;  %v340_v36 = vadd.f32 %v704_v9, %v301_v28  ;;  %v341_v37 = vadd.f32 %v704_v9, %v302_v29 }
  0x28   : > { %v342_v38 = vadd.f32 %v704_v9, %v303_v30  ;;  %v343_v39 = vadd.f32 %v704_v9, %v304_v31  ;;  %v368_v42 = vmax.f32 %v336_v32, 0.0  ;;  %v369_v43 = vmax.f32 %v337_v33, 0.0 }
  0x29   : > { %v370_v44 = vmax.f32 %v338_v34, 0.0  ;;  %v371_v45 = vmax.f32 %v339_v35, 0.0  ;;  %v372_v48 = vmax.f32 %v340_v36, 0.0  ;;  %v373_v49 = vmax.f32 %v341_v37, 0.0 }
  0x2a   : > { %v374_v50 = vmax.f32 %v342_v38, 0.0  ;;  %v375_v51 = vmax.f32 %v343_v39, 0.0  ;;  %401 = vst.msk [vmem:[%s722_s27 + $0x80] sm:$0xff] %vm384_vm0, %v368_v42  ;;  %402 = vst.msk [vmem:[%s722_s27 + $0x88] sm:$0xff] %vm384_vm0, %v369_v43  ;;  %v573_v54 = vunpack.c.l.bf16 %v595_v41  ;;  %v574_v55 = vunpack.c.h.bf16 %v595_v41 }
  0x2b   : > { %403 = vst.msk [vmem:[%s722_s27 + $0x90] sm:$0xff] %vm384_vm0, %v370_v44  ;;  %404 = vst.msk [vmem:[%s722_s27 + $0x98] sm:$0xff] %vm384_vm0, %v371_v45  ;;  %v577_v56 = vunpack.c.l.bf16 %v596_v46  ;;  %v578_v57 = vunpack.c.h.bf16 %v596_v46  ;;  %v581_v58 = vunpack.c.l.bf16 %v597_v47  ;;  %v582_v59 = vunpack.c.h.bf16 %v597_v47 }
  0x2c   : > { %405 = vst.msk [vmem:[%s722_s27 + $0xa0] sm:$0xff] %vm384_vm0, %v372_v48  ;;  %406 = vst.msk [vmem:[%s722_s27 + $0xa8] sm:$0xff] %vm384_vm0, %v373_v49  ;;  %v305_v60 = vmul.f32 %v569_v52, %v695_v0  ;;  %v306_v61 = vmul.f32 %v570_v53, %v695_v0  ;;  %v307_v62 = vmul.f32 %v573_v54, %v695_v0 }
  0x2d   : > { %407 = vst.msk [vmem:[%s722_s27 + $0xb0] sm:$0xff] %vm384_vm0, %v374_v50  ;;  %408 = vst.msk [vmem:[%s722_s27 + $0xb8] sm:$0xff] %vm384_vm0, %v375_v51  ;;  %v308_v63 = vmul.f32 %v574_v55, %v695_v0  ;;  %v309_v1 = vmul.f32 %v577_v56, %v695_v0  ;;  %v310_v2 = vmul.f32 %v578_v57, %v695_v0 }
  0x2e   : > { %v311_v3 = vmul.f32 %v581_v58, %v695_v0  ;;  %v312_v4 = vmul.f32 %v582_v59, %v695_v0  ;;  %v344_v5 = vadd.f32 %v704_v9, %v305_v60  ;;  %v345_v6 = vadd.f32 %v704_v9, %v306_v61 }
  0x2f   : > { %v346_v7 = vadd.f32 %v704_v9, %v307_v62  ;;  %v347_v8 = vadd.f32 %v704_v9, %v308_v63  ;;  %v348_v10 = vadd.f32 %v704_v9, %v309_v1  ;;  %v349_v11 = vadd.f32 %v704_v9, %v310_v2 }
  0x30   : > { %v350_v0 = vadd.f32 %v704_v9, %v311_v3  ;;  %v351_v12 = vadd.f32 %v704_v9, %v312_v4  ;;  %v376_v13 = vmax.f32 %v344_v5, 0.0  ;;  %v377_v14 = vmax.f32 %v345_v6, 0.0 }
  0x31   : > { %v378_v15 = vmax.f32 %v346_v7, 0.0  ;;  %v379_v16 = vmax.f32 %v347_v8, 0.0  ;;  %v380_v17 = vmax.f32 %v348_v10, 0.0  ;;  %v381_v18 = vmax.f32 %v349_v11, 0.0 }
  0x32   : > { %v382_v19 = vmax.f32 %v350_v0, 0.0  ;;  %v383_v20 = vmax.f32 %v351_v12, 0.0  ;;  %409 = vst.msk [vmem:[%s722_s27 + $0xc0] sm:$0xff] %vm384_vm0, %v376_v13  ;;  %410 = vst.msk [vmem:[%s722_s27 + $0xc8] sm:$0xff] %vm384_vm0, %v377_v14 }
  0x33   : > { %411 = vst.msk [vmem:[%s722_s27 + $0xd0] sm:$0xff] %vm384_vm0, %v378_v15  ;;  %412 = vst.msk [vmem:[%s722_s27 + $0xd8] sm:$0xff] %vm384_vm0, %v379_v16 }
  0x34   : > { %413 = vst.msk [vmem:[%s722_s27 + $0xe0] sm:$0xff] %vm384_vm0, %v380_v17  ;;  %414 = vst.msk [vmem:[%s722_s27 + $0xe8] sm:$0xff] %vm384_vm0, %v381_v18 }
  0x35   : > { %415 = vst.msk [vmem:[%s722_s27 + $0xf0] sm:$0xff] %vm384_vm0, %v382_v19  ;;  %416 = vst.msk [vmem:[%s722_s27 + $0xf8] sm:$0xff] %vm384_vm0, %v383_v20 }
  0x36 PF: > { %s13_s14 = sadd.s32 1, %s644_s14   ;;  %s865_s12 = smov %s640_s13 }
  0x37   : > { %p10_p5 = scmp.ge.s32.totalorder %s13_s14, 4   ;;  %s866_s13 = smov %s868_s15 }
  0x39   :  { %12 = sbr.rel (!%p10_p5) target bundleno = 2 (0x2), region = 62 }

// kernel: double_conv.4
= control target key start
LH: loop header
LB: loop body
LE: loop exit
PB: predicated region body
PF: predicated region fallthrough
CT: control target
= control target key end

     0   :  { %s5772_s18 = smov 0   ;;  %s5774_s19 = smov 0   ;;  %s7400_s0 = inlined_call_operand.vmem [shape: f32[1,8], index: 0, kind: input, shape index: {}]   ;;  %s7401_s1 = inlined_call_operand.vmem [shape: f32[1,8], index: 1, kind: input, shape index: {}]   ;;  %s7402_s2 = inlined_call_operand.vmem [shape: bf16[2,256,8], index: 2, kind: input, shape index: {}]   ;;  %s7403_s3 = inlined_call_operand.vmem [shape: bf16[72,8], index: 3, kind: input, shape index: {}]   ;;  %s7404_s4 = inlined_call_operand.vmem [shape: bf16[2,256,8], index: 4, kind: output, shape index: {0}]   ;;  %s7405_s5 = inlined_call_operand.vmem [shape: f32[2,1,2,8], index: 5, kind: output, shape index: {1}]  }
   0x1   :  { %s5776_s20 = smov 0  }
   0x2 LB: > { %s28_s21 = sadd.s32 1, %s5727_s19  ;;  %p5110_p0 = scmp.ge.s32.totalorder %s5731_s20, 1  ;;  %s5731_s20 = sphi %s5776_s20, %s16_s20   ;;  %s5727_s19 = sphi %s5774_s19, %s7413_s19   ;;  %s5723_s18 = sphi %s5772_s18, %s7412_s18  }
   0x3   : > { %p30_p1 = scmp.ge.s32.totalorder %s28_s21, 2  ;;  %p213_p2 = scmp.lt.s32.totalorder %s5731_s20, 3 }
   0x5   : > { %s7415_s21 = smov (%p30_p1, %s28_s21), 0  ;;  %p214_p3 = pnand %p5110_p0, %p213_p2 }
   0x6   : > { %vm474_vm0 = vcmask (!%p214_p3), 60416   ;;  %vm493_vm1 = vcmask (!%p214_p3), 57344   ;;  %vm494_vm2 = vsmask.f32 (!%p214_p3), 256  ;;  %v496_v1 = vld [vmem:[#allocation2 + $0xc] sm:$0x1] (!%p214_p3) }
   0x7   : > { %217 = sbr.rel (%p214_p3) target bundleno = 790 (0x316), region = 36  ;;  %vm5794_vm3 = vmand (!%p214_p3), %vm493_vm1, %vm494_vm2  ;;  %v5733_v2 = vmov (!%p214_p3), 0   ;;  %p257_p4 = scmp.lt.s32.totalorder (!%p214_p3), %s5723_s18, 1  ;;  %v499_v4 = vld [vmem:[#allocation2 + $0x1c] sm:$0x1] (!%p214_p3)  ;;  %vm1166_vm9 = vcmask (!%p214_p3), 64512  }
   0x8   : > { %550 = vst.msk [vmem:[#allocation2 + $0x4] sm:$0xf] (!%p214_p3), %vm474_vm0, %v5733_v2  ;;  %551 = vst.msk [vmem:[#allocation2 + $0x8] sm:$0xf] (!%p214_p3), %vm474_vm0, %v5733_v2  ;;  %v497_v3 = vsel (!%p214_p3), %vm5794_vm3, 0, %v496_v1  ;;  %v500_v6 = vsel (!%p214_p3), %vm5794_vm3, 0, %v499_v4 }
   0x9   : > { %475 = vst.msk [vmem:[#allocation2] sm:$0xf] (!%p214_p3), %vm474_vm0, %v5733_v2  ;;  %476 = vst.msk [vmem:[#allocation2 + $0x10] sm:$0xf] (!%p214_p3), %vm474_vm0, %v5733_v2  ;;  %v502_v5 = vld [vmem:[#allocation2 + $0x2c] sm:$0x1] (!%p214_p3) }
   0xa   : > { %477 = vst.msk [vmem:[#allocation2 + $0x20] sm:$0xf] (!%p214_p3), %vm474_vm0, %v5733_v2  ;;  %478 = vst.msk [vmem:[#allocation2 + $0x30] sm:$0xf] (!%p214_p3), %vm474_vm0, %v5733_v2  ;;  %v503_v7 = vsel (!%p214_p3), %vm5794_vm3, 0, %v502_v5  ;;  %s5734_s28 = smov (!%p214_p3), 8  }
   0xb   : > { %479 = vst.msk [vmem:[#allocation2 + $0x40] sm:$0xf] (!%p214_p3), %vm474_vm0, %v5733_v2  ;;  %480 = vst.msk [vmem:[#allocation2 + $0x50] sm:$0xf] (!%p214_p3), %vm474_vm0, %v5733_v2  ;;  %v505_v8 = vld [vmem:[#allocation2 + $0x3c] sm:$0x1] (!%p214_p3) }
   0xc   : > { %481 = vst.msk [vmem:[#allocation2 + $0x60] sm:$0xf] (!%p214_p3), %vm474_vm0, %v5733_v2  ;;  %482 = vst.msk [vmem:[#allocation2 + $0x70] sm:$0xf] (!%p214_p3), %vm474_vm0, %v5733_v2  ;;  %vm1408_vm4 = vsmask.f32 (!%p214_p3), 3328 }
   0xd   : > { %483 = vst.msk [vmem:[#allocation2 + $0x80] sm:$0xf] (!%p214_p3), %vm474_vm0, %v5733_v2  ;;  %484 = vst.msk [vmem:[#allocation2 + $0x90] sm:$0xf] (!%p214_p3), %vm474_vm0, %v5733_v2  ;;  %v506_v9 = vsel (!%p214_p3), %vm5794_vm3, 0, %v505_v8  ;;  %s5735_s6 = smov (!%p214_p3), 16  }
   0xe   : > { %485 = vst.msk [vmem:[#allocation2 + $0xa0] sm:$0xf] %vm474_vm0, %v5733_v2  ;;  %486 = vst.msk [vmem:[#allocation2 + $0xb0] sm:$0xf] %vm474_vm0, %v5733_v2  ;;  %s7417_s18 = smov (!%p257_p4, %s5723_s18), 1  ;;  %s5736_s7 = smov 32  }
   0xf   : > { %487 = vst.msk [vmem:[#allocation2 + $0xc0] sm:$0xf] %vm474_vm0, %v5733_v2  ;;  %488 = vst.msk [vmem:[#allocation2 + $0xd0] sm:$0xf] %vm474_vm0, %v5733_v2  ;;  %s5397_s22 = sshll.u32 %s7417_s18, 7  ;;  %v5650_v21 = vld [vmem:[#allocation2 + $0x4] sm:$0xff]  }
  0x10   : > { %489 = vst.msk [vmem:[#allocation2 + $0xe0] sm:$0xf] %vm474_vm0, %v5733_v2  ;;  %490 = vst.msk [vmem:[#allocation2 + $0xf0] sm:$0xf] %vm474_vm0, %v5733_v2  ;;  %v508_v10 = vld [vmem:[#allocation2 + $0x4c] sm:$0x1]  ;;  %s5838_s25 = scalar_lea.vmem %s7402_s2, %s5397_s22  ;;  %1295 = vrot.lane.b32.xlu0 %v5650_v21, %s5734_s28 }
  0x11   : > { %491 = vst.msk [vmem:[#allocation2 + $0x100] sm:$0xf] %vm474_vm0, %v5733_v2  ;;  %492 = vst.msk [vmem:[#allocation2 + $0x110] sm:$0xf] %vm474_vm0, %v5733_v2  ;;  %vm1409_vm5 = vsmask.f32 7440 }
  0x12   : > { %553 = vst.msk [vmem:[#allocation2 + $0x114] sm:$0xf] %vm474_vm0, %v5733_v2  ;;  %554 = vst.msk [vmem:[#allocation2 + $0x118] sm:$0xf] %vm474_vm0, %v5733_v2  ;;  %v509_v11 = vsel %vm5794_vm3, 0, %v508_v10  ;;  %v5527_v22 = vld [vmem:[%s5838_s25 + $0x8] sm:$0xff]  }
  0x13   : > { %498 = vst [vmem:[#allocation2 + $0xc] sm:$0x1] %v497_v3  ;;  %501 = vst [vmem:[#allocation2 + $0x1c] sm:$0x1] %v500_v6  ;;  %v511_v12 = vld [vmem:[#allocation2 + $0x5c] sm:$0x1]  ;;  %v5469_v31 = vunpack.c.l.bf16 %v5527_v22  ;;  %v5470_v32 = vunpack.c.h.bf16 %v5527_v22 }
  0x14   : > { %504 = vst [vmem:[#allocation2 + $0x2c] sm:$0x1] %v503_v7  ;;  %507 = vst [vmem:[#allocation2 + $0x3c] sm:$0x1] %v506_v9  ;;  %v1360_v13 = vld [vmem:[#allocation2 + $0x4] sm:$0xf] }
  0x15   : > { %v1361_v14 = vld [vmem:[#allocation2 + $0x8] sm:$0xf]  ;;  %510 = vst [vmem:[#allocation2 + $0x4c] sm:$0x1] %v509_v11  ;;  %v1412_v15 = vshrl.u32 %v1360_v13, 16  ;;  %v1415_v16 = vshll.u32 %v1360_v13, 16  ;;  %vm5860_vm6 = vmor %vm1408_vm4, %vm1409_vm5 }
  0x16   : > { %v1421_v17 = vshll.u32 %v1361_v14, 16  ;;  %v1425_v18 = vshrl.u32 %v1361_v14, 16  ;;  %v5845_v19 = vld [vmem:[%s7400_s0] ss:$0 sm:$0xff]  ;;  %v512_v23 = vsel %vm5794_vm3, 0, %v511_v12  ;;  %v5528_v29 = vld [vmem:[%s5838_s25 + $0x10] sm:$0xff]  }
  0x17   : > { %v1414_v24 = vrot.slane %v1412_v15, 4  ;;  %v1417_v25 = vrot.slane %v1415_v16, 5  ;;  %v5464_v28 = vld [vmem:[%s5838_s25] sm:$0xff]   ;;  %513 = vst [vmem:[#allocation2 + $0x5c] sm:$0x1] %v512_v23  ;;  %v5473_v38 = vunpack.c.l.bf16 %v5528_v29  ;;  %v357_v41 = vmul.f32 %v5469_v31, %v5845_v19  ;;  %s5737_s8 = smov 56  }
  0x18   : > { %v1423_v26 = vrot.slane %v1421_v17, 5  ;;  %v1427_v27 = vrot.slane %v1425_v18, 4  ;;  %v5465_v33 = vunpack.c.l.bf16 %v5464_v28  ;;  %v5856_v36 = vld [vmem:[%s7401_s1] ss:$0 sm:$0xff]  ;;  %v5466_v37 = vunpack.c.h.bf16 %v5464_v28  ;;  %v1908_v52 = vld [vmem:[#allocation2 + $0x10] sm:$0x8] }
  0x19   : > { %v1418_v34 = vor.u32 %v1417_v25, %v1414_v24  ;;  %v358_v42 = vmul.f32 %v5470_v32, %v5845_v19  ;;  %v5474_v47 = vunpack.c.h.bf16 %v5528_v29  ;;  %v396_v48 = vadd.f32 %v5856_v36, %v357_v41  ;;  %v1911_v57 = vld [vmem:[#allocation2 + $0x20] sm:$0x8]  ;;  %v3147_v4 = vld [vmem:[#allocation2 + $0x30] sm:$0x8]  ;;  %v5529_v17 = vld [vmem:[%s5838_s25 + $0x18] sm:$0xff]   ;;  %s5738_s9 = smov 24  }
  0x1a   : > { %v1362_v20 = vld [vmem:[#allocation2 + $0xc] sm:$0x1]  ;;  %v1428_v35 = vor.u32 %v1427_v27, %v1423_v26  ;;  %v355_v43 = vmul.f32 %v5465_v33, %v5845_v19  ;;  %v356_v46 = vmul.f32 %v5466_v37, %v5845_v19  ;;  %v359_v51 = vmul.f32 %v5473_v38, %v5845_v19  ;;  %v3144_v62 = vld [vmem:[#allocation2 + $0x20] sm:$0x8]  ;;  %v2600_v5 = vld [vmem:[#allocation2 + $0x1c] sm:$0x1] }
  0x1b   : > { %v1431_v30 = vshll.u32 %v1362_v20, 16  ;;  %v1419_v44 = vrot.slane %v1418_v34, 4  ;;  %v397_v49 = vadd.f32 %v5856_v36, %v358_v42  ;;  %v360_v56 = vmul.f32 %v5474_v47, %v5845_v19  ;;  %v1365_v10 = vld [vmem:[#allocation2 + $0x1c] sm:$0x1]  ;;  %v3836_v11 = vld [vmem:[#allocation2 + $0x2c] sm:$0x1] }
  0x1c   : > { %v1429_v45 = vrot.slane %v1428_v35, 4  ;;  %v394_v50 = vadd.f32 %v5856_v36, %v355_v43  ;;  %v395_v55 = vadd.f32 %v5856_v36, %v356_v46  ;;  %v428_v59 = vmax.f32 %v396_v48, 0.0  ;;  %v2603_v15 = vld [vmem:[#allocation2 + $0x2c] sm:$0x1]  ;;  %v3839_v16 = vld [vmem:[#allocation2 + $0x3c] sm:$0x1] }
  0x1d   : > { %v1433_v40 = vrot.slane %v1431_v30, 5  ;;  %v1424_v53 = vsel %vm5860_vm6, %v1419_v44, %v1423_v26  ;;  %v429_v60 = vmax.f32 %v397_v49, 0.0  ;;  %v398_v1 = vadd.f32 %v5856_v36, %v359_v51  ;;  %v1368_v23 = vld [vmem:[#allocation2 + $0x2c] sm:$0x1]  ;;  %v1371_v28 = vld [vmem:[#allocation2 + $0x3c] sm:$0x1] }
  0x1e   : > { %v426_v61 = vmax.f32 %v394_v50, 0.0  ;;  %v427_v63 = vmax.f32 %v395_v55, 0.0  ;;  %v399_v2 = vadd.f32 %v5856_v36, %v360_v56  ;;  %v1957_v3 = vshrl.u32 %v1908_v52, 16  ;;  %v1914_v29 = vld [vmem:[#allocation2 + $0x30] sm:$0x8]  ;;  %v5530_v47 = vld [vmem:[%s5838_s25 + $0x20] sm:$0xff]  }
  0x1f   : > { %v1434_v54 = vsel %vm5860_vm6, %v1429_v45, %v1433_v40  ;;  %v5401_v6 = vpack.c.bf16 %v428_v59, %v428_v59  ;;  %v5402_v7 = vpack.c.bf16 %v429_v60, %v429_v60  ;;  %v1979_v9 = vshrl.u32 %v1911_v57, 16  ;;  %v1917_v34 = vld [vmem:[#allocation2 + $0x40] sm:$0x8]  ;;  %v2606_v41 = vld [vmem:[#allocation2 + $0x3c] sm:$0x1]  ;;  %v5531_v52 = vld [vmem:[%s5838_s25 + $0x28] sm:$0xff]  }
  0x20   : > { %v5198_v58 = vcombine.low %v1424_v53, %v1434_v54  ;;  %v5399_v8 = vpack.c.bf16 %v426_v61, %v426_v61  ;;  %v5400_v12 = vpack.c.bf16 %v427_v63, %v427_v63  ;;  %v430_v13 = vmax.f32 %v398_v1, 0.0  ;;  %v2609_v46 = vld [vmem:[#allocation2 + $0x4c] sm:$0x1]  ;;  %v5532_v57 = vld [vmem:[%s5838_s25 + $0x30] sm:$0xff]   ;;  %s5739_s10 = smov 48   ;;  %s5740_s11 = smov 40  }
  0x21   : > { %v431_v14 = vmax.f32 %v399_v2, 0.0  ;;  %670 = vst.msk [vmem:[#allocation2 + $0x24] sm:$0xf] %vm474_vm0, %v5401_v6  ;;  %671 = vst.msk [vmem:[#allocation2 + $0x28] sm:$0xf] %vm474_vm0, %v5402_v7  ;;  %v5885_v18 = vrot.slane %v1957_v3, 11  ;;  %v5477_v45 = vunpack.c.l.bf16 %v5529_v17  ;;  %v5478_v50 = vunpack.c.h.bf16 %v5529_v17 }
  0x22   : > { %1843 = vrot.lane.b32.xlu1 %v5198_v58, %s5735_s6  ;;  %668 = vst.msk [vmem:[#allocation2 + $0x14] sm:$0xf] %vm474_vm0, %v5399_v8  ;;  %v3193_v20 = vshrl.u32 %v3144_v62, 16  ;;  %v3215_v21 = vshrl.u32 %v3147_v4, 16  ;;  %v2666_v22 = vshll.u32 %v2600_v5, 16  ;;  %v5403_v24 = vpack.c.bf16 %v430_v13, %v430_v13  ;;  %s5741_s12 = smov 64  }
  0x23   : > { %669 = vst.msk [vmem:[#allocation2 + $0x18] sm:$0xf] %vm474_vm0, %v5400_v12  ;;  %v5404_v25 = vpack.c.bf16 %v431_v14, %v431_v14  ;;  %v1455_v26 = vshll.u32 %v1365_v10, 16  ;;  %v3902_v27 = vshll.u32 %v3836_v11, 16  ;;  %v5888_v30 = vrot.slane %v1979_v9, 11  ;;  %v5927_v11 = vld [vmem:[%s5838_s25 + $0x38] sm:$0xff]  }
  0x24   : > { %v5890_v31 = vrot.slane %v3193_v20, 11  ;;  %v5892_v32 = vrot.slane %v3215_v21, 11  ;;  %v2690_v33 = vshll.u32 %v2603_v15, 16  ;;  %672 = vst.msk [vmem:[#allocation2 + $0x34] sm:$0xf] %vm474_vm0, %v5403_v24  ;;  %v5896_v35 = vrot.slane %v2666_v22, 5 }
  0x25   : > { %673 = vst.msk [vmem:[#allocation2 + $0x38] sm:$0xf] %vm474_vm0, %v5404_v25  ;;  %v5898_v37 = vrot.slane %v1455_v26, 5  ;;  %v3926_v38 = vshll.u32 %v3839_v16, 16  ;;  %v1479_v40 = vshll.u32 %v1368_v23, 16  ;;  %v5900_v42 = vrot.slane %v3902_v27, 5 }
  0x26   : > { %v1503_v43 = vshll.u32 %v1371_v28, 16  ;;  %v2001_v44 = vshrl.u32 %v1914_v29, 16  ;;  %v5903_v48 = vrot.slane %v2690_v33, 5  ;;  %v2023_v51 = vshrl.u32 %v1917_v34, 16  ;;  %v5920_v3 = vld [vmem:[#allocation2 + $0x40] sm:$0x8] }
  0x27   : > { %v5905_v49 = vrot.slane %v3926_v38, 5  ;;  %v5908_v53 = vrot.slane %v1479_v40, 5  ;;  %v361_v56 = vmul.f32 %v5477_v45, %v5845_v19  ;;  %vm748_vm7 = vsmask.f32 4368 }
  0x28   : > { %v5910_v54 = vrot.slane %v1503_v43, 5  ;;  %v5912_v55 = vrot.slane %v2001_v44, 11  ;;  %v5651_v58 = vld [vmem:[#allocation2 + $0x24] sm:$0xff]   ;;  %v362_v59 = vmul.f32 %v5478_v50, %v5845_v19  ;;  %v2714_v60 = vshll.u32 %v2606_v41, 16  ;;  %vm5964_vm8 = vmor %vm494_vm2, %vm748_vm7 }
  0x29   : > { %v5481_v61 = vunpack.c.l.bf16 %v5530_v47  ;;  %v5482_v62 = vunpack.c.h.bf16 %v5530_v47  ;;  %v400_v1 = vadd.f32 %v5856_v36, %v361_v56  ;;  %v5918_v2 = vrot.slane %v2023_v51, 11  ;;  %2535 = vrot.lane.b32.xlu1 %v5651_v58, %s5736_s7  ;;  %v5655_v22 = vld [vmem:[#allocation2 + $0x24] sm:$0xff]   ;;  %v1909_v38 = vld [vmem:[#allocation2 + $0x14] sm:$0xf] }
  0x2a   : > { %v5652_v63 = vld [vmem:[#allocation2 + $0x14] sm:$0xff]   ;;  %v5485_v4 = vunpack.c.l.bf16 %v5531_v52  ;;  %v5486_v5 = vunpack.c.h.bf16 %v5531_v52  ;;  %v401_v7 = vadd.f32 %v5856_v36, %v362_v59  ;;  %v2738_v8 = vshll.u32 %v2609_v46, 16  ;;  %v5656_v27 = vld [vmem:[#allocation2 + $0x24] sm:$0xff]  }
  0x2b   : > { %v5654_v6 = vld [vmem:[#allocation2 + $0x14] sm:$0xff]   ;;  %v363_v9 = vmul.f32 %v5481_v61, %v5845_v19  ;;  %v364_v10 = vmul.f32 %v5482_v62, %v5845_v19  ;;  %1297 = vrot.lane.b32.xlu0 %v5652_v63, %s5734_s28  ;;  %v432_v13 = vmax.f32 %v400_v1, 0.0  ;;  %v5489_v16 = vunpack.c.l.bf16 %v5532_v57  ;;  %v1912_v41 = vld [vmem:[#allocation2 + $0x24] sm:$0xf]  ;;  %v3146_v1 = vld [vmem:[#allocation2 + $0x28] sm:$0xf] }
  0x2c   : > { %v5653_v12 = vld [vmem:[#allocation2 + $0x34] sm:$0xff]   ;;  %v365_v14 = vmul.f32 %v5485_v4, %v5845_v19  ;;  %v366_v15 = vmul.f32 %v5486_v5, %v5845_v19  ;;  %v433_v17 = vmax.f32 %v401_v7, 0.0  ;;  %v5932_v20 = vrot.slane %v2714_v60, 5  ;;  %v3145_v62 = vld [vmem:[#allocation2 + $0x24] sm:$0xf] }
  0x2d   : > { %v5490_v21 = vunpack.c.h.bf16 %v5532_v57  ;;  %v5405_v23 = vpack.c.bf16 %v432_v13, %v432_v13  ;;  %v5934_v24 = vrot.slane %v2738_v8, 5  ;;  %v5937_v25 = vadd.f32 %v5856_v36, %v363_v9  ;;  %3771 = vrot.lane.b32.xlu1 %v5653_v12, %s5737_s8  ;;  %v1910_v40 = vld [vmem:[#allocation2 + $0x18] sm:$0xf]  ;;  %v1913_v57 = vld [vmem:[#allocation2 + $0x28] sm:$0xf] }
  0x2e   : > { %v5940_v26 = vadd.f32 %v5856_v36, %v364_v10  ;;  %v5406_v28 = vpack.c.bf16 %v433_v17, %v433_v17  ;;  %v3237_v29 = vshrl.u32 %v5920_v3, 16  ;;  %v5945_v33 = vadd.f32 %v5856_v36, %v365_v14  ;;  %v5657_v47 = vld [vmem:[#allocation2 + $0x34] sm:$0xff]  }
  0x2f   : > { %v5948_v34 = vadd.f32 %v5856_v36, %v366_v15  ;;  %2533 = vrot.lane.b32.xlu0 %v5654_v6, %s5736_s7  ;;  %674 = vst.msk [vmem:[#allocation2 + $0x44] sm:$0xf] %vm474_vm0, %v5405_v23  ;;  %v5953_v43 = vmul.f32 %v5489_v16, %v5845_v19  ;;  %v5956_v44 = vmul.f32 %v5490_v21, %v5845_v19  ;;  %v5493_v45 = vunpack.c.l.bf16 %v5927_v11  ;;  %v3148_v23 = vld [vmem:[#allocation2 + $0x34] sm:$0xf] }
  0x30   : > { %v5494_v46 = vunpack.c.h.bf16 %v5927_v11  ;;  %v1962_v50 = vshrl.u32 %v1909_v38, 16  ;;  %v1965_v51 = vshll.u32 %v1909_v38, 16  ;;  %v1971_v52 = vshrl.u32 %v1910_v40, 16  ;;  %675 = vst.msk [vmem:[#allocation2 + $0x48] sm:$0xf] %vm474_vm0, %v5406_v28 }
  0x31   : > { %v1974_v56 = vshll.u32 %v1910_v40, 16  ;;  %v1984_v58 = vshrl.u32 %v1912_v41, 16  ;;  %v1987_v59 = vshll.u32 %v1912_v41, 16  ;;  %v1993_v60 = vshrl.u32 %v1913_v57, 16  ;;  %1299 = vrot.lane.b32.xlu1 %v5655_v22, %s5734_s28  ;;  %v3149_v41 = vld [vmem:[#allocation2 + $0x38] sm:$0xf] }
  0x32   : > { %v1996_v61 = vshll.u32 %v1913_v57, 16  ;;  %v1964_v19 = vrot.slane %v1962_v50, 7  ;;  %v1973_v63 = vrot.slane %v1971_v52, 7  ;;  %v3198_v4 = vshrl.u32 %v3145_v62, 16  ;;  %v2598_v50 = vld [vmem:[#allocation2 + $0x14] sm:$0xf] }
  0x33   : > { %v3201_v5 = vshll.u32 %v3145_v62, 16  ;;  %3769 = vrot.lane.b32.xlu0 %v5656_v27, %s5737_s8  ;;  %v1986_v7 = vrot.slane %v1984_v58, 7  ;;  %v1995_v8 = vrot.slane %v1993_v60, 7  ;;  %v3207_v9 = vshrl.u32 %v3146_v1, 16  ;;  %v2599_v57 = vld [vmem:[#allocation2 + $0x18] sm:$0xf] }
  0x34   : > { %v3210_v10 = vshll.u32 %v3146_v1, 16  ;;  %v1967_v12 = vor.u32 %v1965_v51, %v1964_v19  ;;  %v1969_v13 = vrot.slane %v1964_v19, 4  ;;  %v1976_v14 = vor.u32 %v1974_v56, %v1973_v63 }
  0x35   : > { %v3200_v15 = vrot.slane %v3198_v4, 7  ;;  %v1989_v16 = vor.u32 %v1987_v59, %v1986_v7  ;;  %v1991_v17 = vrot.slane %v1986_v7, 4  ;;  %v1998_v21 = vor.u32 %v1996_v61, %v1995_v8  ;;  %1301 = vrot.lane.b32.xlu1 %v5657_v47, %s5734_s28  ;;  %v1363_v61 = vld [vmem:[#allocation2 + $0x14] sm:$0xf] }
  0x36   : > { %v3209_v22 = vrot.slane %v3207_v9, 7  ;;  %v1968_v28 = vsel %vm5964_vm8, %v5885_v18, %v1967_v12  ;;  %v1977_v27 = vsel %vm5964_vm8, %v1969_v13, %v1976_v14  ;;  %v3220_v59 = vshrl.u32 %v3148_v23, 16 }
  0x37   : > { %v3203_v38 = vor.u32 %v3201_v5, %v3200_v15  ;;  %v3205_v40 = vrot.slane %v3200_v15, 4  ;;  %v5230_v51 = vcombine.low %v1968_v28, %v1977_v27  ;;  %v1990_v52 = vsel %vm5964_vm8, %v5888_v30, %v1989_v16 }
  0x38   : > { %v1999_v56 = vsel %vm5964_vm8, %v1991_v17, %v1998_v21  ;;  %v3212_v47 = vor.u32 %v3210_v10, %v3209_v22  ;;  %v3223_v60 = vshll.u32 %v3148_v23, 16  ;;  %v3229_v30 = vshrl.u32 %v3149_v41, 16  ;;  %v1364_v10 = vld [vmem:[#allocation2 + $0x18] sm:$0xf]  ;;  %v3834_v17 = vld [vmem:[#allocation2 + $0x24] sm:$0xf] }
  0x39   : > { %v5231_v58 = vcombine.low %v1990_v52, %v1999_v56  ;;  %v3204_v18 = vsel %vm5964_vm8, %v5890_v31, %v3203_v38  ;;  %2356 = vrot.lane.b32.xlu0 %v5230_v51, %s5738_s9  ;;  %v3232_v19 = vshll.u32 %v3149_v41, 16  ;;  %v2647_v63 = vshrl.u32 %v2598_v50, 16 }
  0x3a   : > { %v3213_v62 = vsel %vm5964_vm8, %v3205_v40, %v3212_v47  ;;  %v3222_v4 = vrot.slane %v3220_v59, 7  ;;  %v2650_v5 = vshll.u32 %v2598_v50, 16  ;;  %v2656_v7 = vshll.u32 %v2599_v57, 16  ;;  %v3835_v50 = vld [vmem:[#allocation2 + $0x28] sm:$0xf] }
  0x3b   : > { %2358 = vrot.lane.b32.xlu1 %v5231_v58, %s5738_s9  ;;  %v5294_v1 = vcombine.low %v3204_v18, %v3213_v62  ;;  %v3231_v8 = vrot.slane %v3229_v30, 7  ;;  %v2649_v31 = vrot.slane %v2647_v63, 4  ;;  %v2660_v9 = vshrl.u32 %v2599_v57, 16  ;;  %v2601_v57 = vld [vmem:[#allocation2 + $0x24] sm:$0xf] }
  0x3c   : > { %v1436_v12 = vshrl.u32 %v1363_v61, 16  ;;  %v3225_v13 = vor.u32 %v3223_v60, %v3222_v4  ;;  %v3227_v14 = vrot.slane %v3222_v4, 4  ;;  %v2652_v15 = vrot.slane %v2650_v5, 5 }
  0x3d   : > { %v2658_v16 = vrot.slane %v2656_v7, 5  ;;  %3592 = vrot.lane.b32.xlu0 %v5294_v1, %s5739_s10  ;;  %v3234_v21 = vor.u32 %v3232_v19, %v3231_v8  ;;  %v2662_v22 = vrot.slane %v2660_v9, 4  ;;  %v1439_v28 = vshll.u32 %v1363_v61, 16 }
  0x3e   : > { %v1438_v23 = vrot.slane %v1436_v12, 4  ;;  %v3226_v27 = vsel %vm5964_vm8, %v5892_v32, %v3225_v13  ;;  %v2653_v38 = vor.u32 %v2652_v15, %v2649_v31  ;;  %v1445_v40 = vshll.u32 %v1364_v10, 16  ;;  %v2602_v31 = vld [vmem:[#allocation2 + $0x28] sm:$0xf]  ;;  %v3837_v15 = vld [vmem:[#allocation2 + $0x34] sm:$0xf] }
  0x3f   : > { %v1449_v41 = vshrl.u32 %v1364_v10, 16  ;;  %v3235_v51 = vsel %vm5964_vm8, %v3227_v14, %v3234_v21  ;;  %v2663_v52 = vor.u32 %v2662_v22, %v2658_v16  ;;  %v1441_v56 = vrot.slane %v1439_v28, 5 }
  0x40   : > { %v3883_v47 = vshrl.u32 %v3834_v17, 16  ;;  %v5295_v58 = vcombine.low %v3226_v27, %v3235_v51  ;;  %v2654_v18 = vrot.slane %v2653_v38, 4  ;;  %v1447_v59 = vrot.slane %v1445_v40, 5  ;;  %v3838_v38 = vld [vmem:[#allocation2 + $0x38] sm:$0xf] }
  0x41   : > { %v1451_v60 = vrot.slane %v1449_v41, 4  ;;  %v2664_v61 = vrot.slane %v2663_v52, 4  ;;  %v1442_v62 = vor.u32 %v1441_v56, %v1438_v23  ;;  %v3886_v19 = vshll.u32 %v3834_v17, 16 }
  0x42   : > { %v3885_v30 = vrot.slane %v3883_v47, 4  ;;  %3594 = vrot.lane.b32.xlu1 %v5295_v58, %s5739_s10  ;;  %v2659_v32 = vsel %vm5860_vm6, %v2654_v18, %v2658_v16  ;;  %v3892_v1 = vshll.u32 %v3835_v50, 16  ;;  %v3896_v4 = vshrl.u32 %v3835_v50, 16 }
  0x43   : > { %v1452_v63 = vor.u32 %v1451_v60, %v1447_v59  ;;  %v2669_v5 = vsel %vm5860_vm6, %v2664_v61, %v5896_v35  ;;  %v1443_v7 = vrot.slane %v1442_v62, 4  ;;  %v3888_v8 = vrot.slane %v3886_v19, 5 }
  0x44   : > { %v2671_v9 = vshrl.u32 %v2601_v57, 16  ;;  %v5262_v10 = vcombine.low %v2659_v32, %v2669_v5  ;;  %v3894_v13 = vrot.slane %v3892_v1, 5  ;;  %v3898_v14 = vrot.slane %v3896_v4, 4  ;;  %v1367_v32 = vld [vmem:[#allocation2 + $0x28] sm:$0xf] }
  0x45   : > { %v1453_v12 = vrot.slane %v1452_v63, 4  ;;  %v1448_v17 = vsel %vm5860_vm6, %v1443_v7, %v1447_v59  ;;  %v3889_v16 = vor.u32 %v3888_v8, %v3885_v30  ;;  %v2674_v22 = vshll.u32 %v2601_v57, 16  ;;  %v1366_v57 = vld [vmem:[#allocation2 + $0x24] sm:$0xf] }
  0x46   : > { %v2673_v21 = vrot.slane %v2671_v9, 4  ;;  %3078 = vrot.lane.b32.xlu0 %v5262_v10, %s5740_s11  ;;  %v3899_v23 = vor.u32 %v3898_v14, %v3894_v13  ;;  %v2680_v28 = vshll.u32 %v2602_v31, 16  ;;  %v2684_v27 = vshrl.u32 %v2602_v31, 16  ;;  %v1369_v10 = vld [vmem:[#allocation2 + $0x34] sm:$0xf] }
  0x47   : > { %v1458_v35 = vsel %vm5860_vm6, %v1453_v12, %v5898_v37  ;;  %v3890_v41 = vrot.slane %v3889_v16, 4  ;;  %v2676_v50 = vrot.slane %v2674_v22, 5  ;;  %v3907_v51 = vshrl.u32 %v3837_v15, 16  ;;  %v1370_v22 = vld [vmem:[#allocation2 + $0x38] sm:$0xf] }
  0x48   : > { %v5199_v40 = vcombine.low %v1448_v17, %v1458_v35  ;;  %v3900_v52 = vrot.slane %v3899_v23, 4  ;;  %v2682_v56 = vrot.slane %v2680_v28, 5  ;;  %v2686_v47 = vrot.slane %v2684_v27, 4 }
  0x49   : > { %v3910_v58 = vshll.u32 %v3837_v15, 16  ;;  %v3895_v18 = vsel %vm5860_vm6, %v3890_v41, %v3894_v13  ;;  %v2677_v59 = vor.u32 %v2676_v50, %v2673_v21  ;;  %v3909_v37 = vrot.slane %v3907_v51, 4 }
  0x4a   : > { %1845 = vrot.lane.b32.xlu1 %v5199_v40, %s5735_s6  ;;  %v3916_v60 = vshll.u32 %v3838_v38, 16  ;;  %v3905_v61 = vsel %vm5860_vm6, %v3900_v52, %v5900_v42  ;;  %v2687_v62 = vor.u32 %v2686_v47, %v2682_v56  ;;  %v3920_v19 = vshrl.u32 %v3838_v38, 16  ;;  %v1915_v38 = vld [vmem:[#allocation2 + $0x34] sm:$0xf] }
  0x4b   : > { %v3912_v30 = vrot.slane %v3910_v58, 5  ;;  %v5326_v63 = vcombine.low %v3895_v18, %v3905_v61  ;;  %v2678_v1 = vrot.slane %v2677_v59, 4  ;;  %v1460_v5 = vshrl.u32 %v1366_v57, 16  ;;  %v1916_v59 = vld [vmem:[#allocation2 + $0x38] sm:$0xf] }
  0x4c   : > { %v3918_v4 = vrot.slane %v3916_v60, 5  ;;  %v2688_v7 = vrot.slane %v2687_v62, 4  ;;  %v3922_v31 = vrot.slane %v3920_v19, 4  ;;  %v1463_v9 = vshll.u32 %v1366_v57, 16  ;;  %v1918_v19 = vld [vmem:[#allocation2 + $0x44] sm:$0xf] }
  0x4d   : > { %v3913_v8 = vor.u32 %v3912_v30, %v3909_v37  ;;  %4314 = vrot.lane.b32.xlu0 %v5326_v63, %s5741_s12  ;;  %v2683_v12 = vsel %vm5860_vm6, %v2678_v1, %v2682_v56  ;;  %v1462_v42 = vrot.slane %v1460_v5, 4  ;;  %v1469_v13 = vshll.u32 %v1367_v32, 16  ;;  %v1919_v5 = vld [vmem:[#allocation2 + $0x48] sm:$0xf] }
  0x4e   : > { %v1473_v14 = vshrl.u32 %v1367_v32, 16  ;;  %v2693_v15 = vsel %vm5860_vm6, %v2688_v7, %v5903_v48  ;;  %v3923_v16 = vor.u32 %v3922_v31, %v3918_v4  ;;  %v1465_v21 = vrot.slane %v1463_v9, 5  ;;  %v2604_v7 = vld [vmem:[#allocation2 + $0x34] sm:$0xf] }
  0x4f   : > { %v3914_v17 = vrot.slane %v3913_v8, 4  ;;  %v5263_v35 = vcombine.low %v2683_v12, %v2693_v15  ;;  %v1471_v23 = vrot.slane %v1469_v13, 5  ;;  %v1484_v27 = vshrl.u32 %v1369_v10, 16 }
  0x50   : > { %v1475_v28 = vrot.slane %v1473_v14, 4  ;;  %v3924_v41 = vrot.slane %v3923_v16, 4  ;;  %v1466_v50 = vor.u32 %v1465_v21, %v1462_v42  ;;  %v1487_v51 = vshll.u32 %v1369_v10, 16  ;;  %v2605_v21 = vld [vmem:[#allocation2 + $0x38] sm:$0xf] }
  0x51   : > { %v3919_v40 = vsel %vm5860_vm6, %v3914_v17, %v3918_v4  ;;  %3080 = vrot.lane.b32.xlu1 %v5263_v35, %s5740_s11  ;;  %v1486_v56 = vrot.slane %v1484_v27, 4  ;;  %v1493_v48 = vshll.u32 %v1370_v22, 16  ;;  %v1497_v47 = vshrl.u32 %v1370_v22, 16 }
  0x52   : > { %v1476_v52 = vor.u32 %v1475_v28, %v1471_v23  ;;  %v3929_v58 = vsel %vm5860_vm6, %v3924_v41, %v5905_v49  ;;  %v1467_v57 = vrot.slane %v1466_v50, 4  ;;  %v1489_v18 = vrot.slane %v1487_v51, 5  ;;  %v2607_v41 = vld [vmem:[#allocation2 + $0x44] sm:$0xf] }
  0x53   : > { %v2006_v37 = vshrl.u32 %v1915_v38, 16  ;;  %v5327_v60 = vcombine.low %v3919_v40, %v3929_v58  ;;  %v1495_v62 = vrot.slane %v1493_v48, 5  ;;  %v1499_v30 = vrot.slane %v1497_v47, 4 }
  0x54   : > { %v1477_v61 = vrot.slane %v1476_v52, 4  ;;  %v1472_v32 = vsel %vm5860_vm6, %v1467_v57, %v1471_v23  ;;  %v1490_v63 = vor.u32 %v1489_v18, %v1486_v56  ;;  %v2009_v4 = vshll.u32 %v1915_v38, 16  ;;  %v2608_v57 = vld [vmem:[#allocation2 + $0x48] sm:$0xf] }
  0x55   : > { %v2008_v1 = vrot.slane %v2006_v37, 7  ;;  %4316 = vrot.lane.b32.xlu0 %v5327_v60, %s5741_s12  ;;  %v1500_v8 = vor.u32 %v1499_v30, %v1495_v62  ;;  %v2015_v31 = vshrl.u32 %v1916_v59, 16  ;;  %v2018_v9 = vshll.u32 %v1916_v59, 16 }
  0x56   : > { %v1482_v49 = vsel %vm5860_vm6, %v1477_v61, %v5908_v53  ;;  %v1491_v12 = vrot.slane %v1490_v63, 4  ;;  %v2028_v17 = vshrl.u32 %v1918_v19, 16  ;;  %v2031_v16 = vshll.u32 %v1918_v19, 16 }
  0x57   : > { %v5200_v10 = vcombine.low %v1472_v32, %v1482_v49  ;;  %v2011_v42 = vor.u32 %v2009_v4, %v2008_v1  ;;  %v2013_v13 = vrot.slane %v2008_v1, 4  ;;  %v1501_v14 = vrot.slane %v1500_v8, 4  ;;  %v5658_v32 = vld [vmem:[#allocation2 + $0x34] sm:$0xff]  }
  0x58   : > { %v2017_v15 = vrot.slane %v2015_v31, 7  ;;  %v1496_v22 = vsel %vm5860_vm6, %v1491_v12, %v1495_v62  ;;  %v2037_v53 = vshrl.u32 %v1919_v5, 16  ;;  %v2040_v23 = vshll.u32 %v1919_v5, 16  ;;  %v3151_v5 = vld [vmem:[#allocation2 + $0x44] sm:$0xf] }
  0x59   : > { %v2012_v35 = vsel %vm5964_vm8, %v5912_v55, %v2011_v42  ;;  %1847 = vrot.lane.b32.xlu0 %v5200_v10, %s5735_s6  ;;  %v1506_v28 = vsel %vm5860_vm6, %v1501_v14, %v5910_v54  ;;  %v2030_v38 = vrot.slane %v2028_v17, 7  ;;  %v2695_v40 = vshrl.u32 %v2604_v7, 16 }
  0x5a   : > { %v2020_v27 = vor.u32 %v2018_v9, %v2017_v15  ;;  %v5201_v50 = vcombine.low %v1496_v22, %v1506_v28  ;;  %v2039_v51 = vrot.slane %v2037_v53, 7  ;;  %v2698_v52 = vshll.u32 %v2604_v7, 16  ;;  %v3152_v9 = vld [vmem:[#allocation2 + $0x48] sm:$0xf] }
  0x5b   : > { %v2704_v56 = vshll.u32 %v2605_v21, 16  ;;  %v2033_v55 = vor.u32 %v2031_v16, %v2030_v38  ;;  %v2035_v47 = vrot.slane %v2030_v38, 4  ;;  %v2697_v58 = vrot.slane %v2695_v40, 4 }
  0x5c   : > { %v2021_v48 = vsel %vm5964_vm8, %v2013_v13, %v2020_v27  ;;  %1849 = vrot.lane.b32.xlu1 %v5201_v50, %s5735_s6  ;;  %v2042_v59 = vor.u32 %v2040_v23, %v2039_v51  ;;  %v2700_v54 = vrot.slane %v2698_v52, 5  ;;  %v2708_v61 = vshrl.u32 %v2605_v21, 16  ;;  %v5659_v13 = vld [vmem:[#allocation2 + $0x44] sm:$0xff]   ;;  %v3153_v21 = vld [vmem:[#allocation2 + $0x50] sm:$0x8] }
  0x5d   : > { %v5232_v18 = vcombine.low %v2012_v35, %v2021_v48  ;;  %v2706_v37 = vrot.slane %v2704_v56, 5  ;;  %v2034_v60 = vsel %vm5964_vm8, %v5918_v2, %v2033_v55  ;;  %v2719_v62 = vshrl.u32 %v2607_v41, 16  ;;  %v3840_v55 = vld [vmem:[#allocation2 + $0x44] sm:$0xf] }
  0x5e   : > { %v2722_v30 = vshll.u32 %v2607_v41, 16  ;;  %v2043_v19 = vsel %vm5964_vm8, %v2035_v47, %v2042_v59  ;;  %v2701_v63 = vor.u32 %v2700_v54, %v2697_v58  ;;  %v2728_v1 = vshll.u32 %v2608_v57, 16  ;;  %v3841_v47 = vld [vmem:[#allocation2 + $0x48] sm:$0xf]  ;;  %v3845_v59 = vld [vmem:[#allocation2 + $0x5c] sm:$0x1] }
  0x5f   : > { %2360 = vrot.lane.b32.xlu0 %v5232_v18, %s5738_s9  ;;  %v2732_v4 = vshrl.u32 %v2608_v57, 16  ;;  %v5233_v7 = vcombine.low %v2034_v60, %v2043_v19  ;;  %v2710_v49 = vrot.slane %v2708_v61, 4  ;;  %v2721_v8 = vrot.slane %v2719_v62, 4  ;;  %v3842_v18 = vld [vmem:[#allocation2 + $0x4c] sm:$0x1] }
  0x60   : > { %v2724_v31 = vrot.slane %v2722_v30, 5  ;;  %v2702_v10 = vrot.slane %v2701_v63, 4  ;;  %v2730_v2 = vrot.slane %v2728_v1, 5  ;;  %v5280_v42 = vrot.slane %v3237_v29, 11  ;;  %v1372_v61 = vld [vmem:[#allocation2 + $0x44] sm:$0xf] }
  0x61   : > { %v2734_v12 = vrot.slane %v2732_v4, 4  ;;  %2362 = vrot.lane.b32.xlu1 %v5233_v7, %s5738_s9  ;;  %v2711_v14 = vor.u32 %v2710_v49, %v2706_v37  ;;  %v3242_v17 = vshrl.u32 %v3151_v5, 16  ;;  %v3245_v16 = vshll.u32 %v3151_v5, 16  ;;  %v1373_v7 = vld [vmem:[#allocation2 + $0x48] sm:$0xf] }
  0x62   : > { %v2725_v15 = vor.u32 %v2724_v31, %v2721_v8  ;;  %v2707_v22 = vsel %vm5860_vm6, %v2702_v10, %v2706_v37  ;;  %v3251_v53 = vshrl.u32 %v3152_v9, 16  ;;  %v3254_v23 = vshll.u32 %v3152_v9, 16  ;;  %v6074_v10 = vld [vmem:[#allocation2 + $0x5c] sm:$0x1] }
  0x63   : > { %2537 = vrot.lane.b32.xlu0 %v5658_v32, %s5736_s7  ;;  %v2735_v35 = vor.u32 %v2734_v12, %v2730_v2  ;;  %v2712_v28 = vrot.slane %v2711_v14, 4  ;;  %v3244_v3 = vrot.slane %v3242_v17, 7  ;;  %v434_v29 = vmax.f32 %v5937_v25, 0.0  ;;  %v1374_v32 = vld [vmem:[#allocation2 + $0x4c] sm:$0x1] }
  0x64   : > { %v2726_v27 = vrot.slane %v2725_v15, 4  ;;  %v3253_v40 = vrot.slane %v3251_v53, 7  ;;  %v435_v41 = vmax.f32 %v5940_v26, 0.0  ;;  %v3259_v50 = vshrl.u32 %v3153_v21, 16  ;;  %v6078_v14 = vld [vmem:[#allocation2 + $0x50] sm:$0x8] }
  0x65   : > { %v2736_v38 = vrot.slane %v2735_v35, 4  ;;  %2539 = vrot.lane.b32.xlu1 %v5659_v13, %s5736_s7  ;;  %v2717_v51 = vsel %vm5860_vm6, %v2712_v28, %v5932_v20  ;;  %v3247_v56 = vor.u32 %v3245_v16, %v3244_v3  ;;  %v3249_v48 = vrot.slane %v3244_v3, 4  ;;  %v5660_v15 = vld [vmem:[#allocation2 + $0x44] sm:$0xff]  }
  0x66   : > { %v2731_v52 = vsel %vm5860_vm6, %v2726_v27, %v2730_v2  ;;  %v5264_v58 = vcombine.low %v2707_v22, %v2717_v51  ;;  %v3256_v26 = vor.u32 %v3254_v23, %v3253_v40  ;;  %v5407_v57 = vpack.c.bf16 %v434_v29, %v434_v29 }
  0x67   : > { %v2741_v25 = vsel %vm5860_vm6, %v2736_v38, %v5934_v24  ;;  %v3248_v20 = vsel %vm5964_vm8, %v5280_v42, %v3247_v56  ;;  %v5408_v37 = vpack.c.bf16 %v435_v41, %v435_v41  ;;  %v6066_v60 = vrot.slane %v3259_v50, 11 }
  0x68   : > { %v5265_v54 = vcombine.low %v2731_v52, %v2741_v25  ;;  %3082 = vrot.lane.b32.xlu0 %v5264_v58, %s5740_s11  ;;  %v3257_v62 = vsel %vm5964_vm8, %v3249_v48, %v3256_v26  ;;  %676 = vst.msk [vmem:[#allocation2 + $0x54] sm:$0xf] %vm474_vm0, %v5407_v57  ;;  %v3931_v24 = vshrl.u32 %v3840_v55, 16  ;;  %v3934_v30 = vshll.u32 %v3840_v55, 16 }
  0x69   : > { %v3940_v19 = vshll.u32 %v3841_v47, 16  ;;  %v5296_v63 = vcombine.low %v3248_v20, %v3257_v62  ;;  %677 = vst.msk [vmem:[#allocation2 + $0x58] sm:$0xf] %vm474_vm0, %v5408_v37  ;;  %v3944_v1 = vshrl.u32 %v3841_v47, 16  ;;  %v3950_v4 = vshll.u32 %v3842_v18, 16 }
  0x6a   : > { %3084 = vrot.lane.b32.xlu1 %v5265_v54, %s5740_s11  ;;  %v3974_v5 = vshll.u32 %v3845_v59, 16  ;;  %v3933_v49 = vrot.slane %v3931_v24, 4  ;;  %v3936_v8 = vrot.slane %v3934_v30, 5  ;;  %v1508_v9 = vshrl.u32 %v1372_v61, 16 }
  0x6b   : > { %v3942_v31 = vrot.slane %v3940_v19, 5  ;;  %v3946_v2 = vrot.slane %v3944_v1, 4  ;;  %v3952_v12 = vrot.slane %v3950_v4, 5  ;;  %v1511_v13 = vshll.u32 %v1372_v61, 16 }
  0x6c   : > { %v6076_v42 = vrot.slane %v3974_v5, 5  ;;  %3596 = vrot.lane.b32.xlu0 %v5296_v63, %s5739_s10  ;;  %v3937_v17 = vor.u32 %v3936_v8, %v3933_v49  ;;  %v1510_v16 = vrot.slane %v1508_v9, 4  ;;  %v1517_v21 = vshll.u32 %v1373_v7, 16 }
  0x6d   : > { %v1521_v22 = vshrl.u32 %v1373_v7, 16  ;;  %v3947_v35 = vor.u32 %v3946_v2, %v3942_v31  ;;  %v1513_v53 = vrot.slane %v1511_v13, 5  ;;  %v1527_v23 = vshll.u32 %v1374_v32, 16 }
  0x6e   : > { %v1551_v28 = vshll.u32 %v6074_v10, 16  ;;  %v3938_v27 = vrot.slane %v3937_v17, 4  ;;  %v1519_v3 = vrot.slane %v1517_v21, 5  ;;  %v2045_v38 = vshrl.u32 %v6078_v14, 16 }
  0x6f   : > { %v1523_v29 = vrot.slane %v1521_v22, 4  ;;  %v3154_v40 = vld [vmem:[#allocation2 + $0x54] sm:$0xf]  ;;  %v3948_v41 = vrot.slane %v3947_v35, 4  ;;  %v1514_v50 = vor.u32 %v1513_v53, %v1510_v16  ;;  %v1529_v51 = vrot.slane %v1527_v23, 5 }
  0x70   : > { %v6085_v52 = vadd.f32 %v5856_v36, %v5953_v43  ;;  %v3155_v56 = vld [vmem:[#allocation2 + $0x58] sm:$0xf]  ;;  %v3264_v48 = vshrl.u32 %v3154_v40, 16  ;;  %v3267_v55 = vshll.u32 %v3154_v40, 16  ;;  %3773 = vrot.lane.b32.xlu0 %v5660_v15, %s5737_s8  ;;  %v3943_v47 = vsel %vm5860_vm6, %v3938_v27, %v3942_v31  ;;  %v3843_v18 = vld [vmem:[#allocation2 + $0x54] sm:$0xf] }
  0x71   : > { %v1524_v58 = vor.u32 %v1523_v29, %v1519_v3  ;;  %v3273_v25 = vshrl.u32 %v3155_v56, 16  ;;  %v3276_v26 = vshll.u32 %v3155_v56, 16  ;;  %v3953_v57 = vsel %vm5860_vm6, %v3948_v41, %v3952_v12  ;;  %v6095_v36 = vld [vmem:[%s7401_s1] ss:$0 sm:$0xff]  ;;  %v3844_v20 = vld [vmem:[#allocation2 + $0x58] sm:$0xf] }
  0x72   : > { %v6099_v43 = vadd.f32 %v6095_v36, %v5956_v44  ;;  %v3266_v59 = vrot.slane %v3264_v48, 7  ;;  %v5328_v54 = vcombine.low %v3943_v47, %v3953_v57  ;;  %v3955_v37 = vshrl.u32 %v3843_v18, 16  ;;  %v1375_v8 = vld [vmem:[#allocation2 + $0x54] sm:$0xf]  ;;  %v1376_v31 = vld [vmem:[#allocation2 + $0x58] sm:$0xf] }
  0x73   : > { %v3958_v61 = vshll.u32 %v3843_v18, 16  ;;  %v3275_v62 = vrot.slane %v3273_v25, 7  ;;  %v3964_v24 = vshll.u32 %v3844_v20, 16  ;;  %v3968_v30 = vshrl.u32 %v3844_v20, 16  ;;  %v1921_v23 = vld [vmem:[#allocation2 + $0x54] sm:$0xf] }
  0x74   : > { %v1515_v19 = vrot.slane %v1514_v50, 4  ;;  %v3269_v32 = vor.u32 %v3267_v55, %v3266_v59  ;;  %v3271_v63 = vrot.slane %v3266_v59, 4  ;;  %4318 = vrot.lane.b32.xlu0 %v5328_v54, %s5741_s12  ;;  %v3957_v1 = vrot.slane %v3955_v37, 4  ;;  %v1922_v40 = vld [vmem:[#allocation2 + $0x58] sm:$0xf]  ;;  %v5676_v37 = vld [vmem:[%s7403_s3] sm:$0xff]  }
  0x75   : > { %v3960_v4 = vrot.slane %v3958_v61, 5  ;;  %v3278_v5 = vor.u32 %v3276_v26, %v3275_v62  ;;  %v3966_v7 = vrot.slane %v3964_v24, 5  ;;  %v3970_v49 = vrot.slane %v3968_v30, 4  ;;  %v5661_v41 = vld [vmem:[#allocation2 + $0x54] sm:$0xff]   ;;  %v1923_v26 = vld [vmem:[#allocation2 + $0x60] sm:$0x8]  ;;  %5563 = vmatprep.subr.bf16.mxu0 %v5676_v37  ;;  %5605 = vmatprep.subr.bf16.mxu1 %v5676_v37 }
  0x76   : > { %v1520_v44 = vsel %vm5860_vm6, %v1515_v19, %v1519_v3  ;;  %v3270_v9 = vsel %vm5964_vm8, %v6066_v60, %v3269_v32  ;;  %v1525_v12 = vrot.slane %v1524_v58, 4  ;;  %v1532_v13 = vshrl.u32 %v1375_v8, 16  ;;  %v2610_v57 = vld [vmem:[#allocation2 + $0x54] sm:$0xf]  ;;  %v2611_v19 = vld [vmem:[#allocation2 + $0x58] sm:$0xf]  ;;  %5564 = vmatpush3.bf16.msra.mxu0 %v5676_v37  ;;  %5610 = vmatpush3.bf16.msra.mxu1 %v5676_v37 }
  0x77   : > { %v3961_v2 = vor.u32 %v3960_v4, %v3957_v1  ;;  %v3279_v14 = vsel %vm5964_vm8, %v3271_v63, %v3278_v5  ;;  %v3971_v15 = vor.u32 %v3970_v49, %v3966_v7  ;;  %v1535_v17 = vshll.u32 %v1375_v8, 16  ;;  %v514_v8 = vld [vmem:[#allocation2 + $0x6c] sm:$0x1] }
  0x78   : > { %v1541_v16 = vshll.u32 %v1376_v31, 16  ;;  %v5297_v21 = vcombine.low %v3270_v9, %v3279_v14  ;;  %v1530_v35 = vsel %vm5860_vm6, %v1525_v12, %v1529_v51  ;;  %v1534_v53 = vrot.slane %v1532_v13, 4  ;;  %v3156_v14 = vld [vmem:[#allocation2 + $0x60] sm:$0x8] }
  0x79   : > { %v3962_v22 = vrot.slane %v3961_v2, 4  ;;  %v3972_v27 = vrot.slane %v3971_v15, 4  ;;  %v5202_v3 = vcombine.low %v1520_v44, %v1530_v35  ;;  %v1537_v29 = vrot.slane %v1535_v17, 5  ;;  %v5663_v15 = vld [vmem:[#allocation2 + $0x54] sm:$0xff]   ;;  %v3159_v35 = vld [vmem:[#allocation2 + $0x70] sm:$0x8] }
  0x7a   : > { %v1543_v60 = vrot.slane %v1541_v16, 5  ;;  %3598 = vrot.lane.b32.xlu1 %v5297_v21, %s5739_s10  ;;  %v1545_v56 = vshrl.u32 %v1376_v31, 16  ;;  %v1553_v48 = vrot.slane %v1551_v28, 5  ;;  %v5218_v55 = vrot.slane %v2045_v38, 11  ;;  %v5679_v31 = vld [vmem:[%s7403_s3 + $0x8] sm:$0xff]  }
  0x7b   : > { %v3967_v50 = vsel %vm5860_vm6, %v3962_v22, %v3966_v7  ;;  %v3977_v51 = vsel %vm5860_vm6, %v3972_v27, %v6076_v42  ;;  %v1538_v47 = vor.u32 %v1537_v29, %v1534_v53  ;;  %v2050_v58 = vshrl.u32 %v1921_v23, 16  ;;  %v5662_v42 = vld [vmem:[#allocation2 + $0x44] sm:$0xff]   ;;  %v2612_v7 = vld [vmem:[#allocation2 + $0x5c] sm:$0x1]  ;;  %5565 = vmatprep.subr.bf16.mxu0 %v5679_v31  ;;  %5606 = vmatprep.subr.bf16.mxu1 %v5679_v31 }
  0x7c   : > { %v2053_v25 = vshll.u32 %v1921_v23, 16  ;;  %v5329_v18 = vcombine.low %v3967_v50, %v3977_v51  ;;  %v1547_v59 = vrot.slane %v1545_v56, 4  ;;  %v2059_v54 = vshrl.u32 %v1922_v40, 16  ;;  %5566 = vmatpush3.bf16.msra.mxu0 %v5679_v31  ;;  %5611 = vmatpush3.bf16.msra.mxu1 %v5679_v31 }
  0x7d   : > { %v2062_v20 = vshll.u32 %v1922_v40, 16  ;;  %v1539_v10 = vrot.slane %v1538_v47, 4  ;;  %v2052_v28 = vrot.slane %v2050_v58, 7  ;;  %v436_v38 = vmax.f32 %v5945_v33, 0.0  ;;  %v1926_v40 = vld [vmem:[#allocation2 + $0x70] sm:$0x8] }
  0x7e   : > { %v437_v61 = vmax.f32 %v5948_v34, 0.0  ;;  %3775 = vrot.lane.b32.xlu1 %v5661_v41, %s5737_s8  ;;  %4320 = vrot.lane.b32.xlu0 %v5329_v18, %s5741_s12  ;;  %v1548_v62 = vor.u32 %v1547_v59, %v1543_v60  ;;  %v2061_v24 = vrot.slane %v2059_v54, 7  ;;  %v2067_v30 = vshrl.u32 %v1923_v26, 16 }
  0x7f   : > { %v2743_v32 = vshrl.u32 %v2610_v57, 16  ;;  %v1544_v63 = vsel %vm5860_vm6, %v1539_v10, %v1543_v60  ;;  %v2055_v1 = vor.u32 %v2053_v25, %v2052_v28  ;;  %v2057_v4 = vrot.slane %v2052_v28, 4  ;;  %v517_v60 = vld [vmem:[#allocation2 + $0x7c] sm:$0x1]  ;;  %v5664_v25 = vld [vmem:[#allocation2 + $0x54] sm:$0xff]  }
  0x80   : > { %v5409_v5 = vpack.c.bf16 %v436_v38, %v436_v38  ;;  %v1549_v33 = vrot.slane %v1548_v62, 4  ;;  %v2064_v34 = vor.u32 %v2062_v20, %v2061_v24  ;;  %v5410_v49 = vpack.c.bf16 %v437_v61, %v437_v61  ;;  %v6163_v38 = vld [vmem:[%s7400_s0] ss:$0 sm:$0xff] }
  0x81   : > { %v6128_v44 = vrot.slane %v2067_v30, 11  ;;  %v2056_v9 = vsel %vm5964_vm8, %v5218_v55, %v2055_v1  ;;  %v2745_v2 = vrot.slane %v2743_v32, 4  ;;  %v2746_v12 = vshll.u32 %v2610_v57, 16 }
  0x82   : > { %678 = vst.msk [vmem:[#allocation2 + $0x64] sm:$0xf] %vm474_vm0, %v5409_v5  ;;  %v2752_v13 = vshll.u32 %v2611_v19, 16  ;;  %1303 = vrot.lane.b32.xlu1 %v5662_v42, %s5734_s28  ;;  %1851 = vrot.lane.b32.xlu0 %v5202_v3, %s5735_s6  ;;  %v1554_v17 = vsel %vm5860_vm6, %v1549_v33, %v1553_v48  ;;  %v2065_v16 = vsel %vm5964_vm8, %v2057_v4, %v2064_v34  ;;  %679 = vst.msk [vmem:[#allocation2 + $0x68] sm:$0xf] %vm474_vm0, %v5410_v49  ;;  %v5680_v48 = vld [vmem:[%s7403_s3 + $0x10] sm:$0xff]  }
  0x83   : > { %v2756_v21 = vshrl.u32 %v2611_v19, 16  ;;  %v2762_v22 = vshll.u32 %v2612_v7, 16  ;;  %v5203_v53 = vcombine.low %v1544_v63, %v1554_v17  ;;  %v5234_v23 = vcombine.low %v2056_v9, %v2065_v16  ;;  %5567 = vmatprep.subr.bf16.mxu0 %v5680_v48  ;;  %5607 = vmatprep.subr.bf16.mxu1 %v5680_v48 }
  0x84   : > { %v2748_v27 = vrot.slane %v2746_v12, 5  ;;  %v2754_v29 = vrot.slane %v2752_v13, 5  ;;  %v515_v50 = vsel %vm5794_vm3, 0, %v514_v8  ;;  %v3281_v56 = vshrl.u32 %v3156_v14, 16  ;;  %5568 = vmatpush3.bf16.msra.mxu0 %v5680_v48  ;;  %5612 = vmatpush3.bf16.msra.mxu1 %v5680_v48 }
  0x85   : > { %v2758_v3 = vrot.slane %v2756_v21, 4  ;;  %v2764_v41 = vrot.slane %v2762_v22, 5  ;;  %516 = vst [vmem:[#allocation2 + $0x6c] sm:$0x1] %v515_v50  ;;  %v438_v51 = vmax.f32 %v6085_v52, 0.0  ;;  %v439_v47 = vmax.f32 %v6099_v43, 0.0 }
  0x86   : > { %v2749_v55 = vor.u32 %v2748_v27, %v2745_v2  ;;  %v3303_v58 = vshrl.u32 %v3159_v35, 16  ;;  %1305 = vrot.lane.b32.xlu1 %v5663_v15, %s5734_s28  ;;  %2364 = vrot.lane.b32.xlu0 %v5234_v23, %s5738_s9  ;;  %v6152_v57 = vrot.slane %v3281_v56, 11  ;;  %v518_v18 = vsel %vm5794_vm3, 0, %v517_v60 }
  0x87   : > { %v2759_v26 = vor.u32 %v2758_v3, %v2754_v29  ;;  %v2089_v59 = vshrl.u32 %v1926_v40, 16  ;;  %v5411_v20 = vpack.c.bf16 %v438_v51, %v438_v51  ;;  %v5412_v37 = vpack.c.bf16 %v439_v47, %v439_v47  ;;  %519 = vst [vmem:[#allocation2 + $0x7c] sm:$0x1] %v518_v18 }
  0x88   : > { %v2750_v54 = vrot.slane %v2749_v55, 4  ;;  %v6156_v10 = vrot.slane %v3303_v58, 11  ;;  %v369_v61 = vmul.f32 %v6163_v38, %v5493_v45  ;;  %v370_v42 = vmul.f32 %v6163_v38, %v5494_v46 }
  0x89   : > { %v1924_v52 = vld [vmem:[#allocation2 + $0x64] sm:$0xf]  ;;  %v2760_v43 = vrot.slane %v2759_v26, 4  ;;  %v6158_v28 = vrot.slane %v2089_v59, 11  ;;  %v1925_v62 = vld [vmem:[#allocation2 + $0x68] sm:$0xf] }
  0x8a   : > { %v2072_v24 = vshrl.u32 %v1924_v52, 16  ;;  %v2075_v30 = vshll.u32 %v1924_v52, 16  ;;  %v2755_v19 = vsel %vm5860_vm6, %v2750_v54, %v2754_v29  ;;  %680 = vst.msk [vmem:[#allocation2 + $0x74] sm:$0xf] %vm474_vm0, %v5411_v20  ;;  %681 = vst.msk [vmem:[#allocation2 + $0x78] sm:$0xf] %vm474_vm0, %v5412_v37  ;;  %1853 = vrot.lane.b32.xlu1 %v5203_v53, %s5735_s6  ;;  %2541 = vrot.lane.b32.xlu0 %v5664_v25, %s5736_s7 }
  0x8b   : > { %v2081_v32 = vshrl.u32 %v1925_v62, 16  ;;  %v2084_v45 = vshll.u32 %v1925_v62, 16  ;;  %v2765_v11 = vsel %vm5860_vm6, %v2760_v43, %v2764_v41  ;;  %v2613_v46 = vld [vmem:[#allocation2 + $0x64] sm:$0xf]  ;;  %v6180_v63 = vadd.f32 %v6095_v36, %v369_v61  ;;  %v2614_v5 = vld [vmem:[#allocation2 + $0x68] sm:$0xf] }
  0x8c   : > { %v2074_v1 = vrot.slane %v2072_v24, 7  ;;  %v5266_v4 = vcombine.low %v2755_v19, %v2765_v11  ;;  %v2767_v7 = vshrl.u32 %v2613_v46, 16  ;;  %v2770_v33 = vshll.u32 %v2613_v46, 16  ;;  %v2615_v49 = vld [vmem:[#allocation2 + $0x6c] sm:$0x1] }
  0x8d   : > { %v2083_v34 = vrot.slane %v2081_v32, 7  ;;  %v2776_v8 = vshll.u32 %v2614_v5, 16  ;;  %v2780_v31 = vshrl.u32 %v2614_v5, 16  ;;  %v6183_v9 = vadd.f32 %v6095_v36, %v370_v42  ;;  %v3157_v15 = vld [vmem:[#allocation2 + $0x64] sm:$0xf] }
  0x8e   : > { %v2077_v2 = vor.u32 %v2075_v30, %v2074_v1  ;;  %v2079_v12 = vrot.slane %v2074_v1, 4  ;;  %v2769_v13 = vrot.slane %v2767_v7, 4  ;;  %v2772_v14 = vrot.slane %v2770_v33, 5  ;;  %3086 = vrot.lane.b32.xlu0 %v5266_v4, %s5740_s11  ;;  %v3158_v35 = vld [vmem:[#allocation2 + $0x68] sm:$0xf] }
  0x8f   : > { %v2086_v17 = vor.u32 %v2084_v45, %v2083_v34  ;;  %v2778_v16 = vrot.slane %v2776_v8, 5  ;;  %v2782_v21 = vrot.slane %v2780_v31, 4  ;;  %v2786_v22 = vshll.u32 %v2615_v49, 16  ;;  %v3846_v52 = vld [vmem:[#allocation2 + $0x64] sm:$0xf] }
  0x90   : > { %v2078_v53 = vsel %vm5964_vm8, %v6128_v44, %v2077_v2  ;;  %v2773_v23 = vor.u32 %v2772_v14, %v2769_v13  ;;  %v3286_v27 = vshrl.u32 %v3157_v15, 16  ;;  %v3289_v29 = vshll.u32 %v3157_v15, 16  ;;  %v5665_v44 = vld [vmem:[#allocation2 + $0x64] sm:$0xff]   ;;  %v3848_v45 = vld [vmem:[#allocation2 + $0x6c] sm:$0x1]  ;;  %v6202_v2 = vpop.permute.xlu0 %1295 }
  0x91   : > { %v2087_v60 = vsel %vm5964_vm8, %v2079_v12, %v2086_v17  ;;  %v2783_v40 = vor.u32 %v2782_v21, %v2778_v16  ;;  %v2788_v3 = vrot.slane %v2786_v22, 5  ;;  %v3295_v41 = vshrl.u32 %v3158_v35, 16  ;;  %v3160_v50 = vld [vmem:[#allocation2 + $0x74] sm:$0xf]  ;;  %v3161_v56 = vld [vmem:[#allocation2 + $0x78] sm:$0xf] }
  0x92   : > { %v5235_v48 = vcombine.low %v2078_v53, %v2087_v60  ;;  %v2774_v55 = vrot.slane %v2773_v23, 4  ;;  %v3288_v51 = vrot.slane %v3286_v27, 7  ;;  %v3298_v47 = vshll.u32 %v3158_v35, 16  ;;  %v3847_v24 = vld [vmem:[#allocation2 + $0x68] sm:$0xf] }
  0x93   : > { %v2784_v58 = vrot.slane %v2783_v40, 4  ;;  %v3297_v25 = vrot.slane %v3295_v41, 7  ;;  %v3308_v26 = vshrl.u32 %v3160_v50, 16  ;;  %v3311_v18 = vshll.u32 %v3160_v50, 16  ;;  %v3849_v7 = vld [vmem:[#allocation2 + $0x74] sm:$0xf] }
  0x94   : > { %2366 = vrot.lane.b32.xlu1 %v5235_v48, %s5738_s9  ;;  %v2779_v59 = vsel %vm5860_vm6, %v2774_v55, %v2778_v16  ;;  %v3291_v54 = vor.u32 %v3289_v29, %v3288_v51  ;;  %v3293_v20 = vrot.slane %v3288_v51, 4  ;;  %v3317_v37 = vshrl.u32 %v3161_v56, 16  ;;  %v3850_v33 = vld [vmem:[#allocation2 + $0x78] sm:$0xf]  ;;  %v3851_v15 = vld [vmem:[#allocation2 + $0x7c] sm:$0x1] }
  0x95   : > { %v2789_v43 = vsel %vm5860_vm6, %v2784_v58, %v2788_v3  ;;  %v3300_v61 = vor.u32 %v3298_v47, %v3297_v25  ;;  %v3310_v42 = vrot.slane %v3308_v26, 7  ;;  %v3320_v62 = vshll.u32 %v3161_v56, 16  ;;  %v5666_v16 = vld [vmem:[#allocation2 + $0x64] sm:$0xff]   ;;  %v1380_v51 = vld [vmem:[#allocation2 + $0x6c] sm:$0x1]  ;;  %v5681_v58 = vld [vmem:[%s7403_s3 + $0x18] sm:$0xff]  }
  0x96   : > { %v5267_v30 = vcombine.low %v2779_v59, %v2789_v43  ;;  %v3292_v19 = vsel %vm5964_vm8, %v6152_v57, %v3291_v54  ;;  %v3319_v32 = vrot.slane %v3317_v37, 7  ;;  %v3979_v11 = vshrl.u32 %v3846_v52, 16  ;;  %v1378_v53 = vld [vmem:[#allocation2 + $0x64] sm:$0xf]  ;;  %v1379_v50 = vld [vmem:[#allocation2 + $0x68] sm:$0xf]  ;;  %5569 = vmatprep.subr.bf16.mxu0 %v5681_v58  ;;  %5608 = vmatprep.subr.bf16.mxu1 %v5681_v58 }
  0x97   : > { %v3301_v46 = vsel %vm5964_vm8, %v3293_v20, %v3300_v61  ;;  %v3313_v1 = vor.u32 %v3311_v18, %v3310_v42  ;;  %v3315_v4 = vrot.slane %v3310_v42, 4  ;;  %v3982_v5 = vshll.u32 %v3846_v52, 16  ;;  %v1381_v59 = vld [vmem:[#allocation2 + $0x74] sm:$0xf]  ;;  %v1382_v61 = vld [vmem:[#allocation2 + $0x78] sm:$0xf]  ;;  %v6219_v42 = vpop.permute.xlu1 %1843  ;;  %5570 = vmatpush3.bf16.msra.mxu0 %v5681_v58  ;;  %5613 = vmatpush3.bf16.msra.mxu1 %v5681_v58 }
  0x98   : > { %2543 = vrot.lane.b32.xlu1 %v5665_v44, %s5736_s7  ;;  %v5298_v34 = vcombine.low %v3292_v19, %v3301_v46  ;;  %v3322_v49 = vor.u32 %v3320_v62, %v3319_v32  ;;  %v3981_v8 = vrot.slane %v3979_v11, 4  ;;  %v3988_v31 = vshll.u32 %v3847_v24, 16  ;;  %v5667_v62 = vld [vmem:[#allocation2 + $0x74] sm:$0xff]  }
  0x99   : > { %v3314_v57 = vsel %vm5964_vm8, %v6156_v10, %v3313_v1  ;;  %v3984_v12 = vrot.slane %v3982_v5, 5  ;;  %v3992_v13 = vshrl.u32 %v3847_v24, 16  ;;  %v3998_v14 = vshll.u32 %v3848_v45, 16 }
  0x9a   : > { %3600 = vrot.lane.b32.xlu0 %v5298_v34, %s5739_s10  ;;  %v3323_v17 = vsel %vm5964_vm8, %v3315_v4, %v3322_v49  ;;  %v3990_v21 = vrot.slane %v3988_v31, 5  ;;  %v4003_v22 = vshrl.u32 %v3849_v7, 16  ;;  %v4006_v35 = vshll.u32 %v3849_v7, 16  ;;  %v1383_v34 = vld [vmem:[#allocation2 + $0x7c] sm:$0x1] }
  0x9b   : > { %v5299_v23 = vcombine.low %v3314_v57, %v3323_v17  ;;  %v3985_v27 = vor.u32 %v3984_v12, %v3981_v8  ;;  %v3994_v29 = vrot.slane %v3992_v13, 4  ;;  %v4000_v60 = vrot.slane %v3998_v14, 5  ;;  %v1927_v12 = vld [vmem:[#allocation2 + $0x74] sm:$0xf]  ;;  %v5668_v13 = vld [vmem:[#allocation2 + $0x64] sm:$0xff]  }
  0x9c   : > { %3088 = vrot.lane.b32.xlu1 %v5267_v30, %s5740_s11  ;;  %v4005_v10 = vrot.slane %v4003_v22, 4  ;;  %v4008_v40 = vrot.slane %v4006_v35, 5  ;;  %v4012_v3 = vshll.u32 %v3850_v33, 16  ;;  %v4016_v41 = vshrl.u32 %v3850_v33, 16 }
  0x9d   : > { %v3986_v56 = vrot.slane %v3985_v27, 4  ;;  %v3995_v48 = vor.u32 %v3994_v29, %v3990_v21  ;;  %v4022_v55 = vshll.u32 %v3851_v15, 16  ;;  %v1556_v47 = vshrl.u32 %v1378_v53, 16  ;;  %v6215_v54 = vpop.permute.xlu0 %1297  ;;  %v1928_v27 = vld [vmem:[#allocation2 + $0x78] sm:$0xf]  ;;  %v6232_v29 = vpop.permute.xlu1 %2535 }
  0x9e   : > { %3777 = vrot.lane.b32.xlu0 %v5666_v16, %s5737_s8  ;;  %v4009_v25 = vor.u32 %v4008_v40, %v4005_v10  ;;  %v4014_v26 = vrot.slane %v4012_v3, 5  ;;  %v4018_v18 = vrot.slane %v4016_v41, 4  ;;  %v1559_v44 = vshll.u32 %v1378_v53, 16 }
  0x9f   : > { %v3991_v20 = vsel %vm5860_vm6, %v3986_v56, %v3990_v21  ;;  %v3996_v37 = vrot.slane %v3995_v48, 4  ;;  %v4024_v52 = vrot.slane %v4022_v55, 5  ;;  %v1558_v43 = vrot.slane %v1556_v47, 4  ;;  %v5669_v55 = vld [vmem:[#allocation2 + $0x74] sm:$0xff]  }
  0xa0   : > { %3602 = vrot.lane.b32.xlu1 %v5299_v23, %s5739_s10  ;;  %v4010_v24 = vrot.slane %v4009_v25, 4  ;;  %v4019_v30 = vor.u32 %v4018_v18, %v4014_v26  ;;  %v1561_v19 = vrot.slane %v1559_v44, 5  ;;  %v1565_v32 = vshll.u32 %v1379_v50, 16 }
  0xa1   : > { %v4001_v45 = vsel %vm5860_vm6, %v3996_v37, %v4000_v60  ;;  %v1569_v11 = vshrl.u32 %v1379_v50, 16  ;;  %v1575_v46 = vshll.u32 %v1380_v51, 16  ;;  %v1580_v1 = vshrl.u32 %v1381_v59, 16  ;;  %v6230_v21 = vpop.permute.xlu0 %2533  ;;  %v2616_v37 = vld [vmem:[#allocation2 + $0x74] sm:$0xf] }
  0xa2   : > { %v5330_v4 = vcombine.low %v3991_v20, %v4001_v45  ;;  %v4015_v5 = vsel %vm5860_vm6, %v4010_v24, %v4014_v26  ;;  %v4020_v7 = vrot.slane %v4019_v30, 4  ;;  %v1562_v33 = vor.u32 %v1561_v19, %v1558_v43  ;;  %v1929_v20 = vld [vmem:[#allocation2 + $0x80] sm:$0x8]  ;;  %v2617_v24 = vld [vmem:[#allocation2 + $0x78] sm:$0xf] }
  0xa3   : > { %v1567_v49 = vrot.slane %v1565_v32, 5  ;;  %v1571_v8 = vrot.slane %v1569_v11, 4  ;;  %v1577_v31 = vrot.slane %v1575_v46, 5  ;;  %v1582_v57 = vrot.slane %v1580_v1, 4  ;;  %v6245_v46 = vld [vmem:[%s5838_s25 + $0x40] sm:$0xff]   ;;  %v6247_v1 = vpop.permute.xlu1 %3771 }
  0xa4   : > { %3779 = vrot.lane.b32.xlu1 %v5667_v62, %s5737_s8  ;;  %4322 = vrot.lane.b32.xlu0 %v5330_v4, %s5741_s12  ;;  %v4025_v14 = vsel %vm5860_vm6, %v4020_v7, %v4024_v52  ;;  %v1563_v15 = vrot.slane %v1562_v33, 4  ;;  %v1583_v17 = vshll.u32 %v1381_v59, 16  ;;  %v1589_v16 = vshll.u32 %v1382_v61, 16 }
  0xa5   : > { %v5331_v22 = vcombine.low %v4015_v5, %v4025_v14  ;;  %v1572_v35 = vor.u32 %v1571_v8, %v1567_v49  ;;  %v1593_v53 = vshrl.u32 %v1382_v61, 16  ;;  %v1599_v23 = vshll.u32 %v1383_v34, 16  ;;  %v6242_v30 = vpop.permute.xlu0 %3769  ;;  %v2618_v5 = vld [vmem:[#allocation2 + $0x7c] sm:$0x1] }
  0xa6   : > { %v1568_v60 = vsel %vm5860_vm6, %v1563_v15, %v1567_v49  ;;  %v1585_v10 = vrot.slane %v1583_v17, 5  ;;  %v1591_v40 = vrot.slane %v1589_v16, 5  ;;  %v2094_v3 = vshrl.u32 %v1927_v12, 16  ;;  %v700_v15 = vld [vmem:[#allocation2] sm:$0x8] }
  0xa7   : > { %v1573_v41 = vrot.slane %v1572_v35, 4  ;;  %v1595_v50 = vrot.slane %v1593_v53, 4  ;;  %v1601_v56 = vrot.slane %v1599_v23, 5  ;;  %v2097_v48 = vshll.u32 %v1927_v12, 16  ;;  %v6263_v53 = vld [vmem:[#allocation2 + $0x4] sm:$0xf] }
  0xa8   : > { %1307 = vrot.lane.b32.xlu1 %v5668_v13, %s5734_s28  ;;  %4324 = vrot.lane.b32.xlu0 %v5331_v22, %s5741_s12  ;;  %v1586_v51 = vor.u32 %v1585_v10, %v1582_v57  ;;  %v2096_v47 = vrot.slane %v2094_v3, 7  ;;  %v2103_v58 = vshrl.u32 %v1928_v27, 16  ;;  %v2106_v25 = vshll.u32 %v1928_v27, 16  ;;  %v702_v57 = vld [vmem:[#allocation2 + $0x8] sm:$0xf] }
  0xa9   : > { %v1578_v26 = vsel %vm5860_vm6, %v1573_v41, %v1577_v31  ;;  %v1596_v18 = vor.u32 %v1595_v50, %v1591_v40  ;;  %v440_v44 = vmax.f32 %v6180_v63, 0.0  ;;  %v441_v59 = vmax.f32 %v6183_v9, 0.0  ;;  %v520_v31 = vld [vmem:[#allocation2 + $0x8c] sm:$0x1] }
  0xaa   : > { %v5204_v52 = vcombine.low %v1568_v60, %v1578_v26  ;;  %v1587_v43 = vrot.slane %v1586_v51, 4  ;;  %v2099_v61 = vor.u32 %v2097_v48, %v2096_v47  ;;  %v2101_v62 = vrot.slane %v2096_v47, 4  ;;  %v6272_v48 = vpop.permute.xlu1 %1299  ;;  %v5670_v51 = vld [vmem:[#allocation2 + $0x74] sm:$0xff]  }
  0xab   : > { %v1597_v19 = vrot.slane %v1596_v18, 4  ;;  %v2105_v32 = vrot.slane %v2103_v58, 7  ;;  %v5413_v45 = vpack.c.bf16 %v440_v44, %v440_v44  ;;  %v5414_v11 = vpack.c.bf16 %v441_v59, %v441_v59  ;;  %v6270_v3 = vpop.permute.xlu0 %2356 }
  0xac   : > { %1309 = vrot.lane.b32.xlu1 %v5669_v55, %s5734_s28  ;;  %1855 = vrot.lane.b32.xlu0 %v5204_v52, %s5735_s6  ;;  %v1592_v63 = vsel %vm5860_vm6, %v1587_v43, %v1591_v40  ;;  %v2100_v9 = vsel %vm5964_vm8, %v6158_v28, %v2099_v61  ;;  %v2111_v4 = vshrl.u32 %v1929_v20, 16  ;;  %v2791_v7 = vshrl.u32 %v2616_v37, 16  ;;  %v6268_v40 = vld [vmem:[#allocation2 + $0x80] sm:$0x8]  ;;  %v6275_v55 = vld [vmem:[%s5838_s25 + $0x48] sm:$0xff]  }
  0xad   : > { %v1602_v33 = vsel %vm5860_vm6, %v1597_v19, %v1601_v56  ;;  %v2108_v34 = vor.u32 %v2106_v25, %v2105_v32  ;;  %682 = vst.msk [vmem:[#allocation2 + $0x84] sm:$0xf] %vm474_vm0, %v5413_v45  ;;  %683 = vst.msk [vmem:[#allocation2 + $0x88] sm:$0xf] %vm474_vm0, %v5414_v11  ;;  %v2794_v49 = vshll.u32 %v2616_v37, 16  ;;  %v2800_v8 = vshll.u32 %v2617_v24, 16 }
  0xae   : > { %v5205_v12 = vcombine.low %v1592_v63, %v1602_v33  ;;  %v2793_v13 = vrot.slane %v2791_v7, 4  ;;  %v2804_v14 = vshrl.u32 %v2617_v24, 16  ;;  %v5497_v28 = vunpack.c.l.bf16 %v6245_v46 }
  0xaf   : > { %v2109_v17 = vsel %vm5964_vm8, %v2101_v62, %v2108_v34  ;;  %v2796_v16 = vrot.slane %v2794_v49, 5  ;;  %v2802_v22 = vrot.slane %v2800_v8, 5  ;;  %v2810_v35 = vshll.u32 %v2618_v5, 16  ;;  %v6291_v33 = vpop.permute.xlu0 %3592 }
  0xb0   : > { %1857 = vrot.lane.b32.xlu1 %v5205_v12, %s5735_s6  ;;  %v5236_v23 = vcombine.low %v2100_v9, %v2109_v17  ;;  %v2806_v27 = vrot.slane %v2804_v14, 4  ;;  %v521_v60 = vsel %vm5794_vm3, 0, %v520_v31  ;;  %v765_v10 = vshrl.u32 %v702_v57, 16 }
  0xb1   : > { %v5221_v41 = vrot.slane %v2111_v4, 11  ;;  %v2797_v50 = vor.u32 %v2796_v16, %v2793_v13  ;;  %522 = vst [vmem:[#allocation2 + $0x8c] sm:$0x1] %v521_v60  ;;  %v768_v56 = vshll.u32 %v702_v57, 16  ;;  %v2812_v58 = vrot.slane %v2810_v35, 5  ;;  %v6293_v57 = vpop.permute.xlu1 %1301 }
  0xb2   : > { %2368 = vrot.lane.b32.xlu0 %v5236_v23, %s5738_s9  ;;  %v2807_v47 = vor.u32 %v2806_v27, %v2802_v22  ;;  %v767_v25 = vrot.slane %v765_v10, 7  ;;  %v751_v26 = vshrl.u32 %v700_v15, 16  ;;  %v756_v44 = vshrl.u32 %v6263_v53, 16 }
  0xb3   : > { %v2798_v18 = vrot.slane %v2797_v50, 4  ;;  %v759_v59 = vshll.u32 %v6263_v53, 16  ;;  %v3325_v20 = vshrl.u32 %v6268_v40, 16  ;;  %v5498_v61 = vunpack.c.h.bf16 %v6245_v46 }
  0xb4   : > { %v1930_v37 = vld [vmem:[#allocation2 + $0x84] sm:$0xf]  ;;  %v1931_v52 = vld [vmem:[#allocation2 + $0x88] sm:$0xf]  ;;  %v770_v43 = vor.u32 %v768_v56, %v767_v25  ;;  %v371_v62 = vmul.f32 %v6163_v38, %v5497_v28  ;;  %v5501_v24 = vunpack.c.l.bf16 %v6275_v55  ;;  %v2808_v9 = vrot.slane %v2807_v47, 4 }
  0xb5   : > { %v2116_v19 = vshrl.u32 %v1930_v37, 16  ;;  %v2119_v32 = vshll.u32 %v1930_v37, 16  ;;  %v2125_v45 = vshrl.u32 %v1931_v52, 16  ;;  %v2128_v11 = vshll.u32 %v1931_v52, 16  ;;  %v2619_v4 = vld [vmem:[#allocation2 + $0x84] sm:$0xf] }
  0xb6   : > { %2545 = vrot.lane.b32.xlu0 %v5670_v51, %s5736_s7  ;;  %v2803_v63 = vsel %vm5860_vm6, %v2798_v18, %v2802_v22  ;;  %v2620_v5 = vld [vmem:[#allocation2 + $0x88] sm:$0xf]  ;;  %v372_v7 = vmul.f32 %v6163_v38, %v5498_v61  ;;  %v6289_v46 = vadd.f32 %v6095_v36, %v371_v62  ;;  %v2815_v8 = vshrl.u32 %v2619_v4, 16  ;;  %v3163_v53 = vld [vmem:[#allocation2 + $0x84] sm:$0xf] }
  0xb7   : > { %v2118_v34 = vrot.slane %v2116_v19, 7  ;;  %v2127_v49 = vrot.slane %v2125_v45, 7  ;;  %v2818_v31 = vshll.u32 %v2619_v4, 16  ;;  %v2813_v12 = vsel %vm5860_vm6, %v2808_v9, %v2812_v58  ;;  %v3164_v47 = vld [vmem:[#allocation2 + $0x88] sm:$0xf] }
  0xb8   : > { %v2621_v13 = vld [vmem:[#allocation2 + $0x8c] sm:$0x1]  ;;  %v2824_v14 = vshll.u32 %v2620_v5, 16  ;;  %v2828_v15 = vshrl.u32 %v2620_v5, 16  ;;  %vm1343_vm10 = vcmask 130112   ;;  %v5150_v28 = vrot.slane %v751_v26, 11  ;;  %v6302_v37 = vpop.permute.xlu0 %3078 }
  0xb9   : > { %v2121_v17 = vor.u32 %v2119_v32, %v2118_v34  ;;  %v2123_v16 = vrot.slane %v2118_v34, 4  ;;  %v2130_v22 = vor.u32 %v2128_v11, %v2127_v49  ;;  %v5268_v35 = vcombine.low %v2803_v63, %v2813_v12  ;;  %v6304_v32 = vpop.permute.xlu1 %2358  ;;  %v703_v34 = vld [vmem:[#allocation2 + $0x10] sm:$0x8] }
  0xba   : > { %v2817_v23 = vrot.slane %v2815_v8, 4  ;;  %v2820_v27 = vrot.slane %v2818_v31, 5  ;;  %v2826_v60 = vrot.slane %v2824_v14, 5  ;;  %v2830_v10 = vrot.slane %v2828_v15, 4 }
  0xbb   : > { %v2122_v40 = vsel %vm5964_vm8, %v5221_v41, %v2121_v17  ;;  %v2131_v50 = vsel %vm5964_vm8, %v2123_v16, %v2130_v22  ;;  %3090 = vrot.lane.b32.xlu0 %v5268_v35, %s5740_s11  ;;  %v2834_v56 = vshll.u32 %v2621_v13, 16  ;;  %v758_v51 = vrot.slane %v756_v44, 7  ;;  %v5671_v41 = vld [vmem:[#allocation2 + $0x84] sm:$0xff]   ;;  %v705_v13 = vld [vmem:[#allocation2 + $0x18] sm:$0xf] }
  0xbc   : > { %v5237_v58 = vcombine.low %v2122_v40, %v2131_v50  ;;  %v2821_v25 = vor.u32 %v2820_v27, %v2817_v23  ;;  %v2831_v26 = vor.u32 %v2830_v10, %v2826_v60  ;;  %v5284_v18 = vrot.slane %v3325_v20, 11  ;;  %v704_v16 = vld [vmem:[#allocation2 + $0x14] sm:$0xf]  ;;  %v3852_v23 = vld [vmem:[#allocation2 + $0x84] sm:$0xf] }
  0xbd   : > { %v2836_v52 = vrot.slane %v2834_v56, 5  ;;  %v761_v61 = vor.u32 %v759_v59, %v758_v51  ;;  %v763_v62 = vrot.slane %v758_v51, 4  ;;  %v3330_v19 = vshrl.u32 %v3163_v53, 16  ;;  %v3165_v59 = vld [vmem:[#allocation2 + $0x90] sm:$0x8]  ;;  %v6325_v50 = vpop.permute.xlu1 %3594 }
  0xbe   : > { %2370 = vrot.lane.b32.xlu1 %v5237_v58, %s5738_s9  ;;  %v2822_v45 = vrot.slane %v2821_v25, 4  ;;  %v2832_v11 = vrot.slane %v2831_v26, 4  ;;  %v3333_v63 = vshll.u32 %v3163_v53, 16  ;;  %v3339_v44 = vshrl.u32 %v3164_v47, 16  ;;  %v3853_v40 = vld [vmem:[#allocation2 + $0x88] sm:$0xf] }
  0xbf   : > { %v762_v9 = vsel %vm5964_vm8, %v5150_v28, %v761_v61  ;;  %v771_v20 = vsel %vm5964_vm8, %v763_v62, %v770_v43  ;;  %v3332_v4 = vrot.slane %v3330_v19, 7  ;;  %v3342_v5 = vshll.u32 %v3164_v47, 16  ;;  %v6319_v27 = vpop.permute.xlu0 %4314  ;;  %v3854_v58 = vld [vmem:[#allocation2 + $0x8c] sm:$0x1]  ;;  %v706_v61 = vld [vmem:[#allocation2 + $0x20] sm:$0x8] }
  0xc0   : > { %v2827_v49 = vsel %vm5860_vm6, %v2822_v45, %v2826_v60  ;;  %v2837_v8 = vsel %vm5860_vm6, %v2832_v11, %v2836_v52  ;;  %v5166_v31 = vcombine.low %v762_v9, %v771_v20  ;;  %v3341_v12 = vrot.slane %v3339_v44, 7  ;;  %v708_v20 = vld [vmem:[#allocation2 + $0x28] sm:$0xf] }
  0xc1   : > { %v5269_v14 = vcombine.low %v2827_v49, %v2837_v8  ;;  %v3335_v15 = vor.u32 %v3333_v63, %v3332_v4  ;;  %v3337_v17 = vrot.slane %v3332_v4, 4  ;;  %v411_v28 = vadd.f32 %v6095_v36, %v372_v7  ;;  %v5672_v63 = vld [vmem:[#allocation2 + $0x84] sm:$0xff]  }
  0xc2   : > { %2547 = vrot.lane.b32.xlu1 %v5671_v41, %s5736_s7  ;;  %1167 = vst.msk [vmem:[#allocation3] sm:$0xff] %vm1166_vm9, %v5166_v31  ;;  %v3344_v43 = vor.u32 %v3342_v5, %v3341_v12  ;;  %v442_v22 = vmax.f32 %v6289_v46, 0.0  ;;  %v3347_v35 = vshrl.u32 %v3165_v59, 16  ;;  %v773_v53 = vshrl.u32 %v703_v34, 16  ;;  %v707_v49 = vld [vmem:[#allocation2 + $0x24] sm:$0xf] }
  0xc3   : > { %1344 = vst.msk [vmem:[#allocation3] sm:$0xff] %vm1343_vm10, %v6202_v2  ;;  %v3336_v60 = vsel %vm5964_vm8, %v5284_v18, %v3335_v15  ;;  %v443_v36 = vmax.f32 %v411_v28, 0.0  ;;  %v787_v7 = vshrl.u32 %v705_v13, 16  ;;  %v790_v10 = vshll.u32 %v705_v13, 16  ;;  %v6337_v15 = vpop.permute.xlu1 %1845 }
  0xc4   : > { %v3345_v46 = vsel %vm5964_vm8, %v3337_v17, %v3344_v43  ;;  %v5415_v56 = vpack.c.bf16 %v442_v22, %v442_v22  ;;  %v6329_v51 = vrot.slane %v3347_v35, 11  ;;  %v5151_v47 = vrot.slane %v773_v53, 11 }
  0xc5   : > { %v5300_v25 = vcombine.low %v3336_v60, %v3345_v46  ;;  %v5416_v26 = vpack.c.bf16 %v443_v36, %v443_v36  ;;  %v789_v2 = vrot.slane %v787_v7, 7  ;;  %v778_v52 = vshrl.u32 %v704_v16, 16 }
  0xc6   : > { %3092 = vrot.lane.b32.xlu1 %v5269_v14, %s5740_s11  ;;  %684 = vst.msk [vmem:[#allocation2 + $0x94] sm:$0xf] %vm474_vm0, %v5415_v56  ;;  %v781_v18 = vshll.u32 %v704_v16, 16  ;;  %v4027_v62 = vshrl.u32 %v3852_v23, 16  ;;  %v4030_v19 = vshll.u32 %v3852_v23, 16  ;;  %v4036_v41 = vshll.u32 %v3853_v40, 16 }
  0xc7   : > { %3604 = vrot.lane.b32.xlu0 %v5300_v25, %s5739_s10  ;;  %685 = vst.msk [vmem:[#allocation2 + $0x98] sm:$0xf] %vm474_vm0, %v5416_v26  ;;  %v792_v45 = vor.u32 %v790_v10, %v789_v2  ;;  %v780_v11 = vrot.slane %v778_v52, 7  ;;  %v4040_v44 = vshrl.u32 %v3853_v40, 16  ;;  %v4046_v9 = vshll.u32 %v3854_v58, 16  ;;  %v6335_v8 = vpop.permute.xlu0 %4316 }
  0xc8   : > { %v4029_v4 = vrot.slane %v4027_v62, 4  ;;  %v4032_v5 = vrot.slane %v4030_v19, 5  ;;  %v4038_v59 = vrot.slane %v4036_v41, 5  ;;  %v795_v34 = vshrl.u32 %v706_v61, 16  ;;  %v523_v40 = vld [vmem:[#allocation2 + $0x9c] sm:$0x1] }
  0xc9   : > { %v783_v31 = vor.u32 %v781_v18, %v780_v11  ;;  %v785_v12 = vrot.slane %v780_v11, 4  ;;  %v4042_v13 = vrot.slane %v4040_v44, 4  ;;  %v4048_v14 = vrot.slane %v4046_v9, 5 }
  0xca   : > { %v4033_v17 = vor.u32 %v4032_v5, %v4029_v4  ;;  %v5152_v28 = vrot.slane %v795_v34, 11  ;;  %v809_v16 = vshrl.u32 %v708_v20, 16  ;;  %v812_v43 = vshll.u32 %v708_v20, 16 }
  0xcb   : > { %v784_v22 = vsel %vm5964_vm8, %v5151_v47, %v783_v31  ;;  %v793_v35 = vsel %vm5964_vm8, %v785_v12, %v792_v45  ;;  %3781 = vrot.lane.b32.xlu0 %v5672_v63, %s5737_s8  ;;  %v4043_v53 = vor.u32 %v4042_v13, %v4038_v59  ;;  %v800_v23 = vshrl.u32 %v707_v49, 16  ;;  %v6344_v46 = vpop.permute.xlu0 %1847  ;;  %v6359_v63 = vpop.permute.xlu1 %3080 }
  0xcc   : > { %v5167_v60 = vcombine.low %v784_v22, %v793_v35  ;;  %v4034_v36 = vrot.slane %v4033_v17, 4  ;;  %v811_v7 = vrot.slane %v809_v16, 7  ;;  %v803_v10 = vshll.u32 %v707_v49, 16  ;;  %v710_v16 = vld [vmem:[#allocation2 + $0x34] sm:$0xf] }
  0xcd   : > { %v3166_v56 = vld [vmem:[#allocation2 + $0x94] sm:$0xf]  ;;  %v4044_v58 = vrot.slane %v4043_v53, 4  ;;  %v802_v25 = vrot.slane %v800_v23, 7  ;;  %v5502_v26 = vunpack.c.h.bf16 %v6275_v55  ;;  %v6350_v47 = vmul.f32 %v6163_v38, %v5501_v24  ;;  %v709_v24 = vld [vmem:[#allocation2 + $0x30] sm:$0x8] }
  0xce   : > { %v3167_v2 = vld [vmem:[#allocation2 + $0x98] sm:$0xf]  ;;  %v3352_v52 = vshrl.u32 %v3166_v56, 16  ;;  %v3355_v61 = vshll.u32 %v3166_v56, 16  ;;  %1168 = vst.msk [vmem:[#allocation3 + $0x8] sm:$0xff] %vm1166_vm9, %v5167_v60  ;;  %v4039_v18 = vsel %vm5860_vm6, %v4034_v36, %v4038_v59  ;;  %v814_v62 = vor.u32 %v812_v43, %v811_v7 }
  0xcf   : > { %v3361_v19 = vshrl.u32 %v3167_v2, 16  ;;  %v3364_v41 = vshll.u32 %v3167_v2, 16  ;;  %1345 = vst.msk [vmem:[#allocation3 + $0x8] sm:$0xff] %vm1343_vm10, %v6215_v54  ;;  %v4049_v45 = vsel %vm5860_vm6, %v4044_v58, %v4048_v14  ;;  %v805_v11 = vor.u32 %v803_v10, %v802_v25  ;;  %v3855_v38 = vld [vmem:[#allocation2 + $0x94] sm:$0xf]  ;;  %v6376_v2 = vpop.permute.xlu1 %1849 }
  0xd0   : > { %v3354_v44 = vrot.slane %v3352_v52, 7  ;;  %v5332_v9 = vcombine.low %v4039_v18, %v4049_v45  ;;  %v807_v20 = vrot.slane %v802_v25, 4  ;;  %v524_v4 = vsel %vm5794_vm3, 0, %v523_v40  ;;  %v3856_v5 = vld [vmem:[#allocation2 + $0x98] sm:$0xf] }
  0xd1   : > { %v3363_v59 = vrot.slane %v3361_v19, 7  ;;  %v806_v34 = vsel %vm5964_vm8, %v5152_v28, %v805_v11  ;;  %525 = vst [vmem:[#allocation2 + $0x9c] sm:$0x1] %v524_v4  ;;  %v4051_v54 = vshrl.u32 %v3855_v38, 16  ;;  %v4054_v49 = vshll.u32 %v3855_v38, 16  ;;  %v2361_v31 = vpop.permute.xlu0 %2360  ;;  %v5673_v38 = vld [vmem:[#allocation2 + $0x94] sm:$0xff]  }
  0xd2   : > { %v3357_v12 = vor.u32 %v3355_v61, %v3354_v44  ;;  %v3359_v13 = vrot.slane %v3354_v44, 4  ;;  %4326 = vrot.lane.b32.xlu0 %v5332_v9, %s5741_s12  ;;  %v815_v14 = vsel %vm5964_vm8, %v807_v20, %v814_v62  ;;  %v4060_v17 = vshll.u32 %v3856_v5, 16  ;;  %v711_v23 = vld [vmem:[#allocation2 + $0x38] sm:$0xf]  ;;  %v1384_v10 = vld [vmem:[#allocation2 + $0x84] sm:$0xf] }
  0xd3   : > { %v3366_v43 = vor.u32 %v3364_v41, %v3363_v59  ;;  %v5168_v22 = vcombine.low %v806_v34, %v815_v14  ;;  %v4053_v35 = vrot.slane %v4051_v54, 4  ;;  %v4056_v53 = vrot.slane %v4054_v49, 5  ;;  %v1385_v11 = vld [vmem:[#allocation2 + $0x88] sm:$0xf]  ;;  %v1386_v34 = vld [vmem:[#allocation2 + $0x8c] sm:$0x1] }
  0xd4   : > { %v3358_v28 = vsel %vm5964_vm8, %v6329_v51, %v3357_v12  ;;  %v6371_v60 = vrot.slane %v4060_v17, 5  ;;  %v4064_v36 = vshrl.u32 %v3856_v5, 16  ;;  %v817_v7 = vshrl.u32 %v709_v24, 16 }
  0xd5   : > { %v3367_v40 = vsel %vm5964_vm8, %v3359_v13, %v3366_v43  ;;  %1169 = vst.msk [vmem:[#allocation3 + $0x10] sm:$0xff] %vm1166_vm9, %v5168_v22  ;;  %v4057_v56 = vor.u32 %v4056_v53, %v4053_v35  ;;  %v822_v58 = vshrl.u32 %v710_v16, 16  ;;  %v825_v25 = vshll.u32 %v710_v16, 16  ;;  %v6378_v52 = vpop.permute.xlu0 %2537  ;;  %v1932_v16 = vld [vmem:[#allocation2 + $0x90] sm:$0x8]  ;;  %v2363_v43 = vpop.permute.xlu1 %2362  ;;  %v5674_v22 = vld [vmem:[#allocation2 + $0x84] sm:$0xff]  }
  0xd6   : > { %v5301_v61 = vcombine.low %v3358_v28, %v3367_v40  ;;  %1346 = vst.msk [vmem:[#allocation3 + $0x10] sm:$0xff] %vm1343_vm10, %v6272_v48  ;;  %v4066_v51 = vrot.slane %v4064_v36, 4  ;;  %v5153_v18 = vrot.slane %v817_v7, 11  ;;  %v831_v62 = vshrl.u32 %v711_v23, 16  ;;  %v1388_v53 = vld [vmem:[#allocation2 + $0x98] sm:$0xf] }
  0xd7   : > { %v4058_v19 = vrot.slane %v4057_v56, 4  ;;  %v824_v41 = vrot.slane %v822_v58, 7  ;;  %v834_v45 = vshll.u32 %v711_v23, 16  ;;  %vm1891_vm11 = vcmask 195712   ;;  %v1933_v40 = vld [vmem:[#allocation2 + $0x94] sm:$0xf] }
  0xd8   : > { %3606 = vrot.lane.b32.xlu1 %v5301_v61, %s5739_s10  ;;  %v3857_v24 = vld [vmem:[#allocation2 + $0x9c] sm:$0x1]  ;;  %v4067_v44 = vor.u32 %v4066_v51, %v6371_v60  ;;  %v833_v9 = vrot.slane %v831_v62, 7  ;;  %1892 = vst.msk [vmem:[#allocation3] sm:$0xff] %vm1891_vm11, %v6219_v42  ;;  %vm2404_vm12 = vcmask 261312   ;;  %v1604_v48 = vshrl.u32 %v1384_v10, 16 }
  0xd9   : > { %1893 = vst.msk [vmem:[#allocation3 + $0x8] sm:$0xff] %vm1891_vm11, %v6337_v15  ;;  %1894 = vst.msk [vmem:[#allocation3 + $0x10] sm:$0xff] %vm1891_vm11, %v6344_v46  ;;  %v4063_v20 = vsel %vm5860_vm6, %v4058_v19, %v6371_v60  ;;  %v4070_v4 = vshll.u32 %v3857_v24, 16  ;;  %v827_v5 = vor.u32 %v825_v25, %v824_v41  ;;  %v829_v59 = vrot.slane %v824_v41, 4  ;;  %v1387_v42 = vld [vmem:[#allocation2 + $0x94] sm:$0xf] }
  0xda   : > { %2405 = vst.msk [vmem:[#allocation3] sm:$0xff] %vm2404_vm12, %v6270_v3  ;;  %2406 = vst.msk [vmem:[#allocation3 + $0x8] sm:$0xff] %vm2404_vm12, %v6304_v32  ;;  %v4068_v15 = vrot.slane %v4067_v44, 4  ;;  %v836_v54 = vor.u32 %v834_v45, %v833_v9  ;;  %v1606_v46 = vrot.slane %v1604_v48, 4  ;;  %v1607_v49 = vshll.u32 %v1384_v10, 16  ;;  %v6400_v3 = vpop.permute.xlu0 %3082  ;;  %v5675_v45 = vld [vmem:[#allocation2 + $0x94] sm:$0xff]  }
  0xdb   : > { %2407 = vst.msk [vmem:[#allocation3 + $0x10] sm:$0xff] %vm2404_vm12, %v2361_v31  ;;  %v4072_v12 = vrot.slane %v4070_v4, 5  ;;  %v828_v13 = vsel %vm5964_vm8, %v5153_v18, %v827_v5  ;;  %v1613_v14 = vshll.u32 %v1385_v11, 16  ;;  %v1617_v17 = vshrl.u32 %v1385_v11, 16  ;;  %v1389_v10 = vld [vmem:[#allocation2 + $0x9c] sm:$0x1] }
  0xdc   : > { %3783 = vrot.lane.b32.xlu1 %v5673_v38, %s5737_s8  ;;  %v837_v32 = vsel %vm5964_vm8, %v829_v59, %v836_v54  ;;  %v1609_v31 = vrot.slane %v1607_v49, 5  ;;  %v1623_v35 = vshll.u32 %v1386_v34, 16  ;;  %v1628_v23 = vshrl.u32 %v1387_v42, 16  ;;  %v1934_v5 = vld [vmem:[#allocation2 + $0x98] sm:$0xf]  ;;  %v2540_v59 = vpop.permute.xlu1 %2539 }
  0xdd   : > { %v4073_v28 = vsel %vm5860_vm6, %v4068_v15, %v4072_v12  ;;  %v5169_v60 = vcombine.low %v828_v13, %v837_v32  ;;  %v1615_v36 = vrot.slane %v1613_v14, 5  ;;  %v1619_v7 = vrot.slane %v1617_v17, 4  ;;  %v1935_v13 = vld [vmem:[#allocation2 + $0xa0] sm:$0x8] }
  0xde   : > { %v5333_v56 = vcombine.low %v4063_v20, %v4073_v28  ;;  %v1610_v58 = vor.u32 %v1609_v31, %v1606_v46  ;;  %v1625_v25 = vrot.slane %v1623_v35, 5  ;;  %v1630_v61 = vrot.slane %v1628_v23, 4  ;;  %v6408_v41 = vpop.permute.xlu0 %3596  ;;  %v6434_v28 = vld [vmem:[%s7401_s1] ss:$0 sm:$0xff] }
  0xdf   : > { %1170 = vst.msk [vmem:[#allocation3 + $0x18] sm:$0xff] %vm1166_vm9, %v5169_v60  ;;  %v1620_v51 = vor.u32 %v1619_v7, %v1615_v36  ;;  %v1631_v18 = vshll.u32 %v1387_v42, 16  ;;  %v1637_v62 = vshll.u32 %v1388_v53, 16  ;;  %v1641_v19 = vshrl.u32 %v1388_v53, 16 }
  0xe0   : > { %1311 = vrot.lane.b32.xlu1 %v5674_v22, %s5734_s28  ;;  %4328 = vrot.lane.b32.xlu0 %v5333_v56, %s5741_s12  ;;  %1347 = vst.msk [vmem:[#allocation3 + $0x18] sm:$0xff] %vm1343_vm10, %v6293_v57  ;;  %v1611_v11 = vrot.slane %v1610_v58, 4  ;;  %v1647_v38 = vshll.u32 %v1389_v10, 16  ;;  %v2133_v24 = vshrl.u32 %v1932_v16, 16  ;;  %v2138_v44 = vshrl.u32 %v1933_v40, 16 }
  0xe1   : > { %v1621_v9 = vrot.slane %v1620_v51, 4  ;;  %v1633_v48 = vrot.slane %v1631_v18, 5  ;;  %v1639_v20 = vrot.slane %v1637_v62, 5  ;;  %v1643_v4 = vrot.slane %v1641_v19, 4  ;;  %1895 = vst.msk [vmem:[#allocation3 + $0x18] sm:$0xff] %vm1891_vm11, %v6376_v2 }
  0xe2   : > { %v1616_v34 = vsel %vm5860_vm6, %v1611_v11, %v1615_v36  ;;  %v1649_v42 = vrot.slane %v1647_v38, 5  ;;  %v5222_v15 = vrot.slane %v2133_v24, 11  ;;  %v2140_v54 = vrot.slane %v2138_v44, 7  ;;  %2408 = vst.msk [vmem:[#allocation3 + $0x18] sm:$0xff] %vm2404_vm12, %v2363_v43  ;;  %v3774_v22 = vpop.permute.xlu0 %3773  ;;  %v6425_v43 = vld [vmem:[%s7400_s0] ss:$0 sm:$0xff] }
  0xe3   : > { %v1626_v57 = vsel %vm5860_vm6, %v1621_v9, %v1625_v25  ;;  %v1634_v46 = vor.u32 %v1633_v48, %v1630_v61  ;;  %v1644_v49 = vor.u32 %v1643_v4, %v1639_v20  ;;  %v2141_v12 = vshll.u32 %v1933_v40, 16  ;;  %v3085_v40 = vpop.permute.xlu1 %3084  ;;  %v2623_v51 = vld [vmem:[#allocation2 + $0x98] sm:$0xf]  ;;  %v526_v18 = vld [vmem:[#allocation2 + $0xac] sm:$0x1]  ;;  %v5536_v11 = vld [vmem:[%s5838_s25 + $0x50] sm:$0xff]  }
  0xe4   : > { %1313 = vrot.lane.b32.xlu1 %v5675_v45, %s5734_s28  ;;  %v5206_v14 = vcombine.low %v1616_v34, %v1626_v57  ;;  %v2145_v2 = vrot.slane %v2140_v54, 4  ;;  %v2147_v17 = vshrl.u32 %v1934_v5, 16  ;;  %v2150_v16 = vshll.u32 %v1934_v5, 16  ;;  %v3168_v45 = vld [vmem:[#allocation2 + $0xa0] sm:$0x8] }
  0xe5   : > { %v1635_v32 = vrot.slane %v1634_v46, 4  ;;  %v1645_v31 = vrot.slane %v1644_v49, 4  ;;  %v2143_v35 = vor.u32 %v2141_v12, %v2140_v54  ;;  %v374_v53 = vmul.f32 %v6425_v43, %v5502_v26  ;;  %v3171_v48 = vld [vmem:[#allocation2 + $0xb0] sm:$0x8]  ;;  %v529_v54 = vld [vmem:[#allocation2 + $0xbc] sm:$0x1] }
  0xe6   : > { %1859 = vrot.lane.b32.xlu0 %v5206_v14, %s5735_s6  ;;  %v2149_v23 = vrot.slane %v2147_v17, 7  ;;  %v412_v60 = vadd.f32 %v6434_v28, %v6350_v47  ;;  %v2155_v36 = vshrl.u32 %v1935_v13, 16  ;;  %vm2581_vm13 = vcmask 326912   ;;  %v2622_v47 = vld [vmem:[#allocation2 + $0x94] sm:$0xf]  ;;  %v4319_v38 = vpop.permute.xlu0 %4318  ;;  %v6496_v12 = vld [vmem:[%s5838_s25 + $0x58] sm:$0xff]  }
  0xe7   : > { %v1640_v7 = vsel %vm5860_vm6, %v1635_v32, %v1639_v20  ;;  %v1650_v55 = vsel %vm5860_vm6, %v1645_v31, %v1649_v42  ;;  %v2144_v26 = vsel %vm5964_vm8, %v5222_v15, %v2143_v35  ;;  %v413_v10 = vadd.f32 %v6434_v28, %v374_v53  ;;  %2582 = vst.msk [vmem:[#allocation3] sm:$0xff] %vm2581_vm13, %v6230_v21  ;;  %v2624_v21 = vld [vmem:[#allocation2 + $0x9c] sm:$0x1]  ;;  %v6493_v49 = vld [vmem:[#allocation2 + $0xb0] sm:$0x8]  ;;  %v6502_v17 = vld [vmem:[%s5838_s25 + $0x60] sm:$0xff]  }
  0xe8   : > { %2583 = vst.msk [vmem:[#allocation3 + $0x8] sm:$0xff] %vm2581_vm13, %v6232_v29  ;;  %2584 = vst.msk [vmem:[#allocation3 + $0x10] sm:$0xff] %vm2581_vm13, %v6378_v52  ;;  %v5207_v56 = vcombine.low %v1640_v7, %v1650_v55  ;;  %v2152_v58 = vor.u32 %v2150_v16, %v2149_v23  ;;  %v444_v25 = vmax.f32 %v412_v60, 0.0  ;;  %v6452_v61 = vrot.slane %v2155_v36, 11 }
  0xe9   : > { %2585 = vst.msk [vmem:[#allocation3 + $0x18] sm:$0xff] %vm2581_vm13, %v2540_v59  ;;  %v445_v62 = vmax.f32 %v413_v10, 0.0  ;;  %vm3126_vm14 = vcmask 392512   ;;  %vm3640_vm15 = vcmask 458112   ;;  %vm3817_vm2 = vcmask 523712  }
  0xea   : > { %1861 = vrot.lane.b32.xlu1 %v5207_v56, %s5735_s6  ;;  %v2153_v29 = vsel %vm5964_vm8, %v2145_v2, %v2152_v58  ;;  %v5417_v52 = vpack.c.bf16 %v444_v25, %v444_v25  ;;  %3127 = vst.msk [vmem:[#allocation3] sm:$0xff] %vm3126_vm14, %v6302_v37  ;;  %vm4362_vm4 = vcmask 589312   ;;  %v2839_v19 = vshrl.u32 %v2622_v47, 16  ;;  %3128 = vst.msk [vmem:[#allocation3 + $0x8] sm:$0xff] %vm3126_vm14, %v6359_v63 }
  0xeb   : > { %3129 = vst.msk [vmem:[#allocation3 + $0x10] sm:$0xff] %vm3126_vm14, %v6400_v3  ;;  %3130 = vst.msk [vmem:[#allocation3 + $0x18] sm:$0xff] %vm3126_vm14, %v3085_v40  ;;  %v5238_v24 = vcombine.low %v2144_v26, %v2153_v29  ;;  %v5418_v44 = vpack.c.bf16 %v445_v62, %v445_v62  ;;  %v2842_v9 = vshll.u32 %v2622_v47, 16  ;;  %v2848_v37 = vshll.u32 %v2623_v51, 16 }
  0xec   : > { %3641 = vst.msk [vmem:[#allocation3] sm:$0xff] %vm3640_vm15, %v6291_v33  ;;  %3642 = vst.msk [vmem:[#allocation3 + $0x8] sm:$0xff] %vm3640_vm15, %v6325_v50  ;;  %v2841_v63 = vrot.slane %v2839_v19, 4  ;;  %v2852_v3 = vshrl.u32 %v2623_v51, 16  ;;  %v2858_v20 = vshll.u32 %v2624_v21, 16  ;;  %v527_v33 = vsel %vm5794_vm3, 0, %v526_v18  ;;  %v3599_v59 = vpop.permute.xlu1 %3598 }
  0xed   : > { %3643 = vst.msk [vmem:[#allocation3 + $0x10] sm:$0xff] %vm3640_vm15, %v6408_v41  ;;  %2372 = vrot.lane.b32.xlu0 %v5238_v24, %s5738_s9  ;;  %v5677_v50 = vld [vmem:[#allocation2 + $0x94] sm:$0xff]   ;;  %v2850_v41 = vrot.slane %v2848_v37, 5  ;;  %528 = vst [vmem:[#allocation2 + $0xac] sm:$0x1] %v527_v33  ;;  %v3369_v4 = vshrl.u32 %v3168_v45, 16  ;;  %v5505_v5 = vunpack.c.l.bf16 %v5536_v11  ;;  %v5509_v7 = vunpack.c.l.bf16 %v6496_v12 }
  0xee   : > { %686 = vst.msk [vmem:[#allocation2 + $0xa4] sm:$0xf] %vm474_vm0, %v5417_v52  ;;  %687 = vst.msk [vmem:[#allocation2 + $0xa8] sm:$0xf] %vm474_vm0, %v5418_v44  ;;  %v2854_v34 = vrot.slane %v2852_v3, 4  ;;  %v2860_v42 = vrot.slane %v2858_v20, 5  ;;  %v5510_v47 = vunpack.c.h.bf16 %v6496_v12  ;;  %v5513_v40 = vunpack.c.l.bf16 %v6502_v17 }
  0xef   : > { %3818 = vst.msk [vmem:[#allocation3] sm:$0xff] %vm3817_vm2, %v6242_v30  ;;  %3819 = vst.msk [vmem:[#allocation3 + $0x8] sm:$0xff] %vm3817_vm2, %v6247_v1  ;;  %v2844_v30 = vrot.slane %v2842_v9, 5  ;;  %v5684_v1 = vld [vmem:[%s7403_s3 + $0x20] ss:$0 sps:$4 sm:$0xff]   ;;  %v3391_v15 = vshrl.u32 %v3171_v48, 16  ;;  %v375_v46 = vmul.f32 %v6425_v43, %v5505_v5  ;;  %v5514_v56 = vunpack.c.h.bf16 %v6502_v17 }
  0xf0   : > { %3820 = vst.msk [vmem:[#allocation3 + $0x10] sm:$0xff] %vm3817_vm2, %v3774_v22  ;;  %vm4431_vm5 = vcmask 588800   ;;  %v2855_v13 = vor.u32 %v2854_v34, %v2850_v41  ;;  %vm4480_vm7 = vcmask 1043456   ;;  %v530_v31 = vsel %vm5794_vm3, 0, %v529_v54  ;;  %v3776_v35 = vpop.permute.xlu1 %3775  ;;  %v4321_v53 = vpop.permute.xlu0 %4320 }
  0xf1   : > { %4363 = vst.msk [vmem:[#allocation3] sm:$0xff] %vm4362_vm4, %v6319_v27  ;;  %4364 = vst.msk [vmem:[#allocation3 + $0x8] sm:$0xff] %vm4362_vm4, %v6335_v8  ;;  %v5506_v27 = vunpack.c.h.bf16 %v5536_v11  ;;  %v2845_v57 = vor.u32 %v2844_v30, %v2841_v63  ;;  %v6490_v8 = vrot.slane %v3369_v4, 11  ;;  %v6499_v2 = vrot.slane %v3391_v15, 11  ;;  %2549 = vrot.lane.b32.xlu0 %v5677_v50, %s5736_s7  ;;  %5615 = vmatprep.subr.msk.bf16.mxu0 %vm4480_vm7, %v5684_v1 }
  0xf2   : > { %4365 = vst.msk [vmem:[#allocation3 + $0x10] sm:$0xff] %vm4362_vm4, %v4319_v38  ;;  %v6506_v22 = vadd.f32 %v6434_v28, %v375_v46  ;;  %v4482_v32 = vsel %vm4480_vm7, %v5684_v1, 0  ;;  %v2856_v23 = vrot.slane %v2855_v13, 4  ;;  %531 = vst [vmem:[#allocation2 + $0xbc] sm:$0x1] %v530_v31  ;;  %v2177_v36 = vshrl.u32 %v6493_v49, 16  ;;  %5616 = vmatprep.subr.msk.bf16.mxu1 %vm4480_vm7, %v5684_v1 }
  0xf3   : > { %3644 = vst.msk [vmem:[#allocation3 + $0x18] sm:$0xff] %vm3640_vm15, %v3599_v59  ;;  %v376_v14 = vmul.f32 %v6425_v43, %v5506_v27  ;;  %v2846_v16 = vrot.slane %v2845_v57, 4  ;;  %5572 = vmatpush3.bf16.msra.mxu0 %v4482_v32  ;;  %5614 = vmatpush3.bf16.msra.mxu1 %v4482_v32  ;;  %v6528_v62 = vmul.f32 %v6425_v43, %v5509_v7 }
  0xf4   : > { %3821 = vst.msk [vmem:[#allocation3 + $0x18] sm:$0xff] %vm3817_vm2, %v3776_v35  ;;  %v2861_v18 = vsel %vm5860_vm6, %v2856_v23, %v2860_v42  ;;  %v2627_v38 = vld [vmem:[#allocation2 + $0xac] sm:$0x1]  ;;  %v446_v20 = vmax.f32 %v6506_v22, 0.0 }
  0xf5   : > { %v6513_v60 = vadd.f32 %v6434_v28, %v376_v14  ;;  %v1936_v55 = vld [vmem:[#allocation2 + $0xa4] sm:$0xf]  ;;  %v2851_v26 = vsel %vm5860_vm6, %v2846_v16, %v2850_v41  ;;  %4366 = vst.msk [vmem:[#allocation3 + $0x18] sm:$0xff] %vm4362_vm4, %v4321_v53  ;;  %v1937_v58 = vld [vmem:[#allocation2 + $0xa8] sm:$0xf]  ;;  %v2882_v63 = vshll.u32 %v2627_v38, 16 }
  0xf6   : > { %v2625_v10 = vld [vmem:[#allocation2 + $0xa4] sm:$0xf]  ;;  %v2160_v25 = vshrl.u32 %v1936_v55, 16  ;;  %v2163_v51 = vshll.u32 %v1936_v55, 16  ;;  %v2169_v21 = vshrl.u32 %v1937_v58, 16  ;;  %v2172_v29 = vshll.u32 %v1937_v58, 16 }
  0xf7   : > { %v5270_v52 = vcombine.low %v2851_v26, %v2861_v18  ;;  %v2626_v19 = vld [vmem:[#allocation2 + $0xa8] sm:$0xf]  ;;  %v2863_v45 = vshrl.u32 %v2625_v10, 16  ;;  %v2866_v24 = vshll.u32 %v2625_v10, 16  ;;  %v3169_v3 = vld [vmem:[#allocation2 + $0xa4] sm:$0xf] }
  0xf8   : > { %v2162_v11 = vrot.slane %v2160_v25, 7  ;;  %v2872_v44 = vshll.u32 %v2626_v19, 16  ;;  %v2876_v9 = vshrl.u32 %v2626_v19, 16  ;;  %v2171_v37 = vrot.slane %v2169_v21, 7  ;;  %v3170_v4 = vld [vmem:[#allocation2 + $0xa8] sm:$0xf] }
  0xf9   : > { %3094 = vrot.lane.b32.xlu0 %v5270_v52, %s5740_s11  ;;  %v2865_v48 = vrot.slane %v2863_v45, 4  ;;  %v2868_v30 = vrot.slane %v2866_v24, 5  ;;  %v4379_v5 = vld [vmem:[#allocation3] sm:$0xff]  ;;  %v2884_v34 = vrot.slane %v2882_v63, 5  ;;  %v3374_v42 = vshrl.u32 %v3169_v3, 16  ;;  %v4380_v10 = vld [vmem:[#allocation3 + $0x8] sm:$0xff] }
  0xfa   : > { %v2165_v33 = vor.u32 %v2163_v51, %v2162_v11  ;;  %v2167_v50 = vrot.slane %v2162_v11, 4  ;;  %v2874_v41 = vrot.slane %v2872_v44, 5  ;;  %v2174_v1 = vor.u32 %v2172_v29, %v2171_v37  ;;  %5573 = vmatprep.mubr.msk.bf16.mxu0 %vm4431_vm5, %v4379_v5  ;;  %v3858_v22 = vld [vmem:[#allocation2 + $0xa4] sm:$0xf]  ;;  %v3859_v32 = vld [vmem:[#allocation2 + $0xa8] sm:$0xf] }
  0xfb   : > { %v2878_v59 = vrot.slane %v2876_v9, 4  ;;  %v2869_v15 = vor.u32 %v2868_v30, %v2865_v48  ;;  %v3377_v54 = vshll.u32 %v3169_v3, 16  ;;  %v3383_v57 = vshrl.u32 %v3170_v4, 16  ;;  %v4381_v58 = vld [vmem:[#allocation3 + $0x10] sm:$0xff]  ;;  %v5678_v25 = vld [vmem:[#allocation2 + $0xa4] sm:$0xff]   ;;  %5574 = vmatmul.mubr.msk.bf16.vlgmr.msra.gmra.mrb[0].mxu0 %vm4431_vm5, %v4380_v10  ;;  %v6553_v30 = vpop.permute.xlu0 %1851 }
  0xfc   : > { %v2166_v27 = vsel %vm5964_vm8, %v6452_v61, %v2165_v33  ;;  %v2175_v46 = vsel %vm5964_vm8, %v2167_v50, %v2174_v1  ;;  %v3376_v14 = vrot.slane %v3374_v42, 7  ;;  %v3386_v16 = vshll.u32 %v3170_v4, 16  ;;  %v3860_v29 = vld [vmem:[#allocation2 + $0xac] sm:$0x1]  ;;  %v3863_v38 = vld [vmem:[#allocation2 + $0xbc] sm:$0x1]  ;;  %5577 = vmatprep.mubr.msk.bf16.mxu0 %vm4431_vm5, %v4381_v58 }
  0xfd   : > { %v2879_v13 = vor.u32 %v2878_v59, %v2874_v41  ;;  %v5239_v31 = vcombine.low %v2166_v27, %v2175_v46  ;;  %v2870_v35 = vrot.slane %v2869_v15, 4  ;;  %v3385_v53 = vrot.slane %v3383_v57, 7  ;;  %v1390_v24 = vld [vmem:[#allocation2 + $0xa4] sm:$0xf]  ;;  %v1391_v63 = vld [vmem:[#allocation2 + $0xa8] sm:$0xf]  ;;  %v6559_v57 = vpop.permute.xlu1 %1303 }
  0xfe   : > { %v447_v23 = vmax.f32 %v6513_v60, 0.0  ;;  %v3379_v55 = vor.u32 %v3377_v54, %v3376_v14  ;;  %v3381_v26 = vrot.slane %v3376_v14, 4  ;;  %v5419_v61 = vpack.c.bf16 %v446_v20, %v446_v20  ;;  %v5682_v20 = vld [vmem:[#allocation2 + $0xa4] sm:$0xff]   ;;  %v1392_v5 = vld [vmem:[#allocation2 + $0xac] sm:$0x1]  ;;  %v4382_v46 = vld [vmem:[#allocation3 + $0x18] sm:$0xff] }
  0xff   : > { %v2880_v7 = vrot.slane %v2879_v13, 4  ;;  %2374 = vrot.lane.b32.xlu1 %v5239_v31, %s5738_s9  ;;  %v2875_v51 = vsel %vm5860_vm6, %v2870_v35, %v2874_v41  ;;  %v3388_v18 = vor.u32 %v3386_v16, %v3385_v53  ;;  %v4075_v52 = vshrl.u32 %v3858_v22, 16  ;;  %v6557_v54 = vld [vmem:[#allocation2 + $0xbc] sm:$0x1] }
 0x100   : > { %v5420_v21 = vpack.c.bf16 %v447_v23, %v447_v23  ;;  %v3380_v19 = vsel %vm5964_vm8, %v6490_v8, %v3379_v55  ;;  %688 = vst.msk [vmem:[#allocation2 + $0xb4] sm:$0xf] %vm474_vm0, %v5419_v61  ;;  %v4078_v45 = vshll.u32 %v3858_v22, 16  ;;  %v4084_v11 = vshll.u32 %v3859_v32, 16 }
 0x101   : > { %v2885_v60 = vsel %vm5860_vm6, %v2880_v7, %v2884_v34  ;;  %v3389_v9 = vsel %vm5964_vm8, %v3381_v26, %v3388_v18  ;;  %v4077_v37 = vrot.slane %v4075_v52, 4  ;;  %v4088_v48 = vshrl.u32 %v3859_v32, 16 }
 0x102   : > { %v5271_v44 = vcombine.low %v2875_v51, %v2885_v60  ;;  %689 = vst.msk [vmem:[#allocation2 + $0xb8] sm:$0xf] %vm474_vm0, %v5420_v21  ;;  %v5302_v3 = vcombine.low %v3380_v19, %v3389_v9  ;;  %v4080_v8 = vrot.slane %v4078_v45, 5  ;;  %v4086_v33 = vrot.slane %v4084_v11, 5  ;;  %v6574_v21 = vpop.permute.xlu0 %2364 }
 0x103   : > { %v4094_v50 = vshll.u32 %v3860_v29, 16  ;;  %2551 = vrot.lane.b32.xlu1 %v5678_v25, %s5736_s7  ;;  %v4090_v41 = vrot.slane %v4088_v48, 4  ;;  %v4118_v4 = vshll.u32 %v3863_v38, 16  ;;  %v1652_v1 = vshrl.u32 %v1390_v24, 16  ;;  %5578 = vmatmul.mubr.msk.bf16.gmra.mrb[4].mxu0 %vm4431_vm5, %v4382_v46 }
 0x104   : > { %v1655_v59 = vshll.u32 %v1390_v24, 16  ;;  %3608 = vrot.lane.b32.xlu0 %v5302_v3, %s5739_s10  ;;  %v4081_v34 = vor.u32 %v4080_v8, %v4077_v37  ;;  %v1661_v27 = vshll.u32 %v1391_v63, 16  ;;  %v1665_v15 = vshrl.u32 %v1391_v63, 16 }
 0x105   : > { %v4096_v42 = vrot.slane %v4094_v50, 5  ;;  %v4091_v13 = vor.u32 %v4090_v41, %v4086_v33  ;;  %v6561_v14 = vrot.slane %v4118_v4, 5  ;;  %v1654_v16 = vrot.slane %v1652_v1, 4 }
 0x106   : > { %v1657_v22 = vrot.slane %v1655_v59, 5  ;;  %v4082_v32 = vrot.slane %v4081_v34, 4  ;;  %v1663_v31 = vrot.slane %v1661_v27, 5  ;;  %v1667_v35 = vrot.slane %v1665_v15, 4  ;;  %v6590_v15 = vpop.permute.xlu0 %2541 }
 0x107   : > { %v1671_v53 = vshll.u32 %v1392_v5, 16  ;;  %3096 = vrot.lane.b32.xlu1 %v5271_v44, %s5740_s11  ;;  %v3172_v23 = vld [vmem:[#allocation2 + $0xb4] sm:$0xf]  ;;  %v4092_v7 = vrot.slane %v4091_v13, 4  ;;  %v1695_v26 = vshll.u32 %v6557_v54, 16  ;;  %v6568_v61 = vmul.f32 %v6425_v43, %v5510_v47  ;;  %v6582_v44 = vpop.permute.xlu1 %1305 }
 0x108   : > { %v1658_v55 = vor.u32 %v1657_v22, %v1654_v16  ;;  %v3396_v58 = vshrl.u32 %v3172_v23, 16  ;;  %v3399_v25 = vshll.u32 %v3172_v23, 16  ;;  %3785 = vrot.lane.b32.xlu0 %v5682_v20, %s5737_s8  ;;  %v4087_v51 = vsel %vm5860_vm6, %v4082_v32, %v4086_v33  ;;  %v3861_v47 = vld [vmem:[#allocation2 + $0xb4] sm:$0xf] }
 0x109   : > { %v3173_v10 = vld [vmem:[#allocation2 + $0xb8] sm:$0xf]  ;;  %v1668_v18 = vor.u32 %v1667_v35, %v1663_v31  ;;  %v4097_v12 = vsel %vm5860_vm6, %v4092_v7, %v4096_v42  ;;  %v6580_v60 = vadd.f32 %v6434_v28, %v6528_v62  ;;  %v4099_v38 = vshrl.u32 %v3861_v47, 16  ;;  %v1393_v5 = vld [vmem:[#allocation2 + $0xb4] sm:$0xf] }
 0x10a   : > { %v3405_v29 = vshrl.u32 %v3173_v10, 16  ;;  %v3408_v52 = vshll.u32 %v3173_v10, 16  ;;  %v3398_v19 = vrot.slane %v3396_v58, 7  ;;  %v5334_v45 = vcombine.low %v4087_v51, %v4097_v12  ;;  %v3862_v11 = vld [vmem:[#allocation2 + $0xb8] sm:$0xf] }
 0x10b   : > { %v4102_v24 = vshll.u32 %v3861_v47, 16  ;;  %v4108_v37 = vshll.u32 %v3862_v11, 16  ;;  %v4112_v48 = vshrl.u32 %v3862_v11, 16  ;;  %v1659_v63 = vrot.slane %v1658_v55, 4  ;;  %v1394_v1 = vld [vmem:[#allocation2 + $0xb8] sm:$0xf]  ;;  %v6596_v7 = vpop.permute.xlu1 %1853 }
 0x10c   : > { %v3407_v9 = vrot.slane %v3405_v29, 7  ;;  %v3401_v3 = vor.u32 %v3399_v25, %v3398_v19  ;;  %v3403_v20 = vrot.slane %v3398_v19, 4  ;;  %4330 = vrot.lane.b32.xlu0 %v5334_v45, %s5741_s12  ;;  %v4101_v8 = vrot.slane %v4099_v38, 4  ;;  %v1939_v23 = vld [vmem:[#allocation2 + $0xb4] sm:$0xf] }
 0x10d   : > { %v4104_v33 = vrot.slane %v4102_v24, 5  ;;  %v4110_v62 = vrot.slane %v4108_v37, 5  ;;  %v4114_v41 = vrot.slane %v4112_v48, 4  ;;  %v1664_v4 = vsel %vm5860_vm6, %v1659_v63, %v1663_v31  ;;  %v1940_v58 = vld [vmem:[#allocation2 + $0xb8] sm:$0xf]  ;;  %v6606_v48 = vpop.permute.xlu0 %3086 }
 0x10e   : > { %v3410_v50 = vor.u32 %v3408_v52, %v3407_v9  ;;  %v3402_v59 = vsel %vm5964_vm8, %v6499_v2, %v3401_v3  ;;  %v1669_v42 = vrot.slane %v1668_v18, 4  ;;  %v1673_v27 = vrot.slane %v1671_v53, 5  ;;  %v5683_v25 = vld [vmem:[#allocation2 + $0xb4] sm:$0xff]   ;;  %v1941_v11 = vld [vmem:[#allocation2 + $0xc0] sm:$0x8] }
 0x10f   : > { %v4105_v34 = vor.u32 %v4104_v33, %v4101_v8  ;;  %v4115_v46 = vor.u32 %v4114_v41, %v4110_v62  ;;  %v1676_v13 = vshrl.u32 %v1393_v5, 16  ;;  %v1679_v16 = vshll.u32 %v1393_v5, 16  ;;  %v713_v8 = vld [vmem:[#allocation2 + $0x44] sm:$0xf]  ;;  %v6613_v41 = vpop.permute.xlu1 %2366 }
 0x110   : > { %v3411_v54 = vsel %vm5964_vm8, %v3403_v20, %v3410_v50  ;;  %v1674_v31 = vsel %vm5860_vm6, %v1669_v42, %v1673_v27  ;;  %v1685_v35 = vshll.u32 %v1394_v1, 16  ;;  %v1689_v29 = vshrl.u32 %v1394_v1, 16 }
 0x111   : > { %v5303_v22 = vcombine.low %v3402_v59, %v3411_v54  ;;  %v4106_v32 = vrot.slane %v4105_v34, 4  ;;  %v4116_v2 = vrot.slane %v4115_v46, 4  ;;  %v5208_v55 = vcombine.low %v1664_v4, %v1674_v31  ;;  %v714_v59 = vld [vmem:[#allocation2 + $0x48] sm:$0xf] }
 0x112   : > { %v1678_v53 = vrot.slane %v1676_v13, 4  ;;  %v1681_v10 = vrot.slane %v1679_v16, 5  ;;  %v1687_v18 = vrot.slane %v1685_v35, 5  ;;  %v1697_v52 = vrot.slane %v1695_v26, 5 }
 0x113   : > { %3610 = vrot.lane.b32.xlu1 %v5303_v22, %s5739_s10  ;;  %v4111_v51 = vsel %vm5860_vm6, %v4106_v32, %v4110_v62  ;;  %v4121_v12 = vsel %vm5860_vm6, %v4116_v2, %v6561_v14  ;;  %v5224_v19 = vrot.slane %v2177_v36, 11  ;;  %v2182_v45 = vshrl.u32 %v1939_v23, 16  ;;  %v5685_v14 = vld [vmem:[#allocation2 + $0xa4] sm:$0xff]   ;;  %v712_v62 = vld [vmem:[#allocation2 + $0x40] sm:$0x8]  ;;  %v5686_v32 = vld [vmem:[#allocation2 + $0xb4] sm:$0xff]  }
 0x114   : > { %v1682_v47 = vor.u32 %v1681_v10, %v1678_v53  ;;  %v5335_v38 = vcombine.low %v4111_v51, %v4121_v12  ;;  %v1691_v24 = vrot.slane %v1689_v29, 4  ;;  %v2185_v9 = vshll.u32 %v1939_v23, 16  ;;  %v2628_v22 = vld [vmem:[#allocation2 + $0xb4] sm:$0xf]  ;;  %v2629_v53 = vld [vmem:[#allocation2 + $0xb8] sm:$0xf]  ;;  %v6628_v10 = vpop.permute.xlu0 %3600 }
 0x115   : > { %v2191_v37 = vshrl.u32 %v1940_v58, 16  ;;  %v2184_v3 = vrot.slane %v2182_v45, 7  ;;  %v2194_v20 = vshll.u32 %v1940_v58, 16  ;;  %v417_v26 = vadd.f32 %v6434_v28, %v6568_v61  ;;  %v6631_v45 = vpop.permute.xlu1 %2543 }
 0x116   : > { %v1683_v63 = vrot.slane %v1682_v47, 4  ;;  %4332 = vrot.lane.b32.xlu0 %v5335_v38, %s5741_s12  ;;  %v1692_v49 = vor.u32 %v1691_v24, %v1687_v18  ;;  %v448_v33 = vmax.f32 %v6580_v60, 0.0  ;;  %v2199_v50 = vshrl.u32 %v1941_v11, 16 }
 0x117   : > { %3787 = vrot.lane.b32.xlu1 %v5683_v25, %s5737_s8  ;;  %v2193_v36 = vrot.slane %v2191_v37, 7  ;;  %v2187_v5 = vor.u32 %v2185_v9, %v2184_v3  ;;  %v2189_v1 = vrot.slane %v2184_v3, 4  ;;  %v449_v61 = vmax.f32 %v417_v26, 0.0  ;;  %v715_v37 = vld [vmem:[#allocation2 + $0x50] sm:$0x8] }
 0x118   : > { %v1688_v4 = vsel %vm5860_vm6, %v1683_v63, %v1687_v18  ;;  %v1693_v34 = vrot.slane %v1692_v49, 4  ;;  %v5421_v27 = vpack.c.bf16 %v448_v33, %v448_v33  ;;  %v6617_v54 = vrot.slane %v2199_v50, 11  ;;  %v5687_v63 = vld [vmem:[#allocation2 + $0xb4] sm:$0xff]   ;;  %v6640_v50 = vld [vmem:[%s5838_s25 + $0x68] sm:$0xff]  }
 0x119   : > { %v2196_v42 = vor.u32 %v2194_v20, %v2193_v36  ;;  %v2188_v46 = vsel %vm5964_vm8, %v5224_v19, %v2187_v5  ;;  %v5422_v60 = vpack.c.bf16 %v449_v61, %v449_v61  ;;  %v839_v13 = vshrl.u32 %v712_v62, 16  ;;  %v532_v19 = vld [vmem:[#allocation2 + $0xcc] sm:$0x1]  ;;  %v6644_v61 = vpop.permute.xlu0 %3777 }
 0x11a   : > { %v844_v16 = vshrl.u32 %v713_v8, 16  ;;  %1863 = vrot.lane.b32.xlu0 %v5208_v55, %s5735_s6  ;;  %v1698_v31 = vsel %vm5860_vm6, %v1693_v34, %v1697_v52  ;;  %690 = vst.msk [vmem:[#allocation2 + $0xc4] sm:$0xf] %vm474_vm0, %v5421_v27  ;;  %v847_v23 = vshll.u32 %v713_v8, 16  ;;  %v853_v2 = vshrl.u32 %v714_v59, 16 }
 0x11b   : > { %1315 = vrot.lane.b32.xlu1 %v5685_v14, %s5734_s28  ;;  %v2197_v35 = vsel %vm5964_vm8, %v2189_v1, %v2196_v42  ;;  %v5209_v58 = vcombine.low %v1688_v4, %v1698_v31  ;;  %691 = vst.msk [vmem:[#allocation2 + $0xc8] sm:$0xf] %vm474_vm0, %v5422_v60  ;;  %v5154_v51 = vrot.slane %v839_v13, 11  ;;  %v2630_v55 = vld [vmem:[#allocation2 + $0xbc] sm:$0x1]  ;;  %v856_v12 = vshll.u32 %v714_v59, 16 }
 0x11c   : > { %v5240_v25 = vcombine.low %v2188_v46, %v2197_v35  ;;  %v846_v18 = vrot.slane %v844_v16, 7  ;;  %v855_v29 = vrot.slane %v853_v2, 7  ;;  %v2887_v52 = vshrl.u32 %v2628_v22, 16 }
 0x11d   : > { %v2890_v47 = vshll.u32 %v2628_v22, 16  ;;  %v2896_v24 = vshll.u32 %v2629_v53, 16  ;;  %v2900_v9 = vshrl.u32 %v2629_v53, 16  ;;  %v2906_v8 = vshll.u32 %v2630_v55, 16 }
 0x11e   : > { %v849_v11 = vor.u32 %v847_v23, %v846_v18  ;;  %v851_v38 = vrot.slane %v846_v18, 4  ;;  %2376 = vrot.lane.b32.xlu0 %v5240_v25, %s5738_s9  ;;  %v858_v3 = vor.u32 %v856_v12, %v855_v29  ;;  %v2889_v20 = vrot.slane %v2887_v52, 4  ;;  %v716_v12 = vld [vmem:[#allocation2 + $0x54] sm:$0xf]  ;;  %v717_v52 = vld [vmem:[#allocation2 + $0x58] sm:$0xf] }
 0x11f   : > { %1317 = vrot.lane.b32.xlu1 %v5686_v32, %s5734_s28  ;;  %v2892_v26 = vrot.slane %v2890_v47, 5  ;;  %v2898_v49 = vrot.slane %v2896_v24, 5  ;;  %v2902_v36 = vrot.slane %v2900_v9, 4  ;;  %v533_v33 = vsel %vm5794_vm3, 0, %v532_v19  ;;  %v6658_v32 = vpop.permute.xlu1 %3088 }
 0x120   : > { %v850_v14 = vsel %vm5964_vm8, %v5154_v51, %v849_v11  ;;  %v859_v62 = vsel %vm5964_vm8, %v851_v38, %v858_v3  ;;  %v2908_v5 = vrot.slane %v2906_v8, 5  ;;  %534 = vst [vmem:[#allocation2 + $0xcc] sm:$0x1] %v533_v33  ;;  %v861_v1 = vshrl.u32 %v715_v37, 16  ;;  %v4323_v38 = vpop.permute.xlu0 %4322 }
 0x121   : > { %v2893_v4 = vor.u32 %v2892_v26, %v2889_v20  ;;  %v1942_v59 = vld [vmem:[#allocation2 + $0xc4] sm:$0xf]  ;;  %v5170_v34 = vcombine.low %v850_v14, %v859_v62  ;;  %v2903_v42 = vor.u32 %v2902_v36, %v2898_v49  ;;  %v6649_v46 = vmul.f32 %v6425_v43, %v5513_v40  ;;  %v3174_v14 = vld [vmem:[#allocation2 + $0xc0] sm:$0x8] }
 0x122   : > { %v2631_v27 = vld [vmem:[#allocation2 + $0xc4] sm:$0xf]  ;;  %v6654_v60 = vmul.f32 %v6425_v43, %v5514_v56  ;;  %v1943_v13 = vld [vmem:[#allocation2 + $0xc8] sm:$0xf]  ;;  %v2204_v16 = vshrl.u32 %v1942_v59, 16  ;;  %v2207_v22 = vshll.u32 %v1942_v59, 16  ;;  %2553 = vrot.lane.b32.xlu0 %v5687_v63, %s5736_s7  ;;  %v5517_v31 = vunpack.c.l.bf16 %v6640_v50 }
 0x123   : > { %1865 = vrot.lane.b32.xlu1 %v5209_v58, %s5735_s6  ;;  %v5518_v35 = vunpack.c.h.bf16 %v6640_v50  ;;  %v2213_v40 = vshrl.u32 %v1943_v13, 16  ;;  %v2216_v23 = vshll.u32 %v1943_v13, 16  ;;  %1171 = vst.msk [vmem:[#allocation3 + $0x20] sm:$0xff] %vm1166_vm9, %v5170_v34  ;;  %v2894_v17 = vrot.slane %v2893_v4, 4  ;;  %v2632_v2 = vld [vmem:[#allocation2 + $0xc8] sm:$0xf] }
 0x124   : > { %v2904_v43 = vrot.slane %v2903_v42, 4  ;;  %v2206_v56 = vrot.slane %v2204_v16, 7  ;;  %1348 = vst.msk [vmem:[#allocation3 + $0x20] sm:$0xff] %vm1343_vm10, %v6559_v57  ;;  %v2911_v53 = vshrl.u32 %v2631_v27, 16  ;;  %v2914_v58 = vshll.u32 %v2631_v27, 16  ;;  %v5688_v13 = vld [vmem:[#allocation2 + $0xc4] sm:$0xff]  }
 0x125   : > { %v6665_v25 = vrot.slane %v861_v1, 11  ;;  %v2215_v51 = vrot.slane %v2213_v40, 7  ;;  %v2899_v18 = vsel %vm5860_vm6, %v2894_v17, %v2898_v49  ;;  %v2920_v29 = vshll.u32 %v2632_v2, 16  ;;  %1896 = vst.msk [vmem:[#allocation3 + $0x20] sm:$0xff] %vm1891_vm11, %v6553_v30  ;;  %v3175_v62 = vld [vmem:[#allocation2 + $0xc4] sm:$0xf] }
 0x126   : > { %v2909_v55 = vsel %vm5860_vm6, %v2904_v43, %v2908_v5  ;;  %v2209_v47 = vor.u32 %v2207_v22, %v2206_v56  ;;  %v2211_v57 = vrot.slane %v2206_v56, 4  ;;  %v2913_v11 = vrot.slane %v2911_v53, 4  ;;  %2409 = vst.msk [vmem:[#allocation3 + $0x20] sm:$0xff] %vm2404_vm12, %v6574_v21  ;;  %v6683_v21 = vpop.permute.xlu1 %3602  ;;  %v3176_v4 = vld [vmem:[#allocation2 + $0xc8] sm:$0xf] }
 0x127   : > { %v5272_v19 = vcombine.low %v2899_v18, %v2909_v55  ;;  %v2218_v24 = vor.u32 %v2216_v23, %v2215_v51  ;;  %v2633_v9 = vld [vmem:[#allocation2 + $0xcc] sm:$0x1]  ;;  %v2916_v37 = vrot.slane %v2914_v58, 5  ;;  %v2922_v63 = vrot.slane %v2920_v29, 5  ;;  %2586 = vst.msk [vmem:[#allocation3 + $0x20] sm:$0xff] %vm2581_vm13, %v6590_v15  ;;  %v6693_v23 = vpop.permute.xlu0 %4324 }
 0x128   : > { %v2924_v3 = vshrl.u32 %v2632_v2, 16  ;;  %v2210_v30 = vsel %vm5964_vm8, %v6617_v54, %v2209_v47  ;;  %v2930_v20 = vshll.u32 %v2633_v9, 16  ;;  %v866_v26 = vshrl.u32 %v716_v12, 16  ;;  %3131 = vst.msk [vmem:[#allocation3 + $0x20] sm:$0xff] %vm3126_vm14, %v6606_v48  ;;  %v3177_v18 = vld [vmem:[#allocation2 + $0xd0] sm:$0x8] }
 0x129   : > { %3098 = vrot.lane.b32.xlu0 %v5272_v19, %s5740_s11  ;;  %v869_v8 = vshll.u32 %v716_v12, 16  ;;  %v2219_v49 = vsel %vm5964_vm8, %v2211_v57, %v2218_v24  ;;  %v2917_v36 = vor.u32 %v2916_v37, %v2913_v11  ;;  %v875_v33 = vshrl.u32 %v717_v52, 16  ;;  %3645 = vst.msk [vmem:[#allocation3 + $0x20] sm:$0xff] %vm3640_vm15, %v6628_v10  ;;  %v3864_v57 = vld [vmem:[#allocation2 + $0xc4] sm:$0xf] }
 0x12a   : > { %v2926_v15 = vrot.slane %v2924_v3, 4  ;;  %v5241_v54 = vcombine.low %v2210_v30, %v2219_v49  ;;  %v2932_v5 = vrot.slane %v2930_v20, 5  ;;  %v868_v1 = vrot.slane %v866_v26, 7  ;;  %3822 = vst.msk [vmem:[#allocation3 + $0x20] sm:$0xff] %vm3817_vm2, %v6644_v61  ;;  %v6700_v55 = vpop.permute.xlu1 %3779  ;;  %v535_v9 = vld [vmem:[#allocation2 + $0xdc] sm:$0x1] }
 0x12b   : > { %v878_v59 = vshll.u32 %v717_v52, 16  ;;  %v2918_v48 = vrot.slane %v2917_v36, 4  ;;  %v877_v42 = vrot.slane %v875_v33, 7  ;;  %v3413_v27 = vshrl.u32 %v3174_v14, 16  ;;  %4367 = vst.msk [vmem:[#allocation3 + $0x20] sm:$0xff] %vm4362_vm4, %v4323_v38  ;;  %v6714_v14 = vpop.permute.xlu0 %1855 }
 0x12c   : > { %v2927_v34 = vor.u32 %v2926_v15, %v2922_v63  ;;  %2378 = vrot.lane.b32.xlu1 %v5241_v54, %s5738_s9  ;;  %v871_v16 = vor.u32 %v869_v8, %v868_v1  ;;  %v873_v22 = vrot.slane %v868_v1, 4  ;;  %v3418_v40 = vshrl.u32 %v3175_v62, 16  ;;  %v3866_v20 = vld [vmem:[#allocation2 + $0xcc] sm:$0x1]  ;;  %v1396_v8 = vld [vmem:[#allocation2 + $0xc4] sm:$0xf] }
 0x12d   : > { %v3421_v10 = vshll.u32 %v3175_v62, 16  ;;  %v2923_v17 = vsel %vm5860_vm6, %v2918_v48, %v2922_v63  ;;  %v880_v61 = vor.u32 %v878_v59, %v877_v42  ;;  %v5288_v56 = vrot.slane %v3413_v27, 11  ;;  %v1397_v59 = vld [vmem:[#allocation2 + $0xc8] sm:$0xf]  ;;  %v1398_v42 = vld [vmem:[#allocation2 + $0xcc] sm:$0x1] }
 0x12e   : > { %v2928_v43 = vrot.slane %v2927_v34, 4  ;;  %v872_v2 = vsel %vm5964_vm8, %v6665_v25, %v871_v16  ;;  %v3420_v53 = vrot.slane %v3418_v40, 7  ;;  %v3427_v58 = vshrl.u32 %v3176_v4, 16  ;;  %v3865_v25 = vld [vmem:[#allocation2 + $0xc8] sm:$0xf]  ;;  %v6726_v48 = vpop.permute.xlu1 %1307 }
 0x12f   : > { %v3430_v51 = vshll.u32 %v3176_v4, 16  ;;  %v881_v12 = vsel %vm5964_vm8, %v873_v22, %v880_v61  ;;  %v418_v52 = vadd.f32 %v6434_v28, %v6649_v46  ;;  %v419_v47 = vadd.f32 %v6434_v28, %v6654_v60 }
 0x130   : > { %v2933_v29 = vsel %vm5860_vm6, %v2928_v43, %v2932_v5  ;;  %2555 = vrot.lane.b32.xlu1 %v5688_v13, %s5736_s7  ;;  %v5171_v11 = vcombine.low %v872_v2, %v881_v12  ;;  %v3423_v38 = vor.u32 %v3421_v10, %v3420_v53  ;;  %v3425_v24 = vrot.slane %v3420_v53, 4  ;;  %v1944_v10 = vld [vmem:[#allocation2 + $0xd0] sm:$0x8]  ;;  %v6751_v12 = vld [vmem:[%s7400_s0] ss:$0 sm:$0xff] }
 0x131   : > { %v5273_v19 = vcombine.low %v2923_v17, %v2933_v29  ;;  %v3429_v37 = vrot.slane %v3427_v58, 7  ;;  %v450_v63 = vmax.f32 %v418_v52, 0.0  ;;  %v451_v3 = vmax.f32 %v419_v47, 0.0  ;;  %v6759_v47 = vld [vmem:[%s5838_s25 + $0x70] sm:$0xff]  }
 0x132   : > { %v3435_v30 = vshrl.u32 %v3177_v18, 16  ;;  %1172 = vst.msk [vmem:[#allocation3 + $0x28] sm:$0xff] %vm1166_vm9, %v5171_v11  ;;  %v3424_v46 = vsel %vm5964_vm8, %v5288_v56, %v3423_v38  ;;  %v4123_v28 = vshrl.u32 %v3864_v57, 16  ;;  %v4126_v60 = vshll.u32 %v3864_v57, 16  ;;  %v4383_v49 = vld [vmem:[#allocation3 + $0x20] sm:$0xff]  ;;  %v6771_v38 = vpop.permute.xlu1 %1309 }
 0x133   : > { %v4132_v26 = vshll.u32 %v3865_v25, 16  ;;  %1349 = vst.msk [vmem:[#allocation3 + $0x28] sm:$0xff] %vm1343_vm10, %v6582_v44  ;;  %v3432_v36 = vor.u32 %v3430_v51, %v3429_v37  ;;  %v5423_v15 = vpack.c.bf16 %v450_v63, %v450_v63  ;;  %v5424_v33 = vpack.c.bf16 %v451_v3, %v451_v3  ;;  %5581 = vmatprep.mubr.msk.bf16.mxu0 %vm4431_vm5, %v4383_v49  ;;  %v5689_v56 = vld [vmem:[#allocation2 + $0xc4] sm:$0xff]   ;;  %v6744_v51 = vpop.permute.xlu0 %2368 }
 0x134   : > { %v6718_v62 = vrot.slane %v3435_v30, 11  ;;  %3100 = vrot.lane.b32.xlu1 %v5273_v19, %s5740_s11  ;;  %1897 = vst.msk [vmem:[#allocation3 + $0x28] sm:$0xff] %vm1891_vm11, %v6596_v7  ;;  %v4125_v4 = vrot.slane %v4123_v28, 4  ;;  %v4128_v54 = vrot.slane %v4126_v60, 5  ;;  %v4136_v1 = vshrl.u32 %v3865_v25, 16 }
 0x135   : > { %v6724_v5 = vrot.slane %v4132_v26, 5  ;;  %v3433_v44 = vsel %vm5964_vm8, %v3425_v24, %v3432_v36  ;;  %692 = vst.msk [vmem:[#allocation2 + $0xd4] sm:$0xf] %vm474_vm0, %v5423_v15  ;;  %693 = vst.msk [vmem:[#allocation2 + $0xd8] sm:$0xf] %vm474_vm0, %v5424_v33  ;;  %v4142_v34 = vshll.u32 %v3866_v20, 16  ;;  %v381_v52 = vmul.f32 %v6751_v12, %v5517_v31 }
 0x136   : > { %2410 = vst.msk [vmem:[#allocation3 + $0x28] sm:$0xff] %vm2404_vm12, %v6613_v41  ;;  %v536_v7 = vsel %vm5794_vm3, 0, %v535_v9  ;;  %v1700_v27 = vshrl.u32 %v1396_v8, 16  ;;  %v5304_v13 = vcombine.low %v3424_v46, %v3433_v44  ;;  %v4129_v16 = vor.u32 %v4128_v54, %v4125_v4  ;;  %v6782_v9 = vld [vmem:[%s7401_s1] ss:$0 sm:$0xff] }
 0x137   : > { %v4138_v22 = vrot.slane %v4136_v1, 4  ;;  %2587 = vst.msk [vmem:[#allocation3 + $0x28] sm:$0xff] %vm2581_vm13, %v6631_v45  ;;  %537 = vst [vmem:[#allocation2 + $0xdc] sm:$0x1] %v536_v7  ;;  %v1703_v40 = vshll.u32 %v1396_v8, 16  ;;  %v4144_v17 = vrot.slane %v4142_v34, 5  ;;  %v382_v24 = vmul.f32 %v6751_v12, %v5518_v35  ;;  %v6799_v4 = vpop.permute.xlu0 %2545 }
 0x138   : > { %3132 = vst.msk [vmem:[#allocation3 + $0x28] sm:$0xff] %vm3126_vm14, %v6658_v32  ;;  %v1702_v41 = vrot.slane %v1700_v27, 4  ;;  %v1709_v43 = vshll.u32 %v1397_v59, 16  ;;  %v1713_v61 = vshrl.u32 %v1397_v59, 16  ;;  %3612 = vrot.lane.b32.xlu0 %v5304_v13, %s5739_s10  ;;  %v4130_v2 = vrot.slane %v4129_v16, 4  ;;  %v6805_v13 = vpop.permute.xlu1 %1857 }
 0x139   : > { %v4139_v53 = vor.u32 %v4138_v22, %v6724_v5  ;;  %v1705_v58 = vrot.slane %v1703_v40, 5  ;;  %v1719_v45 = vshll.u32 %v1398_v42, 16  ;;  %3646 = vst.msk [vmem:[#allocation3 + $0x28] sm:$0xff] %vm3640_vm15, %v6683_v21  ;;  %v2221_v29 = vshrl.u32 %v1944_v10, 16  ;;  %v6762_v21 = vld [vmem:[%s5838_s25 + $0x78] sm:$0xff]  }
 0x13a   : > { %v6746_v18 = vrot.slane %v1709_v43, 5  ;;  %v1715_v32 = vrot.slane %v1713_v61, 4  ;;  %3823 = vst.msk [vmem:[#allocation3 + $0x28] sm:$0xff] %vm3817_vm2, %v6700_v55  ;;  %v4135_v57 = vsel %vm5860_vm6, %v4130_v2, %v6724_v5  ;;  %v6785_v37 = vadd.f32 %v6782_v9, %v381_v52 }
 0x13b   : > { %v4140_v25 = vrot.slane %v4139_v53, 4  ;;  %v1706_v19 = vor.u32 %v1705_v58, %v1702_v41  ;;  %v6767_v11 = vrot.slane %v1719_v45, 5  ;;  %4368 = vst.msk [vmem:[#allocation3 + $0x28] sm:$0xff] %vm4362_vm4, %v6693_v23  ;;  %v6774_v55 = vrot.slane %v2221_v29, 11 }
 0x13c   : > { %v1716_v31 = vor.u32 %v1715_v32, %v6746_v18  ;;  %v3178_v63 = vld [vmem:[#allocation2 + $0xd4] sm:$0xf]  ;;  %v3179_v23 = vld [vmem:[#allocation2 + $0xd8] sm:$0xf]  ;;  %3789 = vrot.lane.b32.xlu0 %v5689_v56, %s5737_s8  ;;  %v5521_v30 = vunpack.c.l.bf16 %v6759_v47  ;;  %v5522_v50 = vunpack.c.h.bf16 %v6759_v47  ;;  %v5525_v35 = vunpack.c.l.bf16 %v6762_v21 }
 0x13d   : > { %v4145_v3 = vsel %vm5860_vm6, %v4140_v25, %v4144_v17  ;;  %v3440_v20 = vshrl.u32 %v3178_v63, 16  ;;  %v3443_v46 = vshll.u32 %v3178_v63, 16  ;;  %v3449_v28 = vshrl.u32 %v3179_v23, 16  ;;  %v3867_v8 = vld [vmem:[#allocation2 + $0xd4] sm:$0xf] }
 0x13e   : > { %v3452_v60 = vshll.u32 %v3179_v23, 16  ;;  %v5336_v26 = vcombine.low %v4135_v57, %v4145_v3  ;;  %v3868_v49 = vld [vmem:[#allocation2 + $0xd8] sm:$0xf]  ;;  %v1707_v36 = vrot.slane %v1706_v19, 4  ;;  %v6794_v15 = vadd.f32 %v6782_v9, %v382_v24  ;;  %v3869_v1 = vld [vmem:[#allocation2 + $0xdc] sm:$0x1]  ;;  %v6812_v24 = vpop.permute.xlu0 %3090 }
 0x13f   : > { %v6797_v33 = vmul.f32 %v6751_v12, %v5521_v30  ;;  %v3442_v54 = vrot.slane %v3440_v20, 7  ;;  %v3451_v5 = vrot.slane %v3449_v28, 7  ;;  %v4147_v59 = vshrl.u32 %v3867_v8, 16  ;;  %v1399_v17 = vld [vmem:[#allocation2 + $0xd4] sm:$0xf] }
 0x140   : > { %v4150_v44 = vshll.u32 %v3867_v8, 16  ;;  %4334 = vrot.lane.b32.xlu0 %v5336_v26, %s5741_s12  ;;  %v4156_v34 = vshll.u32 %v3868_v49, 16  ;;  %v4160_v7 = vshrl.u32 %v3868_v49, 16  ;;  %v4166_v42 = vshll.u32 %v3869_v1, 16  ;;  %v1400_v2 = vld [vmem:[#allocation2 + $0xd8] sm:$0xf]  ;;  %v6818_v26 = vpop.permute.xlu1 %2370 }
 0x141   : > { %v1712_v27 = vsel %vm5860_vm6, %v1707_v36, %v6746_v18  ;;  %v3445_v16 = vor.u32 %v3443_v46, %v3442_v54  ;;  %v3447_v22 = vrot.slane %v3442_v54, 4  ;;  %v3454_v40 = vor.u32 %v3452_v60, %v3451_v5  ;;  %v1401_v18 = vld [vmem:[#allocation2 + $0xdc] sm:$0x1]  ;;  %v1945_v19 = vld [vmem:[#allocation2 + $0xd4] sm:$0xf] }
 0x142   : > { %v4149_v10 = vrot.slane %v4147_v59, 4  ;;  %v4152_v41 = vrot.slane %v4150_v44, 5  ;;  %v4158_v43 = vrot.slane %v4156_v34, 5  ;;  %v4162_v61 = vrot.slane %v4160_v7, 4  ;;  %v4384_v30 = vld [vmem:[#allocation3 + $0x28] sm:$0xff] }
 0x143   : > { %v4168_v56 = vrot.slane %v4166_v42, 5  ;;  %v3446_v53 = vsel %vm5964_vm8, %v6718_v62, %v3445_v16  ;;  %v3455_v58 = vsel %vm5964_vm8, %v3447_v22, %v3454_v40  ;;  %v1717_v45 = vrot.slane %v1716_v31, 4  ;;  %v5690_v31 = vld [vmem:[#allocation2 + $0xd4] sm:$0xff]   ;;  %5582 = vmatmul.mubr.msk.bf16.gmra.mrb[8].mxu0 %vm4431_vm5, %v4384_v30  ;;  %v1947_v16 = vld [vmem:[#allocation2 + $0xe0] sm:$0x8]  ;;  %v5691_v40 = vld [vmem:[#allocation2 + $0xc4] sm:$0xff]  }
 0x144   : > { %v1724_v32 = vshrl.u32 %v1399_v17, 16  ;;  %v5305_v29 = vcombine.low %v3446_v53, %v3455_v58  ;;  %v4153_v52 = vor.u32 %v4152_v41, %v4149_v10  ;;  %v4163_v57 = vor.u32 %v4162_v61, %v4158_v43  ;;  %v1946_v54 = vld [vmem:[#allocation2 + $0xd8] sm:$0xf]  ;;  %v718_v22 = vld [vmem:[#allocation2 + $0x60] sm:$0x8] }
 0x145   : > { %v1727_v25 = vshll.u32 %v1399_v17, 16  ;;  %v1722_v63 = vsel %vm5860_vm6, %v1717_v45, %v6767_v11  ;;  %v1733_v3 = vshll.u32 %v1400_v2, 16  ;;  %v1737_v62 = vshrl.u32 %v1400_v2, 16  ;;  %v719_v45 = vld [vmem:[#allocation2 + $0x64] sm:$0xf] }
 0x146   : > { %v1726_v23 = vrot.slane %v1724_v32, 4  ;;  %3614 = vrot.lane.b32.xlu1 %v5305_v29, %s5739_s10  ;;  %v4154_v20 = vrot.slane %v4153_v52, 4  ;;  %v4164_v46 = vrot.slane %v4163_v57, 4  ;;  %v5210_v28 = vcombine.low %v1712_v27, %v1722_v63  ;;  %v720_v57 = vld [vmem:[#allocation2 + $0x68] sm:$0xf] }
 0x147   : > { %v1729_v60 = vrot.slane %v1727_v25, 5  ;;  %v1735_v8 = vrot.slane %v1733_v3, 5  ;;  %v1739_v49 = vrot.slane %v1737_v62, 4  ;;  %v1743_v36 = vshll.u32 %v1401_v18, 16  ;;  %v6833_v25 = vpop.permute.xlu1 %2547  ;;  %v5692_v3 = vld [vmem:[#allocation2 + $0xd4] sm:$0xff]  }
 0x148   : > { %v2226_v11 = vshrl.u32 %v1945_v19, 16  ;;  %v4159_v5 = vsel %vm5860_vm6, %v4154_v20, %v4158_v43  ;;  %v4169_v1 = vsel %vm5860_vm6, %v4164_v46, %v4168_v56  ;;  %v2229_v44 = vshll.u32 %v1945_v19, 16  ;;  %v6827_v43 = vpop.permute.xlu0 %3604  ;;  %v2635_v46 = vld [vmem:[#allocation2 + $0xd8] sm:$0xf] }
 0x149   : > { %v1730_v59 = vor.u32 %v1729_v60, %v1726_v23  ;;  %v5337_v34 = vcombine.low %v4159_v5, %v4169_v1  ;;  %v1740_v7 = vor.u32 %v1739_v49, %v1735_v8  ;;  %v1745_v42 = vrot.slane %v1743_v36, 5  ;;  %v538_v36 = vld [vmem:[#allocation2 + $0xec] sm:$0x1]  ;;  %v2636_v5 = vld [vmem:[#allocation2 + $0xdc] sm:$0x1] }
 0x14a   : > { %v2228_v27 = vrot.slane %v2226_v11, 7  ;;  %3791 = vrot.lane.b32.xlu1 %v5690_v31, %s5737_s8  ;;  %v2235_v17 = vshrl.u32 %v1946_v54, 16  ;;  %v2238_v41 = vshll.u32 %v1946_v54, 16  ;;  %v452_v61 = vmax.f32 %v6785_v37, 0.0 }
 0x14b   : > { %v1731_v10 = vrot.slane %v1730_v59, 4  ;;  %4336 = vrot.lane.b32.xlu0 %v5337_v34, %s5741_s12  ;;  %v1741_v56 = vrot.slane %v1740_v7, 4  ;;  %v453_v58 = vmax.f32 %v6794_v15, 0.0  ;;  %v2243_v52 = vshrl.u32 %v1947_v16, 16  ;;  %v2634_v15 = vld [vmem:[#allocation2 + $0xd4] sm:$0xf] }
 0x14c   : > { %v2231_v2 = vor.u32 %v2229_v44, %v2228_v27  ;;  %v2233_v53 = vrot.slane %v2228_v27, 4  ;;  %v2237_v32 = vrot.slane %v2235_v17, 7  ;;  %v5425_v29 = vpack.c.bf16 %v452_v61, %v452_v61  ;;  %v6848_v44 = vpop.permute.xlu0 %3781  ;;  %v721_v27 = vld [vmem:[#allocation2 + $0x70] sm:$0x8]  ;;  %v6851_v17 = vld [vmem:[#allocation2 + $0x74] sm:$0xf] }
 0x14d   : > { %v1736_v18 = vsel %vm5860_vm6, %v1731_v10, %v1735_v8  ;;  %v1746_v37 = vsel %vm5860_vm6, %v1741_v56, %v1745_v42  ;;  %v5426_v63 = vpack.c.bf16 %v453_v58, %v453_v58  ;;  %v883_v23 = vshrl.u32 %v718_v22, 16  ;;  %v5693_v61 = vld [vmem:[#allocation2 + $0xd4] sm:$0xff]  }
 0x14e   : > { %v2232_v19 = vsel %vm5964_vm8, %v6774_v55, %v2231_v2  ;;  %1319 = vrot.lane.b32.xlu1 %v5691_v40, %s5734_s28  ;;  %v5211_v62 = vcombine.low %v1736_v18, %v1746_v37  ;;  %v2240_v30 = vor.u32 %v2238_v41, %v2237_v32  ;;  %694 = vst.msk [vmem:[#allocation2 + $0xe4] sm:$0xf] %vm474_vm0, %v5425_v29  ;;  %v6842_v31 = vrot.slane %v2243_v52, 11  ;;  %v6853_v41 = vpop.permute.xlu1 %3092 }
 0x14f   : > { %v888_v20 = vshrl.u32 %v719_v45, 16  ;;  %1867 = vrot.lane.b32.xlu0 %v5210_v28, %s5735_s6  ;;  %695 = vst.msk [vmem:[#allocation2 + $0xe8] sm:$0xf] %vm474_vm0, %v5426_v63  ;;  %v5156_v60 = vrot.slane %v883_v23, 11  ;;  %v891_v55 = vshll.u32 %v719_v45, 16  ;;  %v897_v8 = vshrl.u32 %v720_v57, 16 }
 0x150   : > { %v900_v49 = vshll.u32 %v720_v57, 16  ;;  %v2241_v54 = vsel %vm5964_vm8, %v2233_v53, %v2240_v30  ;;  %v2935_v1 = vshrl.u32 %v2634_v15, 16  ;;  %v2938_v59 = vshll.u32 %v2634_v15, 16 }
 0x151   : > { %v890_v11 = vrot.slane %v888_v20, 7  ;;  %v5242_v34 = vcombine.low %v2232_v19, %v2241_v54  ;;  %v899_v7 = vrot.slane %v897_v8, 7  ;;  %v2944_v42 = vshll.u32 %v2635_v46, 16 }
 0x152   : > { %v2948_v28 = vshrl.u32 %v2635_v46, 16  ;;  %1321 = vrot.lane.b32.xlu1 %v5692_v3, %s5734_s28  ;;  %v2937_v40 = vrot.slane %v2935_v1, 4  ;;  %v2940_v10 = vrot.slane %v2938_v59, 5  ;;  %v2954_v58 = vshll.u32 %v2636_v5, 16  ;;  %v6867_v46 = vpop.permute.xlu0 %4326  ;;  %v6880_v5 = vpop.permute.xlu1 %3606 }
 0x153   : > { %v893_v16 = vor.u32 %v891_v55, %v890_v11  ;;  %v895_v22 = vrot.slane %v890_v11, 4  ;;  %2380 = vrot.lane.b32.xlu0 %v5242_v34, %s5738_s9  ;;  %v902_v56 = vor.u32 %v900_v49, %v899_v7  ;;  %v2946_v2 = vrot.slane %v2944_v42, 5 }
 0x154   : > { %v2950_v53 = vrot.slane %v2948_v28, 4  ;;  %v2941_v18 = vor.u32 %v2940_v10, %v2937_v40  ;;  %v539_v32 = vsel %vm5794_vm3, 0, %v538_v36  ;;  %v905_v29 = vshrl.u32 %v721_v27, 16 }
 0x155   : > { %v894_v45 = vsel %vm5964_vm8, %v5156_v60, %v893_v16  ;;  %v1948_v52 = vld [vmem:[#allocation2 + $0xe4] sm:$0xf]  ;;  %v903_v57 = vsel %vm5964_vm8, %v895_v22, %v902_v56  ;;  %v2956_v19 = vrot.slane %v2954_v58, 5  ;;  %540 = vst [vmem:[#allocation2 + $0xec] sm:$0x1] %v539_v32  ;;  %v910_v63 = vshrl.u32 %v6851_v17, 16 }
 0x156   : > { %v2951_v37 = vor.u32 %v2950_v53, %v2946_v2  ;;  %1869 = vrot.lane.b32.xlu1 %v5211_v62, %s5735_s6  ;;  %v1949_v23 = vld [vmem:[#allocation2 + $0xe8] sm:$0xf]  ;;  %v2248_v15 = vshrl.u32 %v1948_v52, 16  ;;  %v2251_v3 = vshll.u32 %v1948_v52, 16  ;;  %v5172_v30 = vcombine.low %v894_v45, %v903_v57  ;;  %v2637_v62 = vld [vmem:[#allocation2 + $0xe4] sm:$0xf] }
 0x157   : > { %v384_v20 = vmul.f32 %v6751_v12, %v5522_v50  ;;  %v2257_v60 = vshrl.u32 %v1949_v23, 16  ;;  %v2260_v55 = vshll.u32 %v1949_v23, 16  ;;  %2557 = vrot.lane.b32.xlu0 %v5693_v61, %s5736_s7  ;;  %v2942_v8 = vrot.slane %v2941_v18, 4  ;;  %v2638_v54 = vld [vmem:[#allocation2 + $0xe8] sm:$0xf] }
 0x158   : > { %v2952_v49 = vrot.slane %v2951_v37, 4  ;;  %v2250_v36 = vrot.slane %v2248_v15, 7  ;;  %1173 = vst.msk [vmem:[#allocation3 + $0x30] sm:$0xff] %vm1166_vm9, %v5172_v30  ;;  %v6871_v11 = vrot.slane %v905_v29, 11  ;;  %v6875_v47 = vadd.f32 %v6782_v9, %v6797_v33  ;;  %v723_v16 = vld [vmem:[#allocation2 + $0x78] sm:$0xf] }
 0x159   : > { %v6878_v50 = vadd.f32 %v6782_v9, %v384_v20  ;;  %v2259_v1 = vrot.slane %v2257_v60, 7  ;;  %1350 = vst.msk [vmem:[#allocation3 + $0x30] sm:$0xff] %vm1343_vm10, %v6726_v48  ;;  %v2947_v59 = vsel %vm5860_vm6, %v2942_v8, %v2946_v2  ;;  %v2959_v7 = vshrl.u32 %v2637_v62, 16  ;;  %v3180_v48 = vld [vmem:[#allocation2 + $0xe0] sm:$0x8] }
 0x15a   : > { %v2957_v34 = vsel %vm5860_vm6, %v2952_v49, %v2956_v19  ;;  %v2253_v42 = vor.u32 %v2251_v3, %v2250_v36  ;;  %v2255_v28 = vrot.slane %v2250_v36, 4  ;;  %v2962_v27 = vshll.u32 %v2637_v62, 16  ;;  %1898 = vst.msk [vmem:[#allocation3 + $0x30] sm:$0xff] %vm1891_vm11, %v6714_v14  ;;  %v6899_v14 = vpop.permute.xlu0 %4328  ;;  %v3181_v52 = vld [vmem:[#allocation2 + $0xe4] sm:$0xf] }
 0x15b   : > { %v5274_v33 = vcombine.low %v2947_v59, %v2957_v34  ;;  %v2262_v22 = vor.u32 %v2260_v55, %v2259_v1  ;;  %v2961_v40 = vrot.slane %v2959_v7, 4  ;;  %v2968_v10 = vshll.u32 %v2638_v54, 16  ;;  %2411 = vst.msk [vmem:[#allocation3 + $0x30] sm:$0xff] %vm2404_vm12, %v6744_v51  ;;  %v3183_v59 = vld [vmem:[#allocation2 + $0xf0] sm:$0x8] }
 0x15c   : > { %v2972_v61 = vshrl.u32 %v2638_v54, 16  ;;  %v2254_v56 = vsel %vm5964_vm8, %v6842_v31, %v2253_v42  ;;  %v2639_v2 = vld [vmem:[#allocation2 + $0xec] sm:$0x1]  ;;  %v2964_v53 = vrot.slane %v2962_v27, 5  ;;  %v912_v58 = vrot.slane %v910_v63, 7  ;;  %2588 = vst.msk [vmem:[#allocation3 + $0x30] sm:$0xff] %vm2581_vm13, %v6799_v4  ;;  %v6907_v4 = vpop.permute.xlu1 %3783 }
 0x15d   : > { %3102 = vrot.lane.b32.xlu0 %v5274_v33, %s5740_s11  ;;  %v913_v45 = vshll.u32 %v6851_v17, 16  ;;  %v2263_v18 = vsel %vm5964_vm8, %v2255_v28, %v2262_v22  ;;  %v2970_v51 = vrot.slane %v2968_v10, 5  ;;  %v2978_v29 = vshll.u32 %v2639_v2, 16  ;;  %3133 = vst.msk [vmem:[#allocation3 + $0x30] sm:$0xff] %vm3126_vm14, %v6812_v24  ;;  %v3182_v17 = vld [vmem:[#allocation2 + $0xe8] sm:$0xf] }
 0x15e   : > { %v2974_v32 = vrot.slane %v2972_v61, 4  ;;  %v5243_v31 = vcombine.low %v2254_v56, %v2263_v18  ;;  %v2965_v57 = vor.u32 %v2964_v53, %v2961_v40  ;;  %v917_v19 = vrot.slane %v912_v58, 4  ;;  %3647 = vst.msk [vmem:[#allocation3 + $0x30] sm:$0xff] %vm3640_vm15, %v6827_v43  ;;  %v5694_v24 = vld [vmem:[#allocation2 + $0xe4] sm:$0xff]   ;;  %v6919_v34 = vpop.permute.xlu0 %1859  ;;  %v3872_v53 = vld [vmem:[#allocation2 + $0xec] sm:$0x1] }
 0x15f   : > { %v915_v37 = vor.u32 %v913_v45, %v912_v58  ;;  %v2980_v23 = vrot.slane %v2978_v29, 5  ;;  %v919_v15 = vshrl.u32 %v723_v16, 16  ;;  %v922_v3 = vshll.u32 %v723_v16, 16  ;;  %3824 = vst.msk [vmem:[#allocation3 + $0x30] sm:$0xff] %vm3817_vm2, %v6848_v44  ;;  %v3870_v28 = vld [vmem:[#allocation2 + $0xe4] sm:$0xf] }
 0x160   : > { %v2975_v63 = vor.u32 %v2974_v32, %v2970_v51  ;;  %2382 = vrot.lane.b32.xlu1 %v5243_v31, %s5738_s9  ;;  %v2966_v30 = vrot.slane %v2965_v57, 4  ;;  %v3457_v60 = vshrl.u32 %v3180_v48, 16  ;;  %v3462_v55 = vshrl.u32 %v3181_v52, 16  ;;  %4369 = vst.msk [vmem:[#allocation3 + $0x30] sm:$0xff] %vm4362_vm4, %v6867_v46  ;;  %v3871_v40 = vld [vmem:[#allocation2 + $0xe8] sm:$0xf]  ;;  %v6926_v10 = vpop.permute.xlu1 %1311 }
 0x161   : > { %v916_v20 = vsel %vm5964_vm8, %v6871_v11, %v915_v37  ;;  %v921_v8 = vrot.slane %v919_v15, 7  ;;  %v3465_v49 = vshll.u32 %v3181_v52, 16  ;;  %v3471_v36 = vshrl.u32 %v3182_v17, 16  ;;  %v1402_v32 = vld [vmem:[#allocation2 + $0xe4] sm:$0xf] }
 0x162   : > { %v2976_v43 = vrot.slane %v2975_v63, 4  ;;  %v2971_v44 = vsel %vm5860_vm6, %v2966_v30, %v2970_v51  ;;  %v5290_v62 = vrot.slane %v3457_v60, 11  ;;  %v3464_v54 = vrot.slane %v3462_v55, 7  ;;  %v541_v51 = vld [vmem:[#allocation2 + $0xfc] sm:$0x1] }
 0x163   : > { %v3474_v1 = vshll.u32 %v3182_v17, 16  ;;  %v924_v7 = vor.u32 %v922_v3, %v921_v8  ;;  %v3473_v42 = vrot.slane %v3471_v36, 7  ;;  %v454_v46 = vmax.f32 %v6875_v47, 0.0  ;;  %v1403_v57 = vld [vmem:[#allocation2 + $0xe8] sm:$0xf]  ;;  %v6941_v3 = vpop.permute.xlu0 %2372 }
 0x164   : > { %v2981_v11 = vsel %vm5860_vm6, %v2976_v43, %v2980_v23  ;;  %2559 = vrot.lane.b32.xlu1 %v5694_v24, %s5736_s7  ;;  %v3467_v27 = vor.u32 %v3465_v49, %v3464_v54  ;;  %v3469_v16 = vrot.slane %v3464_v54, 4  ;;  %v455_v22 = vmax.f32 %v6878_v50, 0.0  ;;  %v1404_v15 = vld [vmem:[#allocation2 + $0xec] sm:$0x1]  ;;  %v1950_v55 = vld [vmem:[#allocation2 + $0xf0] sm:$0x8] }
 0x165   : > { %v5275_v33 = vcombine.low %v2971_v44, %v2981_v11  ;;  %v925_v61 = vsel %vm5964_vm8, %v917_v19, %v924_v7  ;;  %v3476_v48 = vor.u32 %v3474_v1, %v3473_v42  ;;  %v5427_v56 = vpack.c.bf16 %v454_v46, %v454_v46  ;;  %v5695_v43 = vld [vmem:[#allocation2 + $0xe4] sm:$0xff]  }
 0x166   : > { %v3479_v2 = vshrl.u32 %v3183_v59, 16  ;;  %v5173_v58 = vcombine.low %v916_v20, %v925_v61  ;;  %v3468_v47 = vsel %vm5964_vm8, %v5290_v62, %v3467_v27  ;;  %v5428_v45 = vpack.c.bf16 %v455_v22, %v455_v22  ;;  %v6950_v62 = vpop.permute.xlu1 %1313 }
 0x167   : > { %v4171_v18 = vshrl.u32 %v3870_v28, 16  ;;  %v3477_v50 = vsel %vm5964_vm8, %v3469_v16, %v3476_v48  ;;  %696 = vst.msk [vmem:[#allocation2 + $0xf4] sm:$0xf] %vm474_vm0, %v5427_v56  ;;  %v4174_v52 = vshll.u32 %v3870_v28, 16  ;;  %v4180_v31 = vshll.u32 %v3871_v40, 16  ;;  %v4385_v37 = vld [vmem:[#allocation3 + $0x30] sm:$0xff] }
 0x168   : > { %v6935_v29 = vrot.slane %v3479_v2, 11  ;;  %3104 = vrot.lane.b32.xlu1 %v5275_v33, %s5740_s11  ;;  %1174 = vst.msk [vmem:[#allocation3 + $0x38] sm:$0xff] %vm1166_vm9, %v5173_v58  ;;  %v5306_v19 = vcombine.low %v3468_v47, %v3477_v50  ;;  %v4184_v63 = vshrl.u32 %v3871_v40, 16  ;;  %v4190_v23 = vshll.u32 %v3872_v53, 16  ;;  %5585 = vmatprep.mubr.msk.bf16.mxu0 %vm4431_vm5, %v4385_v37 }
 0x169   : > { %697 = vst.msk [vmem:[#allocation2 + $0xf8] sm:$0xf] %vm474_vm0, %v5428_v45  ;;  %v4173_v17 = vrot.slane %v4171_v18, 4  ;;  %v4176_v24 = vrot.slane %v4174_v52, 5  ;;  %v4182_v30 = vrot.slane %v4180_v31, 5  ;;  %v542_v20 = vsel %vm5794_vm3, 0, %v541_v51 }
 0x16a   : > { %1351 = vst.msk [vmem:[#allocation3 + $0x38] sm:$0xff] %vm1343_vm10, %v6771_v38  ;;  %v1748_v60 = vshrl.u32 %v1402_v32, 16  ;;  %3616 = vrot.lane.b32.xlu0 %v5306_v19, %s5739_s10  ;;  %v4186_v8 = vrot.slane %v4184_v63, 4  ;;  %v4192_v49 = vrot.slane %v4190_v23, 5  ;;  %543 = vst [vmem:[#allocation2 + $0xfc] sm:$0x1] %v542_v20  ;;  %v385_v40 = vmul.f32 %v6751_v12, %v5525_v35  ;;  %v6985_v45 = vpop.permute.xlu1 %1861 }
 0x16b   : > { %1899 = vst.msk [vmem:[#allocation3 + $0x38] sm:$0xff] %vm1891_vm11, %v6805_v13  ;;  %v1751_v36 = vshll.u32 %v1402_v32, 16  ;;  %v1757_v44 = vshll.u32 %v1403_v57, 16  ;;  %v4177_v38 = vor.u32 %v4176_v24, %v4173_v17  ;;  %v1761_v1 = vshrl.u32 %v1403_v57, 16 }
 0x16c   : > { %2412 = vst.msk [vmem:[#allocation3 + $0x38] sm:$0xff] %vm2404_vm12, %v6818_v26  ;;  %v1750_v54 = vrot.slane %v1748_v60, 4  ;;  %v1767_v59 = vshll.u32 %v1404_v15, 16  ;;  %v4187_v11 = vor.u32 %v4186_v8, %v4182_v30  ;;  %v2265_v42 = vshrl.u32 %v1950_v55, 16 }
 0x16d   : > { %2589 = vst.msk [vmem:[#allocation3 + $0x38] sm:$0xff] %vm2581_vm13, %v6833_v25  ;;  %v1753_v13 = vrot.slane %v1751_v36, 5  ;;  %v6956_v7 = vrot.slane %v1757_v44, 5  ;;  %v4178_v46 = vrot.slane %v4177_v38, 4  ;;  %v1763_v28 = vrot.slane %v1761_v1, 4 }
 0x16e   : > { %3134 = vst.msk [vmem:[#allocation3 + $0x38] sm:$0xff] %vm3126_vm14, %v6853_v41  ;;  %v6960_v33 = vrot.slane %v1767_v59, 5  ;;  %v5526_v26 = vunpack.c.h.bf16 %v6762_v21  ;;  %v3184_v27 = vld [vmem:[#allocation2 + $0xf4] sm:$0xf]  ;;  %3793 = vrot.lane.b32.xlu0 %v5695_v43, %s5737_s8  ;;  %v4188_v16 = vrot.slane %v4187_v11, 4  ;;  %v6966_v25 = vrot.slane %v2265_v42, 11  ;;  %v6971_v41 = vpop.permute.xlu0 %2549 }
 0x16f   : > { %v1754_v22 = vor.u32 %v1753_v13, %v1750_v54  ;;  %3648 = vst.msk [vmem:[#allocation3 + $0x38] sm:$0xff] %vm3640_vm15, %v6880_v5  ;;  %v3484_v48 = vshrl.u32 %v3184_v27, 16  ;;  %v3487_v56 = vshll.u32 %v3184_v27, 16  ;;  %v4183_v2 = vsel %vm5860_vm6, %v4178_v46, %v4182_v30  ;;  %v3873_v47 = vld [vmem:[#allocation2 + $0xf4] sm:$0xf] }
 0x170   : > { %v3185_v61 = vld [vmem:[#allocation2 + $0xf8] sm:$0xf]  ;;  %v1764_v53 = vor.u32 %v1763_v28, %v6956_v7  ;;  %3825 = vst.msk [vmem:[#allocation3 + $0x38] sm:$0xff] %vm3817_vm2, %v6907_v4  ;;  %v4193_v21 = vsel %vm5860_vm6, %v4188_v16, %v4192_v49  ;;  %v6981_v35 = vmul.f32 %v6751_v12, %v5526_v26  ;;  %v4195_v52 = vshrl.u32 %v3873_v47, 16  ;;  %v1405_v20 = vld [vmem:[#allocation2 + $0xf4] sm:$0xf] }
 0x171   : > { %v3493_v5 = vshrl.u32 %v3185_v61, 16  ;;  %v3496_v58 = vshll.u32 %v3185_v61, 16  ;;  %4370 = vst.msk [vmem:[#allocation3 + $0x38] sm:$0xff] %vm4362_vm4, %v6899_v14  ;;  %v3486_v18 = vrot.slane %v3484_v48, 7  ;;  %v5338_v51 = vcombine.low %v4183_v2, %v4193_v21  ;;  %v3874_v32 = vld [vmem:[#allocation2 + $0xf8] sm:$0xf]  ;;  %v6998_v11 = vpop.permute.xlu1 %2374 }
 0x172   : > { %v3875_v50 = vld [vmem:[#allocation2 + $0xfc] sm:$0x1]  ;;  %v6988_v4 = vadd.f32 %v6782_v9, %v385_v40  ;;  %v4198_v57 = vshll.u32 %v3873_v47, 16  ;;  %v4204_v37 = vshll.u32 %v3874_v32, 16  ;;  %v4208_v19 = vshrl.u32 %v3874_v32, 16  ;;  %v6991_v60 = vpop.permute.xlu0 %3094  ;;  %v5696_v27 = vld [vmem:[#allocation2 + $0xf4] sm:$0xff]  }
 0x173   : > { %v3495_v31 = vrot.slane %v3493_v5, 7  ;;  %v3489_v17 = vor.u32 %v3487_v56, %v3486_v18  ;;  %v3491_v12 = vrot.slane %v3486_v18, 4  ;;  %4338 = vrot.lane.b32.xlu0 %v5338_v51, %s5741_s12  ;;  %v4197_v63 = vrot.slane %v4195_v52, 4  ;;  %v1406_v54 = vld [vmem:[#allocation2 + $0xf8] sm:$0xf] }
 0x174   : > { %v4214_v14 = vshll.u32 %v3875_v50, 16  ;;  %v4200_v15 = vrot.slane %v4198_v57, 5  ;;  %v4206_v24 = vrot.slane %v4204_v37, 5  ;;  %v4210_v30 = vrot.slane %v4208_v19, 4  ;;  %v1407_v1 = vld [vmem:[#allocation2 + $0xfc] sm:$0x1] }
 0x175   : > { %v3498_v23 = vor.u32 %v3496_v58, %v3495_v31  ;;  %v3490_v55 = vsel %vm5964_vm8, %v6935_v29, %v3489_v17  ;;  %v1755_v8 = vrot.slane %v1754_v22, 4  ;;  %v1765_v49 = vrot.slane %v1764_v53, 4  ;;  %v1951_v28 = vld [vmem:[#allocation2 + $0xf4] sm:$0xf]  ;;  %v1952_v53 = vld [vmem:[#allocation2 + $0xf8] sm:$0xf]  ;;  %v7014_v17 = vpop.permute.xlu1 %2551 }
 0x176   : > { %v4216_v43 = vrot.slane %v4214_v14, 5  ;;  %v4201_v44 = vor.u32 %v4200_v15, %v4197_v63  ;;  %v4211_v38 = vor.u32 %v4210_v30, %v4206_v24  ;;  %v1772_v59 = vshrl.u32 %v1405_v20, 16  ;;  %v7012_v47 = vpop.permute.xlu0 %3608  ;;  %v1953_v19 = vld [vmem:[#allocation2 + $0x100] sm:$0x8] }
 0x177   : > { %v3499_v36 = vsel %vm5964_vm8, %v3491_v12, %v3498_v23  ;;  %v1760_v42 = vsel %vm5860_vm6, %v1755_v8, %v6956_v7  ;;  %v1770_v29 = vsel %vm5860_vm6, %v1765_v49, %v6960_v33  ;;  %v1775_v46 = vshll.u32 %v1405_v20, 16  ;;  %v5697_v12 = vld [vmem:[#allocation2 + $0xe4] sm:$0xff]  }
 0x178   : > { %v5307_v13 = vcombine.low %v3490_v55, %v3499_v36  ;;  %v4386_v26 = vld [vmem:[#allocation3 + $0x38] sm:$0xff]  ;;  %v4202_v16 = vrot.slane %v4201_v44, 4  ;;  %v4212_v22 = vrot.slane %v4211_v38, 4  ;;  %v5212_v40 = vcombine.low %v1760_v42, %v1770_v29  ;;  %v726_v38 = vld [vmem:[#allocation2 + $0x88] sm:$0xf] }
 0x179   : > { %v1774_v61 = vrot.slane %v1772_v59, 4  ;;  %5586 = vmatmul.mubr.msk.bf16.gmra.mrb[12].mxu0 %vm4431_vm5, %v4386_v26  ;;  %v1777_v48 = vrot.slane %v1775_v46, 5  ;;  %v1781_v56 = vshll.u32 %v1406_v54, 16  ;;  %v1785_v2 = vshrl.u32 %v1406_v54, 16 }
 0x17a   : > { %3618 = vrot.lane.b32.xlu1 %v5307_v13, %s5739_s10  ;;  %v1791_v7 = vshll.u32 %v1407_v1, 16  ;;  %v4207_v33 = vsel %vm5860_vm6, %v4202_v16, %v4206_v24  ;;  %v4217_v5 = vsel %vm5860_vm6, %v4212_v22, %v4216_v43  ;;  %v2270_v58 = vshrl.u32 %v1951_v28, 16  ;;  %v724_v24 = vld [vmem:[#allocation2 + $0x80] sm:$0x8]  ;;  %v725_v43 = vld [vmem:[#allocation2 + $0x84] sm:$0xf]  ;;  %v7026_v59 = vpop.permute.xlu0 %3785 }
 0x17b   : > { %v2273_v21 = vshll.u32 %v1951_v28, 16  ;;  %v5339_v18 = vcombine.low %v4207_v33, %v4217_v5  ;;  %v1778_v51 = vor.u32 %v1777_v48, %v1774_v61  ;;  %v1783_v32 = vrot.slane %v1781_v56, 5  ;;  %v5698_v13 = vld [vmem:[#allocation2 + $0xf4] sm:$0xff]   ;;  %v2642_v61 = vld [vmem:[#allocation2 + $0xfc] sm:$0x1]  ;;  %v7035_v48 = vpop.permute.xlu1 %3096 }
 0x17c   : > { %v1787_v50 = vrot.slane %v1785_v2, 4  ;;  %v1793_v52 = vrot.slane %v1791_v7, 5  ;;  %v2272_v31 = vrot.slane %v2270_v58, 7  ;;  %v2279_v57 = vshrl.u32 %v1952_v53, 16 }
 0x17d   : > { %v2282_v37 = vshll.u32 %v1952_v53, 16  ;;  %4340 = vrot.lane.b32.xlu0 %v5339_v18, %s5741_s12  ;;  %v1779_v63 = vrot.slane %v1778_v51, 4  ;;  %v425_v23 = vadd.f32 %v6782_v9, %v6981_v35  ;;  %v456_v15 = vmax.f32 %v6988_v4, 0.0  ;;  %v2640_v4 = vld [vmem:[#allocation2 + $0xf4] sm:$0xf] }
 0x17e   : > { %3795 = vrot.lane.b32.xlu1 %v5696_v27, %s5737_s8  ;;  %v1788_v14 = vor.u32 %v1787_v50, %v1783_v32  ;;  %v2275_v30 = vor.u32 %v2273_v21, %v2272_v31  ;;  %v2277_v20 = vrot.slane %v2272_v31, 4  ;;  %v2281_v55 = vrot.slane %v2279_v57, 7  ;;  %v544_v21 = vld [vmem:[#allocation2 + $0x10c] sm:$0x1]  ;;  %v5699_v18 = vld [vmem:[#allocation2 + $0xf4] sm:$0xff]  }
 0x17f   : > { %v1784_v8 = vsel %vm5860_vm6, %v1779_v63, %v1783_v32  ;;  %v457_v36 = vmax.f32 %v425_v23, 0.0  ;;  %v5429_v44 = vpack.c.bf16 %v456_v15, %v456_v15  ;;  %v2287_v9 = vshrl.u32 %v1953_v19, 16 }
 0x180   : > { %v1789_v49 = vrot.slane %v1788_v14, 4  ;;  %v2276_v54 = vsel %vm5964_vm8, %v6966_v25, %v2275_v30  ;;  %v2284_v1 = vor.u32 %v2282_v37, %v2281_v55  ;;  %v927_v35 = vshrl.u32 %v724_v24, 16  ;;  %v2641_v25 = vld [vmem:[#allocation2 + $0xf8] sm:$0xf]  ;;  %v727_v24 = vld [vmem:[#allocation2 + $0x90] sm:$0x8] }
 0x181   : > { %1871 = vrot.lane.b32.xlu0 %v5212_v40, %s5735_s6  ;;  %v5430_v29 = vpack.c.bf16 %v457_v36, %v457_v36  ;;  %698 = vst.msk [vmem:[#allocation2 + $0x104] sm:$0xf] %vm474_vm0, %v5429_v44  ;;  %v932_v46 = vshrl.u32 %v725_v43, 16  ;;  %v935_v28 = vshll.u32 %v725_v43, 16  ;;  %v941_v22 = vshrl.u32 %v726_v38, 16 }
 0x182   : > { %1323 = vrot.lane.b32.xlu1 %v5697_v12, %s5734_s28  ;;  %v1794_v42 = vsel %vm5860_vm6, %v1789_v49, %v1793_v52  ;;  %v2285_v27 = vsel %vm5964_vm8, %v2277_v20, %v2284_v1  ;;  %v5158_v16 = vrot.slane %v927_v35, 11  ;;  %v944_v2 = vshll.u32 %v726_v38, 16  ;;  %v7040_v12 = vpop.permute.xlu0 %4330 }
 0x183   : > { %v5213_v26 = vcombine.low %v1784_v8, %v1794_v42  ;;  %v5244_v56 = vcombine.low %v2276_v54, %v2285_v27  ;;  %699 = vst.msk [vmem:[#allocation2 + $0x108] sm:$0xf] %vm474_vm0, %v5430_v29  ;;  %v934_v40 = vrot.slane %v932_v46, 7  ;;  %v2983_v7 = vshrl.u32 %v2640_v4, 16 }
 0x184   : > { %v943_v53 = vrot.slane %v941_v22, 7  ;;  %v2986_v33 = vshll.u32 %v2640_v4, 16  ;;  %v2992_v5 = vshll.u32 %v2641_v25, 16  ;;  %v2996_v58 = vshrl.u32 %v2641_v25, 16 }
 0x185   : > { %2384 = vrot.lane.b32.xlu0 %v5244_v56, %s5738_s9  ;;  %v937_v51 = vor.u32 %v935_v28, %v934_v40  ;;  %v939_v32 = vrot.slane %v934_v40, 4  ;;  %v2985_v50 = vrot.slane %v2983_v7, 4  ;;  %v3002_v52 = vshll.u32 %v2642_v61, 16  ;;  %v7050_v49 = vpop.permute.xlu1 %3610 }
 0x186   : > { %1325 = vrot.lane.b32.xlu1 %v5698_v13, %s5734_s28  ;;  %v946_v31 = vor.u32 %v944_v2, %v943_v53  ;;  %v2988_v57 = vrot.slane %v2986_v33, 5  ;;  %v2994_v37 = vrot.slane %v2992_v5, 5  ;;  %v2998_v19 = vrot.slane %v2996_v58, 4  ;;  %v729_v5 = vld [vmem:[#allocation2 + $0x98] sm:$0xf] }
 0x187   : > { %v7042_v63 = vrot.slane %v2287_v9, 11  ;;  %v938_v14 = vsel %vm5964_vm8, %v5158_v16, %v937_v51  ;;  %v3004_v23 = vrot.slane %v3002_v52, 5  ;;  %v545_v15 = vsel %vm5794_vm3, 0, %v544_v21  ;;  %v728_v16 = vld [vmem:[#allocation2 + $0x94] sm:$0xf] }
 0x188   : > { %v1954_v30 = vld [vmem:[#allocation2 + $0x104] sm:$0xf]  ;;  %v947_v20 = vsel %vm5964_vm8, %v939_v32, %v946_v31  ;;  %v2989_v55 = vor.u32 %v2988_v57, %v2985_v50  ;;  %v2999_v43 = vor.u32 %v2998_v19, %v2994_v37  ;;  %546 = vst [vmem:[#allocation2 + $0x10c] sm:$0x1] %v545_v15  ;;  %v949_v35 = vshrl.u32 %v727_v24, 16  ;;  %v7059_v22 = vpop.permute.xlu0 %4332 }
 0x189   : > { %v2643_v8 = vld [vmem:[#allocation2 + $0x104] sm:$0xf]  ;;  %v2292_v36 = vshrl.u32 %v1954_v30, 16  ;;  %v2295_v44 = vshll.u32 %v1954_v30, 16  ;;  %2561 = vrot.lane.b32.xlu0 %v5699_v18, %s5736_s7  ;;  %v5174_v38 = vcombine.low %v938_v14, %v947_v20  ;;  %v7067_v58 = vpop.permute.xlu1 %3787  ;;  %v954_v50 = vshrl.u32 %v728_v16, 16 }
 0x18a   : > { %1873 = vrot.lane.b32.xlu1 %v5213_v26, %s5735_s6  ;;  %v3007_v54 = vshrl.u32 %v2643_v8, 16  ;;  %v1955_v1 = vld [vmem:[#allocation2 + $0x108] sm:$0xf]  ;;  %v2990_v9 = vrot.slane %v2989_v55, 4  ;;  %v3000_v29 = vrot.slane %v2999_v43, 4  ;;  %v3010_v26 = vshll.u32 %v2643_v8, 16 }
 0x18b   : > { %v2294_v4 = vrot.slane %v2292_v36, 7  ;;  %v2301_v13 = vshrl.u32 %v1955_v1, 16  ;;  %v2304_v42 = vshll.u32 %v1955_v1, 16  ;;  %1175 = vst.msk [vmem:[#allocation3 + $0x40] sm:$0xff] %vm1166_vm9, %v5174_v38  ;;  %v2644_v46 = vld [vmem:[#allocation2 + $0x108] sm:$0xf] }
 0x18c   : > { %1352 = vst.msk [vmem:[#allocation3 + $0x40] sm:$0xff] %vm1343_vm10, %v6926_v10  ;;  %v2995_v28 = vsel %vm5860_vm6, %v2990_v9, %v2994_v37  ;;  %v3009_v25 = vrot.slane %v3007_v54, 4  ;;  %v3016_v27 = vshll.u32 %v2644_v46, 16  ;;  %v3005_v2 = vsel %vm5860_vm6, %v3000_v29, %v3004_v23  ;;  %v3187_v23 = vld [vmem:[#allocation2 + $0x104] sm:$0xf]  ;;  %v7083_v55 = vpop.permute.xlu0 %1863 }
 0x18d   : > { %v2297_v61 = vor.u32 %v2295_v44, %v2294_v4  ;;  %v2299_v56 = vrot.slane %v2294_v4, 4  ;;  %v2303_v40 = vrot.slane %v2301_v13, 7  ;;  %1900 = vst.msk [vmem:[#allocation3 + $0x40] sm:$0xff] %vm1891_vm11, %v6919_v34  ;;  %v5276_v7 = vcombine.low %v2995_v28, %v3005_v2  ;;  %v3188_v20 = vld [vmem:[#allocation2 + $0x108] sm:$0xf] }
 0x18e   : > { %v3012_v10 = vrot.slane %v3010_v26, 5  ;;  %v3018_v53 = vrot.slane %v3016_v27, 5  ;;  %v3020_v33 = vshrl.u32 %v2644_v46, 16  ;;  %2413 = vst.msk [vmem:[#allocation3 + $0x40] sm:$0xff] %vm2404_vm12, %v6941_v3  ;;  %v5159_v32 = vrot.slane %v949_v35, 11  ;;  %v7090_v35 = vpop.permute.xlu1 %1315 }
 0x18f   : > { %v2298_v21 = vsel %vm5964_vm8, %v7042_v63, %v2297_v61  ;;  %v2306_v18 = vor.u32 %v2304_v42, %v2303_v40  ;;  %v2645_v51 = vld [vmem:[#allocation2 + $0x10c] sm:$0x1]  ;;  %2590 = vst.msk [vmem:[#allocation3 + $0x40] sm:$0xff] %vm2581_vm13, %v6971_v41  ;;  %3106 = vrot.lane.b32.xlu0 %v5276_v7, %s5740_s11  ;;  %v957_v57 = vshll.u32 %v728_v16, 16  ;;  %v3186_v3 = vld [vmem:[#allocation2 + $0x100] sm:$0x8] }
 0x190   : > { %v3013_v34 = vor.u32 %v3012_v10, %v3009_v25  ;;  %v3022_v52 = vrot.slane %v3020_v33, 4  ;;  %v3026_v31 = vshll.u32 %v2645_v51, 16  ;;  %3135 = vst.msk [vmem:[#allocation3 + $0x40] sm:$0xff] %vm3126_vm14, %v6991_v60  ;;  %v956_v19 = vrot.slane %v954_v50, 7  ;;  %v3189_v44 = vld [vmem:[#allocation2 + $0x110] sm:$0x8]  ;;  %v7099_v33 = vpop.permute.xlu0 %2376 }
 0x191   : > { %v2307_v37 = vsel %vm5964_vm8, %v2299_v56, %v2306_v18  ;;  %v963_v63 = vshrl.u32 %v729_v5, 16  ;;  %v966_v14 = vshll.u32 %v729_v5, 16  ;;  %3649 = vst.msk [vmem:[#allocation3 + $0x40] sm:$0xff] %vm3640_vm15, %v7012_v47  ;;  %v3501_v36 = vshrl.u32 %v3186_v3, 16  ;;  %v5700_v47 = vld [vmem:[#allocation2 + $0x104] sm:$0xff]  }
 0x192   : > { %v5245_v41 = vcombine.low %v2298_v21, %v2307_v37  ;;  %v3014_v15 = vrot.slane %v3013_v34, 4  ;;  %v3023_v24 = vor.u32 %v3022_v52, %v3018_v53  ;;  %v3028_v30 = vrot.slane %v3026_v31, 5  ;;  %3826 = vst.msk [vmem:[#allocation3 + $0x40] sm:$0xff] %vm3817_vm2, %v7026_v59  ;;  %v3190_v59 = vld [vmem:[#allocation2 + $0x114] sm:$0xf]  ;;  %v7104_v3 = vpop.permute.xlu1 %1317 }
 0x193   : > { %v959_v60 = vor.u32 %v957_v57, %v956_v19  ;;  %v961_v43 = vrot.slane %v956_v19, 4  ;;  %v965_v8 = vrot.slane %v963_v63, 7  ;;  %4371 = vst.msk [vmem:[#allocation3 + $0x40] sm:$0xff] %vm4362_vm4, %v7040_v12  ;;  %v3506_v1 = vshrl.u32 %v3187_v23, 16  ;;  %v3191_v25 = vld [vmem:[#allocation2 + $0x118] sm:$0xf] }
 0x194   : > { %2386 = vrot.lane.b32.xlu1 %v5245_v41, %s5738_s9  ;;  %v3019_v38 = vsel %vm5860_vm6, %v3014_v15, %v3018_v53  ;;  %v3024_v54 = vrot.slane %v3023_v24, 4  ;;  %v3509_v9 = vshll.u32 %v3187_v23, 16  ;;  %v5292_v42 = vrot.slane %v3501_v36, 11  ;;  %v3876_v40 = vld [vmem:[#allocation2 + $0x104] sm:$0xf] }
 0x195   : > { %v960_v4 = vsel %vm5964_vm8, %v5159_v32, %v959_v60  ;;  %v968_v13 = vor.u32 %v966_v14, %v965_v8  ;;  %v3515_v29 = vshrl.u32 %v3188_v20, 16  ;;  %v3508_v46 = vrot.slane %v3506_v1, 7  ;;  %v3877_v32 = vld [vmem:[#allocation2 + $0x108] sm:$0xf]  ;;  %v3878_v52 = vld [vmem:[#allocation2 + $0x10c] sm:$0x1] }
 0x196   : > { %v3029_v12 = vsel %vm5860_vm6, %v3024_v54, %v3028_v30  ;;  %v3518_v28 = vshll.u32 %v3188_v20, 16  ;;  %v3523_v26 = vshrl.u32 %v3189_v44, 16  ;;  %v3528_v56 = vshrl.u32 %v3190_v59, 16  ;;  %v547_v41 = vld [vmem:[#allocation2 + $0x11c] sm:$0x1] }
 0x197   : > { %v5277_v27 = vcombine.low %v3019_v38, %v3029_v12  ;;  %v969_v16 = vsel %vm5964_vm8, %v961_v43, %v968_v13  ;;  %v3517_v61 = vrot.slane %v3515_v29, 7  ;;  %v3511_v7 = vor.u32 %v3509_v9, %v3508_v46  ;;  %v3879_v15 = vld [vmem:[#allocation2 + $0x114] sm:$0xf]  ;;  %v3880_v44 = vld [vmem:[#allocation2 + $0x118] sm:$0xf] }
 0x198   : > { %2563 = vrot.lane.b32.xlu1 %v5700_v47, %s5736_s7  ;;  %v5175_v2 = vcombine.low %v960_v4, %v969_v16  ;;  %v3513_v10 = vrot.slane %v3508_v46, 4  ;;  %v5293_v53 = vrot.slane %v3523_v26, 11  ;;  %v3530_v21 = vrot.slane %v3528_v56, 7  ;;  %v5701_v47 = vld [vmem:[#allocation2 + $0x104] sm:$0xff]   ;;  %v730_v9 = vld [vmem:[#allocation2 + $0xa0] sm:$0x8]  ;;  %s7226_s7 = scalar_lea.vmem %s7404_s4, %s5397_s22 }
 0x199   : > { %v3520_v5 = vor.u32 %v3518_v28, %v3517_v61  ;;  %v3531_v18 = vshll.u32 %v3190_v59, 16  ;;  %v3537_v51 = vshrl.u32 %v3191_v25, 16  ;;  %v3512_v50 = vsel %vm5964_vm8, %v5292_v42, %v3511_v7  ;;  %v7123_v59 = vpop.permute.xlu0 %2553  ;;  %v731_v29 = vld [vmem:[#allocation2 + $0xa4] sm:$0xf]  ;;  %v733_v56 = vld [vmem:[#allocation2 + $0xb0] sm:$0x8] }
 0x19a   : > { %1176 = vst.msk [vmem:[#allocation3 + $0x48] sm:$0xff] %vm1166_vm9, %v5175_v2  ;;  %v3540_v34 = vshll.u32 %v3191_v25, 16  ;;  %v4219_v31 = vshrl.u32 %v3876_v40, 16  ;;  %v4222_v57 = vshll.u32 %v3876_v40, 16  ;;  %v4387_v37 = vld [vmem:[#allocation3 + $0x40] sm:$0xff]  ;;  %v3535_v14 = vrot.slane %v3530_v21, 4  ;;  %v7131_v25 = vpop.permute.xlu1 %1865 }
 0x19b   : > { %1353 = vst.msk [vmem:[#allocation3 + $0x48] sm:$0xff] %vm1343_vm10, %v6950_v62  ;;  %v3521_v19 = vsel %vm5964_vm8, %v3513_v10, %v3520_v5  ;;  %v3533_v63 = vor.u32 %v3531_v18, %v3530_v21  ;;  %v3539_v23 = vrot.slane %v3537_v51, 7  ;;  %5589 = vmatprep.mubr.msk.bf16.mxu1 %vm4431_vm5, %v4387_v37  ;;  %v4228_v60 = vshll.u32 %v3877_v32, 16  ;;  %v734_v10 = vld [vmem:[#allocation2 + $0xb4] sm:$0xf]  ;;  %s5115_s22 = sshll.u32 %s7417_s18, 1 }
 0x19c   : > { %3108 = vrot.lane.b32.xlu1 %v5277_v27, %s5740_s11  ;;  %v5308_v24 = vcombine.low %v3512_v50, %v3521_v19  ;;  %1901 = vst.msk [vmem:[#allocation3 + $0x48] sm:$0xff] %vm1891_vm11, %v6985_v45  ;;  %v4221_v30 = vrot.slane %v4219_v31, 4  ;;  %v4224_v20 = vrot.slane %v4222_v57, 5  ;;  %v4232_v8 = vshrl.u32 %v3877_v32, 16  ;;  %v735_v37 = vld [vmem:[#allocation2 + $0xb8] sm:$0xf] }
 0x19d   : > { %v3534_v62 = vsel %vm5964_vm8, %v5293_v53, %v3533_v63  ;;  %v3542_v43 = vor.u32 %v3540_v34, %v3539_v23  ;;  %2414 = vst.msk [vmem:[#allocation3 + $0x48] sm:$0xff] %vm2404_vm12, %v6998_v11  ;;  %v4238_v36 = vshll.u32 %v3878_v52, 16  ;;  %v4230_v54 = vrot.slane %v4228_v60, 5  ;;  %v7141_v34 = vpop.permute.xlu0 %3098 }
 0x19e   : > { %3620 = vrot.lane.b32.xlu0 %v5308_v24, %s5739_s10  ;;  %v4225_v38 = vor.u32 %v4224_v20, %v4221_v30  ;;  %v548_v45 = vsel %vm5794_vm3, 0, %v547_v41  ;;  %v4243_v1 = vshrl.u32 %v3879_v15, 16  ;;  %2591 = vst.msk [vmem:[#allocation3 + $0x48] sm:$0xff] %vm2581_vm13, %v7014_v17  ;;  %v4234_v4 = vrot.slane %v4232_v8, 4  ;;  %v732_v17 = vld [vmem:[#allocation2 + $0xa8] sm:$0xf] }
 0x19f   : > { %v3543_v11 = vsel %vm5964_vm8, %v3535_v14, %v3542_v43  ;;  %v4240_v13 = vrot.slane %v4238_v36, 5  ;;  %549 = vst [vmem:[#allocation2 + $0x11c] sm:$0x1] %v548_v45  ;;  %v4246_v42 = vshll.u32 %v3879_v15, 16  ;;  %3136 = vst.msk [vmem:[#allocation3 + $0x48] sm:$0xff] %vm3126_vm14, %v7035_v48  ;;  %v4252_v28 = vshll.u32 %v3880_v44, 16  ;;  %v7146_v15 = vpop.permute.xlu1 %2378 }
 0x1a0   : > { %v5309_v0 = vcombine.low %v3534_v62, %v3543_v11  ;;  %v4226_v12 = vrot.slane %v4225_v38, 4  ;;  %v4245_v46 = vrot.slane %v4243_v1, 4  ;;  %3650 = vst.msk [vmem:[#allocation3 + $0x48] sm:$0xff] %vm3640_vm15, %v7050_v49  ;;  %v4235_v26 = vor.u32 %v4234_v4, %v4230_v54  ;;  %v5702_v48 = vld [vmem:[#allocation2 + $0x114] sm:$0xff]   ;;  %v736_v24 = vld [vmem:[#allocation2 + $0xc0] sm:$0x8] }
 0x1a1   : > { %v4248_v27 = vrot.slane %v4246_v42, 5  ;;  %v4256_v16 = vshrl.u32 %v3880_v44, 16  ;;  %3827 = vst.msk [vmem:[#allocation3 + $0x48] sm:$0xff] %vm3817_vm2, %v7067_v58  ;;  %v971_v61 = vshrl.u32 %v730_v9, 16  ;;  %v4254_v49 = vrot.slane %v4252_v28, 5 }
 0x1a2   : > { %3622 = vrot.lane.b32.xlu1 %v5309_v0, %s5739_s10  ;;  %3797 = vrot.lane.b32.xlu0 %v5701_v47, %s5737_s8  ;;  %v4231_v40 = vsel %vm5860_vm6, %v4226_v12, %v4230_v54  ;;  %v976_v2 = vshrl.u32 %v731_v29, 16  ;;  %v979_v7 = vshll.u32 %v731_v29, 16  ;;  %4372 = vst.msk [vmem:[#allocation3 + $0x48] sm:$0xff] %vm4362_vm4, %v7059_v22  ;;  %v4236_v53 = vrot.slane %v4235_v26, 4  ;;  %v737_v43 = vld [vmem:[#allocation2 + $0xc4] sm:$0xf]  ;;  %s282_s10 = scalar_lea.vmem %s7405_s5, %s5115_s22 }
 0x1a3   : > { %v4249_v5 = vor.u32 %v4248_v27, %v4245_v46  ;;  %v4258_v58 = vrot.slane %v4256_v16, 4  ;;  %v5160_v21 = vrot.slane %v971_v61, 11  ;;  %v985_v51 = vshrl.u32 %v732_v17, 16  ;;  %v738_v29 = vld [vmem:[#allocation2 + $0xc8] sm:$0xf] }
 0x1a4   : > { %v978_v18 = vrot.slane %v976_v2, 7  ;;  %v988_v32 = vshll.u32 %v732_v17, 16  ;;  %v993_v50 = vshrl.u32 %v733_v56, 16  ;;  %v4241_v52 = vsel %vm5860_vm6, %v4236_v53, %v4240_v13  ;;  %v739_v12 = vld [vmem:[#allocation2 + $0xd0] sm:$0x8]  ;;  %v7160_v56 = vpop.permute.xlu1 %2555 }
 0x1a5   : > { %v4250_v31 = vrot.slane %v4249_v5, 4  ;;  %v4259_v57 = vor.u32 %v4258_v58, %v4254_v49  ;;  %v998_v19 = vshrl.u32 %v734_v10, 16  ;;  %v5340_v22 = vcombine.low %v4231_v40, %v4241_v52  ;;  %v740_v27 = vld [vmem:[#allocation2 + $0xd4] sm:$0xf]  ;;  %v742_v53 = vld [vmem:[#allocation2 + $0xe0] sm:$0x8] }
 0x1a6   : > { %3799 = vrot.lane.b32.xlu1 %v5702_v48, %s5737_s8  ;;  %v3881_v63 = vld [vmem:[#allocation2 + $0x11c] sm:$0x1]  ;;  %v981_v14 = vor.u32 %v979_v7, %v978_v18  ;;  %v983_v23 = vrot.slane %v978_v18, 4  ;;  %v987_v41 = vrot.slane %v985_v51, 7  ;;  %v5161_v62 = vrot.slane %v993_v50, 11 }
 0x1a7   : > { %v4255_v30 = vsel %vm5860_vm6, %v4250_v31, %v4254_v49  ;;  %v4260_v20 = vrot.slane %v4259_v57, 4  ;;  %v4262_v60 = vshll.u32 %v3881_v63, 16  ;;  %4342 = vrot.lane.b32.xlu0 %v5340_v22, %s5741_s12  ;;  %v1000_v44 = vrot.slane %v998_v19, 7  ;;  %v741_v49 = vld [vmem:[#allocation2 + $0xd8] sm:$0xf] }
 0x1a8   : > { %v982_v8 = vsel %vm5964_vm8, %v5160_v21, %v981_v14  ;;  %v990_v36 = vor.u32 %v988_v32, %v987_v41  ;;  %v1001_v47 = vshll.u32 %v734_v10, 16  ;;  %v1007_v54 = vshrl.u32 %v735_v37, 16  ;;  %v743_v32 = vld [vmem:[#allocation2 + $0xe4] sm:$0xf] }
 0x1a9   : > { %v4264_v38 = vrot.slane %v4262_v60, 5  ;;  %v1010_v45 = vshll.u32 %v735_v37, 16  ;;  %v4388_v1 = vld [vmem:[#allocation3 + $0x48] sm:$0xff]  ;;  %v1015_v9 = vshrl.u32 %v736_v24, 16  ;;  %v1005_v13 = vrot.slane %v1000_v44, 4  ;;  %v3101_v24 = vpop.permute.xlu1 %3100 }
 0x1aa   : > { %v991_v11 = vsel %vm5964_vm8, %v983_v23, %v990_v36  ;;  %v1003_v4 = vor.u32 %v1001_v47, %v1000_v44  ;;  %5590 = vmatmul.mubr.msk.bf16.vlgmr.msra.gmra.mrb[0].mxu1 %vm4431_vm5, %v4388_v1  ;;  %v3613_v42 = vpop.permute.xlu0 %3612  ;;  %v1020_v0 = vshrl.u32 %v737_v43, 16  ;;  %v1009_v17 = vrot.slane %v1007_v54, 7  ;;  %v744_v37 = vld [vmem:[#allocation2 + $0xe8] sm:$0xf]  ;;  %v746_v47 = vld [vmem:[#allocation2 + $0xf4] sm:$0xf] }
 0x1ab   : > { %v4265_v46 = vsel %vm5860_vm6, %v4260_v20, %v4264_v38  ;;  %v5176_v28 = vcombine.low %v982_v8, %v991_v11  ;;  %v5162_v26 = vrot.slane %v1015_v9, 11  ;;  %v1023_v40 = vshll.u32 %v737_v43, 16  ;;  %v745_v43 = vld [vmem:[#allocation2 + $0xf0] sm:$0x8] }
 0x1ac   : > { %v5341_v16 = vcombine.low %v4255_v30, %v4265_v46  ;;  %v1004_v61 = vsel %vm5964_vm8, %v5161_v62, %v1003_v4  ;;  %v1022_v48 = vrot.slane %v1020_v0, 7  ;;  %v1012_v2 = vor.u32 %v1010_v45, %v1009_v17  ;;  %v747_v45 = vld [vmem:[#allocation2 + $0xf8] sm:$0xf] }
 0x1ad   : > { %1177 = vst.msk [vmem:[#allocation3 + $0x50] sm:$0xff] %vm1166_vm9, %v5176_v28  ;;  %v1029_v7 = vshrl.u32 %v738_v29, 16  ;;  %v1032_v10 = vshll.u32 %v738_v29, 16  ;;  %v1037_v39 = vshrl.u32 %v739_v12, 16  ;;  %v1042_v18 = vshrl.u32 %v740_v27, 16 }
 0x1ae   : > { %4344 = vrot.lane.b32.xlu1 %v5341_v16, %s5741_s12  ;;  %1354 = vst.msk [vmem:[#allocation3 + $0x50] sm:$0xff] %vm1343_vm10, %v7090_v35  ;;  %v3790_v5 = vpop.permute.xlu0 %3789  ;;  %v1025_v58 = vor.u32 %v1023_v40, %v1022_v48  ;;  %v1027_v21 = vrot.slane %v1022_v48, 4  ;;  %v1045_v51 = vshll.u32 %v740_v27, 16  ;;  %v1013_v50 = vsel %vm5964_vm8, %v1005_v13, %v1012_v2 }
 0x1af   : > { %1902 = vst.msk [vmem:[#allocation3 + $0x50] sm:$0xff] %vm1891_vm11, %v7083_v55  ;;  %v1031_v52 = vrot.slane %v1029_v7, 7  ;;  %v5163_v31 = vrot.slane %v1037_v39, 11  ;;  %v1051_v57 = vshrl.u32 %v741_v49, 16  ;;  %v5177_v19 = vcombine.low %v1004_v61, %v1013_v50 }
 0x1b0   : > { %2415 = vst.msk [vmem:[#allocation3 + $0x50] sm:$0xff] %vm2404_vm12, %v7099_v33  ;;  %v1026_v35 = vsel %vm5964_vm8, %v5162_v26, %v1025_v58  ;;  %v1044_v22 = vrot.slane %v1042_v18, 7  ;;  %v1054_v63 = vshll.u32 %v741_v49, 16  ;;  %v1059_v41 = vshrl.u32 %v742_v53, 16 }
 0x1b1   : > { %2592 = vst.msk [vmem:[#allocation3 + $0x50] sm:$0xff] %vm2581_vm13, %v7123_v59  ;;  %v1034_v14 = vor.u32 %v1032_v10, %v1031_v52  ;;  %v1053_v23 = vrot.slane %v1051_v57, 7  ;;  %v1064_v55 = vshrl.u32 %v743_v32, 16  ;;  %v1067_v60 = vshll.u32 %v743_v32, 16 }
 0x1b2   : > { %1178 = vst.msk [vmem:[#allocation3 + $0x58] sm:$0xff] %vm1166_vm9, %v5177_v19  ;;  %v4335_v30 = vpop.permute.xlu0 %4334  ;;  %v1047_v33 = vor.u32 %v1045_v51, %v1044_v22  ;;  %v1049_v20 = vrot.slane %v1044_v22, 4  ;;  %v1073_v62 = vshrl.u32 %v744_v37, 16  ;;  %v5164_v36 = vrot.slane %v1059_v41, 11 }
 0x1b3   : > { %3137 = vst.msk [vmem:[#allocation3 + $0x50] sm:$0xff] %vm3126_vm14, %v7141_v34  ;;  %v1035_v59 = vsel %vm5964_vm8, %v1027_v21, %v1034_v14  ;;  %v1056_v8 = vor.u32 %v1054_v63, %v1053_v23  ;;  %v1066_v44 = vrot.slane %v1064_v55, 7  ;;  %v1089_v29 = vshll.u32 %v746_v47, 16 }
 0x1b4   : > { %1355 = vst.msk [vmem:[#allocation3 + $0x58] sm:$0xff] %vm1343_vm10, %v7104_v3  ;;  %v5178_v34 = vcombine.low %v1026_v35, %v1035_v59  ;;  %v1048_v38 = vsel %vm5964_vm8, %v5163_v31, %v1047_v33  ;;  %v1075_v54 = vrot.slane %v1073_v62, 7  ;;  %v1076_v3 = vshll.u32 %v744_v37, 16 }
 0x1b5   : > { %3651 = vst.msk [vmem:[#allocation3 + $0x50] sm:$0xff] %vm3640_vm15, %v3613_v42  ;;  %v1057_v1 = vsel %vm5964_vm8, %v1049_v20, %v1056_v8  ;;  %v1069_v9 = vor.u32 %v1067_v60, %v1066_v44  ;;  %v1071_v11 = vrot.slane %v1066_v44, 4  ;;  %v1086_v42 = vshrl.u32 %v746_v47, 16 }
 0x1b6   : > { %1903 = vst.msk [vmem:[#allocation3 + $0x58] sm:$0xff] %vm1891_vm11, %v7131_v25  ;;  %v1081_v25 = vshrl.u32 %v745_v43, 16  ;;  %v5179_v4 = vcombine.low %v1048_v38, %v1057_v1  ;;  %v1078_v13 = vor.u32 %v1076_v3, %v1075_v54  ;;  %v1095_v0 = vshrl.u32 %v747_v45, 16 }
 0x1b7   : > { %3828 = vst.msk [vmem:[#allocation3 + $0x50] sm:$0xff] %vm3817_vm2, %v3790_v5  ;;  %v1098_v12 = vshll.u32 %v747_v45, 16  ;;  %v1088_v26 = vrot.slane %v1086_v42, 7 }
 0x1b8   : > { %2416 = vst.msk [vmem:[#allocation3 + $0x58] sm:$0xff] %vm2404_vm12, %v7146_v15  ;;  %v1070_v15 = vsel %vm5964_vm8, %v5164_v36, %v1069_v9  ;;  %v3615_v46 = vpop.permute.xlu1 %3614  ;;  %v1079_v28 = vsel %vm5964_vm8, %v1071_v11, %v1078_v13  ;;  %v5165_v17 = vrot.slane %v1081_v25, 11  ;;  %v1097_v16 = vrot.slane %v1095_v0, 7 }
 0x1b9   : > { %4373 = vst.msk [vmem:[#allocation3 + $0x50] sm:$0xff] %vm4362_vm4, %v4335_v30  ;;  %v5180_v27 = vcombine.low %v1070_v15, %v1079_v28  ;;  %v1091_v61 = vor.u32 %v1089_v29, %v1088_v26 }
 0x1ba   : > { %2593 = vst.msk [vmem:[#allocation3 + $0x58] sm:$0xff] %vm2581_vm13, %v7160_v56  ;;  %v1093_v56 = vrot.slane %v1088_v26, 4  ;;  %v1100_v48 = vor.u32 %v1098_v12, %v1097_v16 }
 0x1bb   : > { %1179 = vst.msk [vmem:[#allocation3 + $0x60] sm:$0xff] %vm1166_vm9, %v5178_v34  ;;  %1180 = vst.msk [vmem:[#allocation3 + $0x68] sm:$0xff] %vm1166_vm9, %v5179_v4  ;;  %v1092_v2 = vsel %vm5964_vm8, %v5165_v17, %v1091_v61 }
 0x1bc   : > { %3138 = vst.msk [vmem:[#allocation3 + $0x58] sm:$0xff] %vm3126_vm14, %v3101_v24  ;;  %v3792_v40 = vpop.permute.xlu1 %3791  ;;  %v1101_v10 = vsel %vm5964_vm8, %v1093_v56, %v1100_v48 }
 0x1bd   : > { %3652 = vst.msk [vmem:[#allocation3 + $0x58] sm:$0xff] %vm3640_vm15, %v3615_v46  ;;  %v4337_v7 = vpop.permute.xlu0 %4336  ;;  %v5181_v39 = vcombine.low %v1092_v2, %v1101_v10 }
 0x1be   : > { %1181 = vst.msk [vmem:[#allocation3 + $0x70] sm:$0xff] %vm1166_vm9, %v5180_v27 }
 0x1bf   : > { %3829 = vst.msk [vmem:[#allocation3 + $0x58] sm:$0xff] %vm3817_vm2, %v3792_v40 }
 0x1c0   : > { %v4389_v49 = vld [vmem:[#allocation3 + $0x50] sm:$0xff]  ;;  %4374 = vst.msk [vmem:[#allocation3 + $0x58] sm:$0xff] %vm4362_vm4, %v4337_v7  ;;  %v1320_v53 = vpop.permute.xlu1 %1319 }
 0x1c1   : > { %5593 = vmatprep.mubr.msk.bf16.mxu1 %vm4431_vm5, %v4389_v49  ;;  %1182 = vst.msk [vmem:[#allocation3 + $0x78] sm:$0xff] %vm1166_vm9, %v5181_v39  ;;  %v1868_v5 = vpop.permute.xlu0 %1867 }
 0x1c2   : > { %1356 = vst.msk [vmem:[#allocation3 + $0x60] sm:$0xff] %vm1343_vm10, %v1320_v53 }
 0x1c3   : > { %1904 = vst.msk [vmem:[#allocation3 + $0x60] sm:$0xff] %vm1891_vm11, %v1868_v5 }
 0x1c4   : > { %v1322_v58 = vpop.permute.xlu1 %1321 }
 0x1c5   : > { %1357 = vst.msk [vmem:[#allocation3 + $0x68] sm:$0xff] %vm1343_vm10, %v1322_v58  ;;  %v2381_v21 = vpop.permute.xlu0 %2380 }
 0x1c6   : > { %2417 = vst.msk [vmem:[#allocation3 + $0x60] sm:$0xff] %vm2404_vm12, %v2381_v21 }
 0x1c7   : > { %v4390_v18 = vld [vmem:[#allocation3 + $0x58] sm:$0xff] }
 0x1c8   : > { %5594 = vmatmul.mubr.msk.bf16.gmra.mrb[4].mxu1 %vm4431_vm5, %v4390_v18  ;;  %v1870_v6 = vpop.permute.xlu1 %1869 }
 0x1c9   : > { %1905 = vst.msk [vmem:[#allocation3 + $0x68] sm:$0xff] %vm1891_vm11, %v1870_v6  ;;  %v2558_v51 = vpop.permute.xlu0 %2557 }
 0x1ca   : > { %2594 = vst.msk [vmem:[#allocation3 + $0x60] sm:$0xff] %vm2581_vm13, %v2558_v51 }
 0x1ce   : > { %v5575_v52 = vpop.f32.mrb[0].mxu0 }
 0x1cf   : > { %v3103_v32 = vpop.permute.xlu0 %3102  ;;  %v5433_v31 = vpack.c.bf16 %v5575_v52, %v5575_v52  ;;  %v4518_v57 = vpop.f32.mrb[1].mxu0  ;;  %v4718_v22 = vmul.f32 %v5575_v52, %v5575_v52  ;;  %v4648_v60 = vsel %vm1166_vm9, %v5575_v52, 0.0 }
 0x1d0   : > { %3139 = vst.msk [vmem:[#allocation3 + $0x60] sm:$0xff] %vm3126_vm14, %v3103_v32  ;;  %v4716_v37 = vmul.f32 %v4518_v57, %v4518_v57  ;;  %v5431_v19 = vpack.c.bf16 %v4518_v57, %v4518_v57  ;;  %v5576_v35 = vpop.f32.mrb[2].mxu0  ;;  %v4645_v41 = vsel %vm1166_vm9, %v4518_v57, 0.0 }
 0x1d1   : > { %4948 = vst.msk [vmem:[%s7226_s7 + $0x8] sm:$0xf] %vm474_vm0, %v5433_v31  ;;  %v5434_v63 = vpack.c.bf16 %v5576_v35, %v5576_v35  ;;  %v4521_v14 = vpop.f32.mrb[3].mxu0  ;;  %v4719_v33 = vmul.f32 %v5576_v35, %v5576_v35  ;;  %v4751_v44 = vsel %vm1166_vm9, %v4718_v22, 0.0  ;;  %v4650_v34 = vsel %vm1166_vm9, %v5576_v35, 0.0 }
 0x1d2   : > { %v2383_v50 = vpop.permute.xlu1 %2382  ;;  %4946 = vst.msk [vmem:[%s7226_s7] sm:$0xf] %vm474_vm0, %v5431_v19  ;;  %v4646_v55 = vsel %vm1166_vm9, %v4521_v14, 0.0  ;;  %v4717_v24 = vmul.f32 %v4521_v14, %v4521_v14  ;;  %v5432_v30 = vpack.c.bf16 %v4521_v14, %v4521_v14  ;;  %v4748_v62 = vsel %vm1166_vm9, %v4716_v37, 0.0 }
 0x1d3   : > { %2418 = vst.msk [vmem:[#allocation3 + $0x68] sm:$0xff] %vm2404_vm12, %v2383_v50  ;;  %v4647_v20 = vadd.f32 %v4646_v55, %v4645_v41  ;;  %v4753_v38 = vsel %vm1166_vm9, %v4719_v33, 0.0 }
 0x1d4   : > { %4949 = vst.msk [vmem:[%s7226_s7 + $0xc] sm:$0xf] %vm474_vm0, %v5434_v63  ;;  %v4749_v43 = vsel %vm1166_vm9, %v4717_v24, 0.0  ;;  %4947 = vst.msk [vmem:[%s7226_s7 + $0x4] sm:$0xf] %vm474_vm0, %v5432_v30 }
 0x1d5   : > { %v4649_v59 = vadd.f32 %v4648_v60, %v4647_v20  ;;  %v4750_v8 = vadd.f32 %v4749_v43, %v4748_v62 }
 0x1d6   : > { %v2560_v23 = vpop.permute.xlu1 %2559  ;;  %v5579_v47 = vpop.f32.mrb[4].mxu0 }
 0x1d7   : > { %2595 = vst.msk [vmem:[#allocation3 + $0x68] sm:$0xff] %vm2581_vm13, %v2560_v23  ;;  %v4752_v54 = vadd.f32 %v4751_v44, %v4750_v8  ;;  %v5437_v3 = vpack.c.bf16 %v5579_v47, %v5579_v47  ;;  %v4534_v45 = vpop.f32.mrb[5].mxu0  ;;  %v4651_v9 = vadd.f32 %v4650_v34, %v4649_v59  ;;  %v4722_v28 = vmul.f32 %v5579_v47, %v5579_v47 }
 0x1d8   : > { %v4652_v11 = vsel %vm1166_vm9, %v4534_v45, 0.0  ;;  %v4720_v25 = vmul.f32 %v4534_v45, %v4534_v45  ;;  %v5435_v4 = vpack.c.bf16 %v4534_v45, %v4534_v45  ;;  %v5580_v13 = vpop.f32.mrb[6].mxu0  ;;  %v4656_v56 = vsel %vm1166_vm9, %v5579_v47, 0.0 }
 0x1d9   : > { %4952 = vst.msk [vmem:[%s7226_s7 + $0x18] sm:$0xf] %vm474_vm0, %v5437_v3  ;;  %v4754_v42 = vadd.f32 %v4753_v38, %v4752_v54  ;;  %v4537_v29 = vpop.f32.mrb[7].mxu0  ;;  %v4653_v15 = vadd.f32 %v4652_v11, %v4651_v9  ;;  %v5438_v12 = vpack.c.bf16 %v5580_v13, %v5580_v13  ;;  %v4723_v48 = vmul.f32 %v5580_v13, %v5580_v13 }
 0x1da   : > { %v3105_v36 = vpop.permute.xlu1 %3104  ;;  %v4755_v0 = vsel %vm1166_vm9, %v4720_v25, 0.0  ;;  %4950 = vst.msk [vmem:[%s7226_s7 + $0x10] sm:$0xf] %vm474_vm0, %v5435_v4  ;;  %v4654_v46 = vsel %vm1166_vm9, %v4537_v29, 0.0  ;;  %v4721_v26 = vmul.f32 %v4537_v29, %v4537_v29  ;;  %v5436_v27 = vpack.c.bf16 %v4537_v29, %v4537_v29 }
 0x1db   : > { %3140 = vst.msk [vmem:[#allocation3 + $0x68] sm:$0xff] %vm3126_vm14, %v3105_v36  ;;  %v4756_v17 = vadd.f32 %v4755_v0, %v4754_v42  ;;  %v4655_v61 = vadd.f32 %v4654_v46, %v4653_v15  ;;  %v4759_v7 = vsel %vm1166_vm9, %v4722_v28, 0.0  ;;  %v4658_v10 = vsel %vm1166_vm9, %v5580_v13, 0.0 }
 0x1dc   : > { %v3617_v1 = vpop.permute.xlu0 %3616  ;;  %4953 = vst.msk [vmem:[%s7226_s7 + $0x1c] sm:$0xf] %vm474_vm0, %v5438_v12  ;;  %v4757_v40 = vsel %vm1166_vm9, %v4721_v26, 0.0  ;;  %4951 = vst.msk [vmem:[%s7226_s7 + $0x14] sm:$0xf] %vm474_vm0, %v5436_v27  ;;  %v4761_v58 = vsel %vm1166_vm9, %v4723_v48, 0.0 }
 0x1dd   : > { %3653 = vst.msk [vmem:[#allocation3 + $0x60] sm:$0xff] %vm3640_vm15, %v3617_v1  ;;  %v4657_v49 = vadd.f32 %v4656_v56, %v4655_v61  ;;  %v4758_v2 = vadd.f32 %v4757_v40, %v4756_v17 }
 0x1df   : > { %v4760_v39 = vadd.f32 %v4759_v7, %v4758_v2  ;;  %v4659_v53 = vadd.f32 %v4658_v10, %v4657_v49 }
 0x1e0   : > { %v3794_v16 = vpop.permute.xlu0 %3793 }
 0x1e1   : > { %3830 = vst.msk [vmem:[#allocation3 + $0x60] sm:$0xff] %vm3817_vm2, %v3794_v16  ;;  %v4762_v21 = vadd.f32 %v4761_v58, %v4760_v39 }
 0x1e5   : > { %v4339_v5 = vpop.permute.xlu0 %4338 }
 0x1e6   : > { %4375 = vst.msk [vmem:[#allocation3 + $0x60] sm:$0xff] %vm4362_vm4, %v4339_v5 }
 0x1ec   : > { %v3619_v18 = vpop.permute.xlu1 %3618 }
 0x1ed   : > { %3654 = vst.msk [vmem:[#allocation3 + $0x68] sm:$0xff] %vm3640_vm15, %v3619_v18  ;;  %v4391_v6 = vld [vmem:[#allocation3 + $0x60] sm:$0xff] }
 0x1ee   : > { %5597 = vmatprep.mubr.msk.bf16.mxu1 %vm4431_vm5, %v4391_v6 }
 0x1ef   : > { %v4341_v32 = vpop.permute.xlu0 %4340 }
 0x1f0   : > { %v3796_v51 = vpop.permute.xlu1 %3795 }
 0x1f1   : > { %3831 = vst.msk [vmem:[#allocation3 + $0x68] sm:$0xff] %vm3817_vm2, %v3796_v51 }
 0x1f2   : > { %4376 = vst.msk [vmem:[#allocation3 + $0x68] sm:$0xff] %vm4362_vm4, %v4341_v32 }
 0x1f3   : > { %v1872_v52 = vpop.permute.xlu0 %1871 }
 0x1f4   : > { %v1324_v50 = vpop.permute.xlu1 %1323 }
 0x1f5   : > { %1358 = vst.msk [vmem:[#allocation3 + $0x70] sm:$0xff] %vm1343_vm10, %v1324_v50 }
 0x1f6   : > { %1906 = vst.msk [vmem:[#allocation3 + $0x70] sm:$0xff] %vm1891_vm11, %v1872_v52 }
 0x1f7   : > { %v2385_v57 = vpop.permute.xlu0 %2384 }
 0x1f8   : > { %v1326_v31 = vpop.permute.xlu1 %1325  ;;  %2419 = vst.msk [vmem:[#allocation3 + $0x70] sm:$0xff] %vm2404_vm12, %v2385_v57 }
 0x1f9   : > { %1359 = vst.msk [vmem:[#allocation3 + $0x78] sm:$0xff] %vm1343_vm10, %v1326_v31  ;;  %v4392_v37 = vld [vmem:[#allocation3 + $0x68] sm:$0xff] }
 0x1fa   : > { %5598 = vmatmul.mubr.msk.bf16.gmra.mrb[8].mxu1 %vm4431_vm5, %v4392_v37 }
 0x1fb   : > { %v2562_v35 = vpop.permute.xlu0 %2561 }
 0x1fc   : > { %v1874_v19 = vpop.permute.xlu1 %1873  ;;  %2596 = vst.msk [vmem:[#allocation3 + $0x70] sm:$0xff] %vm2581_vm13, %v2562_v35 }
 0x1fd   : > { %1907 = vst.msk [vmem:[#allocation3 + $0x78] sm:$0xff] %vm1891_vm11, %v1874_v19 }
 0x201   : > { %v3107_v22 = vpop.permute.xlu0 %3106 }
 0x202   : > { %3141 = vst.msk [vmem:[#allocation3 + $0x70] sm:$0xff] %vm3126_vm14, %v3107_v22 }
 0x206   : > { %v2387_v63 = vpop.permute.xlu1 %2386 }
 0x207   : > { %2420 = vst.msk [vmem:[#allocation3 + $0x78] sm:$0xff] %vm2404_vm12, %v2387_v63 }
 0x20a   : > { %v2564_v14 = vpop.permute.xlu1 %2563 }
 0x20b   : > { %2597 = vst.msk [vmem:[#allocation3 + $0x78] sm:$0xff] %vm2581_vm13, %v2564_v14 }
 0x20e   : > { %v3109_v23 = vpop.permute.xlu1 %3108 }
 0x20f   : > { %3142 = vst.msk [vmem:[#allocation3 + $0x78] sm:$0xff] %vm3126_vm14, %v3109_v23 }
 0x210   : > { %v3621_v41 = vpop.permute.xlu0 %3620 }
 0x211   : > { %3655 = vst.msk [vmem:[#allocation3 + $0x70] sm:$0xff] %vm3640_vm15, %v3621_v41 }
 0x214   : > { %v3623_v55 = vpop.permute.xlu1 %3622  ;;  %v3798_v24 = vpop.permute.xlu0 %3797 }
 0x215   : > { %3656 = vst.msk [vmem:[#allocation3 + $0x78] sm:$0xff] %vm3640_vm15, %v3623_v55 }
 0x216   : > { %3832 = vst.msk [vmem:[#allocation3 + $0x70] sm:$0xff] %vm3817_vm2, %v3798_v24  ;;  %v5583_v33 = vpop.f32.mrb[8].mxu0 }
 0x217   : > { %v5441_v60 = vpack.c.bf16 %v5583_v33, %v5583_v33  ;;  %v4550_v62 = vpop.f32.mrb[9].mxu0  ;;  %v4726_v44 = vmul.f32 %v5583_v33, %v5583_v33  ;;  %v4664_v25 = vsel %vm1166_vm9, %v5583_v33, 0.0 }
 0x218   : > { %v3800_v30 = vpop.permute.xlu1 %3799  ;;  %v4660_v43 = vsel %vm1166_vm9, %v4550_v62, 0.0  ;;  %v4724_v59 = vmul.f32 %v4550_v62, %v4550_v62  ;;  %v5439_v8 = vpack.c.bf16 %v4550_v62, %v4550_v62  ;;  %v5584_v36 = vpop.f32.mrb[10].mxu0 }
 0x219   : > { %3833 = vst.msk [vmem:[#allocation3 + $0x78] sm:$0xff] %vm3817_vm2, %v3800_v30  ;;  %v4343_v20 = vpop.permute.xlu0 %4342  ;;  %v4661_v47 = vadd.f32 %v4660_v43, %v4659_v53  ;;  %v4553_v34 = vpop.f32.mrb[11].mxu0  ;;  %v5442_v54 = vpack.c.bf16 %v5584_v36, %v5584_v36  ;;  %v4727_v4 = vmul.f32 %v5584_v36, %v5584_v36  ;;  %v4767_v0 = vsel %vm1166_vm9, %v4726_v44, 0.0 }
 0x21a   : > { %4377 = vst.msk [vmem:[#allocation3 + $0x70] sm:$0xff] %vm4362_vm4, %v4343_v20  ;;  %v4763_v38 = vsel %vm1166_vm9, %v4724_v59, 0.0  ;;  %v4662_v3 = vsel %vm1166_vm9, %v4553_v34, 0.0  ;;  %v4725_v45 = vmul.f32 %v4553_v34, %v4553_v34  ;;  %v5440_v11 = vpack.c.bf16 %v4553_v34, %v4553_v34 }
 0x21b   : > { %4956 = vst.msk [vmem:[%s7226_s7 + $0x28] sm:$0xf] %vm474_vm0, %v5441_v60  ;;  %4954 = vst.msk [vmem:[%s7226_s7 + $0x20] sm:$0xf] %vm474_vm0, %v5439_v8  ;;  %v4764_v1 = vadd.f32 %v4763_v38, %v4762_v21  ;;  %v4663_v9 = vadd.f32 %v4662_v3, %v4661_v47  ;;  %v4666_v12 = vsel %vm1166_vm9, %v5584_v36, 0.0  ;;  %v4769_v26 = vsel %vm1166_vm9, %v4727_v4, 0.0 }
 0x21c   : > { %4957 = vst.msk [vmem:[%s7226_s7 + $0x2c] sm:$0xf] %vm474_vm0, %v5442_v54  ;;  %v4765_v13 = vsel %vm1166_vm9, %v4725_v45, 0.0  ;;  %4955 = vst.msk [vmem:[%s7226_s7 + $0x24] sm:$0xf] %vm474_vm0, %v5440_v11 }
 0x21d   : > { %v4665_v29 = vadd.f32 %v4664_v25, %v4663_v9  ;;  %v4766_v15 = vadd.f32 %v4765_v13, %v4764_v1 }
 0x21f   : > { %v4768_v28 = vadd.f32 %v4767_v0, %v4766_v15  ;;  %v4667_v17 = vadd.f32 %v4666_v12, %v4665_v29 }
 0x220   : > { %v4345_v42 = vpop.permute.xlu1 %4344 }
 0x221   : > { %4378 = vst.msk [vmem:[#allocation3 + $0x78] sm:$0xff] %vm4362_vm4, %v4345_v42  ;;  %v4393_v46 = vld [vmem:[#allocation3 + $0x70] sm:$0xff]  ;;  %v4770_v27 = vadd.f32 %v4769_v26, %v4768_v28 }
 0x222   : > { %5601 = vmatprep.mubr.msk.bf16.mxu1 %vm4431_vm5, %v4393_v46 }
 0x228   : > { %v4394_v16 = vld [vmem:[#allocation3 + $0x78] sm:$0xff] }
 0x229   : > { %5602 = vmatmul.mubr.msk.bf16.gmra.mrb[12].mxu1 %vm4431_vm5, %v4394_v16 }
 0x24c   : > { %v5587_v61 = vpop.f32.mrb[12].mxu0 }
 0x24d   : > { %v5445_v56 = vpack.c.bf16 %v5587_v61, %v5587_v61  ;;  %v4566_v48 = vpop.f32.mrb[13].mxu0  ;;  %v4730_v10 = vmul.f32 %v5587_v61, %v5587_v61  ;;  %v4672_v50 = vsel %vm1166_vm9, %v5587_v61, 0.0 }
 0x24e   : > { %v4668_v40 = vsel %vm1166_vm9, %v4566_v48, 0.0  ;;  %v4728_v49 = vmul.f32 %v4566_v48, %v4566_v48  ;;  %v5443_v2 = vpack.c.bf16 %v4566_v48, %v4566_v48  ;;  %v5588_v7 = vpop.f32.mrb[14].mxu0 }
 0x24f   : > { %4960 = vst.msk [vmem:[%s7226_s7 + $0x38] sm:$0xf] %vm474_vm0, %v5445_v56  ;;  %v4669_v39 = vadd.f32 %v4668_v40, %v4667_v17  ;;  %v4569_v53 = vpop.f32.mrb[15].mxu0  ;;  %v5446_v58 = vpack.c.bf16 %v5588_v7, %v5588_v7  ;;  %v4731_v52 = vmul.f32 %v5588_v7, %v5588_v7  ;;  %v4775_v19 = vsel %vm1166_vm9, %v4730_v10, 0.0 }
 0x250   : > { %v4771_v5 = vsel %vm1166_vm9, %v4728_v49, 0.0  ;;  %4958 = vst.msk [vmem:[%s7226_s7 + $0x30] sm:$0xf] %vm474_vm0, %v5443_v2  ;;  %v4670_v21 = vsel %vm1166_vm9, %v4569_v53, 0.0  ;;  %v4729_v18 = vmul.f32 %v4569_v53, %v4569_v53  ;;  %v5444_v32 = vpack.c.bf16 %v4569_v53, %v4569_v53 }
 0x251   : > { %v4772_v6 = vadd.f32 %v4771_v5, %v4770_v27  ;;  %v4671_v51 = vadd.f32 %v4670_v21, %v4669_v39  ;;  %4961 = vst.msk [vmem:[%s7226_s7 + $0x3c] sm:$0xf] %vm474_vm0, %v5446_v58  ;;  %v4674_v35 = vsel %vm1166_vm9, %v5588_v7, 0.0  ;;  %v4777_v14 = vsel %vm1166_vm9, %v4731_v52, 0.0 }
 0x252   : > { %v4773_v31 = vsel %vm1166_vm9, %v4729_v18, 0.0  ;;  %4959 = vst.msk [vmem:[%s7226_s7 + $0x34] sm:$0xf] %vm474_vm0, %v5444_v32 }
 0x253   : > { %v4673_v57 = vadd.f32 %v4672_v50, %v4671_v51  ;;  %v4774_v37 = vadd.f32 %v4773_v31, %v4772_v6 }
 0x255   : > { %v4776_v22 = vadd.f32 %v4775_v19, %v4774_v37  ;;  %v4675_v63 = vadd.f32 %v4674_v35, %v4673_v57 }
 0x257   : > { %v4778_v23 = vadd.f32 %v4777_v14, %v4776_v22 }
 0x27d   : > { %v5591_v41 = vpop.f32.mrb[0].mxu1 }
 0x27e   : > { %v5449_v55 = vpack.c.bf16 %v5591_v41, %v5591_v41  ;;  %v4582_v24 = vpop.f32.mrb[1].mxu1  ;;  %v4734_v62 = vmul.f32 %v5591_v41, %v5591_v41  ;;  %v4680_v3 = vsel %vm1166_vm9, %v5591_v41, 0.0 }
 0x27f   : > { %v4676_v30 = vsel %vm1166_vm9, %v4582_v24, 0.0  ;;  %v4732_v33 = vmul.f32 %v4582_v24, %v4582_v24  ;;  %v5447_v20 = vpack.c.bf16 %v4582_v24, %v4582_v24  ;;  %v5592_v60 = vpop.f32.mrb[2].mxu1 }
 0x280   : > { %4964 = vst.msk [vmem:[%s7226_s7 + $0x48] sm:$0xf] %vm474_vm0, %v5449_v55  ;;  %v4677_v43 = vadd.f32 %v4676_v30, %v4675_v63  ;;  %v4585_v59 = vpop.f32.mrb[3].mxu1  ;;  %v5450_v36 = vpack.c.bf16 %v5592_v60, %v5592_v60  ;;  %v4735_v45 = vmul.f32 %v5592_v60, %v5592_v60  ;;  %v4783_v25 = vsel %vm1166_vm9, %v4734_v62, 0.0 }
 0x281   : > { %v4779_v8 = vsel %vm1166_vm9, %v4732_v33, 0.0  ;;  %4962 = vst.msk [vmem:[%s7226_s7 + $0x40] sm:$0xf] %vm474_vm0, %v5447_v20  ;;  %v4678_v44 = vsel %vm1166_vm9, %v4585_v59, 0.0  ;;  %v4733_v47 = vmul.f32 %v4585_v59, %v4585_v59  ;;  %v5448_v54 = vpack.c.bf16 %v4585_v59, %v4585_v59 }
 0x282   : > { %v4780_v34 = vadd.f32 %v4779_v8, %v4778_v23  ;;  %v4679_v38 = vadd.f32 %v4678_v44, %v4677_v43  ;;  %4965 = vst.msk [vmem:[%s7226_s7 + $0x4c] sm:$0xf] %vm474_vm0, %v5450_v36  ;;  %v4682_v4 = vsel %vm1166_vm9, %v5592_v60, 0.0  ;;  %v4785_v29 = vsel %vm1166_vm9, %v4735_v45, 0.0 }
 0x283   : > { %v4781_v1 = vsel %vm1166_vm9, %v4733_v47, 0.0  ;;  %4963 = vst.msk [vmem:[%s7226_s7 + $0x44] sm:$0xf] %vm474_vm0, %v5448_v54 }
 0x284   : > { %v4681_v9 = vadd.f32 %v4680_v3, %v4679_v38  ;;  %v4782_v11 = vadd.f32 %v4781_v1, %v4780_v34 }
 0x286   : > { %v4784_v13 = vadd.f32 %v4783_v25, %v4782_v11  ;;  %v4683_v42 = vadd.f32 %v4682_v4, %v4681_v9 }
 0x288   : > { %v4786_v15 = vadd.f32 %v4785_v29, %v4784_v13 }
 0x29b   : > { %v5595_v0 = vpop.f32.mrb[4].mxu1 }
 0x29c   : > { %v5453_v12 = vpack.c.bf16 %v5595_v0, %v5595_v0  ;;  %v4598_v46 = vpop.f32.mrb[5].mxu1  ;;  %v4738_v16 = vmul.f32 %v5595_v0, %v5595_v0  ;;  %v4688_v53 = vsel %vm1166_vm9, %v5595_v0, 0.0 }
 0x29d   : > { %v4684_v28 = vsel %vm1166_vm9, %v4598_v46, 0.0  ;;  %v4736_v17 = vmul.f32 %v4598_v46, %v4598_v46  ;;  %v5451_v26 = vpack.c.bf16 %v4598_v46, %v4598_v46  ;;  %v5596_v27 = vpop.f32.mrb[6].mxu1 }
 0x29e   : > { %4968 = vst.msk [vmem:[%s7226_s7 + $0x58] sm:$0xf] %vm474_vm0, %v5453_v12  ;;  %v4685_v61 = vadd.f32 %v4684_v28, %v4683_v42  ;;  %v4601_v56 = vpop.f32.mrb[7].mxu1  ;;  %v5454_v40 = vpack.c.bf16 %v5596_v27, %v5596_v27  ;;  %v4739_v5 = vmul.f32 %v5596_v27, %v5596_v27  ;;  %v4791_v6 = vsel %vm1166_vm9, %v4738_v16, 0.0 }
 0x29f   : > { %v4787_v48 = vsel %vm1166_vm9, %v4736_v17, 0.0  ;;  %4966 = vst.msk [vmem:[%s7226_s7 + $0x50] sm:$0xf] %vm474_vm0, %v5451_v26  ;;  %v4686_v49 = vsel %vm1166_vm9, %v4601_v56, 0.0  ;;  %v4737_v2 = vmul.f32 %v4601_v56, %v4601_v56  ;;  %v5452_v39 = vpack.c.bf16 %v4601_v56, %v4601_v56 }
 0x2a0   : > { %v4788_v7 = vadd.f32 %v4787_v48, %v4786_v15  ;;  %v4687_v10 = vadd.f32 %v4686_v49, %v4685_v61  ;;  %4969 = vst.msk [vmem:[%s7226_s7 + $0x5c] sm:$0xf] %vm474_vm0, %v5454_v40  ;;  %v4690_v51 = vsel %vm1166_vm9, %v5596_v27, 0.0  ;;  %v4793_v52 = vsel %vm1166_vm9, %v4739_v5, 0.0 }
 0x2a1   : > { %v4789_v58 = vsel %vm1166_vm9, %v4737_v2, 0.0  ;;  %4967 = vst.msk [vmem:[%s7226_s7 + $0x54] sm:$0xf] %vm474_vm0, %v5452_v39 }
 0x2a2   : > { %v4689_v21 = vadd.f32 %v4688_v53, %v4687_v10  ;;  %v4790_v18 = vadd.f32 %v4789_v58, %v4788_v7 }
 0x2a4   : > { %v4792_v32 = vadd.f32 %v4791_v6, %v4790_v18  ;;  %v4691_v50 = vadd.f32 %v4690_v51, %v4689_v21 }
 0x2a6   : > { %v4794_v31 = vadd.f32 %v4793_v52, %v4792_v32 }
 0x2cd   : > { %v5599_v57 = vpop.f32.mrb[8].mxu1 }
 0x2ce   : > { %v5457_v37 = vpack.c.bf16 %v5599_v57, %v5599_v57  ;;  %v4614_v19 = vpop.f32.mrb[9].mxu1  ;;  %v4742_v23 = vmul.f32 %v5599_v57, %v5599_v57  ;;  %v4696_v59 = vsel %vm1166_vm9, %v5599_v57, 0.0 }
 0x2cf   : > { %v4692_v35 = vsel %vm1166_vm9, %v4614_v19, 0.0  ;;  %v4740_v22 = vmul.f32 %v4614_v19, %v4614_v19  ;;  %v5455_v63 = vpack.c.bf16 %v4614_v19, %v4614_v19  ;;  %v5600_v14 = vpop.f32.mrb[10].mxu1 }
 0x2d0   : > { %4972 = vst.msk [vmem:[%s7226_s7 + $0x68] sm:$0xf] %vm474_vm0, %v5457_v37  ;;  %v4693_v41 = vadd.f32 %v4692_v35, %v4691_v50  ;;  %v4617_v55 = vpop.f32.mrb[11].mxu1  ;;  %v5458_v30 = vpack.c.bf16 %v5600_v14, %v5600_v14  ;;  %v4743_v8 = vmul.f32 %v5600_v14, %v5600_v14  ;;  %v4799_v34 = vsel %vm1166_vm9, %v4742_v23, 0.0 }
 0x2d1   : > { %v4795_v24 = vsel %vm1166_vm9, %v4740_v22, 0.0  ;;  %4970 = vst.msk [vmem:[%s7226_s7 + $0x60] sm:$0xf] %vm474_vm0, %v5455_v63  ;;  %v4694_v33 = vsel %vm1166_vm9, %v4617_v55, 0.0  ;;  %v4741_v20 = vmul.f32 %v4617_v55, %v4617_v55  ;;  %v5456_v43 = vpack.c.bf16 %v4617_v55, %v4617_v55 }
 0x2d2   : > { %v4796_v60 = vadd.f32 %v4795_v24, %v4794_v31  ;;  %v4695_v62 = vadd.f32 %v4694_v33, %v4693_v41  ;;  %4973 = vst.msk [vmem:[%s7226_s7 + $0x6c] sm:$0xf] %vm474_vm0, %v5458_v30  ;;  %v4698_v38 = vsel %vm1166_vm9, %v5600_v14, 0.0  ;;  %v4801_v45 = vsel %vm1166_vm9, %v4743_v8, 0.0 }
 0x2d3   : > { %v4797_v36 = vsel %vm1166_vm9, %v4741_v20, 0.0  ;;  %4971 = vst.msk [vmem:[%s7226_s7 + $0x64] sm:$0xf] %vm474_vm0, %v5456_v43 }
 0x2d4   : > { %v4697_v44 = vadd.f32 %v4696_v59, %v4695_v62  ;;  %v4798_v47 = vadd.f32 %v4797_v36, %v4796_v60 }
 0x2d6   : > { %v4800_v54 = vadd.f32 %v4799_v34, %v4798_v47  ;;  %v4699_v3 = vadd.f32 %v4698_v38, %v4697_v44 }
 0x2d8   : > { %v4802_v1 = vadd.f32 %v4801_v45, %v4800_v54 }
 0x2fc   : > { %v5603_v9 = vpop.f32.mrb[12].mxu1 }
 0x2fd   : > { %v5461_v11 = vpack.c.bf16 %v5603_v9, %v5603_v9  ;;  %v4630_v25 = vpop.f32.mrb[13].mxu1  ;;  %v4746_v15 = vmul.f32 %v5603_v9, %v5603_v9  ;;  %v4704_v56 = vsel %vm1166_vm9, %v5603_v9, 0.0 }
 0x2fe   : > { %v4700_v4 = vsel %vm1166_vm9, %v4630_v25, 0.0  ;;  %v4744_v13 = vmul.f32 %v4630_v25, %v4630_v25  ;;  %v5459_v42 = vpack.c.bf16 %v4630_v25, %v4630_v25  ;;  %v5604_v29 = vpop.f32.mrb[14].mxu1 }
 0x2ff   : > { %4976 = vst.msk [vmem:[%s7226_s7 + $0x78] sm:$0xf] %vm474_vm0, %v5461_v11  ;;  %v4701_v0 = vadd.f32 %v4700_v4, %v4699_v3  ;;  %v4633_v12 = vpop.f32.mrb[15].mxu1  ;;  %v5462_v28 = vpack.c.bf16 %v5604_v29, %v5604_v29  ;;  %v4747_v48 = vmul.f32 %v5604_v29, %v5604_v29  ;;  %v4807_v7 = vsel %vm1166_vm9, %v4746_v15, 0.0 }
 0x300   : > { %v4803_v46 = vsel %vm1166_vm9, %v4744_v13, 0.0  ;;  %4974 = vst.msk [vmem:[%s7226_s7 + $0x70] sm:$0xf] %vm474_vm0, %v5459_v42  ;;  %v4702_v17 = vsel %vm1166_vm9, %v4633_v12, 0.0  ;;  %v4745_v26 = vmul.f32 %v4633_v12, %v4633_v12  ;;  %v5460_v61 = vpack.c.bf16 %v4633_v12, %v4633_v12 }
 0x301   : > { %v4804_v27 = vadd.f32 %v4803_v46, %v4802_v1  ;;  %v4703_v16 = vadd.f32 %v4702_v17, %v4701_v0  ;;  %4977 = vst.msk [vmem:[%s7226_s7 + $0x7c] sm:$0xf] %vm474_vm0, %v5462_v28  ;;  %v4706_v10 = vsel %vm1166_vm9, %v5604_v29, 0.0  ;;  %v4809_v5 = vsel %vm1166_vm9, %v4747_v48, 0.0 }
 0x302   : > { %v4805_v40 = vsel %vm1166_vm9, %v4745_v26, 0.0  ;;  %4975 = vst.msk [vmem:[%s7226_s7 + $0x74] sm:$0xf] %vm474_vm0, %v5460_v61 }
 0x303   : > { %v4705_v49 = vadd.f32 %v4704_v56, %v4703_v16  ;;  %v4806_v2 = vadd.f32 %v4805_v40, %v4804_v27 }
 0x305   : > { %v4707_v39 = vadd.f32 %v4706_v10, %v4705_v49  ;;  %v4808_v53 = vadd.f32 %v4807_v7, %v4806_v2 }
 0x307   : > { %v4708_v58 = vrot.slane %v4707_v39, 4  ;;  %v4810_v21 = vadd.f32 %v4809_v5, %v4808_v53 }
 0x309   : > { %v4709_v18 = vadd.f32 %v4708_v58, %v4707_v39  ;;  %v4811_v6 = vrot.slane %v4810_v21, 4 }
 0x30b   : > { %v4710_v51 = vrot.slane %v4709_v18, 2  ;;  %v4812_v32 = vadd.f32 %v4811_v6, %v4810_v21 }
 0x30d   : > { %v4711_v50 = vadd.f32 %v4710_v51, %v4709_v18  ;;  %v4813_v52 = vrot.slane %v4812_v32, 2 }
 0x30f   : > { %v4712_v31 = vrot.slane %v4711_v50, 1  ;;  %v4814_v57 = vadd.f32 %v4813_v52, %v4812_v32 }
 0x311   : > { %v4713_v37 = vadd.f32 %v4712_v31, %v4711_v50  ;;  %v4815_v19 = vrot.slane %v4814_v57, 1 }
 0x313   : > { %4715 = vst.msk [vmem:[%s282_s10] sm:$0x1] %vm493_vm1, %v4713_v37  ;;  %v4816_v35 = vadd.f32 %v4815_v19, %v4814_v57 }
 0x315   : > { %4817 = vst.msk [vmem:[%s282_s10 + $0x1] sm:$0x1] %vm493_vm1, %v4816_v35 }
 0x316 PF: > { %s16_s20 = sadd.s32 1, %s5731_s20   ;;  %s7412_s18 = smov %s5727_s19 }
 0x317   : > { %p13_p5 = scmp.ge.s32.totalorder %s16_s20, 4   ;;  %s7413_s19 = smov %s7415_s21 }
 0x319   :  { %15 = sbr.rel (!%p13_p5) target bundleno = 2 (0x2), region = 81 }

// kernel: double_conv.3
= control target key start
LH: loop header
LB: loop body
LE: loop exit
PB: predicated region body
PF: predicated region fallthrough
CT: control target
= control target key end

     0   :  { %s5515_s18 = smov 0   ;;  %s5517_s19 = smov 0   ;;  %s6859_s0 = inlined_call_operand.vmem [shape: f32[1,4], index: 0, kind: input, shape index: {}]   ;;  %s6860_s1 = inlined_call_operand.vmem [shape: f32[1,4], index: 1, kind: input, shape index: {}]   ;;  %s6861_s2 = inlined_call_operand.vmem [shape: f32[2,256,4], index: 2, kind: input, shape index: {}]   ;;  %s6862_s3 = inlined_call_operand.vmem [shape: bf16[36,8], index: 3, kind: input, shape index: {}]   ;;  %s6863_s4 = inlined_call_operand.vmem [shape: bf16[2,256,8], index: 4, kind: output, shape index: {0}]   ;;  %s6864_s5 = inlined_call_operand.vmem [shape: f32[2,1,2,8], index: 5, kind: output, shape index: {1}]  }
   0x1   :  { %s5519_s0 = smov 0  }
   0x2 LB: > { %s28_s1 = sadd.s32 1, %s5470_s19  ;;  %p4954_p0 = scmp.ge.s32.totalorder %s5474_s0, 1  ;;  %s5474_s0 = sphi %s5519_s0, %s16_s0   ;;  %s5470_s19 = sphi %s5517_s19, %s6872_s19   ;;  %s5466_s18 = sphi %s5515_s18, %s6871_s18  }
   0x3   : > { %p30_p1 = scmp.ge.s32.totalorder %s28_s1, 2  ;;  %p213_p2 = scmp.lt.s32.totalorder %s5474_s0, 3 }
   0x5   : > { %s6874_s1 = smov (%p30_p1, %s28_s1), 0  ;;  %p214_p3 = pnand %p4954_p0, %p213_p2 }
   0x6   : > { %vm332_vm0 = vcmask (!%p214_p3), 27648   ;;  %p257_p4 = scmp.lt.s32.totalorder (!%p214_p3), %s5466_s18, 1  ;;  %vm351_vm1 = vcmask (!%p214_p3), 24576   ;;  %v5476_v0 = vmov (!%p214_p3), 0   ;;  %vm352_vm2 = vsmask.f32 (!%p214_p3), 256 }
   0x7   : > { %217 = sbr.rel (%p214_p3) target bundleno = 761 (0x2f9), region = 36  ;;  %408 = vst.msk [vmem:[#allocation2 + $0x4] sm:$0xf] (!%p214_p3), %vm332_vm0, %v5476_v0  ;;  %409 = vst.msk [vmem:[#allocation2 + $0x8] sm:$0xf] (!%p214_p3), %vm332_vm0, %v5476_v0  ;;  %s5477_s24 = smov (!%p214_p3), 4  }
   0x8   : > { %333 = vst.msk [vmem:[#allocation2] sm:$0xf] (!%p214_p3), %vm332_vm0, %v5476_v0  ;;  %334 = vst.msk [vmem:[#allocation2 + $0x10] sm:$0xf] (!%p214_p3), %vm332_vm0, %v5476_v0  ;;  %v354_v1 = vld [vmem:[#allocation2 + $0xc] sm:$0x1] (!%p214_p3) }
   0x9   : > { %335 = vst.msk [vmem:[#allocation2 + $0x20] sm:$0xf] (!%p214_p3), %vm332_vm0, %v5476_v0  ;;  %336 = vst.msk [vmem:[#allocation2 + $0x30] sm:$0xf] (!%p214_p3), %vm332_vm0, %v5476_v0  ;;  %v357_v4 = vld [vmem:[#allocation2 + $0x1c] sm:$0x1] (!%p214_p3) }
   0xa   : > { %337 = vst.msk [vmem:[#allocation2 + $0x40] sm:$0xf] (!%p214_p3), %vm332_vm0, %v5476_v0  ;;  %338 = vst.msk [vmem:[#allocation2 + $0x50] sm:$0xf] (!%p214_p3), %vm332_vm0, %v5476_v0  ;;  %v360_v5 = vld [vmem:[#allocation2 + $0x2c] sm:$0x1] (!%p214_p3) }
   0xb   : > { %339 = vst.msk [vmem:[#allocation2 + $0x60] sm:$0xf] (!%p214_p3), %vm332_vm0, %v5476_v0  ;;  %340 = vst.msk [vmem:[#allocation2 + $0x70] sm:$0xf] (!%p214_p3), %vm332_vm0, %v5476_v0  ;;  %v363_v8 = vld [vmem:[#allocation2 + $0x3c] sm:$0x1] (!%p214_p3) }
   0xc   : > { %341 = vst.msk [vmem:[#allocation2 + $0x80] sm:$0xf] (!%p214_p3), %vm332_vm0, %v5476_v0  ;;  %342 = vst.msk [vmem:[#allocation2 + $0x90] sm:$0xf] (!%p214_p3), %vm332_vm0, %v5476_v0  ;;  %vm1266_vm4 = vsmask.f32 (!%p214_p3), 3328 }
   0xd   : > { %343 = vst.msk [vmem:[#allocation2 + $0xa0] sm:$0xf] (!%p214_p3), %vm332_vm0, %v5476_v0  ;;  %344 = vst.msk [vmem:[#allocation2 + $0xb0] sm:$0xf] (!%p214_p3), %vm332_vm0, %v5476_v0  ;;  %vm1267_vm5 = vsmask.f32 (!%p214_p3), 7440 }
   0xe   : > { %345 = vst.msk [vmem:[#allocation2 + $0xc0] sm:$0xf] %vm332_vm0, %v5476_v0  ;;  %346 = vst.msk [vmem:[#allocation2 + $0xd0] sm:$0xf] %vm332_vm0, %v5476_v0  ;;  %s6876_s18 = smov (!%p257_p4, %s5466_s18), 1  ;;  %v5401_v19 = vld [vmem:[#allocation2 + $0x4] sm:$0xff]  }
   0xf   : > { %347 = vst.msk [vmem:[#allocation2 + $0xe0] sm:$0xf] %vm332_vm0, %v5476_v0  ;;  %348 = vst.msk [vmem:[#allocation2 + $0xf0] sm:$0xf] %vm332_vm0, %v5476_v0  ;;  %s5237_s20 = sshll.u32 %s6876_s18, 8  ;;  %1153 = vrot.lane.b32.xlu0 %v5401_v19, %s5477_s24  ;;  %s5478_s25 = smov 16  }
  0x10   : > { %349 = vst.msk [vmem:[#allocation2 + $0x100] sm:$0xf] %vm332_vm0, %v5476_v0  ;;  %350 = vst.msk [vmem:[#allocation2 + $0x110] sm:$0xf] %vm332_vm0, %v5476_v0  ;;  %s5575_s23 = scalar_lea.vmem %s6861_s2, %s5237_s20  ;;  %v1218_v23 = vld [vmem:[#allocation2 + $0x4] sm:$0xf] }
  0x11   : > { %411 = vst.msk [vmem:[#allocation2 + $0x114] sm:$0xf] %vm332_vm0, %v5476_v0  ;;  %412 = vst.msk [vmem:[#allocation2 + $0x118] sm:$0xf] %vm332_vm0, %v5476_v0  ;;  %v286_v9 = vld [vmem:[%s5575_s23 + $0x10] sm:$0xff]  ;;  %v287_v10 = vld [vmem:[%s5575_s23 + $0x18] sm:$0xff] }
  0x12   : > { %vm5565_vm3 = vmand %vm351_vm1, %vm352_vm2  ;;  %v284_v11 = vld [vmem:[%s5575_s23] sm:$0xff]  ;;  %v5241_v13 = vpack.c.bf16 %v286_v9, %v286_v9  ;;  %v5242_v14 = vpack.c.bf16 %v287_v10, %v287_v10  ;;  %v285_v15 = vld [vmem:[%s5575_s23 + $0x8] sm:$0xff]  ;;  %v1270_v26 = vshrl.u32 %v1218_v23, 16  ;;  %v1273_v27 = vshll.u32 %v1218_v23, 16  ;;  %s5479_s26 = smov 28   ;;  %s5480_s27 = smov 8  }
  0x13   : > { %v355_v3 = vsel %vm5565_vm3, 0, %v354_v1  ;;  %v358_v6 = vsel %vm5565_vm3, 0, %v357_v4  ;;  %v361_v7 = vsel %vm5565_vm3, 0, %v360_v5  ;;  %v364_v12 = vsel %vm5565_vm3, 0, %v363_v8  ;;  %v288_v17 = vld [vmem:[%s5575_s23 + $0x20] sm:$0xff]  ;;  %v289_v18 = vld [vmem:[%s5575_s23 + $0x28] sm:$0xff]  ;;  %vm5602_vm7 = vmor %vm1266_vm4, %vm1267_vm5 }
  0x14   : > { %356 = vst [vmem:[#allocation2 + $0xc] sm:$0x1] %v355_v3  ;;  %359 = vst [vmem:[#allocation2 + $0x1c] sm:$0x1] %v358_v6  ;;  %v5239_v16 = vpack.c.bf16 %v284_v11, %v284_v11  ;;  %v5240_v20 = vpack.c.bf16 %v285_v15, %v285_v15  ;;  %v5243_v21 = vpack.c.bf16 %v288_v17, %v288_v17  ;;  %v1219_v24 = vld [vmem:[#allocation2 + $0x8] sm:$0xf] }
  0x15   : > { %362 = vst [vmem:[#allocation2 + $0x2c] sm:$0x1] %v361_v7  ;;  %365 = vst [vmem:[#allocation2 + $0x3c] sm:$0x1] %v364_v12  ;;  %v5244_v22 = vpack.c.bf16 %v289_v18, %v289_v18  ;;  %v1766_v25 = vld [vmem:[#allocation2 + $0x10] sm:$0x8] }
  0x16   : > { %528 = vst.msk [vmem:[#allocation2 + $0x24] sm:$0xf] %vm332_vm0, %v5241_v13  ;;  %529 = vst.msk [vmem:[#allocation2 + $0x28] sm:$0xf] %vm332_vm0, %v5242_v14  ;;  %v1279_v28 = vshll.u32 %v1219_v24, 16  ;;  %v1283_v29 = vshrl.u32 %v1219_v24, 16 }
  0x17   : > { %526 = vst.msk [vmem:[#allocation2 + $0x14] sm:$0xf] %vm332_vm0, %v5239_v16  ;;  %527 = vst.msk [vmem:[#allocation2 + $0x18] sm:$0xf] %vm332_vm0, %v5240_v20  ;;  %v1769_v30 = vld [vmem:[#allocation2 + $0x20] sm:$0x8] }
  0x18   : > { %530 = vst.msk [vmem:[#allocation2 + $0x34] sm:$0xf] %vm332_vm0, %v5243_v21  ;;  %531 = vst.msk [vmem:[#allocation2 + $0x38] sm:$0xf] %vm332_vm0, %v5244_v22  ;;  %v1815_v32 = vshrl.u32 %v1766_v25, 16  ;;  %v1837_v33 = vshrl.u32 %v1769_v30, 16 }
  0x19   : > { %v3002_v34 = vld [vmem:[#allocation2 + $0x20] sm:$0x8]  ;;  %v1272_v35 = vrot.slane %v1270_v26, 4  ;;  %v1275_v36 = vrot.slane %v1273_v27, 5  ;;  %v1281_v37 = vrot.slane %v1279_v28, 5  ;;  %v1285_v38 = vrot.slane %v1283_v29, 4 }
  0x1a   : > { %v3005_v39 = vld [vmem:[#allocation2 + $0x30] sm:$0x8]  ;;  %v5596_v41 = vrot.slane %v1815_v32, 11  ;;  %v5598_v42 = vrot.slane %v1837_v33, 11  ;;  %v3051_v43 = vshrl.u32 %v3002_v34, 16  ;;  %s5481_s28 = smov 12  }
  0x1b   : > { %v1220_v31 = vld [vmem:[#allocation2 + $0xc] sm:$0x1]  ;;  %v2458_v44 = vld [vmem:[#allocation2 + $0x1c] sm:$0x1]  ;;  %v1276_v45 = vor.u32 %v1275_v36, %v1272_v35  ;;  %v1286_v46 = vor.u32 %v1285_v38, %v1281_v37  ;;  %v3073_v47 = vshrl.u32 %v3005_v39, 16  ;;  %s5482_s29 = smov 24  }
  0x1c   : > { %v1289_v40 = vshll.u32 %v1220_v31, 16  ;;  %v2524_v48 = vshll.u32 %v2458_v44, 16  ;;  %v1223_v49 = vld [vmem:[#allocation2 + $0x1c] sm:$0x1]  ;;  %v3694_v50 = vld [vmem:[#allocation2 + $0x2c] sm:$0x1] }
  0x1d   : > { %vm606_vm6 = vsmask.f32 4368  ;;  %v5606_v53 = vrot.slane %v3051_v43, 11  ;;  %v1313_v54 = vshll.u32 %v1223_v49, 16  ;;  %v3760_v55 = vshll.u32 %v3694_v50, 16  ;;  %v5402_v56 = vld [vmem:[#allocation2 + $0x24] sm:$0xff]  }
  0x1e   : > { %v1291_v52 = vrot.slane %v1289_v40, 5  ;;  %v1277_v57 = vrot.slane %v1276_v45, 4  ;;  %v5403_v58 = vld [vmem:[#allocation2 + $0x14] sm:$0xff]   ;;  %v1287_v59 = vrot.slane %v1286_v46, 4  ;;  %2393 = vrot.lane.b32.xlu1 %v5402_v56, %s5478_s25  ;;  %v5609_v61 = vrot.slane %v3073_v47, 11  ;;  %v5406_v3 = vld [vmem:[#allocation2 + $0x24] sm:$0xff]   ;;  %vm5627_vm8 = vmor %vm352_vm2, %vm606_vm6 }
  0x1f   : > { %v5404_v60 = vld [vmem:[#allocation2 + $0x34] sm:$0xff]   ;;  %1155 = vrot.lane.b32.xlu0 %v5403_v58, %s5477_s24  ;;  %v5616_v1 = vrot.slane %v2524_v48, 5  ;;  %v5618_v4 = vrot.slane %v1313_v54, 5  ;;  %v5407_v5 = vld [vmem:[#allocation2 + $0x24] sm:$0xff]   ;;  %v5620_v6 = vrot.slane %v3760_v55, 5  ;;  %s5483_s30 = smov 20  }
  0x20   : > { %v5405_v62 = vld [vmem:[#allocation2 + $0x14] sm:$0xff]   ;;  %v1282_v63 = vsel %vm5602_vm7, %v1277_v57, %v1281_v37  ;;  %v1292_v0 = vsel %vm5602_vm7, %v1287_v59, %v1291_v52  ;;  %v1770_v10 = vld [vmem:[#allocation2 + $0x24] sm:$0xf]  ;;  %v1771_v15 = vld [vmem:[#allocation2 + $0x28] sm:$0xf]  ;;  %s5484_s6 = smov 32  }
  0x21   : > { %v5040_v7 = vcombine.low %v1282_v63, %v1292_v0  ;;  %v1767_v8 = vld [vmem:[#allocation2 + $0x14] sm:$0xf]  ;;  %v1768_v9 = vld [vmem:[#allocation2 + $0x18] sm:$0xf]  ;;  %v1842_v16 = vshrl.u32 %v1770_v10, 16  ;;  %v1845_v17 = vshll.u32 %v1770_v10, 16 }
  0x22   : > { %3629 = vrot.lane.b32.xlu1 %v5404_v60, %s5479_s26  ;;  %v1820_v11 = vshrl.u32 %v1767_v8, 16  ;;  %v1823_v12 = vshll.u32 %v1767_v8, 16  ;;  %v1829_v13 = vshrl.u32 %v1768_v9, 16  ;;  %v1832_v14 = vshll.u32 %v1768_v9, 16  ;;  %v3003_v20 = vld [vmem:[#allocation2 + $0x24] sm:$0xf] }
  0x23   : > { %2391 = vrot.lane.b32.xlu0 %v5405_v62, %s5478_s25  ;;  %v1851_v18 = vshrl.u32 %v1771_v15, 16  ;;  %v1854_v19 = vshll.u32 %v1771_v15, 16  ;;  %v3004_v23 = vld [vmem:[#allocation2 + $0x28] sm:$0xf]  ;;  %v3056_v24 = vshrl.u32 %v3003_v20, 16  ;;  %v3059_v25 = vshll.u32 %v3003_v20, 16 }
  0x24   : > { %v1822_v21 = vrot.slane %v1820_v11, 7  ;;  %v1831_v22 = vrot.slane %v1829_v13, 7  ;;  %v1844_v27 = vrot.slane %v1842_v16, 7  ;;  %v3065_v29 = vshrl.u32 %v3004_v23, 16  ;;  %v3006_v39 = vld [vmem:[#allocation2 + $0x34] sm:$0xf] }
  0x25   : > { %v1853_v28 = vrot.slane %v1851_v18, 7  ;;  %v3068_v30 = vshll.u32 %v3004_v23, 16  ;;  %v3058_v34 = vrot.slane %v3056_v24, 7  ;;  %v3007_v46 = vld [vmem:[#allocation2 + $0x38] sm:$0xf]  ;;  %v3078_v56 = vshrl.u32 %v3006_v39, 16 }
  0x26   : > { %1157 = vrot.lane.b32.xlu1 %v5406_v3, %s5477_s24  ;;  %v1825_v31 = vor.u32 %v1823_v12, %v1822_v21  ;;  %v1827_v32 = vrot.slane %v1822_v21, 4  ;;  %v1834_v33 = vor.u32 %v1832_v14, %v1831_v22  ;;  %v1847_v35 = vor.u32 %v1845_v17, %v1844_v27  ;;  %v2456_v47 = vld [vmem:[#allocation2 + $0x14] sm:$0xf]  ;;  %v1222_v63 = vld [vmem:[#allocation2 + $0x18] sm:$0xf]  ;;  %s5238_s13 = sshll.u32 %s6876_s18, 7 }
  0x27   : > { %3627 = vrot.lane.b32.xlu0 %v5407_v5, %s5479_s26  ;;  %v1849_v36 = vrot.slane %v1844_v27, 4  ;;  %v1856_v37 = vor.u32 %v1854_v19, %v1853_v28  ;;  %v3067_v38 = vrot.slane %v3065_v29, 7  ;;  %v3061_v44 = vor.u32 %v3059_v25, %v3058_v34  ;;  %v1221_v58 = vld [vmem:[#allocation2 + $0x14] sm:$0xf]  ;;  %v3692_v15 = vld [vmem:[#allocation2 + $0x24] sm:$0xf]  ;;  %s6692_s16 = scalar_lea.vmem %s6863_s4, %s5238_s13 }
  0x28   : > { %v1826_v40 = vsel %vm5627_vm8, %v5596_v41, %v1825_v31  ;;  %v1835_v43 = vsel %vm5627_vm8, %v1827_v32, %v1834_v33  ;;  %v3063_v45 = vrot.slane %v3058_v34, 4  ;;  %v1848_v49 = vsel %vm5627_vm8, %v5598_v42, %v1847_v35  ;;  %v2457_v41 = vld [vmem:[#allocation2 + $0x18] sm:$0xf]  ;;  %v3693_v28 = vld [vmem:[#allocation2 + $0x28] sm:$0xf]  ;;  %s4959_s17 = sshll.u32 %s6876_s18, 1 }
  0x29   : > { %v5072_v48 = vcombine.low %v1826_v40, %v1835_v43  ;;  %v1857_v50 = vsel %vm5627_vm8, %v1849_v36, %v1856_v37  ;;  %v3070_v52 = vor.u32 %v3068_v30, %v3067_v38  ;;  %v3062_v55 = vsel %vm5627_vm8, %v5606_v53, %v3061_v44  ;;  %v2459_v34 = vld [vmem:[#allocation2 + $0x24] sm:$0xf]  ;;  %v2460_v44 = vld [vmem:[#allocation2 + $0x28] sm:$0xf]  ;;  %s282_s22 = scalar_lea.vmem %s6864_s5, %s4959_s17 }
  0x2a   : > { %1701 = vrot.lane.b32.xlu1 %v5040_v7, %s5480_s27  ;;  %v5073_v54 = vcombine.low %v1848_v49, %v1857_v50  ;;  %v3081_v57 = vshll.u32 %v3006_v39, 16  ;;  %v3087_v42 = vshrl.u32 %v3007_v46, 16  ;;  %v3090_v60 = vshll.u32 %v3007_v46, 16 }
  0x2b   : > { %2214 = vrot.lane.b32.xlu0 %v5072_v48, %s5481_s28  ;;  %v3071_v59 = vsel %vm5627_vm8, %v3063_v45, %v3070_v52  ;;  %v2505_v62 = vshrl.u32 %v2456_v47, 16  ;;  %v3080_v3 = vrot.slane %v3078_v56, 7  ;;  %v2508_v5 = vshll.u32 %v2456_v47, 16  ;;  %v2461_v45 = vld [vmem:[#allocation2 + $0x2c] sm:$0x1] }
  0x2c   : > { %v5136_v0 = vcombine.low %v3062_v55, %v3071_v59  ;;  %v2514_v7 = vshll.u32 %v2457_v41, 16  ;;  %v3089_v53 = vrot.slane %v3087_v42, 7  ;;  %v2518_v9 = vshrl.u32 %v2457_v41, 16  ;;  %v3695_v59 = vld [vmem:[#allocation2 + $0x34] sm:$0xf] }
  0x2d   : > { %v2507_v8 = vrot.slane %v2505_v62, 4  ;;  %v1294_v10 = vshrl.u32 %v1221_v58, 16  ;;  %v3083_v11 = vor.u32 %v3081_v57, %v3080_v3  ;;  %v3085_v12 = vrot.slane %v3080_v3, 4 }
  0x2e   : > { %2216 = vrot.lane.b32.xlu1 %v5073_v54, %s5481_s28  ;;  %v2510_v13 = vrot.slane %v2508_v5, 5  ;;  %v2516_v14 = vrot.slane %v2514_v7, 5  ;;  %v3092_v16 = vor.u32 %v3090_v60, %v3089_v53  ;;  %v2520_v17 = vrot.slane %v2518_v9, 4  ;;  %v3696_v7 = vld [vmem:[#allocation2 + $0x38] sm:$0xf] }
  0x2f   : > { %3450 = vrot.lane.b32.xlu0 %v5136_v0, %s5482_s29  ;;  %v1296_v18 = vrot.slane %v1294_v10, 4  ;;  %v1297_v19 = vshll.u32 %v1221_v58, 16  ;;  %v3084_v20 = vsel %vm5627_vm8, %v5609_v61, %v3083_v11  ;;  %v1303_v22 = vshll.u32 %v1222_v63, 16 }
  0x30   : > { %v2511_v21 = vor.u32 %v2510_v13, %v2507_v8  ;;  %v1307_v23 = vshrl.u32 %v1222_v63, 16  ;;  %v3093_v24 = vsel %vm5627_vm8, %v3085_v12, %v3092_v16  ;;  %v2521_v25 = vor.u32 %v2520_v17, %v2516_v14 }
  0x31   : > { %v1299_v27 = vrot.slane %v1297_v19, 5  ;;  %v3741_v29 = vshrl.u32 %v3692_v15, 16  ;;  %v5137_v30 = vcombine.low %v3084_v20, %v3093_v24  ;;  %v1305_v32 = vrot.slane %v1303_v22, 5  ;;  %v1225_v24 = vld [vmem:[#allocation2 + $0x28] sm:$0xf] }
  0x32   : > { %v2512_v31 = vrot.slane %v2511_v21, 4  ;;  %v1309_v33 = vrot.slane %v1307_v23, 4  ;;  %v2522_v35 = vrot.slane %v2521_v25, 4  ;;  %v3744_v38 = vshll.u32 %v3692_v15, 16  ;;  %v1224_v15 = vld [vmem:[#allocation2 + $0x24] sm:$0xf] }
  0x33   : > { %v1300_v36 = vor.u32 %v1299_v27, %v1296_v18  ;;  %v3743_v37 = vrot.slane %v3741_v29, 4  ;;  %3452 = vrot.lane.b32.xlu1 %v5137_v30, %s5482_s29  ;;  %v3750_v40 = vshll.u32 %v3693_v28, 16  ;;  %v3754_v43 = vshrl.u32 %v3693_v28, 16 }
  0x34   : > { %v2517_v61 = vsel %vm5602_vm7, %v2512_v31, %v2516_v14  ;;  %v1310_v39 = vor.u32 %v1309_v33, %v1305_v32  ;;  %v2527_v46 = vsel %vm5602_vm7, %v2522_v35, %v5616_v1  ;;  %v3746_v48 = vrot.slane %v3744_v38, 5 }
  0x35   : > { %v1301_v47 = vrot.slane %v1300_v36, 4  ;;  %v2529_v49 = vshrl.u32 %v2459_v34, 16  ;;  %v5104_v50 = vcombine.low %v2517_v61, %v2527_v46  ;;  %v3752_v41 = vrot.slane %v3750_v40, 5 }
  0x36   : > { %v1311_v52 = vrot.slane %v1310_v39, 4  ;;  %v3756_v54 = vrot.slane %v3754_v43, 4  ;;  %v3747_v56 = vor.u32 %v3746_v48, %v3743_v37  ;;  %v2532_v58 = vshll.u32 %v2459_v34, 16  ;;  %v1227_v34 = vld [vmem:[#allocation2 + $0x34] sm:$0xf] }
  0x37   : > { %v1306_v55 = vsel %vm5602_vm7, %v1301_v47, %v1305_v32  ;;  %v2531_v57 = vrot.slane %v2529_v49, 4  ;;  %2936 = vrot.lane.b32.xlu0 %v5104_v50, %s5483_s30  ;;  %v2538_v60 = vshll.u32 %v2460_v44, 16  ;;  %v2542_v62 = vshrl.u32 %v2460_v44, 16  ;;  %v1226_v32 = vld [vmem:[#allocation2 + $0x2c] sm:$0x1] }
  0x38   : > { %v1316_v1 = vsel %vm5602_vm7, %v1311_v52, %v5618_v4  ;;  %v3757_v42 = vor.u32 %v3756_v54, %v3752_v41  ;;  %v3748_v0 = vrot.slane %v3747_v56, 4  ;;  %v2534_v3 = vrot.slane %v2532_v58, 5  ;;  %v3697_v4 = vld [vmem:[#allocation2 + $0x3c] sm:$0x1]  ;;  %v1228_v44 = vld [vmem:[#allocation2 + $0x38] sm:$0xf] }
  0x39   : > { %v5041_v63 = vcombine.low %v1306_v55, %v1316_v1  ;;  %v2548_v5 = vshll.u32 %v2461_v45, 16  ;;  %v2540_v8 = vrot.slane %v2538_v60, 5  ;;  %v2544_v9 = vrot.slane %v2542_v62, 4  ;;  %v5408_v52 = vld [vmem:[#allocation2 + $0x34] sm:$0xff]   ;;  %v1229_v54 = vld [vmem:[#allocation2 + $0x3c] sm:$0x1] }
  0x3a   : > { %v3758_v53 = vrot.slane %v3757_v42, 4  ;;  %v3765_v10 = vshrl.u32 %v3695_v59, 16  ;;  %v3753_v11 = vsel %vm5602_vm7, %v3748_v0, %v3752_v41  ;;  %v2535_v12 = vor.u32 %v2534_v3, %v2531_v57  ;;  %v1772_v1 = vld [vmem:[#allocation2 + $0x30] sm:$0x8]  ;;  %v1773_v0 = vld [vmem:[#allocation2 + $0x34] sm:$0xf] }
  0x3b   : > { %1703 = vrot.lane.b32.xlu1 %v5041_v63, %s5480_s27  ;;  %v2550_v13 = vrot.slane %v2548_v5, 5  ;;  %v3768_v14 = vshll.u32 %v3695_v59, 16  ;;  %v2545_v17 = vor.u32 %v2544_v9, %v2540_v8  ;;  %v3774_v19 = vshll.u32 %v3696_v7, 16 }
  0x3c   : > { %v3763_v16 = vsel %vm5602_vm7, %v3758_v53, %v5620_v6  ;;  %v3767_v18 = vrot.slane %v3765_v10, 4  ;;  %v2536_v21 = vrot.slane %v2535_v12, 4  ;;  %v3778_v23 = vshrl.u32 %v3696_v7, 16 }
  0x3d   : > { %v5168_v20 = vcombine.low %v3753_v11, %v3763_v16  ;;  %v3770_v22 = vrot.slane %v3768_v14, 5  ;;  %v2546_v25 = vrot.slane %v2545_v17, 4  ;;  %v3776_v27 = vrot.slane %v3774_v19, 5 }
  0x3e   : > { %v3784_v28 = vshll.u32 %v3697_v4, 16  ;;  %v1318_v29 = vshrl.u32 %v1224_v15, 16  ;;  %v2541_v30 = vsel %vm5602_vm7, %v2536_v21, %v2540_v8  ;;  %v3780_v6 = vrot.slane %v3778_v23, 4  ;;  %v1774_v8 = vld [vmem:[#allocation2 + $0x38] sm:$0xf] }
  0x3f   : > { %4172 = vrot.lane.b32.xlu0 %v5168_v20, %s5484_s6  ;;  %v3771_v31 = vor.u32 %v3770_v22, %v3767_v18  ;;  %v1321_v33 = vshll.u32 %v1224_v15, 16  ;;  %v2551_v35 = vsel %vm5602_vm7, %v2546_v25, %v2550_v13  ;;  %v1327_v38 = vshll.u32 %v1225_v24, 16  ;;  %v290_v13 = vld [vmem:[%s5575_s23 + $0x30] sm:$0xff]  ;;  %v291_v21 = vld [vmem:[%s5575_s23 + $0x38] sm:$0xff]  ;;  %v1775_v22 = vld [vmem:[#allocation2 + $0x40] sm:$0x8] }
  0x40   : > { %v3786_v36 = vrot.slane %v3784_v28, 5  ;;  %v1320_v37 = vrot.slane %v1318_v29, 4  ;;  %v5105_v61 = vcombine.low %v2541_v30, %v2551_v35  ;;  %v3781_v40 = vor.u32 %v3780_v6, %v3776_v27  ;;  %v2462_v28 = vld [vmem:[#allocation2 + $0x34] sm:$0xf]  ;;  %v2463_v29 = vld [vmem:[#allocation2 + $0x38] sm:$0xf] }
  0x41   : > { %v3772_v39 = vrot.slane %v3771_v31, 4  ;;  %v1323_v43 = vrot.slane %v1321_v33, 5  ;;  %v1329_v45 = vrot.slane %v1327_v38, 5  ;;  %v1331_v46 = vshrl.u32 %v1225_v24, 16  ;;  %v2464_v33 = vld [vmem:[#allocation2 + $0x3c] sm:$0x1] }
  0x42   : > { %v1337_v47 = vshll.u32 %v1226_v32, 16  ;;  %v1342_v48 = vshrl.u32 %v1227_v34, 16  ;;  %2938 = vrot.lane.b32.xlu1 %v5105_v61, %s5483_s30  ;;  %v3782_v50 = vrot.slane %v3781_v40, 4  ;;  %v1345_v55 = vshll.u32 %v1227_v34, 16  ;;  %v366_v34 = vld [vmem:[#allocation2 + $0x4c] sm:$0x1] }
  0x43   : > { %v3777_v49 = vsel %vm5602_vm7, %v3772_v39, %v3776_v27  ;;  %v1324_v41 = vor.u32 %v1323_v43, %v1320_v37  ;;  %v1333_v56 = vrot.slane %v1331_v46, 4  ;;  %v1351_v59 = vshll.u32 %v1228_v44, 16  ;;  %v3008_v61 = vld [vmem:[#allocation2 + $0x40] sm:$0x8] }
  0x44   : > { %v1339_v57 = vrot.slane %v1337_v47, 5  ;;  %v1344_v58 = vrot.slane %v1342_v48, 4  ;;  %v3787_v42 = vsel %vm5602_vm7, %v3782_v50, %v3786_v36  ;;  %v1347_v62 = vrot.slane %v1345_v55, 5  ;;  %v292_v39 = vld [vmem:[%s5575_s23 + $0x40] sm:$0xff]  ;;  %v5704_v50 = vld [vmem:[#allocation2 + $0x50] sm:$0x8] }
  0x45   : > { %v1325_v60 = vrot.slane %v1324_v41, 4  ;;  %v1355_v63 = vshrl.u32 %v1228_v44, 16  ;;  %v5169_v3 = vcombine.low %v3777_v49, %v3787_v42  ;;  %v1334_v5 = vor.u32 %v1333_v56, %v1329_v45  ;;  %v293_v56 = vld [vmem:[%s5575_s23 + $0x48] sm:$0xff] }
  0x46   : > { %v1353_v7 = vrot.slane %v1351_v59, 5  ;;  %v1361_v53 = vshll.u32 %v1229_v54, 16  ;;  %1159 = vrot.lane.b32.xlu1 %v5408_v52, %s5477_s24  ;;  %v1348_v10 = vor.u32 %v1347_v62, %v1344_v58  ;;  %v1859_v12 = vshrl.u32 %v1772_v1, 16 }
  0x47   : > { %v1330_v9 = vsel %vm5602_vm7, %v1325_v60, %v1329_v45  ;;  %v1357_v11 = vrot.slane %v1355_v63, 4  ;;  %4174 = vrot.lane.b32.xlu0 %v5169_v3, %s5484_s6  ;;  %v1335_v4 = vrot.slane %v1334_v5, 4  ;;  %v1864_v15 = vshrl.u32 %v1773_v0, 16  ;;  %v294_v60 = vld [vmem:[%s5575_s23 + $0x50] sm:$0xff]  ;;  %v295_v5 = vld [vmem:[%s5575_s23 + $0x58] sm:$0xff] }
  0x48   : > { %v1363_v14 = vrot.slane %v1361_v53, 5  ;;  %v1867_v16 = vshll.u32 %v1773_v0, 16  ;;  %v1349_v17 = vrot.slane %v1348_v10, 4  ;;  %v5058_v19 = vrot.slane %v1859_v12, 11  ;;  %v5409_v53 = vld [vmem:[#allocation2 + $0x34] sm:$0xff]   ;;  %v297_v12 = vld [vmem:[%s5575_s23 + $0x68] sm:$0xff] }
  0x49   : > { %v1358_v18 = vor.u32 %v1357_v11, %v1353_v7  ;;  %v1873_v20 = vshrl.u32 %v1774_v8, 16  ;;  %v1340_v23 = vsel %vm5602_vm7, %v1335_v4, %v1339_v57  ;;  %v1866_v24 = vrot.slane %v1864_v15, 7  ;;  %v369_v57 = vld [vmem:[#allocation2 + $0x5c] sm:$0x1] }
  0x4a   : > { %v1876_v25 = vshll.u32 %v1774_v8, 16  ;;  %v5245_v27 = vpack.c.bf16 %v290_v13, %v290_v13  ;;  %v5042_v30 = vcombine.low %v1330_v9, %v1340_v23  ;;  %v1354_v31 = vsel %vm5602_vm7, %v1349_v17, %v1353_v7  ;;  %v296_v7 = vld [vmem:[%s5575_s23 + $0x60] sm:$0xff]  ;;  %v298_v13 = vld [vmem:[%s5575_s23 + $0x70] sm:$0xff] }
  0x4b   : > { %v1359_v6 = vrot.slane %v1358_v18, 4  ;;  %v1875_v32 = vrot.slane %v1873_v20, 7  ;;  %v1869_v35 = vor.u32 %v1867_v16, %v1866_v24  ;;  %v1871_v36 = vrot.slane %v1866_v24, 4 }
  0x4c   : > { %v5246_v37 = vpack.c.bf16 %v291_v21, %v291_v21  ;;  %532 = vst.msk [vmem:[#allocation2 + $0x44] sm:$0xf] %vm332_vm0, %v5245_v27  ;;  %v1881_v38 = vshrl.u32 %v1775_v22, 16  ;;  %1705 = vrot.lane.b32.xlu0 %v5042_v30, %s5480_s27  ;;  %v2553_v44 = vshrl.u32 %v2462_v28, 16  ;;  %v2556_v45 = vshll.u32 %v2462_v28, 16 }
  0x4d   : > { %v1364_v40 = vsel %vm5602_vm7, %v1359_v6, %v1363_v14  ;;  %v1878_v43 = vor.u32 %v1876_v25, %v1875_v32  ;;  %v1870_v47 = vsel %vm5627_vm8, %v5058_v19, %v1869_v35  ;;  %v2562_v49 = vshll.u32 %v2463_v29, 16 }
  0x4e   : > { %v5043_v46 = vcombine.low %v1354_v31, %v1364_v40  ;;  %533 = vst.msk [vmem:[#allocation2 + $0x48] sm:$0xf] %vm332_vm0, %v5246_v37  ;;  %v5702_v48 = vrot.slane %v1881_v38, 11  ;;  %v2555_v41 = vrot.slane %v2553_v44, 4  ;;  %v2558_v54 = vrot.slane %v2556_v45, 5 }
  0x4f   : > { %v1879_v52 = vsel %vm5627_vm8, %v1871_v36, %v1878_v43  ;;  %v2566_v55 = vshrl.u32 %v2463_v29, 16  ;;  %v2564_v59 = vrot.slane %v2562_v49, 5  ;;  %v2572_v1 = vshll.u32 %v2464_v33, 16 }
  0x50   : > { %1707 = vrot.lane.b32.xlu1 %v5043_v46, %s5480_s27  ;;  %v5074_v58 = vcombine.low %v1870_v47, %v1879_v52  ;;  %v367_v42 = vsel %vm5565_vm3, 0, %v366_v34  ;;  %v2559_v62 = vor.u32 %v2558_v54, %v2555_v41  ;;  %v3095_v0 = vshrl.u32 %v3008_v61, 16 }
  0x51   : > { %v2568_v63 = vrot.slane %v2566_v55, 4  ;;  %368 = vst [vmem:[#allocation2 + $0x4c] sm:$0x1] %v367_v42  ;;  %v5247_v3 = vpack.c.bf16 %v292_v39, %v292_v39  ;;  %v2574_v8 = vrot.slane %v2572_v1, 5  ;;  %v5248_v9 = vpack.c.bf16 %v293_v56, %v293_v56 }
  0x52   : > { %2218 = vrot.lane.b32.xlu0 %v5074_v58, %s5481_s28  ;;  %v3117_v10 = vshrl.u32 %v5704_v50, 16  ;;  %v370_v11 = vsel %vm5565_vm3, 0, %v369_v57  ;;  %v2560_v14 = vrot.slane %v2559_v62, 4  ;;  %v5721_v16 = vrot.slane %v3095_v0, 11 }
  0x53   : > { %v1776_v4 = vld [vmem:[#allocation2 + $0x44] sm:$0xf]  ;;  %v2569_v15 = vor.u32 %v2568_v63, %v2564_v59  ;;  %534 = vst.msk [vmem:[#allocation2 + $0x54] sm:$0xf] %vm332_vm0, %v5247_v3  ;;  %371 = vst [vmem:[#allocation2 + $0x5c] sm:$0x1] %v370_v11  ;;  %v5249_v17 = vpack.c.bf16 %v294_v60, %v294_v60  ;;  %v5250_v21 = vpack.c.bf16 %v295_v5, %v295_v5 }
  0x54   : > { %v1886_v18 = vshrl.u32 %v1776_v4, 16  ;;  %v1889_v19 = vshll.u32 %v1776_v4, 16  ;;  %v2465_v20 = vld [vmem:[#allocation2 + $0x44] sm:$0xf]  ;;  %535 = vst.msk [vmem:[#allocation2 + $0x58] sm:$0xf] %vm332_vm0, %v5248_v9  ;;  %v5251_v22 = vpack.c.bf16 %v296_v7, %v296_v7  ;;  %v2565_v24 = vsel %vm5602_vm7, %v2560_v14, %v2564_v59 }
  0x55   : > { %v1777_v23 = vld [vmem:[#allocation2 + $0x48] sm:$0xf]  ;;  %v2570_v25 = vrot.slane %v2569_v15, 4  ;;  %v3009_v27 = vld [vmem:[#allocation2 + $0x44] sm:$0xf]  ;;  %v5252_v28 = vpack.c.bf16 %v297_v12, %v297_v12  ;;  %v5253_v29 = vpack.c.bf16 %v298_v13, %v298_v13  ;;  %v2577_v33 = vshrl.u32 %v2465_v20, 16 }
  0x56   : > { %536 = vst.msk [vmem:[#allocation2 + $0x64] sm:$0xf] %vm332_vm0, %v5249_v17  ;;  %v1888_v30 = vrot.slane %v1886_v18, 7  ;;  %v1895_v31 = vshrl.u32 %v1777_v23, 16  ;;  %v1898_v6 = vshll.u32 %v1777_v23, 16  ;;  %2395 = vrot.lane.b32.xlu0 %v5409_v53, %s5478_s25  ;;  %v2580_v35 = vshll.u32 %v2465_v20, 16 }
  0x57   : > { %v2466_v32 = vld [vmem:[#allocation2 + $0x48] sm:$0xf]  ;;  %537 = vst.msk [vmem:[#allocation2 + $0x68] sm:$0xf] %vm332_vm0, %v5250_v21  ;;  %538 = vst.msk [vmem:[#allocation2 + $0x74] sm:$0xf] %vm332_vm0, %v5251_v22  ;;  %v2575_v34 = vsel %vm5602_vm7, %v2570_v25, %v2574_v8 }
  0x58   : > { %v2586_v36 = vshll.u32 %v2466_v32, 16  ;;  %v2590_v37 = vshrl.u32 %v2466_v32, 16  ;;  %v3010_v38 = vld [vmem:[#allocation2 + $0x48] sm:$0xf]  ;;  %539 = vst.msk [vmem:[#allocation2 + $0x78] sm:$0xf] %vm332_vm0, %v5252_v28  ;;  %v1891_v61 = vor.u32 %v1889_v19, %v1888_v30  ;;  %v5106_v43 = vcombine.low %v2565_v24, %v2575_v34 }
  0x59   : > { %540 = vst.msk [vmem:[#allocation2 + $0x84] sm:$0xf] %vm332_vm0, %v5253_v29  ;;  %v1893_v39 = vrot.slane %v1888_v30, 4  ;;  %v1897_v40 = vrot.slane %v1895_v31, 7  ;;  %v2467_v44 = vld [vmem:[#allocation2 + $0x4c] sm:$0x1] }
  0x5a   : > { %v2579_v45 = vrot.slane %v2577_v33, 4  ;;  %v2582_v46 = vrot.slane %v2580_v35, 5  ;;  %v2588_v47 = vrot.slane %v2586_v36, 5  ;;  %v2592_v49 = vrot.slane %v2590_v37, 4  ;;  %2940 = vrot.lane.b32.xlu0 %v5106_v43, %s5483_s30  ;;  %v3012_v1 = vld [vmem:[#allocation2 + $0x54] sm:$0xf] }
  0x5b   : > { %v1892_v52 = vsel %vm5627_vm8, %v5702_v48, %v1891_v61  ;;  %v1900_v41 = vor.u32 %v1898_v6, %v1897_v40  ;;  %v2596_v54 = vshll.u32 %v2467_v44, 16  ;;  %v3100_v55 = vshrl.u32 %v3009_v27, 16  ;;  %v3013_v7 = vld [vmem:[#allocation2 + $0x58] sm:$0xf]  ;;  %v3698_v12 = vld [vmem:[#allocation2 + $0x44] sm:$0xf] }
  0x5c   : > { %v2583_v56 = vor.u32 %v2582_v46, %v2579_v45  ;;  %v2593_v57 = vor.u32 %v2592_v49, %v2588_v47  ;;  %v3103_v58 = vshll.u32 %v3009_v27, 16  ;;  %v3109_v59 = vshrl.u32 %v3010_v38, 16  ;;  %v5410_v13 = vld [vmem:[#allocation2 + $0x44] sm:$0xff]   ;;  %v3700_v21 = vld [vmem:[#allocation2 + $0x4c] sm:$0x1] }
  0x5d   : > { %v1901_v42 = vsel %vm5627_vm8, %v1893_v39, %v1900_v41  ;;  %v2598_v60 = vrot.slane %v2596_v54, 5  ;;  %v3102_v62 = vrot.slane %v3100_v55, 7  ;;  %v3112_v63 = vshll.u32 %v3010_v38, 16  ;;  %v3699_v20 = vld [vmem:[#allocation2 + $0x48] sm:$0xf] }
  0x5e   : > { %v5075_v0 = vcombine.low %v1892_v52, %v1901_v42  ;;  %v2584_v3 = vrot.slane %v2583_v56, 4  ;;  %v2594_v5 = vrot.slane %v2593_v57, 4  ;;  %v3111_v48 = vrot.slane %v3109_v59, 7  ;;  %v3701_v27 = vld [vmem:[#allocation2 + $0x54] sm:$0xf]  ;;  %v5411_v37 = vld [vmem:[#allocation2 + $0x44] sm:$0xff]  }
  0x5f   : > { %v3105_v53 = vor.u32 %v3103_v58, %v3102_v62  ;;  %v3107_v8 = vrot.slane %v3102_v62, 4  ;;  %v5123_v9 = vrot.slane %v3117_v10, 11  ;;  %v3122_v11 = vshrl.u32 %v3012_v1, 16  ;;  %v3702_v34 = vld [vmem:[#allocation2 + $0x58] sm:$0xf] }
  0x60   : > { %2220 = vrot.lane.b32.xlu1 %v5075_v0, %s5481_s28  ;;  %v2589_v4 = vsel %vm5602_vm7, %v2584_v3, %v2588_v47  ;;  %v2599_v14 = vsel %vm5602_vm7, %v2594_v5, %v2598_v60  ;;  %v3114_v15 = vor.u32 %v3112_v63, %v3111_v48  ;;  %v3125_v17 = vshll.u32 %v3012_v1, 16  ;;  %v3703_v61 = vld [vmem:[#allocation2 + $0x5c] sm:$0x1]  ;;  %v1230_v46 = vld [vmem:[#allocation2 + $0x44] sm:$0xf] }
  0x61   : > { %v5107_v18 = vcombine.low %v2589_v4, %v2599_v14  ;;  %v3106_v19 = vsel %vm5627_vm8, %v5721_v16, %v3105_v53  ;;  %v3124_v50 = vrot.slane %v3122_v11, 7  ;;  %v3131_v10 = vshrl.u32 %v3013_v7, 16  ;;  %v1231_v58 = vld [vmem:[#allocation2 + $0x48] sm:$0xf]  ;;  %v1232_v60 = vld [vmem:[#allocation2 + $0x4c] sm:$0x1] }
  0x62   : > { %v3115_v22 = vsel %vm5627_vm8, %v3107_v8, %v3114_v15  ;;  %v3134_v23 = vshll.u32 %v3013_v7, 16  ;;  %v3789_v24 = vshrl.u32 %v3698_v12, 16  ;;  %v3792_v25 = vshll.u32 %v3698_v12, 16  ;;  %v1233_v48 = vld [vmem:[#allocation2 + $0x54] sm:$0xf] }
  0x63   : > { %v5138_v28 = vcombine.low %v3106_v19, %v3115_v22  ;;  %v3127_v29 = vor.u32 %v3125_v17, %v3124_v50  ;;  %v3129_v30 = vrot.slane %v3124_v50, 4  ;;  %v3133_v31 = vrot.slane %v3131_v10, 7  ;;  %v1234_v7 = vld [vmem:[#allocation2 + $0x58] sm:$0xf]  ;;  %v1235_v22 = vld [vmem:[#allocation2 + $0x5c] sm:$0x1] }
  0x64   : > { %2397 = vrot.lane.b32.xlu1 %v5410_v13, %s5478_s25  ;;  %v3791_v6 = vrot.slane %v3789_v24, 4  ;;  %v3794_v32 = vrot.slane %v3792_v25, 5  ;;  %v3798_v16 = vshll.u32 %v3699_v20, 16  ;;  %v3802_v33 = vshrl.u32 %v3699_v20, 16  ;;  %v5412_v12 = vld [vmem:[#allocation2 + $0x54] sm:$0xff]  }
  0x65   : > { %3454 = vrot.lane.b32.xlu0 %v5138_v28, %s5482_s29  ;;  %v3128_v35 = vsel %vm5627_vm8, %v5123_v9, %v3127_v29  ;;  %v3136_v36 = vor.u32 %v3134_v23, %v3133_v31  ;;  %v3808_v38 = vshll.u32 %v3700_v21, 16  ;;  %v3813_v39 = vshrl.u32 %v3701_v27, 16  ;;  %v1778_v29 = vld [vmem:[#allocation2 + $0x50] sm:$0x8] }
  0x66   : > { %v3795_v40 = vor.u32 %v3794_v32, %v3791_v6  ;;  %v3800_v43 = vrot.slane %v3798_v16, 5  ;;  %v3804_v44 = vrot.slane %v3802_v33, 4  ;;  %v3816_v45 = vshll.u32 %v3701_v27, 16  ;;  %v1779_v33 = vld [vmem:[#allocation2 + $0x54] sm:$0xf] }
  0x67   : > { %v3137_v47 = vsel %vm5627_vm8, %v3129_v30, %v3136_v36  ;;  %v3810_v49 = vrot.slane %v3808_v38, 5  ;;  %v3815_v52 = vrot.slane %v3813_v39, 4  ;;  %v3822_v41 = vshll.u32 %v3702_v34, 16  ;;  %v5413_v30 = vld [vmem:[#allocation2 + $0x44] sm:$0xff]   ;;  %v1780_v38 = vld [vmem:[#allocation2 + $0x58] sm:$0xf] }
  0x68   : > { %2942 = vrot.lane.b32.xlu1 %v5107_v18, %s5483_s30  ;;  %v5139_v54 = vcombine.low %v3128_v35, %v3137_v47  ;;  %v3796_v55 = vrot.slane %v3795_v40, 4  ;;  %v3805_v56 = vor.u32 %v3804_v44, %v3800_v43  ;;  %v3818_v57 = vrot.slane %v3816_v45, 5  ;;  %v5414_v39 = vld [vmem:[#allocation2 + $0x54] sm:$0xff]   ;;  %v1781_v45 = vld [vmem:[#allocation2 + $0x60] sm:$0x8] }
  0x69   : > { %3631 = vrot.lane.b32.xlu0 %v5411_v37, %s5479_s26  ;;  %v3824_v59 = vrot.slane %v3822_v41, 5  ;;  %v3826_v1 = vshrl.u32 %v3702_v34, 16  ;;  %v3832_v42 = vshll.u32 %v3703_v61, 16  ;;  %v1366_v62 = vshrl.u32 %v1230_v46, 16  ;;  %v1782_v41 = vld [vmem:[#allocation2 + $0x64] sm:$0xf] }
  0x6a   : > { %v3801_v63 = vsel %vm5602_vm7, %v3796_v55, %v3800_v43  ;;  %v3806_v0 = vrot.slane %v3805_v56, 4  ;;  %v3819_v3 = vor.u32 %v3818_v57, %v3815_v52  ;;  %v1369_v5 = vshll.u32 %v1230_v46, 16 }
  0x6b   : > { %v3828_v53 = vrot.slane %v3826_v1, 4  ;;  %v3834_v8 = vrot.slane %v3832_v42, 5  ;;  %v1368_v9 = vrot.slane %v1366_v62, 4  ;;  %v1375_v11 = vshll.u32 %v1231_v58, 16 }
  0x6c   : > { %3456 = vrot.lane.b32.xlu1 %v5139_v54, %s5482_s29  ;;  %v3811_v13 = vsel %vm5602_vm7, %v3806_v0, %v3810_v49  ;;  %v3820_v4 = vrot.slane %v3819_v3, 4  ;;  %v1371_v14 = vrot.slane %v1369_v5, 5  ;;  %v1379_v15 = vshrl.u32 %v1231_v58, 16  ;;  %v5429_v54 = vld [vmem:[%s6862_s3] sm:$0xff]  }
  0x6d   : > { %v5170_v17 = vcombine.low %v3801_v63, %v3811_v13  ;;  %v3829_v18 = vor.u32 %v3828_v53, %v3824_v59  ;;  %v1377_v19 = vrot.slane %v1375_v11, 5  ;;  %v1385_v50 = vshll.u32 %v1232_v60, 16  ;;  %5322 = vmatprep.subr.bf16.mxu0 %v5429_v54  ;;  %v5430_v63 = vld [vmem:[%s6862_s3 + $0x8] sm:$0xff]   ;;  %5360 = vmatprep.subr.bf16.mxu1 %v5429_v54  ;;  %v2468_v11 = vld [vmem:[#allocation2 + $0x54] sm:$0xf] }
  0x6e   : > { %v3825_v10 = vsel %vm5602_vm7, %v3820_v4, %v3824_v59  ;;  %v1372_v20 = vor.u32 %v1371_v14, %v1368_v9  ;;  %v1381_v21 = vrot.slane %v1379_v15, 4  ;;  %v1390_v23 = vshrl.u32 %v1233_v48, 16  ;;  %v1783_v59 = vld [vmem:[#allocation2 + $0x68] sm:$0xf]  ;;  %5323 = vmatpush3.bf16.msra.mxu0 %v5429_v54  ;;  %5363 = vmatpush3.bf16.msra.mxu1 %v5429_v54  ;;  %v2469_v15 = vld [vmem:[#allocation2 + $0x58] sm:$0xf] }
  0x6f   : > { %4176 = vrot.lane.b32.xlu0 %v5170_v17, %s5484_s6  ;;  %v3830_v24 = vrot.slane %v3829_v18, 4  ;;  %v1387_v25 = vrot.slane %v1385_v50, 5  ;;  %v1393_v27 = vshll.u32 %v1233_v48, 16  ;;  %v1399_v28 = vshll.u32 %v1234_v7, 16  ;;  %5324 = vmatprep.subr.bf16.mxu0 %v5430_v63  ;;  %v372_v17 = vld [vmem:[#allocation2 + $0x6c] sm:$0x1] }
  0x70   : > { %3633 = vrot.lane.b32.xlu1 %v5412_v12, %s5479_s26  ;;  %v1373_v31 = vrot.slane %v1372_v20, 4  ;;  %v1382_v6 = vor.u32 %v1381_v21, %v1377_v19  ;;  %v1392_v32 = vrot.slane %v1390_v23, 4  ;;  %v1403_v16 = vshrl.u32 %v1234_v7, 16  ;;  %5361 = vmatprep.subr.bf16.mxu1 %v5430_v63  ;;  %v2470_v20 = vld [vmem:[#allocation2 + $0x5c] sm:$0x1] }
  0x71   : > { %v3835_v34 = vsel %vm5602_vm7, %v3830_v24, %v3834_v8  ;;  %v1395_v35 = vrot.slane %v1393_v27, 5  ;;  %v1401_v36 = vrot.slane %v1399_v28, 5  ;;  %v1409_v37 = vshll.u32 %v1235_v22, 16 }
  0x72   : > { %v5171_v61 = vcombine.low %v3825_v10, %v3835_v34  ;;  %v1378_v40 = vsel %vm5602_vm7, %v1373_v31, %v1377_v19  ;;  %v1383_v43 = vrot.slane %v1382_v6, 4  ;;  %v1405_v44 = vrot.slane %v1403_v16, 4  ;;  %5325 = vmatpush3.bf16.msra.mxu0 %v5430_v63  ;;  %5364 = vmatpush3.bf16.msra.mxu1 %v5430_v63 }
  0x73   : > { %v1396_v46 = vor.u32 %v1395_v35, %v1392_v32  ;;  %v1411_v47 = vrot.slane %v1409_v37, 5  ;;  %v1903_v49 = vshrl.u32 %v1778_v29, 16  ;;  %v1908_v52 = vshrl.u32 %v1779_v33, 16 }
  0x74   : > { %1161 = vrot.lane.b32.xlu1 %v5413_v30, %s5477_s24  ;;  %4178 = vrot.lane.b32.xlu0 %v5171_v61, %s5484_s6  ;;  %v1388_v55 = vsel %vm5602_vm7, %v1383_v43, %v1387_v25  ;;  %v1406_v56 = vor.u32 %v1405_v44, %v1401_v36  ;;  %v1911_v57 = vshll.u32 %v1779_v33, 16  ;;  %v1917_v58 = vshrl.u32 %v1780_v38, 16  ;;  %v2471_v25 = vld [vmem:[#allocation2 + $0x64] sm:$0xf]  ;;  %v2472_v33 = vld [vmem:[#allocation2 + $0x68] sm:$0xf] }
  0x75   : > { %v5044_v1 = vcombine.low %v1378_v40, %v1388_v55  ;;  %v1397_v42 = vrot.slane %v1396_v46, 4  ;;  %v5060_v60 = vrot.slane %v1903_v49, 11  ;;  %v1910_v62 = vrot.slane %v1908_v52, 7  ;;  %v3014_v44 = vld [vmem:[#allocation2 + $0x60] sm:$0x8] }
  0x76   : > { %v1407_v0 = vrot.slane %v1406_v56, 4  ;;  %v1919_v3 = vrot.slane %v1917_v58, 7  ;;  %v1920_v5 = vshll.u32 %v1780_v38, 16  ;;  %v1925_v48 = vshrl.u32 %v1781_v45, 16  ;;  %v3015_v52 = vld [vmem:[#allocation2 + $0x64] sm:$0xf] }
  0x77   : > { %v1402_v7 = vsel %vm5602_vm7, %v1397_v42, %v1401_v36  ;;  %v1913_v53 = vor.u32 %v1911_v57, %v1910_v62  ;;  %v1915_v8 = vrot.slane %v1910_v62, 4  ;;  %v1930_v9 = vshrl.u32 %v1782_v41, 16  ;;  %v5415_v36 = vld [vmem:[#allocation2 + $0x54] sm:$0xff]   ;;  %v3016_v57 = vld [vmem:[#allocation2 + $0x68] sm:$0xf] }
  0x78   : > { %1163 = vrot.lane.b32.xlu1 %v5414_v39, %s5477_s24  ;;  %1709 = vrot.lane.b32.xlu0 %v5044_v1, %s5480_s27  ;;  %v1412_v12 = vsel %vm5602_vm7, %v1407_v0, %v1411_v47  ;;  %v1922_v13 = vor.u32 %v1920_v5, %v1919_v3  ;;  %v5061_v4 = vrot.slane %v1925_v48, 11  ;;  %v1933_v14 = vshll.u32 %v1782_v41, 16  ;;  %v3017_v58 = vld [vmem:[#allocation2 + $0x70] sm:$0x8]  ;;  %v5416_v62 = vld [vmem:[#allocation2 + $0x64] sm:$0xff]  }
  0x79   : > { %v5045_v18 = vcombine.low %v1402_v7, %v1412_v12  ;;  %v1914_v19 = vsel %vm5627_vm8, %v5060_v60, %v1913_v53  ;;  %v1932_v50 = vrot.slane %v1930_v9, 7  ;;  %v1939_v10 = vshrl.u32 %v1783_v59, 16 }
  0x7a   : > { %v1923_v21 = vsel %vm5627_vm8, %v1915_v8, %v1922_v13  ;;  %v1942_v22 = vshll.u32 %v1783_v59, 16  ;;  %v2601_v23 = vshrl.u32 %v2468_v11, 16  ;;  %v2604_v24 = vshll.u32 %v2468_v11, 16  ;;  %v3018_v13 = vld [vmem:[#allocation2 + $0x74] sm:$0xf] }
  0x7b   : > { %v5076_v27 = vcombine.low %v1914_v19, %v1923_v21  ;;  %v1935_v28 = vor.u32 %v1933_v14, %v1932_v50  ;;  %v1937_v29 = vrot.slane %v1932_v50, 4  ;;  %v1941_v30 = vrot.slane %v1939_v10, 7  ;;  %v3019_v50 = vld [vmem:[#allocation2 + $0x78] sm:$0xf] }
  0x7c   : > { %1711 = vrot.lane.b32.xlu1 %v5045_v18, %s5480_s27  ;;  %v2603_v31 = vrot.slane %v2601_v23, 4  ;;  %v2606_v6 = vrot.slane %v2604_v24, 5  ;;  %v2610_v32 = vshll.u32 %v2469_v15, 16  ;;  %v2614_v16 = vshrl.u32 %v2469_v15, 16  ;;  %v3704_v23 = vld [vmem:[#allocation2 + $0x64] sm:$0xf] }
  0x7d   : > { %2222 = vrot.lane.b32.xlu0 %v5076_v27, %s5481_s28  ;;  %v1936_v34 = vsel %vm5627_vm8, %v5061_v4, %v1935_v28  ;;  %v1944_v35 = vor.u32 %v1942_v22, %v1941_v30  ;;  %v2620_v37 = vshll.u32 %v2470_v20, 16  ;;  %v373_v38 = vsel %vm5565_vm3, 0, %v372_v17 }
  0x7e   : > { %v2607_v61 = vor.u32 %v2606_v6, %v2603_v31  ;;  %v2612_v39 = vrot.slane %v2610_v32, 5  ;;  %v2616_v40 = vrot.slane %v2614_v16, 4  ;;  %374 = vst [vmem:[#allocation2 + $0x6c] sm:$0x1] %v373_v38  ;;  %v2625_v43 = vshrl.u32 %v2471_v25, 16 }
  0x7f   : > { %v1945_v45 = vsel %vm5627_vm8, %v1937_v29, %v1944_v35  ;;  %v2622_v46 = vrot.slane %v2620_v37, 5  ;;  %v2628_v47 = vshll.u32 %v2471_v25, 16  ;;  %v2634_v49 = vshll.u32 %v2472_v33, 16  ;;  %v3705_v29 = vld [vmem:[#allocation2 + $0x68] sm:$0xf] }
  0x80   : > { %v5077_v41 = vcombine.low %v1936_v34, %v1945_v45  ;;  %v2608_v54 = vrot.slane %v2607_v61, 4  ;;  %v2617_v55 = vor.u32 %v2616_v40, %v2612_v39  ;;  %v2627_v56 = vrot.slane %v2625_v43, 4  ;;  %v375_v16 = vld [vmem:[#allocation2 + $0x7c] sm:$0x1] }
  0x81   : > { %2399 = vrot.lane.b32.xlu0 %v5415_v36, %s5478_s25  ;;  %v2630_v59 = vrot.slane %v2628_v47, 5  ;;  %v2636_v1 = vrot.slane %v2634_v49, 5  ;;  %v2638_v42 = vshrl.u32 %v2472_v33, 16  ;;  %v3139_v60 = vshrl.u32 %v3014_v44, 16  ;;  %v3707_v33 = vld [vmem:[#allocation2 + $0x74] sm:$0xf]  ;;  %v5818_v49 = vpop.permute.xlu0 %1153 }
  0x82   : > { %2224 = vrot.lane.b32.xlu1 %v5077_v41, %s5481_s28  ;;  %v2613_v63 = vsel %vm5602_vm7, %v2608_v54, %v2612_v39  ;;  %v2618_v0 = vrot.slane %v2617_v55, 4  ;;  %v3144_v3 = vshrl.u32 %v3015_v52, 16  ;;  %v3147_v5 = vshll.u32 %v3015_v52, 16  ;;  %v5417_v41 = vld [vmem:[#allocation2 + $0x64] sm:$0xff]  }
  0x83   : > { %v2631_v48 = vor.u32 %v2630_v59, %v2627_v56  ;;  %v2640_v7 = vrot.slane %v2638_v42, 4  ;;  %v5124_v53 = vrot.slane %v3139_v60, 11  ;;  %v3153_v8 = vshrl.u32 %v3016_v57, 16 }
  0x84   : > { %v2623_v9 = vsel %vm5602_vm7, %v2618_v0, %v2622_v46  ;;  %v3146_v11 = vrot.slane %v3144_v3, 7  ;;  %v3156_v12 = vshll.u32 %v3016_v57, 16  ;;  %v3161_v4 = vshrl.u32 %v3017_v58, 16  ;;  %v1236_v3 = vld [vmem:[#allocation2 + $0x64] sm:$0xf] }
  0x85   : > { %v5108_v14 = vcombine.low %v2613_v63, %v2623_v9  ;;  %v2473_v15 = vld [vmem:[#allocation2 + $0x6c] sm:$0x1]  ;;  %v2632_v17 = vrot.slane %v2631_v48, 4  ;;  %v2641_v18 = vor.u32 %v2640_v7, %v2636_v1  ;;  %v3155_v19 = vrot.slane %v3153_v8, 7  ;;  %v5418_v9 = vld [vmem:[#allocation2 + $0x74] sm:$0xff]  }
  0x86   : > { %2401 = vrot.lane.b32.xlu1 %v5416_v62, %s5478_s25  ;;  %v2644_v10 = vshll.u32 %v2473_v15, 16  ;;  %v3149_v20 = vor.u32 %v3147_v5, %v3146_v11  ;;  %v3151_v21 = vrot.slane %v3146_v11, 4  ;;  %v5125_v22 = vrot.slane %v3161_v4, 11  ;;  %v3706_v40 = vld [vmem:[#allocation2 + $0x6c] sm:$0x1] }
  0x87   : > { %2944 = vrot.lane.b32.xlu0 %v5108_v14, %s5483_s30  ;;  %v2637_v24 = vsel %vm5602_vm7, %v2632_v17, %v2636_v1  ;;  %v2642_v25 = vrot.slane %v2641_v18, 4  ;;  %v3158_v27 = vor.u32 %v3156_v12, %v3155_v19  ;;  %v3166_v28 = vshrl.u32 %v3018_v13, 16  ;;  %v3708_v1 = vld [vmem:[#allocation2 + $0x78] sm:$0xf]  ;;  %v1237_v5 = vld [vmem:[#allocation2 + $0x68] sm:$0xf] }
  0x88   : > { %v2646_v30 = vrot.slane %v2644_v10, 5  ;;  %v3150_v31 = vsel %vm5627_vm8, %v5124_v53, %v3149_v20  ;;  %v3169_v6 = vshll.u32 %v3018_v13, 16  ;;  %v3175_v32 = vshrl.u32 %v3019_v50, 16  ;;  %v1238_v15 = vld [vmem:[#allocation2 + $0x6c] sm:$0x1] }
  0x89   : > { %v3159_v34 = vsel %vm5627_vm8, %v3151_v21, %v3158_v27  ;;  %v3168_v35 = vrot.slane %v3166_v28, 7  ;;  %v3178_v36 = vshll.u32 %v3019_v50, 16  ;;  %v3837_v37 = vshrl.u32 %v3704_v23, 16 }
  0x8a   : > { %v2647_v38 = vsel %vm5602_vm7, %v2642_v25, %v2646_v30  ;;  %v5140_v61 = vcombine.low %v3150_v31, %v3159_v34  ;;  %v3177_v39 = vrot.slane %v3175_v32, 7  ;;  %v3840_v43 = vshll.u32 %v3704_v23, 16  ;;  %v1239_v23 = vld [vmem:[#allocation2 + $0x74] sm:$0xf]  ;;  %v5419_v30 = vld [vmem:[#allocation2 + $0x64] sm:$0xff]  }
  0x8b   : > { %v5109_v44 = vcombine.low %v2637_v24, %v2647_v38  ;;  %v3171_v45 = vor.u32 %v3169_v6, %v3168_v35  ;;  %v3173_v46 = vrot.slane %v3168_v35, 4  ;;  %v3839_v47 = vrot.slane %v3837_v37, 4  ;;  %v1240_v37 = vld [vmem:[#allocation2 + $0x78] sm:$0xf] }
  0x8c   : > { %3458 = vrot.lane.b32.xlu0 %v5140_v61, %s5482_s29  ;;  %v3180_v52 = vor.u32 %v3178_v36, %v3177_v39  ;;  %v3842_v54 = vrot.slane %v3840_v43, 5  ;;  %v3846_v55 = vshll.u32 %v3705_v29, 16  ;;  %v3850_v56 = vshrl.u32 %v3705_v29, 16 }
  0x8d   : > { %2946 = vrot.lane.b32.xlu1 %v5109_v44, %s5483_s30  ;;  %v3172_v57 = vsel %vm5627_vm8, %v5125_v22, %v3171_v45  ;;  %v3856_v58 = vshll.u32 %v3706_v40, 16  ;;  %v376_v59 = vsel %vm5565_vm3, 0, %v375_v16  ;;  %v3861_v42 = vshrl.u32 %v3707_v33, 16  ;;  %v1784_v16 = vld [vmem:[#allocation2 + $0x70] sm:$0x8] }
  0x8e   : > { %v3181_v60 = vsel %vm5627_vm8, %v3173_v46, %v3180_v52  ;;  %v3843_v62 = vor.u32 %v3842_v54, %v3839_v47  ;;  %v3848_v63 = vrot.slane %v3846_v55, 5  ;;  %v3852_v0 = vrot.slane %v3850_v56, 4  ;;  %377 = vst [vmem:[#allocation2 + $0x7c] sm:$0x1] %v376_v59  ;;  %v5420_v59 = vld [vmem:[#allocation2 + $0x74] sm:$0xff]  }
  0x8f   : > { %v5141_v48 = vcombine.low %v3172_v57, %v3181_v60  ;;  %v3858_v7 = vrot.slane %v3856_v58, 5  ;;  %v3863_v53 = vrot.slane %v3861_v42, 4  ;;  %v3864_v8 = vshll.u32 %v3707_v33, 16 }
  0x90   : > { %3635 = vrot.lane.b32.xlu0 %v5417_v41, %s5479_s26  ;;  %v3844_v11 = vrot.slane %v3843_v62, 4  ;;  %v3853_v12 = vor.u32 %v3852_v0, %v3848_v63  ;;  %v3870_v13 = vshll.u32 %v3708_v1, 16  ;;  %v3874_v4 = vshrl.u32 %v3708_v1, 16  ;;  %v5837_v45 = vpop.permute.xlu1 %2393  ;;  %v1785_v62 = vld [vmem:[#allocation2 + $0x74] sm:$0xf] }
  0x91   : > { %3460 = vrot.lane.b32.xlu1 %v5141_v48, %s5482_s29  ;;  %v3866_v14 = vrot.slane %v3864_v8, 5  ;;  %v1414_v17 = vshrl.u32 %v1236_v3, 16  ;;  %v1417_v18 = vshll.u32 %v1236_v3, 16  ;;  %v1423_v19 = vshll.u32 %v1237_v5, 16  ;;  %v5830_v50 = vpop.permute.xlu0 %1155 }
  0x92   : > { %v3849_v10 = vsel %vm5602_vm7, %v3844_v11, %v3848_v63  ;;  %v3854_v20 = vrot.slane %v3853_v12, 4  ;;  %v3872_v21 = vrot.slane %v3870_v13, 5  ;;  %v3876_v22 = vrot.slane %v3874_v4, 4  ;;  %v299_v12 = vld [vmem:[%s5575_s23 + $0x78] sm:$0xff]  ;;  %v1787_v13 = vld [vmem:[#allocation2 + $0x80] sm:$0x8] }
  0x93   : > { %v3867_v24 = vor.u32 %v3866_v14, %v3863_v53  ;;  %v1416_v25 = vrot.slane %v1414_v17, 4  ;;  %v1419_v27 = vrot.slane %v1417_v18, 5  ;;  %v1425_v28 = vrot.slane %v1423_v19, 5  ;;  %v1788_v18 = vld [vmem:[#allocation2 + $0x84] sm:$0xf] }
  0x94   : > { %v3859_v29 = vsel %vm5602_vm7, %v3854_v20, %v3858_v7  ;;  %v3877_v31 = vor.u32 %v3876_v22, %v3872_v21  ;;  %v1427_v6 = vshrl.u32 %v1237_v5, 16  ;;  %v1433_v32 = vshll.u32 %v1238_v15, 16  ;;  %v1786_v7 = vld [vmem:[#allocation2 + $0x78] sm:$0xf]  ;;  %v5852_v19 = vpop.permute.xlu1 %3629 }
  0x95   : > { %3637 = vrot.lane.b32.xlu1 %v5418_v9, %s5479_s26  ;;  %v5172_v33 = vcombine.low %v3849_v10, %v3859_v29  ;;  %v3709_v34 = vld [vmem:[#allocation2 + $0x7c] sm:$0x1]  ;;  %v3868_v35 = vrot.slane %v3867_v24, 4  ;;  %v1420_v36 = vor.u32 %v1419_v27, %v1416_v25  ;;  %v1438_v38 = vshrl.u32 %v1239_v23, 16  ;;  %v5842_v54 = vpop.permute.xlu0 %2391  ;;  %v2474_v29 = vld [vmem:[#allocation2 + $0x74] sm:$0xf] }
  0x96   : > { %v3878_v61 = vrot.slane %v3877_v31, 4  ;;  %v3880_v39 = vshll.u32 %v3709_v34, 16  ;;  %v1429_v40 = vrot.slane %v1427_v6, 4  ;;  %v1435_v43 = vrot.slane %v1433_v32, 5  ;;  %v1241_v44 = vld [vmem:[#allocation2 + $0x7c] sm:$0x1] }
  0x97   : > { %4180 = vrot.lane.b32.xlu0 %v5172_v33, %s5484_s6  ;;  %v3873_v46 = vsel %vm5602_vm7, %v3868_v35, %v3872_v21  ;;  %v1421_v47 = vrot.slane %v1420_v36, 4  ;;  %v1440_v52 = vrot.slane %v1438_v38, 4  ;;  %v1441_v41 = vshll.u32 %v1239_v23, 16 }
  0x98   : > { %v3882_v55 = vrot.slane %v3880_v39, 5  ;;  %v1430_v56 = vor.u32 %v1429_v40, %v1425_v28  ;;  %v1447_v57 = vshll.u32 %v1240_v37, 16  ;;  %v1451_v58 = vshrl.u32 %v1240_v37, 16  ;;  %v560_v40 = vld [vmem:[#allocation2 + $0x8] sm:$0xf] }
  0x99   : > { %1165 = vrot.lane.b32.xlu1 %v5419_v30, %s5477_s24  ;;  %v1426_v1 = vsel %vm5602_vm7, %v1421_v47, %v1425_v28  ;;  %v1443_v42 = vrot.slane %v1441_v41, 5  ;;  %v1457_v60 = vshll.u32 %v1241_v44, 16  ;;  %v1947_v63 = vshrl.u32 %v1784_v16, 16  ;;  %v5856_v23 = vpop.permute.xlu0 %3627  ;;  %v2475_v16 = vld [vmem:[#allocation2 + $0x78] sm:$0xf]  ;;  %v5870_v41 = vpop.permute.xlu1 %1157 }
  0x9a   : > { %v3883_v0 = vsel %vm5602_vm7, %v3878_v61, %v3882_v55  ;;  %v1431_v3 = vrot.slane %v1430_v56, 4  ;;  %v1449_v5 = vrot.slane %v1447_v57, 5  ;;  %v1453_v48 = vrot.slane %v1451_v58, 4  ;;  %v2476_v44 = vld [vmem:[#allocation2 + $0x7c] sm:$0x1] }
  0x9b   : > { %v5173_v53 = vcombine.low %v3873_v46, %v3883_v0  ;;  %v1444_v8 = vor.u32 %v1443_v42, %v1440_v52  ;;  %v1459_v9 = vrot.slane %v1457_v60, 5  ;;  %v5062_v11 = vrot.slane %v1947_v63, 11  ;;  %v301_v63 = vld [vmem:[%s5575_s23 + $0x88] sm:$0xff]  ;;  %v302_v0 = vld [vmem:[%s5575_s23 + $0x90] sm:$0xff] }
  0x9c   : > { %v1436_v4 = vsel %vm5602_vm7, %v1431_v3, %v1435_v43  ;;  %v1454_v14 = vor.u32 %v1453_v48, %v1449_v5  ;;  %v1952_v15 = vshrl.u32 %v1785_v62, 16  ;;  %v1955_v17 = vshll.u32 %v1785_v62, 16  ;;  %v300_v62 = vld [vmem:[%s5575_s23 + $0x80] sm:$0xff] }
  0x9d   : > { %4182 = vrot.lane.b32.xlu0 %v5173_v53, %s5484_s6  ;;  %1167 = vrot.lane.b32.xlu1 %v5420_v59, %s5477_s24  ;;  %v5046_v10 = vcombine.low %v1426_v1, %v1436_v4  ;;  %v1445_v20 = vrot.slane %v1444_v8, 4  ;;  %v1961_v21 = vshrl.u32 %v1786_v7, 16  ;;  %v1964_v22 = vshll.u32 %v1786_v7, 16  ;;  %v5878_v58 = vpop.permute.xlu0 %2214  ;;  %v558_v7 = vld [vmem:[#allocation2] sm:$0x8]  ;;  %v5421_v8 = vld [vmem:[#allocation2 + $0x74] sm:$0xff]  }
  0x9e   : > { %v1455_v24 = vrot.slane %v1454_v14, 4  ;;  %v1954_v25 = vrot.slane %v1952_v15, 7  ;;  %v5254_v27 = vpack.c.bf16 %v299_v12, %v299_v12  ;;  %v1969_v28 = vshrl.u32 %v1787_v13, 16  ;;  %v559_v13 = vld [vmem:[#allocation2 + $0x4] sm:$0xf] }
  0x9f   : > { %v1450_v30 = vsel %vm5602_vm7, %v1445_v20, %v1449_v5  ;;  %v1963_v31 = vrot.slane %v1961_v21, 7  ;;  %v1974_v6 = vshrl.u32 %v1788_v18, 16  ;;  %v1977_v32 = vshll.u32 %v1788_v18, 16  ;;  %v378_v4 = vld [vmem:[#allocation2 + $0x8c] sm:$0x1] }
  0xa0   : > { %v1460_v33 = vsel %vm5602_vm7, %v1455_v24, %v1459_v9  ;;  %v1957_v34 = vor.u32 %v1955_v17, %v1954_v25  ;;  %v1959_v35 = vrot.slane %v1954_v25, 4  ;;  %541 = vst.msk [vmem:[#allocation2 + $0x88] sm:$0xf] %vm332_vm0, %v5254_v27  ;;  %v5863_v36 = vrot.slane %v1969_v28, 11  ;;  %v2477_v25 = vld [vmem:[#allocation2 + $0x84] sm:$0xf]  ;;  %v5889_v27 = vpop.permute.xlu1 %1701 }
  0xa1   : > { %1713 = vrot.lane.b32.xlu0 %v5046_v10, %s5480_s27  ;;  %v5047_v37 = vcombine.low %v1450_v30, %v1460_v33  ;;  %v1966_v38 = vor.u32 %v1964_v22, %v1963_v31  ;;  %v5866_v61 = vrot.slane %v1974_v6, 7  ;;  %v2649_v39 = vshrl.u32 %v2474_v29, 16 }
  0xa2   : > { %v1958_v43 = vsel %vm5627_vm8, %v5062_v11, %v1957_v34  ;;  %v2652_v46 = vshll.u32 %v2474_v29, 16  ;;  %v2658_v47 = vshll.u32 %v2475_v16, 16  ;;  %v2662_v52 = vshrl.u32 %v2475_v16, 16 }
  0xa3   : > { %1715 = vrot.lane.b32.xlu1 %v5047_v37, %s5480_s27  ;;  %v1967_v55 = vsel %vm5627_vm8, %v1959_v35, %v1966_v38  ;;  %v5876_v56 = vor.u32 %v1977_v32, %v5866_v61  ;;  %v2651_v57 = vrot.slane %v2649_v39, 4  ;;  %v1981_v3 = vrot.slane %v5866_v61, 4  ;;  %v5893_v32 = vpop.permute.xlu0 %3450 }
  0xa4   : > { %v5078_v59 = vcombine.low %v1958_v43, %v1967_v55  ;;  %v2654_v1 = vrot.slane %v2652_v46, 5  ;;  %v2660_v42 = vrot.slane %v2658_v47, 5  ;;  %v2664_v60 = vrot.slane %v2662_v52, 4 }
  0xa5   : > { %v2668_v5 = vshll.u32 %v2476_v44, 16  ;;  %v623_v48 = vshrl.u32 %v560_v40, 16  ;;  %v1980_v53 = vsel %vm5627_vm8, %v5863_v36, %v5876_v56  ;;  %v626_v12 = vshll.u32 %v560_v40, 16  ;;  %v3020_v36 = vld [vmem:[#allocation2 + $0x80] sm:$0x8] }
  0xa6   : > { %2226 = vrot.lane.b32.xlu0 %v5078_v59, %s5481_s28  ;;  %v2655_v9 = vor.u32 %v2654_v1, %v2651_v57  ;;  %v2665_v11 = vor.u32 %v2664_v60, %v2660_v42  ;;  %vm1024_vm9 = vcmask 31744   ;;  %v5255_v17 = vpack.c.bf16 %v300_v62, %v300_v62  ;;  %v3021_v56 = vld [vmem:[#allocation2 + $0x84] sm:$0xf] }
  0xa7   : > { %v1789_v14 = vld [vmem:[#allocation2 + $0x88] sm:$0xf]  ;;  %v2670_v15 = vrot.slane %v2668_v5, 5  ;;  %v5256_v18 = vpack.c.bf16 %v301_v63, %v301_v63  ;;  %v5257_v10 = vpack.c.bf16 %v302_v0, %v302_v0  ;;  %vm1201_vm10 = vcmask 64544   ;;  %v5906_v63 = vpop.permute.xlu1 %2216 }
  0xa8   : > { %v1983_v20 = vshrl.u32 %v1789_v14, 16  ;;  %v1986_v21 = vshll.u32 %v1789_v14, 16  ;;  %v2656_v22 = vrot.slane %v2655_v9, 4  ;;  %v2666_v24 = vrot.slane %v2665_v11, 4  ;;  %v2478_v6 = vld [vmem:[#allocation2 + $0x88] sm:$0xf] }
  0xa9   : > { %v625_v28 = vrot.slane %v623_v48, 7  ;;  %v609_v29 = vshrl.u32 %v558_v7, 16  ;;  %v614_v30 = vshrl.u32 %v559_v13, 16  ;;  %v617_v31 = vshll.u32 %v559_v13, 16  ;;  %542 = vst.msk [vmem:[#allocation2 + $0x94] sm:$0xf] %vm332_vm0, %v5255_v17  ;;  %v5912_v11 = vpop.permute.xlu0 %2936 }
  0xaa   : > { %543 = vst.msk [vmem:[#allocation2 + $0x98] sm:$0xf] %vm332_vm0, %v5256_v18  ;;  %544 = vst.msk [vmem:[#allocation2 + $0xa4] sm:$0xf] %vm332_vm0, %v5257_v10  ;;  %v1985_v16 = vrot.slane %v1983_v20, 7  ;;  %2403 = vrot.lane.b32.xlu0 %v5421_v8, %s5478_s25  ;;  %v2661_v33 = vsel %vm5602_vm7, %v2656_v22, %v2660_v42  ;;  %v2671_v34 = vsel %vm5602_vm7, %v2666_v24, %v2670_v15  ;;  %v379_v35 = vsel %vm5565_vm3, 0, %v378_v4 }
  0xab   : > { %v5110_v37 = vcombine.low %v2661_v33, %v2671_v34  ;;  %v628_v38 = vor.u32 %v626_v12, %v625_v28  ;;  %v4992_v61 = vrot.slane %v609_v29, 11  ;;  %v616_v39 = vrot.slane %v614_v30, 7  ;;  %380 = vst [vmem:[#allocation2 + $0x8c] sm:$0x1] %v379_v35  ;;  %v3022_v62 = vld [vmem:[#allocation2 + $0x88] sm:$0xf] }
  0xac   : > { %v1988_v40 = vor.u32 %v1986_v21, %v1985_v16  ;;  %v2673_v43 = vshrl.u32 %v2477_v25, 16  ;;  %v2676_v44 = vshll.u32 %v2477_v25, 16  ;;  %v2682_v46 = vshll.u32 %v2478_v6, 16  ;;  %v561_v8 = vld [vmem:[#allocation2 + $0x10] sm:$0x8]  ;;  %v5422_v15 = vld [vmem:[#allocation2 + $0x84] sm:$0xff]  }
  0xad   : > { %v619_v47 = vor.u32 %v617_v31, %v616_v39  ;;  %v621_v52 = vrot.slane %v616_v39, 4  ;;  %v2686_v55 = vshrl.u32 %v2478_v6, 16  ;;  %v3183_v57 = vshrl.u32 %v3020_v36, 16  ;;  %v563_v9 = vld [vmem:[#allocation2 + $0x18] sm:$0xf] }
  0xae   : > { %v1989_v59 = vsel %vm5627_vm8, %v1981_v3, %v1988_v40  ;;  %2948 = vrot.lane.b32.xlu0 %v5110_v37, %s5483_s30  ;;  %v2675_v1 = vrot.slane %v2673_v43, 4  ;;  %v2678_v42 = vrot.slane %v2676_v44, 5  ;;  %v2684_v60 = vrot.slane %v2682_v46, 5  ;;  %v562_v14 = vld [vmem:[#allocation2 + $0x14] sm:$0xf]  ;;  %v5920_v37 = vpop.permute.xlu1 %3452 }
  0xaf   : > { %v5079_v0 = vcombine.low %v1980_v53, %v1989_v59  ;;  %v620_v5 = vsel %vm5627_vm8, %v4992_v61, %v619_v47  ;;  %v629_v48 = vsel %vm5627_vm8, %v621_v52, %v628_v38  ;;  %v2688_v7 = vrot.slane %v2686_v55, 4  ;;  %v3023_v20 = vld [vmem:[#allocation2 + $0x90] sm:$0x8] }
  0xb0   : > { %v5008_v3 = vcombine.low %v620_v5, %v629_v48  ;;  %v2679_v12 = vor.u32 %v2678_v42, %v2675_v1  ;;  %v5126_v13 = vrot.slane %v3183_v57, 11  ;;  %v3188_v4 = vshrl.u32 %v3021_v56, 16  ;;  %v3024_v21 = vld [vmem:[#allocation2 + $0x94] sm:$0xf]  ;;  %v3710_v1 = vld [vmem:[#allocation2 + $0x84] sm:$0xf] }
  0xb1   : > { %2228 = vrot.lane.b32.xlu1 %v5079_v0, %s5481_s28  ;;  %v2689_v53 = vor.u32 %v2688_v7, %v2684_v60  ;;  %v3191_v17 = vshll.u32 %v3021_v56, 16  ;;  %v3197_v18 = vshrl.u32 %v3022_v62, 16  ;;  %v3200_v10 = vshll.u32 %v3022_v62, 16  ;;  %v3025_v43 = vld [vmem:[#allocation2 + $0x98] sm:$0xf] }
  0xb2   : > { %1025 = vst.msk [vmem:[#allocation3] sm:$0xff] %vm1024_vm9, %v5008_v3  ;;  %v2479_v22 = vld [vmem:[#allocation2 + $0x8c] sm:$0x1]  ;;  %v2680_v24 = vrot.slane %v2679_v12, 4  ;;  %v3190_v25 = vrot.slane %v3188_v4, 7  ;;  %v631_v28 = vshrl.u32 %v561_v8, 16 }
  0xb3   : > { %v645_v29 = vshrl.u32 %v563_v9, 16  ;;  %1202 = vst.msk [vmem:[#allocation3] sm:$0xff] %vm1201_vm10, %v5818_v49  ;;  %v2690_v30 = vrot.slane %v2689_v53, 4  ;;  %v2692_v31 = vshll.u32 %v2479_v22, 16  ;;  %v3199_v6 = vrot.slane %v3197_v18, 7  ;;  %v5923_v49 = vpop.permute.xlu0 %4172 }
  0xb4   : > { %v648_v16 = vshll.u32 %v563_v9, 16  ;;  %v2685_v33 = vsel %vm5602_vm7, %v2680_v24, %v2684_v60  ;;  %v3193_v34 = vor.u32 %v3191_v17, %v3190_v25  ;;  %v3195_v35 = vrot.slane %v3190_v25, 4  ;;  %v5423_v9 = vld [vmem:[#allocation2 + $0x84] sm:$0xff]   ;;  %v564_v12 = vld [vmem:[#allocation2 + $0x20] sm:$0x8]  ;;  %v1704_v17 = vpop.permute.xlu1 %1703 }
  0xb5   : > { %v4993_v36 = vrot.slane %v631_v28, 11  ;;  %2405 = vrot.lane.b32.xlu1 %v5422_v15, %s5478_s25  ;;  %v2694_v38 = vrot.slane %v2692_v31, 5  ;;  %v3202_v61 = vor.u32 %v3200_v10, %v3199_v6  ;;  %v647_v39 = vrot.slane %v645_v29, 7  ;;  %v3711_v3 = vld [vmem:[#allocation2 + $0x88] sm:$0xf] }
  0xb6   : > { %v636_v40 = vshrl.u32 %v562_v14, 16  ;;  %v3194_v44 = vsel %vm5627_vm8, %v5126_v13, %v3193_v34  ;;  %v639_v46 = vshll.u32 %v562_v14, 16  ;;  %v3205_v47 = vshrl.u32 %v3023_v20, 16  ;;  %v3712_v14 = vld [vmem:[#allocation2 + $0x8c] sm:$0x1] }
  0xb7   : > { %v3210_v52 = vshrl.u32 %v3024_v21, 16  ;;  %v2695_v55 = vsel %vm5602_vm7, %v2690_v30, %v2694_v38  ;;  %v3203_v56 = vsel %vm5627_vm8, %v3195_v35, %v3202_v61  ;;  %v650_v57 = vor.u32 %v648_v16, %v647_v39  ;;  %v566_v22 = vld [vmem:[#allocation2 + $0x28] sm:$0xf]  ;;  %v565_v34 = vld [vmem:[#allocation2 + $0x24] sm:$0xf] }
  0xb8   : > { %v638_v59 = vrot.slane %v636_v40, 7  ;;  %v5111_v42 = vcombine.low %v2685_v33, %v2695_v55  ;;  %v5142_v60 = vcombine.low %v3194_v44, %v3203_v56  ;;  %v5127_v62 = vrot.slane %v3205_v47, 11  ;;  %v381_v39 = vld [vmem:[#allocation2 + $0x9c] sm:$0x1]  ;;  %v3713_v47 = vld [vmem:[#allocation2 + $0x94] sm:$0xf] }
  0xb9   : > { %v3212_v0 = vrot.slane %v3210_v52, 7  ;;  %v3213_v7 = vshll.u32 %v3024_v21, 16  ;;  %v3219_v8 = vshrl.u32 %v3025_v43, 16  ;;  %v3222_v4 = vshll.u32 %v3025_v43, 16  ;;  %v5937_v24 = vpop.permute.xlu0 %4174 }
  0xba   : > { %v641_v5 = vor.u32 %v639_v46, %v638_v59  ;;  %v643_v48 = vrot.slane %v638_v59, 4  ;;  %2950 = vrot.lane.b32.xlu1 %v5111_v42, %s5483_s30  ;;  %3462 = vrot.lane.b32.xlu0 %v5142_v60, %s5482_s29  ;;  %v3885_v15 = vshrl.u32 %v3710_v1, 16  ;;  %v3888_v53 = vshll.u32 %v3710_v1, 16  ;;  %v3714_v59 = vld [vmem:[#allocation2 + $0x98] sm:$0xf]  ;;  %v5947_v1 = vpop.permute.xlu1 %2938 }
  0xbb   : > { %v3217_v13 = vrot.slane %v3212_v0, 4  ;;  %v3215_v20 = vor.u32 %v3213_v7, %v3212_v0  ;;  %v3221_v21 = vrot.slane %v3219_v8, 7  ;;  %v3894_v30 = vshll.u32 %v3711_v3, 16 }
  0xbc   : > { %v642_v18 = vsel %vm5627_vm8, %v4993_v36, %v641_v5  ;;  %v651_v10 = vsel %vm5627_vm8, %v643_v48, %v650_v57  ;;  %v3887_v28 = vrot.slane %v3885_v15, 4  ;;  %v3890_v29 = vrot.slane %v3888_v53, 5  ;;  %v5424_v5 = vld [vmem:[#allocation2 + $0x94] sm:$0xff]  }
  0xbd   : > { %v5009_v25 = vcombine.low %v642_v18, %v651_v10  ;;  %v3216_v31 = vsel %vm5627_vm8, %v5127_v62, %v3215_v20  ;;  %v3224_v6 = vor.u32 %v3222_v4, %v3221_v21  ;;  %v3898_v16 = vshrl.u32 %v3711_v3, 16  ;;  %v1243_v18 = vld [vmem:[#allocation2 + $0x88] sm:$0xf] }
  0xbe   : > { %v3904_v33 = vshll.u32 %v3712_v14, 16  ;;  %3639 = vrot.lane.b32.xlu0 %v5423_v9, %s5479_s26  ;;  %v3891_v35 = vor.u32 %v3890_v29, %v3887_v28  ;;  %v3896_v36 = vrot.slane %v3894_v30, 5  ;;  %v653_v38 = vshrl.u32 %v564_v12, 16  ;;  %v5949_v42 = vpop.permute.xlu0 %1705  ;;  %v1242_v14 = vld [vmem:[#allocation2 + $0x84] sm:$0xf] }
  0xbf   : > { %1026 = vst.msk [vmem:[#allocation3 + $0x8] sm:$0xff] %vm1024_vm9, %v5009_v25  ;;  %v667_v61 = vshrl.u32 %v566_v22, 16  ;;  %v3225_v40 = vsel %vm5627_vm8, %v3217_v13, %v3224_v6  ;;  %v3900_v43 = vrot.slane %v3898_v16, 4  ;;  %v670_v46 = vshll.u32 %v566_v22, 16  ;;  %v5425_v29 = vld [vmem:[#allocation2 + $0x84] sm:$0xff]  }
  0xc0   : > { %1203 = vst.msk [vmem:[#allocation3 + $0x8] sm:$0xff] %vm1201_vm10, %v5830_v50  ;;  %v3906_v44 = vrot.slane %v3904_v33, 5  ;;  %v5143_v52 = vcombine.low %v3216_v31, %v3225_v40  ;;  %v3892_v55 = vrot.slane %v3891_v35, 4  ;;  %v4994_v56 = vrot.slane %v653_v38, 11  ;;  %v1244_v6 = vld [vmem:[#allocation2 + $0x8c] sm:$0x1]  ;;  %v5968_v33 = vpop.permute.xlu1 %1159 }
  0xc1   : > { %v669_v57 = vrot.slane %v667_v61, 7  ;;  %v3901_v60 = vor.u32 %v3900_v43, %v3896_v36  ;;  %v658_v62 = vshrl.u32 %v565_v34, 16  ;;  %v661_v0 = vshll.u32 %v565_v34, 16  ;;  %v1246_v40 = vld [vmem:[#allocation2 + $0x98] sm:$0xf] }
  0xc2   : > { %v382_v50 = vsel %vm5565_vm3, 0, %v381_v39  ;;  %3464 = vrot.lane.b32.xlu1 %v5143_v52, %s5482_s29  ;;  %v3897_v48 = vsel %vm5602_vm7, %v3892_v55, %v3896_v36  ;;  %v3909_v8 = vshrl.u32 %v3713_v47, 16  ;;  %v3912_v9 = vshll.u32 %v3713_v47, 16  ;;  %v1245_v36 = vld [vmem:[#allocation2 + $0x94] sm:$0xf] }
  0xc3   : > { %v672_v7 = vor.u32 %v670_v46, %v669_v57  ;;  %383 = vst [vmem:[#allocation2 + $0x9c] sm:$0x1] %v382_v50  ;;  %v3902_v3 = vrot.slane %v3901_v60, 4  ;;  %v660_v12 = vrot.slane %v658_v62, 7  ;;  %v3918_v13 = vshll.u32 %v3714_v59, 16  ;;  %v5426_v57 = vld [vmem:[#allocation2 + $0x94] sm:$0xff]  }
  0xc4   : > { %v3922_v4 = vshrl.u32 %v3714_v59, 16  ;;  %v3911_v15 = vrot.slane %v3909_v8, 4  ;;  %v3914_v53 = vrot.slane %v3912_v9, 5  ;;  %vm1749_vm11 = vcmask 97344   ;;  %v2219_v25 = vpop.permute.xlu0 %2218 }
  0xc5   : > { %vm2262_vm12 = vcmask 130144   ;;  %v3907_v10 = vsel %vm5602_vm7, %v3902_v3, %v3906_v44  ;;  %v663_v20 = vor.u32 %v661_v0, %v660_v12  ;;  %v665_v21 = vrot.slane %v660_v12, 4  ;;  %1750 = vst.msk [vmem:[#allocation3] sm:$0xff] %vm1749_vm11, %v5889_v27  ;;  %1751 = vst.msk [vmem:[#allocation3 + $0x8] sm:$0xff] %vm1749_vm11, %v1704_v17 }
  0xc6   : > { %v5958_v22 = vrot.slane %v3918_v13, 5  ;;  %3641 = vrot.lane.b32.xlu1 %v5424_v5, %s5479_s26  ;;  %v5174_v28 = vcombine.low %v3897_v48, %v3907_v10  ;;  %v3915_v30 = vor.u32 %v3914_v53, %v3911_v15  ;;  %v3924_v31 = vrot.slane %v3922_v4, 4  ;;  %2263 = vst.msk [vmem:[#allocation3] sm:$0xff] %vm2262_vm12, %v5878_v58  ;;  %2264 = vst.msk [vmem:[#allocation3 + $0x8] sm:$0xff] %vm2262_vm12, %v5906_v63  ;;  %v1790_v48 = vld [vmem:[#allocation2 + $0x90] sm:$0x8]  ;;  %v5985_v13 = vpop.permute.xlu1 %1707 }
  0xc7   : > { %v1462_v16 = vshrl.u32 %v1242_v14, 16  ;;  %v664_v27 = vsel %vm5627_vm8, %v4994_v56, %v663_v20  ;;  %v673_v17 = vsel %vm5627_vm8, %v665_v21, %v672_v7  ;;  %v1465_v34 = vshll.u32 %v1242_v14, 16  ;;  %v1792_v21 = vld [vmem:[#allocation2 + $0x98] sm:$0xf] }
  0xc8   : > { %v1471_v35 = vshll.u32 %v1243_v18, 16  ;;  %4184 = vrot.lane.b32.xlu0 %v5174_v28, %s5484_s6  ;;  %v5010_v38 = vcombine.low %v664_v27, %v673_v17  ;;  %v3916_v58 = vrot.slane %v3915_v30, 4  ;;  %v3925_v61 = vor.u32 %v3924_v31, %v5958_v22  ;;  %v2396_v7 = vpop.permute.xlu0 %2395 }
  0xc9   : > { %v1464_v39 = vrot.slane %v1462_v16, 4  ;;  %v1467_v43 = vrot.slane %v1465_v34, 5  ;;  %v1475_v46 = vshrl.u32 %v1243_v18, 16  ;;  %v1481_v47 = vshll.u32 %v1244_v6, 16 }
  0xca   : > { %v3715_v63 = vld [vmem:[#allocation2 + $0x9c] sm:$0x1]  ;;  %v1473_v44 = vrot.slane %v1471_v35, 5  ;;  %1027 = vst.msk [vmem:[#allocation3 + $0x10] sm:$0xff] %vm1024_vm9, %v5010_v38  ;;  %1169 = vrot.lane.b32.xlu1 %v5425_v29, %s5477_s24  ;;  %v3921_v52 = vsel %vm5602_vm7, %v3916_v58, %v5958_v22  ;;  %v3926_v55 = vrot.slane %v3925_v61, 4  ;;  %v1486_v60 = vshrl.u32 %v1245_v36, 16 }
  0xcb   : > { %v3928_v56 = vshll.u32 %v3715_v63, 16  ;;  %v1247_v59 = vld [vmem:[#allocation2 + $0x9c] sm:$0x1]  ;;  %1204 = vst.msk [vmem:[#allocation3 + $0x10] sm:$0xff] %vm1201_vm10, %v5870_v41  ;;  %v1468_v62 = vor.u32 %v1467_v43, %v1464_v39  ;;  %v1477_v0 = vrot.slane %v1475_v46, 4  ;;  %v1483_v50 = vrot.slane %v1481_v47, 5 }
  0xcc   : > { %v1489_v5 = vshll.u32 %v1245_v36, 16  ;;  %v1488_v9 = vrot.slane %v1486_v60, 4  ;;  %v1495_v3 = vshll.u32 %v1246_v40, 16  ;;  %v1499_v12 = vshrl.u32 %v1246_v40, 16  ;;  %1752 = vst.msk [vmem:[#allocation3 + $0x10] sm:$0xff] %vm1749_vm11, %v5949_v42  ;;  %v2941_v36 = vpop.permute.xlu0 %2940  ;;  %v303_v40 = vld [vmem:[%s5575_s23 + $0x98] sm:$0xff] }
  0xcd   : > { %v3930_v8 = vrot.slane %v3928_v56, 5  ;;  %v1469_v4 = vrot.slane %v1468_v62, 4  ;;  %v1478_v14 = vor.u32 %v1477_v0, %v1473_v44  ;;  %v1505_v53 = vshll.u32 %v1247_v59, 16  ;;  %v1791_v41 = vld [vmem:[#allocation2 + $0x94] sm:$0xf]  ;;  %2265 = vst.msk [vmem:[#allocation3 + $0x10] sm:$0xff] %vm2262_vm12, %v2219_v25 }
  0xce   : > { %v1491_v15 = vrot.slane %v1489_v5, 5  ;;  %1171 = vrot.lane.b32.xlu1 %v5426_v57, %s5477_s24  ;;  %v1497_v10 = vrot.slane %v1495_v3, 5  ;;  %v1501_v20 = vrot.slane %v1499_v12, 4  ;;  %v1991_v22 = vshrl.u32 %v1790_v48, 16  ;;  %v1793_v63 = vld [vmem:[#allocation2 + $0xa0] sm:$0x8] }
  0xcf   : > { %v3931_v18 = vsel %vm5602_vm7, %v3926_v55, %v3930_v8  ;;  %v1474_v42 = vsel %vm5602_vm7, %v1469_v4, %v1473_v44  ;;  %v1479_v29 = vrot.slane %v1478_v14, 4  ;;  %v1507_v6 = vrot.slane %v1505_v53, 5  ;;  %v1794_v47 = vld [vmem:[#allocation2 + $0xa4] sm:$0xf]  ;;  %v2480_v57 = vld [vmem:[#allocation2 + $0x94] sm:$0xf] }
  0xd0   : > { %v5175_v28 = vcombine.low %v3921_v52, %v3931_v18  ;;  %v1492_v30 = vor.u32 %v1491_v15, %v1488_v9  ;;  %v1502_v31 = vor.u32 %v1501_v20, %v1497_v10  ;;  %v5064_v16 = vrot.slane %v1991_v22, 11  ;;  %v3027_v18 = vld [vmem:[#allocation2 + $0xa4] sm:$0xf] }
  0xd1   : > { %v1996_v25 = vshrl.u32 %v1791_v41, 16  ;;  %v1484_v27 = vsel %vm5602_vm7, %v1479_v29, %v1483_v50  ;;  %v1999_v34 = vshll.u32 %v1791_v41, 16  ;;  %v2005_v35 = vshrl.u32 %v1792_v21, 16  ;;  %v2481_v50 = vld [vmem:[#allocation2 + $0x98] sm:$0xf]  ;;  %v304_v22 = vld [vmem:[%s5575_s23 + $0xa0] sm:$0xff] }
  0xd2   : > { %4186 = vrot.lane.b32.xlu0 %v5175_v28, %s5484_s6  ;;  %v1493_v17 = vrot.slane %v1492_v30, 4  ;;  %v5048_v38 = vcombine.low %v1474_v42, %v1484_v27  ;;  %v1503_v58 = vrot.slane %v1502_v31, 4  ;;  %v2008_v39 = vshll.u32 %v1792_v21, 16  ;;  %v5997_v43 = vpop.permute.xlu1 %2220 }
  0xd3   : > { %v1998_v61 = vrot.slane %v1996_v25, 7  ;;  %v2007_v46 = vrot.slane %v2005_v35, 7  ;;  %vm2439_vm13 = vcmask 162944   ;;  %vm2984_vm14 = vcmask 195744   ;;  %v306_v25 = vld [vmem:[%s5575_s23 + $0xb0] sm:$0xff] }
  0xd4   : > { %v1498_v44 = vsel %vm5602_vm7, %v1493_v17, %v1497_v10  ;;  %v1508_v52 = vsel %vm5602_vm7, %v1503_v58, %v1507_v6  ;;  %2440 = vst.msk [vmem:[#allocation3] sm:$0xff] %vm2439_vm13, %v5842_v54  ;;  %vm3498_vm15 = vcmask 228544   ;;  %2441 = vst.msk [vmem:[#allocation3 + $0x8] sm:$0xff] %vm2439_vm13, %v5837_v45  ;;  %v5258_v62 = vpack.c.bf16 %v303_v40, %v303_v40  ;;  %v384_v54 = vld [vmem:[#allocation2 + $0xac] sm:$0x1] }
  0xd5   : > { %v2001_v55 = vor.u32 %v1999_v34, %v1998_v61  ;;  %v2003_v56 = vrot.slane %v1998_v61, 4  ;;  %2442 = vst.msk [vmem:[#allocation3 + $0x10] sm:$0xff] %vm2439_vm13, %v2396_v7  ;;  %v5049_v59 = vcombine.low %v1498_v44, %v1508_v52  ;;  %v2010_v60 = vor.u32 %v2008_v39, %v2007_v46  ;;  %v2482_v7 = vld [vmem:[#allocation2 + $0x9c] sm:$0x1]  ;;  %v305_v6 = vld [vmem:[%s5575_s23 + $0xa8] sm:$0xff] }
  0xd6   : > { %1717 = vrot.lane.b32.xlu0 %v5048_v38, %s5480_s27  ;;  %2985 = vst.msk [vmem:[#allocation3] sm:$0xff] %vm2984_vm14, %v5912_v11  ;;  %v2013_v0 = vshrl.u32 %v1793_v63, 16  ;;  %2986 = vst.msk [vmem:[#allocation3 + $0x8] sm:$0xff] %vm2984_vm14, %v5947_v1  ;;  %v2018_v5 = vshrl.u32 %v1794_v47, 16  ;;  %v2021_v48 = vshll.u32 %v1794_v47, 16  ;;  %vm3675_vm1 = vcmask 261344   ;;  %v6020_v11 = vpop.permute.xlu1 %2397 }
  0xd7   : > { %2987 = vst.msk [vmem:[#allocation3 + $0x10] sm:$0xff] %vm2984_vm14, %v2941_v36  ;;  %v2002_v45 = vsel %vm5627_vm8, %v5064_v16, %v2001_v55  ;;  %1719 = vrot.lane.b32.xlu1 %v5049_v59, %s5480_s27  ;;  %v2011_v1 = vsel %vm5627_vm8, %v2003_v56, %v2010_v60  ;;  %vm4220_vm2 = vcmask 294144   ;;  %v3455_v9 = vpop.permute.xlu0 %3454  ;;  %v2700_v4 = vshll.u32 %v2480_v57, 16 }
  0xd8   : > { %3499 = vst.msk [vmem:[#allocation3] sm:$0xff] %vm3498_vm15, %v5893_v32  ;;  %3500 = vst.msk [vmem:[#allocation3 + $0x8] sm:$0xff] %vm3498_vm15, %v5920_v37  ;;  %v6026_v8 = vrot.slane %v2013_v0, 11  ;;  %v2697_v32 = vshrl.u32 %v2480_v57, 16  ;;  %v3026_v37 = vld [vmem:[#allocation2 + $0xa0] sm:$0x8]  ;;  %v5080_v3 = vcombine.low %v2002_v45, %v2011_v1  ;;  %v5259_v63 = vpack.c.bf16 %v304_v22, %v304_v22 }
  0xd9   : > { %545 = vst.msk [vmem:[#allocation2 + $0xa8] sm:$0xf] %vm332_vm0, %v5258_v62  ;;  %v6032_v12 = vrot.slane %v2018_v5, 7  ;;  %v2706_v14 = vshll.u32 %v2481_v50, 16  ;;  %v2710_v53 = vshrl.u32 %v2481_v50, 16  ;;  %v385_v41 = vsel %vm5565_vm3, 0, %v384_v54 }
  0xda   : > { %3676 = vst.msk [vmem:[#allocation3] sm:$0xff] %vm3675_vm1, %v5856_v23  ;;  %3677 = vst.msk [vmem:[#allocation3 + $0x8] sm:$0xff] %vm3675_vm1, %v5852_v19  ;;  %v2483_v23 = vld [vmem:[#allocation2 + $0xa4] sm:$0xf]  ;;  %v2699_v15 = vrot.slane %v2697_v32, 4  ;;  %v2716_v19 = vshll.u32 %v2482_v7, 16  ;;  %2230 = vrot.lane.b32.xlu0 %v5080_v3, %s5481_s28  ;;  %v6047_v28 = vpop.permute.xlu1 %2942  ;;  %v5260_v44 = vpack.c.bf16 %v305_v6, %v305_v6  ;;  %v5261_v47 = vpack.c.bf16 %v306_v25, %v306_v25 }
  0xdb   : > { %4221 = vst.msk [vmem:[#allocation3] sm:$0xff] %vm4220_vm2, %v5923_v49  ;;  %4222 = vst.msk [vmem:[#allocation3 + $0x8] sm:$0xff] %vm4220_vm2, %v5937_v24  ;;  %v6043_v49 = vor.u32 %v2021_v48, %v6032_v12  ;;  %v2025_v10 = vrot.slane %v6032_v12, 4  ;;  %v5427_v24 = vld [vmem:[#allocation2 + $0x94] sm:$0xff]   ;;  %v2702_v20 = vrot.slane %v2700_v4, 5  ;;  %v2708_v21 = vrot.slane %v2706_v14, 5  ;;  %v3632_v16 = vpop.permute.xlu0 %3631 }
  0xdc   : > { %3501 = vst.msk [vmem:[#allocation3 + $0x10] sm:$0xff] %vm3498_vm15, %v3455_v9  ;;  %386 = vst [vmem:[#allocation2 + $0xac] sm:$0x1] %v385_v41  ;;  %v2712_v42 = vrot.slane %v2710_v53, 4  ;;  %v2718_v29 = vrot.slane %v2716_v19, 5  ;;  %v2721_v30 = vshrl.u32 %v2483_v23, 16 }
  0xdd   : > { %v2724_v31 = vshll.u32 %v2483_v23, 16  ;;  %v2024_v27 = vsel %vm5627_vm8, %v6026_v8, %v6043_v49  ;;  %v2703_v17 = vor.u32 %v2702_v20, %v2699_v15  ;;  %v3227_v34 = vshrl.u32 %v3026_v37, 16  ;;  %3678 = vst.msk [vmem:[#allocation3 + $0x10] sm:$0xff] %vm3675_vm1, %v3632_v16  ;;  %v567_v45 = vld [vmem:[#allocation2 + $0x30] sm:$0x8] }
  0xde   : > { %v3232_v35 = vshrl.u32 %v3027_v18, 16  ;;  %v2713_v36 = vor.u32 %v2712_v42, %v2708_v21  ;;  %v2723_v38 = vrot.slane %v2721_v30, 4  ;;  %v3235_v61 = vshll.u32 %v3027_v18, 16  ;;  %2407 = vrot.lane.b32.xlu0 %v5427_v24, %s5478_s25  ;;  %v6057_v46 = vpop.permute.xlu1 %3456  ;;  %546 = vst.msk [vmem:[#allocation2 + $0xb4] sm:$0xf] %vm332_vm0, %v5259_v63 }
  0xdf   : > { %v2726_v58 = vrot.slane %v2724_v31, 5  ;;  %v2704_v40 = vrot.slane %v2703_v17, 4  ;;  %v5128_v54 = vrot.slane %v3227_v34, 11  ;;  %547 = vst.msk [vmem:[#allocation2 + $0xb8] sm:$0xf] %vm332_vm0, %v5260_v44  ;;  %v675_v30 = vshrl.u32 %v567_v45, 16 }
  0xe0   : > { %v1795_v39 = vld [vmem:[#allocation2 + $0xa8] sm:$0xf]  ;;  %v2714_v56 = vrot.slane %v2713_v36, 4  ;;  %548 = vst.msk [vmem:[#allocation2 + $0xc4] sm:$0xf] %vm332_vm0, %v5261_v47  ;;  %v3234_v8 = vrot.slane %v3232_v35, 7 }
  0xe1   : > { %v2027_v52 = vshrl.u32 %v1795_v39, 16  ;;  %v2030_v55 = vshll.u32 %v1795_v39, 16  ;;  %v2484_v57 = vld [vmem:[#allocation2 + $0xa8] sm:$0xf]  ;;  %v2727_v59 = vor.u32 %v2726_v58, %v2723_v38  ;;  %v2709_v60 = vsel %vm5602_vm7, %v2704_v40, %v2708_v21  ;;  %v4177_v32 = vpop.permute.xlu0 %4176  ;;  %v568_v41 = vld [vmem:[#allocation2 + $0x34] sm:$0xf] }
  0xe2   : > { %v2730_v62 = vshll.u32 %v2484_v57, 16  ;;  %v2734_v0 = vshrl.u32 %v2484_v57, 16  ;;  %v3028_v50 = vld [vmem:[#allocation2 + $0xa8] sm:$0xf]  ;;  %v2719_v48 = vsel %vm5602_vm7, %v2714_v56, %v2718_v29  ;;  %v6066_v14 = vpop.permute.xlu1 %3633  ;;  %4223 = vst.msk [vmem:[#allocation3 + $0x10] sm:$0xff] %vm4220_vm2, %v4177_v32  ;;  %v3237_v15 = vor.u32 %v3235_v61, %v3234_v8 }
  0xe3   : > { %v2029_v5 = vrot.slane %v2027_v52, 7  ;;  %v2485_v7 = vld [vmem:[#allocation2 + $0xac] sm:$0x1]  ;;  %v2728_v1 = vrot.slane %v2727_v59, 4  ;;  %v5112_v37 = vcombine.low %v2709_v60, %v2719_v48  ;;  %v3239_v53 = vrot.slane %v3234_v8, 4  ;;  %v5428_v39 = vld [vmem:[#allocation2 + $0xa4] sm:$0xff]  }
  0xe4   : > { %v2732_v9 = vrot.slane %v2730_v62, 5  ;;  %v2736_v3 = vrot.slane %v2734_v0, 4  ;;  %v2740_v4 = vshll.u32 %v2485_v7, 16  ;;  %v3241_v19 = vshrl.u32 %v3028_v50, 16  ;;  %v569_v21 = vld [vmem:[#allocation2 + $0x38] sm:$0xf] }
  0xe5   : > { %v2032_v23 = vor.u32 %v2030_v55, %v2029_v5  ;;  %2952 = vrot.lane.b32.xlu0 %v5112_v37, %s5483_s30  ;;  %v3244_v20 = vshll.u32 %v3028_v50, 16  ;;  %v3238_v42 = vsel %vm5627_vm8, %v5128_v54, %v3237_v15  ;;  %v3029_v31 = vld [vmem:[#allocation2 + $0xb0] sm:$0x8]  ;;  %v680_v25 = vshrl.u32 %v568_v41, 16  ;;  %v3030_v12 = vld [vmem:[#allocation2 + $0xb4] sm:$0xf] }
  0xe6   : > { %v2733_v18 = vsel %vm5602_vm7, %v2728_v1, %v2732_v9  ;;  %v2737_v49 = vor.u32 %v2736_v3, %v2732_v9  ;;  %v2742_v24 = vrot.slane %v2740_v4, 5  ;;  %v3243_v29 = vrot.slane %v3241_v19, 7  ;;  %v6078_v34 = vpop.permute.xlu0 %4178  ;;  %v3716_v61 = vld [vmem:[#allocation2 + $0xa4] sm:$0xf]  ;;  %v3031_v63 = vld [vmem:[#allocation2 + $0xb8] sm:$0xf]  ;;  %v6086_v52 = vpop.permute.xlu1 %1161 }
  0xe7   : > { %v2033_v22 = vsel %vm5627_vm8, %v2025_v10, %v2032_v23  ;;  %v683_v17 = vshll.u32 %v568_v41, 16  ;;  %v4995_v36 = vrot.slane %v675_v30, 11  ;;  %v689_v38 = vshrl.u32 %v569_v21, 16  ;;  %v5432_v10 = vld [vmem:[%s6862_s3 + $0x10] ss:$0 sps:$4 sm:$0x33]  }
  0xe8   : > { %v5081_v6 = vcombine.low %v2024_v27, %v2033_v22  ;;  %v2738_v16 = vrot.slane %v2737_v49, 4  ;;  %v3246_v35 = vor.u32 %v3244_v20, %v3243_v29  ;;  %v692_v58 = vshll.u32 %v569_v21, 16  ;;  %v4237_v54 = vld [vmem:[#allocation3] sm:$0xff]  ;;  %v3717_v45 = vld [vmem:[#allocation2 + $0xa8] sm:$0xf] }
  0xe9   : > { %v682_v40 = vrot.slane %v680_v25, 7  ;;  %v3249_v44 = vshrl.u32 %v3029_v31, 16  ;;  %v3254_v47 = vshrl.u32 %v3030_v12, 16  ;;  %v691_v57 = vrot.slane %v689_v38, 7  ;;  %v387_v32 = vld [vmem:[#allocation2 + $0xbc] sm:$0x1] }
  0xea   : > { %2232 = vrot.lane.b32.xlu1 %v5081_v6, %s5481_s28  ;;  %v2743_v27 = vsel %vm5602_vm7, %v2738_v16, %v2742_v24  ;;  %v3247_v56 = vsel %vm5627_vm8, %v3239_v53, %v3246_v35  ;;  %v3257_v59 = vshll.u32 %v3030_v12, 16  ;;  %v6090_v5 = vpop.permute.xlu0 %1709  ;;  %v3263_v1 = vshrl.u32 %v3031_v63, 16  ;;  %v5431_v9 = vld [vmem:[#allocation2 + $0xa4] sm:$0xff]   ;;  %v3718_v19 = vld [vmem:[#allocation2 + $0xac] sm:$0x1]  ;;  %v6101_v21 = vpop.permute.xlu1 %1163  ;;  %v4239_v35 = vld [vmem:[#allocation3 + $0x10] sm:$0xff] }
  0xeb   : > { %v5113_v55 = vcombine.low %v2733_v18, %v2743_v27  ;;  %v5144_v60 = vcombine.low %v3238_v42, %v3247_v56  ;;  %v685_v62 = vor.u32 %v683_v17, %v682_v40  ;;  %v687_v0 = vrot.slane %v682_v40, 4  ;;  %v3719_v41 = vld [vmem:[#allocation2 + $0xb4] sm:$0xf]  ;;  %v4238_v31 = vld [vmem:[#allocation3 + $0x8] sm:$0xff]  ;;  %v3720_v6 = vld [vmem:[#allocation2 + $0xb8] sm:$0xf] }
  0xec   : > { %v5129_v50 = vrot.slane %v3249_v44, 11  ;;  %v694_v48 = vor.u32 %v692_v58, %v691_v57  ;;  %v3256_v7 = vrot.slane %v3254_v47, 7  ;;  %v3266_v8 = vshll.u32 %v3031_v63, 16  ;;  %v1248_v16 = vld [vmem:[#allocation2 + $0xa4] sm:$0xf] }
  0xed   : > { %3466 = vrot.lane.b32.xlu0 %v5144_v60, %s5482_s29  ;;  %v686_v37 = vsel %vm5627_vm8, %v4995_v36, %v685_v62  ;;  %vm4322_vm4 = vcmask 1041408   ;;  %vm4273_vm5 = vcmask 293888   ;;  %v3933_v3 = vshrl.u32 %v3716_v61, 16  ;;  %v6106_v25 = vld [vmem:[#allocation2 + $0xa8] sm:$0xf]  ;;  %v5433_v60 = vld [vmem:[#allocation2 + $0xb4] sm:$0xff]  }
  0xee   : > { %2409 = vrot.lane.b32.xlu1 %v5428_v39, %s5478_s25  ;;  %v695_v4 = vsel %vm5627_vm8, %v687_v0, %v694_v48  ;;  %v3259_v23 = vor.u32 %v3257_v59, %v3256_v7  ;;  %v3261_v15 = vrot.slane %v3256_v7, 4  ;;  %v3265_v53 = vrot.slane %v3263_v1, 7  ;;  %5366 = vmatprep.subr.msk.bf16.mxu0 %vm4322_vm4, %v5432_v10  ;;  %v1250_v59 = vld [vmem:[#allocation2 + $0xac] sm:$0x1]  ;;  %v1251_v1 = vld [vmem:[#allocation2 + $0xb4] sm:$0xf] }
  0xef   : > { %5328 = vmatprep.mubr.msk.bf16.mxu0 %vm4273_vm5, %v4237_v54  ;;  %v5011_v18 = vcombine.low %v686_v37, %v695_v4  ;;  %v4324_v49 = vsel %vm4322_vm4, %v5432_v10, 0  ;;  %v3935_v24 = vrot.slane %v3933_v3, 4  ;;  %v3936_v20 = vshll.u32 %v3716_v61, 16  ;;  %5367 = vmatprep.subr.msk.bf16.mxu1 %vm4322_vm4, %v5432_v10  ;;  %v6108_v17 = vpop.permute.xlu0 %2222  ;;  %v6129_v54 = vpop.permute.xlu1 %1711  ;;  %v5434_v4 = vld [vmem:[#allocation2 + $0xa4] sm:$0xff]  }
  0xf0   : > { %v3260_v22 = vsel %vm5627_vm8, %v5129_v50, %v3259_v23  ;;  %v3268_v42 = vor.u32 %v3266_v8, %v3265_v53  ;;  %5327 = vmatpush3.bf16.msra.mxu0 %v4324_v49  ;;  %v3942_v29 = vshll.u32 %v3717_v45, 16  ;;  %v3946_v30 = vshrl.u32 %v3717_v45, 16  ;;  %5365 = vmatpush3.bf16.msra.mxu1 %v4324_v49  ;;  %v1796_v53 = vld [vmem:[#allocation2 + $0xb0] sm:$0x8]  ;;  %v590_v2 = vld [vmem:[#allocation2 + $0xa8] sm:$0xf] }
  0xf1   : > { %1028 = vst.msk [vmem:[#allocation3 + $0x18] sm:$0xff] %vm1024_vm9, %v5011_v18  ;;  %3643 = vrot.lane.b32.xlu0 %v5431_v9, %s5479_s26  ;;  %v3938_v36 = vrot.slane %v3936_v20, 5  ;;  %v3952_v38 = vshll.u32 %v3718_v19, 16  ;;  %v388_v58 = vsel %vm5565_vm3, 0, %v387_v32  ;;  %v3957_v12 = vshrl.u32 %v3719_v41, 16 }
  0xf2   : > { %2954 = vrot.lane.b32.xlu1 %v5113_v55, %s5483_s30  ;;  %1205 = vst.msk [vmem:[#allocation3 + $0x18] sm:$0xff] %vm1201_vm10, %v5968_v33  ;;  %v3269_v10 = vsel %vm5627_vm8, %v3261_v15, %v3268_v42  ;;  %v3944_v61 = vrot.slane %v3942_v29, 5  ;;  %v3948_v39 = vrot.slane %v3946_v30, 4  ;;  %389 = vst [vmem:[#allocation2 + $0xbc] sm:$0x1] %v388_v58  ;;  %v3960_v27 = vshll.u32 %v3719_v41, 16 }
  0xf3   : > { %v5145_v40 = vcombine.low %v3260_v22, %v3269_v10  ;;  %1753 = vst.msk [vmem:[#allocation3 + $0x18] sm:$0xff] %vm1749_vm11, %v5985_v13  ;;  %v3939_v63 = vor.u32 %v3938_v36, %v3935_v24  ;;  %v3954_v44 = vrot.slane %v3952_v38, 5  ;;  %5329 = vmatmul.mubr.msk.bf16.vlgmr.msra.gmra.mrb[0].mxu0 %vm4273_vm5, %v4238_v31  ;;  %v3959_v47 = vrot.slane %v3957_v12, 4  ;;  %v6133_v8 = vpop.permute.xlu0 %2399  ;;  %v1252_v24 = vld [vmem:[#allocation2 + $0xb8] sm:$0xf] }
  0xf4   : > { %v3949_v55 = vor.u32 %v3948_v39, %v3944_v61  ;;  %2266 = vst.msk [vmem:[#allocation3 + $0x18] sm:$0xff] %vm2262_vm12, %v5997_v43  ;;  %v3962_v33 = vrot.slane %v3960_v27, 5  ;;  %v3966_v56 = vshll.u32 %v3720_v6, 16  ;;  %v3970_v57 = vshrl.u32 %v3720_v6, 16  ;;  %5332 = vmatprep.mubr.msk.bf16.mxu0 %vm4273_vm5, %v4239_v35  ;;  %v5435_v12 = vld [vmem:[#allocation2 + $0xb4] sm:$0xff]  }
  0xf5   : > { %v3940_v62 = vrot.slane %v3939_v63, 4  ;;  %2443 = vst.msk [vmem:[#allocation3 + $0x18] sm:$0xff] %vm2439_vm13, %v6020_v11  ;;  %v1510_v13 = vshrl.u32 %v1248_v16, 16  ;;  %v1513_v0 = vshll.u32 %v1248_v16, 16  ;;  %v1519_v50 = vshll.u32 %v6106_v25, 16 }
  0xf6   : > { %3468 = vrot.lane.b32.xlu1 %v5145_v40, %s5482_s29  ;;  %v3950_v43 = vrot.slane %v3949_v55, 4  ;;  %v3963_v45 = vor.u32 %v3962_v33, %v3959_v47  ;;  %v3968_v48 = vrot.slane %v3966_v56, 5  ;;  %v3972_v7 = vrot.slane %v3970_v57, 4  ;;  %2988 = vst.msk [vmem:[#allocation3 + $0x18] sm:$0xff] %vm2984_vm14, %v6047_v28  ;;  %v1797_v27 = vld [vmem:[#allocation2 + $0xb4] sm:$0xf] }
  0xf7   : > { %v3945_v32 = vsel %vm5602_vm7, %v3940_v62, %v3944_v61  ;;  %v1512_v11 = vrot.slane %v1510_v13, 4  ;;  %v1515_v37 = vrot.slane %v1513_v0, 5  ;;  %v1521_v9 = vrot.slane %v1519_v50, 5  ;;  %3502 = vst.msk [vmem:[#allocation3 + $0x18] sm:$0xff] %vm3498_vm15, %v6057_v46  ;;  %v1798_v33 = vld [vmem:[#allocation2 + $0xb8] sm:$0xf] }
  0xf8   : > { %v3955_v3 = vsel %vm5602_vm7, %v3950_v43, %v3954_v44  ;;  %v3964_v23 = vrot.slane %v3963_v45, 4  ;;  %v3973_v15 = vor.u32 %v3972_v7, %v3968_v48  ;;  %v1523_v28 = vshrl.u32 %v6106_v25, 16  ;;  %3679 = vst.msk [vmem:[#allocation3 + $0x18] sm:$0xff] %vm3675_vm1, %v6066_v14  ;;  %v6150_v25 = vpop.permute.xlu1 %2224  ;;  %v307_v62 = vld [vmem:[%s5575_s23 + $0xb8] sm:$0xff]  ;;  %v1799_v13 = vld [vmem:[#allocation2 + $0xc0] sm:$0x8] }
  0xf9   : > { %v5176_v19 = vcombine.low %v3945_v32, %v3955_v3  ;;  %v3721_v41 = vld [vmem:[#allocation2 + $0xbc] sm:$0x1]  ;;  %v1516_v18 = vor.u32 %v1515_v37, %v1512_v11  ;;  %v1529_v49 = vshll.u32 %v1250_v59, 16  ;;  %v1534_v46 = vshrl.u32 %v1251_v1, 16  ;;  %4224 = vst.msk [vmem:[#allocation3 + $0x18] sm:$0xff] %vm4220_vm2, %v6078_v34  ;;  %v6152_v34 = vpop.permute.xlu0 %2944 }
  0xfa   : > { %3645 = vrot.lane.b32.xlu1 %v5433_v60, %s5479_s26  ;;  %v3969_v20 = vsel %vm5602_vm7, %v3964_v23, %v3968_v48  ;;  %v3974_v22 = vrot.slane %v3973_v15, 4  ;;  %v3976_v42 = vshll.u32 %v3721_v41, 16  ;;  %v1525_v29 = vrot.slane %v1523_v28, 4  ;;  %v1253_v30 = vld [vmem:[#allocation2 + $0xbc] sm:$0x1] }
  0xfb   : > { %4188 = vrot.lane.b32.xlu0 %v5176_v19, %s5484_s6  ;;  %v1517_v14 = vrot.slane %v1516_v18, 4  ;;  %v1531_v31 = vrot.slane %v1529_v49, 5  ;;  %v1536_v6 = vrot.slane %v1534_v46, 4  ;;  %v1537_v16 = vshll.u32 %v1251_v1, 16  ;;  %v1800_v48 = vld [vmem:[#allocation2 + $0xc4] sm:$0xf] }
  0xfc   : > { %v3978_v35 = vrot.slane %v3976_v42, 5  ;;  %v1526_v36 = vor.u32 %v1525_v29, %v1521_v9  ;;  %v1543_v38 = vshll.u32 %v1252_v24, 16  ;;  %v1547_v58 = vshrl.u32 %v1252_v24, 16  ;;  %v2486_v28 = vld [vmem:[#allocation2 + $0xb4] sm:$0xf] }
  0xfd   : > { %v1522_v10 = vsel %vm5602_vm7, %v1517_v14, %v1521_v9  ;;  %v1539_v61 = vrot.slane %v1537_v16, 5  ;;  %v1553_v39 = vshll.u32 %v1253_v30, 16  ;;  %v2035_v40 = vshrl.u32 %v1796_v53, 16  ;;  %v6164_v9 = vpop.permute.xlu1 %2401  ;;  %v2487_v24 = vld [vmem:[#allocation2 + $0xb8] sm:$0xf] }
  0xfe   : > { %1173 = vrot.lane.b32.xlu1 %v5434_v4, %s5477_s24  ;;  %v3979_v63 = vsel %vm5602_vm7, %v3974_v22, %v3978_v35  ;;  %v1527_v44 = vrot.slane %v1526_v36, 4  ;;  %v1545_v47 = vrot.slane %v1543_v38, 5  ;;  %v1549_v55 = vrot.slane %v1547_v58, 4  ;;  %v6167_v53 = vpop.permute.xlu0 %3458  ;;  %v571_v16 = vld [vmem:[#allocation2 + $0x44] sm:$0xf] }
  0xff   : > { %v5177_v56 = vcombine.low %v3969_v20, %v3979_v63  ;;  %v1540_v57 = vor.u32 %v1539_v61, %v1536_v6  ;;  %v1555_v59 = vrot.slane %v1553_v39, 5  ;;  %v5066_v60 = vrot.slane %v2035_v40, 11  ;;  %v570_v6 = vld [vmem:[#allocation2 + $0x40] sm:$0x8]  ;;  %v2488_v36 = vld [vmem:[#allocation2 + $0xbc] sm:$0x1] }
 0x100   : > { %v1532_v0 = vsel %vm5602_vm7, %v1527_v44, %v1531_v31  ;;  %v1550_v50 = vor.u32 %v1549_v55, %v1545_v47  ;;  %v2040_v43 = vshrl.u32 %v1797_v27, 16  ;;  %v2043_v45 = vshll.u32 %v1797_v27, 16  ;;  %v4240_v7 = vld [vmem:[#allocation3 + $0x18] sm:$0xff]  ;;  %v572_v40 = vld [vmem:[#allocation2 + $0x48] sm:$0xf] }
 0x101   : > { %4190 = vrot.lane.b32.xlu0 %v5177_v56, %s5484_s6  ;;  %v5050_v1 = vcombine.low %v1522_v10, %v1532_v0  ;;  %v1541_v32 = vrot.slane %v1540_v57, 4  ;;  %v2049_v11 = vshrl.u32 %v1798_v33, 16  ;;  %v2052_v37 = vshll.u32 %v1798_v33, 16  ;;  %5333 = vmatmul.mubr.msk.bf16.gmra.mrb[4].mxu0 %vm4273_vm5, %v4240_v7  ;;  %v6188_v63 = vpop.permute.xlu1 %2946  ;;  %v308_v56 = vld [vmem:[%s5575_s23 + $0xc0] sm:$0xff]  ;;  %v309_v57 = vld [vmem:[%s5575_s23 + $0xc8] sm:$0xff] }
 0x102   : > { %1175 = vrot.lane.b32.xlu1 %v5435_v12, %s5477_s24  ;;  %v1551_v3 = vrot.slane %v1550_v50, 4  ;;  %v2042_v4 = vrot.slane %v2040_v43, 7  ;;  %v5262_v23 = vpack.c.bf16 %v307_v62, %v307_v62  ;;  %v2057_v15 = vshrl.u32 %v1799_v13, 16  ;;  %v5436_v43 = vld [vmem:[#allocation2 + $0xb4] sm:$0xff]  }
 0x103   : > { %v1546_v19 = vsel %vm5602_vm7, %v1541_v32, %v1545_v47  ;;  %v2051_v41 = vrot.slane %v2049_v11, 7  ;;  %v2062_v18 = vshrl.u32 %v1800_v48, 16  ;;  %v2065_v49 = vshll.u32 %v1800_v48, 16  ;;  %v390_v32 = vld [vmem:[#allocation2 + $0xcc] sm:$0x1] }
 0x104   : > { %v1556_v46 = vsel %vm5602_vm7, %v1551_v3, %v1555_v59  ;;  %v2045_v20 = vor.u32 %v2043_v45, %v2042_v4  ;;  %v2047_v22 = vrot.slane %v2042_v4, 4  ;;  %549 = vst.msk [vmem:[#allocation2 + $0xc8] sm:$0xf] %vm332_vm0, %v5262_v23  ;;  %v6174_v42 = vrot.slane %v2057_v15, 11  ;;  %v6192_v59 = vpop.permute.xlu0 %3635 }
 0x105   : > { %1721 = vrot.lane.b32.xlu0 %v5050_v1, %s5480_s27  ;;  %v5051_v29 = vcombine.low %v1546_v19, %v1556_v46  ;;  %v2054_v30 = vor.u32 %v2052_v37, %v2051_v41  ;;  %v6177_v14 = vrot.slane %v2062_v18, 7  ;;  %v2745_v31 = vshrl.u32 %v2486_v28, 16  ;;  %v2489_v18 = vld [vmem:[#allocation2 + $0xc4] sm:$0xf] }
 0x106   : > { %v2046_v35 = vsel %vm5627_vm8, %v5066_v60, %v2045_v20  ;;  %v2748_v38 = vshll.u32 %v2486_v28, 16  ;;  %v2754_v58 = vshll.u32 %v2487_v24, 16  ;;  %v2758_v12 = vshrl.u32 %v2487_v24, 16  ;;  %v310_v60 = vld [vmem:[%s5575_s23 + $0xd0] sm:$0xff] }
 0x107   : > { %1723 = vrot.lane.b32.xlu1 %v5051_v29, %s5480_s27  ;;  %v2055_v10 = vsel %vm5627_vm8, %v2047_v22, %v2054_v30  ;;  %v6185_v61 = vor.u32 %v2065_v49, %v6177_v14  ;;  %v2069_v39 = vrot.slane %v6177_v14, 4  ;;  %v2747_v27 = vrot.slane %v2745_v31, 4 }
 0x108   : > { %v5082_v44 = vcombine.low %v2046_v35, %v2055_v10  ;;  %v2750_v47 = vrot.slane %v2748_v38, 5  ;;  %v2756_v55 = vrot.slane %v2754_v58, 5  ;;  %v2760_v33 = vrot.slane %v2758_v12, 4 }
 0x109   : > { %v2068_v62 = vsel %vm5627_vm8, %v6174_v42, %v6185_v61  ;;  %v2764_v13 = vshll.u32 %v2488_v36, 16  ;;  %v697_v0 = vshrl.u32 %v570_v6, 16  ;;  %v702_v50 = vshrl.u32 %v571_v16, 16  ;;  %v6202_v42 = vpop.permute.xlu1 %3460  ;;  %v6212_v35 = vpop.permute.xlu0 %4180 }
 0x10a   : > { %2234 = vrot.lane.b32.xlu0 %v5082_v44, %s5481_s28  ;;  %v2751_v45 = vor.u32 %v2750_v47, %v2747_v27  ;;  %v2761_v48 = vor.u32 %v2760_v33, %v2756_v55  ;;  %v705_v7 = vshll.u32 %v571_v16, 16  ;;  %v711_v1 = vshrl.u32 %v572_v40, 16  ;;  %v3032_v16 = vld [vmem:[#allocation2 + $0xc0] sm:$0x8]  ;;  %v3033_v33 = vld [vmem:[#allocation2 + $0xc4] sm:$0xf] }
 0x10b   : > { %v1801_v11 = vld [vmem:[#allocation2 + $0xc8] sm:$0xf]  ;;  %v2766_v37 = vrot.slane %v2764_v13, 5  ;;  %v5263_v3 = vpack.c.bf16 %v308_v56, %v308_v56  ;;  %v5264_v4 = vpack.c.bf16 %v309_v57, %v309_v57  ;;  %v5265_v23 = vpack.c.bf16 %v310_v60, %v310_v60 }
 0x10c   : > { %v2071_v15 = vshrl.u32 %v1801_v11, 16  ;;  %v2074_v28 = vshll.u32 %v1801_v11, 16  ;;  %v2752_v19 = vrot.slane %v2751_v45, 4  ;;  %v2762_v41 = vrot.slane %v2761_v48, 4  ;;  %v2490_v22 = vld [vmem:[#allocation2 + $0xc8] sm:$0xf] }
 0x10d   : > { %v4996_v49 = vrot.slane %v697_v0, 11  ;;  %v704_v24 = vrot.slane %v702_v50, 7  ;;  %v713_v46 = vrot.slane %v711_v1, 7  ;;  %v714_v20 = vshll.u32 %v572_v40, 16  ;;  %550 = vst.msk [vmem:[#allocation2 + $0xd4] sm:$0xf] %vm332_vm0, %v5263_v3  ;;  %v6223_v11 = vpop.permute.xlu1 %3637 }
 0x10e   : > { %551 = vst.msk [vmem:[#allocation2 + $0xd8] sm:$0xf] %vm332_vm0, %v5264_v4  ;;  %552 = vst.msk [vmem:[#allocation2 + $0xe4] sm:$0xf] %vm332_vm0, %v5265_v23  ;;  %v2073_v29 = vrot.slane %v2071_v15, 7  ;;  %2411 = vrot.lane.b32.xlu0 %v5436_v43, %s5478_s25  ;;  %v2757_v30 = vsel %vm5602_vm7, %v2752_v19, %v2756_v55  ;;  %v2767_v31 = vsel %vm5602_vm7, %v2762_v41, %v2766_v37  ;;  %v391_v6 = vsel %vm5565_vm3, 0, %v390_v32 }
 0x10f   : > { %v5114_v36 = vcombine.low %v2757_v30, %v2767_v31  ;;  %v707_v38 = vor.u32 %v705_v7, %v704_v24  ;;  %v709_v58 = vrot.slane %v704_v24, 4  ;;  %v716_v12 = vor.u32 %v714_v20, %v713_v46  ;;  %392 = vst [vmem:[#allocation2 + $0xcc] sm:$0x1] %v391_v6  ;;  %v3034_v56 = vld [vmem:[#allocation2 + $0xc8] sm:$0xf]  ;;  %v6226_v23 = vpop.permute.xlu0 %4182 }
 0x110   : > { %v2076_v10 = vor.u32 %v2074_v28, %v2073_v29  ;;  %v2769_v61 = vshrl.u32 %v2489_v18, 16  ;;  %v2772_v27 = vshll.u32 %v2489_v18, 16  ;;  %v2778_v40 = vshll.u32 %v2490_v22, 16  ;;  %v573_v43 = vld [vmem:[#allocation2 + $0x50] sm:$0x8]  ;;  %v5437_v15 = vld [vmem:[#allocation2 + $0xc4] sm:$0xff]  }
 0x111   : > { %v708_v44 = vsel %vm5627_vm8, %v4996_v49, %v707_v38  ;;  %v717_v47 = vsel %vm5627_vm8, %v709_v58, %v716_v12  ;;  %v2782_v55 = vshrl.u32 %v2490_v22, 16  ;;  %v3271_v57 = vshrl.u32 %v3032_v16, 16  ;;  %v574_v45 = vld [vmem:[#allocation2 + $0x54] sm:$0xf]  ;;  %v3035_v18 = vld [vmem:[#allocation2 + $0xd0] sm:$0x8] }
 0x112   : > { %v2077_v60 = vsel %vm5627_vm8, %v2069_v39, %v2076_v10  ;;  %2956 = vrot.lane.b32.xlu0 %v5114_v36, %s5483_s30  ;;  %v5012_v13 = vcombine.low %v708_v44, %v717_v47  ;;  %v2771_v0 = vrot.slane %v2769_v61, 4  ;;  %v2774_v50 = vrot.slane %v2772_v27, 5  ;;  %v575_v39 = vld [vmem:[#allocation2 + $0x58] sm:$0xf]  ;;  %v3722_v58 = vld [vmem:[#allocation2 + $0xc4] sm:$0xf] }
 0x113   : > { %v5083_v48 = vcombine.low %v2068_v62, %v2077_v60  ;;  %v2780_v7 = vrot.slane %v2778_v40, 5  ;;  %v2784_v1 = vrot.slane %v2782_v55, 4  ;;  %v5130_v32 = vrot.slane %v3271_v57, 11 }
 0x114   : > { %1029 = vst.msk [vmem:[#allocation3 + $0x20] sm:$0xff] %vm1024_vm9, %v5012_v13  ;;  %v2775_v37 = vor.u32 %v2774_v50, %v2771_v0  ;;  %v3276_v14 = vshrl.u32 %v3033_v33, 16  ;;  %v3279_v3 = vshll.u32 %v3033_v33, 16  ;;  %v3285_v4 = vshrl.u32 %v3034_v56, 16  ;;  %v3036_v27 = vld [vmem:[#allocation2 + $0xd4] sm:$0xf]  ;;  %v6250_v33 = vpop.permute.xlu0 %1713 }
 0x115   : > { %2236 = vrot.lane.b32.xlu1 %v5083_v48, %s5481_s28  ;;  %1206 = vst.msk [vmem:[#allocation3 + $0x20] sm:$0xff] %vm1201_vm10, %v6086_v52  ;;  %v2785_v62 = vor.u32 %v2784_v1, %v2780_v7  ;;  %v3288_v28 = vshll.u32 %v3034_v56, 16  ;;  %v719_v19 = vshrl.u32 %v573_v43, 16  ;;  %v724_v41 = vshrl.u32 %v574_v45, 16  ;;  %v3723_v13 = vld [vmem:[#allocation2 + $0xc8] sm:$0xf] }
 0x116   : > { %v2491_v49 = vld [vmem:[#allocation2 + $0xcc] sm:$0x1]  ;;  %v2776_v24 = vrot.slane %v2775_v37, 4  ;;  %v3278_v46 = vrot.slane %v3276_v14, 7  ;;  %v3287_v20 = vrot.slane %v3285_v4, 7  ;;  %v727_v22 = vshll.u32 %v574_v45, 16 }
 0x117   : > { %1754 = vst.msk [vmem:[#allocation3 + $0x20] sm:$0xff] %vm1749_vm11, %v6090_v5  ;;  %v2786_v29 = vrot.slane %v2785_v62, 4  ;;  %v2788_v30 = vshll.u32 %v2491_v49, 16  ;;  %v4997_v31 = vrot.slane %v719_v19, 11  ;;  %v726_v6 = vrot.slane %v724_v41, 7 }
 0x118   : > { %2267 = vst.msk [vmem:[#allocation3 + $0x20] sm:$0xff] %vm2262_vm12, %v6108_v17  ;;  %v2781_v52 = vsel %vm5602_vm7, %v2776_v24, %v2780_v7  ;;  %v3281_v16 = vor.u32 %v3279_v3, %v3278_v46  ;;  %v3283_v36 = vrot.slane %v3278_v46, 4  ;;  %v3290_v38 = vor.u32 %v3288_v28, %v3287_v20  ;;  %v6242_v17 = vpop.permute.xlu1 %1165  ;;  %v3724_v48 = vld [vmem:[#allocation2 + $0xcc] sm:$0x1]  ;;  %v3725_v19 = vld [vmem:[#allocation2 + $0xd4] sm:$0xf] }
 0x119   : > { %2444 = vst.msk [vmem:[#allocation3 + $0x20] sm:$0xff] %vm2439_vm13, %v6133_v8  ;;  %2413 = vrot.lane.b32.xlu1 %v5437_v15, %s5478_s25  ;;  %v2790_v5 = vrot.slane %v2788_v30, 5  ;;  %v729_v12 = vor.u32 %v727_v22, %v726_v6  ;;  %v731_v10 = vrot.slane %v726_v6, 4  ;;  %v733_v61 = vshrl.u32 %v575_v39, 16  ;;  %v3037_v8 = vld [vmem:[#allocation2 + $0xd8] sm:$0xf]  ;;  %v6266_v22 = vpop.permute.xlu0 %2226 }
 0x11a   : > { %2989 = vst.msk [vmem:[#allocation3 + $0x20] sm:$0xff] %vm2984_vm14, %v6152_v34  ;;  %v3282_v40 = vsel %vm5627_vm8, %v5130_v32, %v3281_v16  ;;  %v3291_v44 = vsel %vm5627_vm8, %v3283_v36, %v3290_v38  ;;  %v736_v47 = vshll.u32 %v575_v39, 16  ;;  %v3293_v55 = vshrl.u32 %v3035_v18, 16  ;;  %v5438_v32 = vld [vmem:[#allocation2 + $0xc4] sm:$0xff]   ;;  %v393_v39 = vld [vmem:[#allocation2 + $0xdc] sm:$0x1] }
 0x11b   : > { %3503 = vst.msk [vmem:[#allocation3 + $0x20] sm:$0xff] %vm3498_vm15, %v6167_v53  ;;  %v2791_v56 = vsel %vm5602_vm7, %v2786_v29, %v2790_v5  ;;  %v5146_v34 = vcombine.low %v3282_v40, %v3291_v44  ;;  %v730_v57 = vsel %vm5627_vm8, %v4997_v31, %v729_v12  ;;  %v735_v60 = vrot.slane %v733_v61, 7  ;;  %v3726_v20 = vld [vmem:[#allocation2 + $0xd8] sm:$0xf] }
 0x11c   : > { %3680 = vst.msk [vmem:[#allocation3 + $0x20] sm:$0xff] %vm3675_vm1, %v6192_v59  ;;  %v5115_v0 = vcombine.low %v2781_v52, %v2791_v56  ;;  %v5131_v50 = vrot.slane %v3293_v55, 11  ;;  %v3298_v43 = vshrl.u32 %v3036_v27, 16  ;;  %v3301_v45 = vshll.u32 %v3036_v27, 16  ;;  %v6264_v41 = vpop.permute.xlu1 %1167  ;;  %v1255_v27 = vld [vmem:[#allocation2 + $0xc8] sm:$0xf] }
 0x11d   : > { %4225 = vst.msk [vmem:[#allocation3 + $0x20] sm:$0xff] %vm4220_vm2, %v6212_v35  ;;  %3470 = vrot.lane.b32.xlu0 %v5146_v34, %s5482_s29  ;;  %v738_v53 = vor.u32 %v736_v47, %v735_v60  ;;  %v3307_v7 = vshrl.u32 %v3037_v8, 16  ;;  %v3310_v1 = vshll.u32 %v3037_v8, 16  ;;  %v3981_v37 = vshrl.u32 %v3722_v58, 16  ;;  %v1256_v55 = vld [vmem:[#allocation2 + $0xcc] sm:$0x1] }
 0x11e   : > { %2958 = vrot.lane.b32.xlu1 %v5115_v0, %s5483_s30  ;;  %v3300_v14 = vrot.slane %v3298_v43, 7  ;;  %v3984_v3 = vshll.u32 %v3722_v58, 16  ;;  %v3990_v59 = vshll.u32 %v3723_v13, 16  ;;  %v3994_v4 = vshrl.u32 %v3723_v13, 16  ;;  %v1254_v58 = vld [vmem:[#allocation2 + $0xc4] sm:$0xf] }
 0x11f   : > { %v739_v15 = vsel %vm5627_vm8, %v731_v10, %v738_v53  ;;  %v3309_v62 = vrot.slane %v3307_v7, 7  ;;  %v3983_v28 = vrot.slane %v3981_v37, 4  ;;  %v4000_v35 = vshll.u32 %v3724_v48, 16  ;;  %v6292_v48 = vpop.permute.xlu0 %2403  ;;  %v311_v37 = vld [vmem:[%s5575_s23 + $0xd8] sm:$0xff] }
 0x120   : > { %v5013_v18 = vcombine.low %v730_v57, %v739_v15  ;;  %v3303_v49 = vor.u32 %v3301_v45, %v3300_v14  ;;  %v3305_v24 = vrot.slane %v3300_v14, 4  ;;  %v3986_v46 = vrot.slane %v3984_v3, 5  ;;  %v6284_v13 = vpop.permute.xlu1 %1715  ;;  %v1257_v45 = vld [vmem:[#allocation2 + $0xd4] sm:$0xf]  ;;  %v5440_v3 = vld [vmem:[#allocation2 + $0xc4] sm:$0xff]  }
 0x121   : > { %v3312_v29 = vor.u32 %v3310_v1, %v3309_v62  ;;  %3647 = vrot.lane.b32.xlu0 %v5438_v32, %s5479_s26  ;;  %v3992_v30 = vrot.slane %v3990_v59, 5  ;;  %v3996_v31 = vrot.slane %v3994_v4, 4  ;;  %v4002_v6 = vrot.slane %v4000_v35, 5 }
 0x122   : > { %1030 = vst.msk [vmem:[#allocation3 + $0x28] sm:$0xff] %vm1024_vm9, %v5013_v18  ;;  %v3304_v52 = vsel %vm5627_vm8, %v5131_v50, %v3303_v49  ;;  %v3987_v16 = vor.u32 %v3986_v46, %v3983_v28  ;;  %v394_v36 = vsel %vm5565_vm3, 0, %v393_v39  ;;  %v4005_v38 = vshrl.u32 %v3725_v19, 16  ;;  %v1258_v28 = vld [vmem:[#allocation2 + $0xd8] sm:$0xf] }
 0x123   : > { %1207 = vst.msk [vmem:[#allocation3 + $0x28] sm:$0xff] %vm1201_vm10, %v6101_v21  ;;  %v3313_v5 = vsel %vm5627_vm8, %v3305_v24, %v3312_v29  ;;  %v3997_v12 = vor.u32 %v3996_v31, %v3992_v30  ;;  %395 = vst [vmem:[#allocation2 + $0xdc] sm:$0x1] %v394_v36  ;;  %v4008_v10 = vshll.u32 %v3725_v19, 16  ;;  %v4014_v61 = vshll.u32 %v3726_v20, 16 }
 0x124   : > { %v5147_v40 = vcombine.low %v3304_v52, %v3313_v5  ;;  %1755 = vst.msk [vmem:[#allocation3 + $0x28] sm:$0xff] %vm1749_vm11, %v6129_v54  ;;  %v3988_v44 = vrot.slane %v3987_v16, 4  ;;  %v4007_v47 = vrot.slane %v4005_v38, 4  ;;  %v4018_v8 = vshrl.u32 %v3726_v20, 16  ;;  %v4241_v56 = vld [vmem:[#allocation3 + $0x20] sm:$0xff]  ;;  %v5439_v54 = vld [vmem:[#allocation2 + $0xd4] sm:$0xff]   ;;  %v6311_v31 = vpop.permute.xlu1 %2228  ;;  %v6314_v38 = vpop.permute.xlu0 %2948 }
 0x125   : > { %v3998_v34 = vrot.slane %v3997_v12, 4  ;;  %2268 = vst.msk [vmem:[#allocation3 + $0x28] sm:$0xff] %vm2262_vm12, %v6150_v25  ;;  %v4010_v21 = vrot.slane %v4008_v10, 5  ;;  %v6282_v57 = vrot.slane %v4014_v61, 5  ;;  %v1558_v60 = vshrl.u32 %v1254_v58, 16  ;;  %5336 = vmatprep.mubr.msk.bf16.mxu0 %vm4273_vm5, %v4241_v56 }
 0x126   : > { %3472 = vrot.lane.b32.xlu1 %v5147_v40, %s5482_s29  ;;  %v3993_v0 = vsel %vm5602_vm7, %v3988_v44, %v3992_v30  ;;  %v4020_v50 = vrot.slane %v4018_v8, 4  ;;  %2445 = vst.msk [vmem:[#allocation3 + $0x28] sm:$0xff] %vm2439_vm13, %v6164_v9  ;;  %v1561_v25 = vshll.u32 %v1254_v58, 16  ;;  %v1567_v43 = vshll.u32 %v1255_v27, 16  ;;  %v1802_v30 = vld [vmem:[#allocation2 + $0xd0] sm:$0x8] }
 0x127   : > { %v4003_v53 = vsel %vm5602_vm7, %v3998_v34, %v4002_v6  ;;  %v4011_v7 = vor.u32 %v4010_v21, %v4007_v47  ;;  %v1560_v1 = vrot.slane %v1558_v60, 4  ;;  %v1571_v32 = vshrl.u32 %v1255_v27, 16  ;;  %2990 = vst.msk [vmem:[#allocation3 + $0x28] sm:$0xff] %vm2984_vm14, %v6188_v63  ;;  %v1803_v44 = vld [vmem:[#allocation2 + $0xd4] sm:$0xf] }
 0x128   : > { %v5178_v14 = vcombine.low %v3993_v0, %v4003_v53  ;;  %v4021_v59 = vor.u32 %v4020_v50, %v6282_v57  ;;  %v1563_v9 = vrot.slane %v1561_v25, 5  ;;  %v1569_v4 = vrot.slane %v1567_v43, 5  ;;  %3504 = vst.msk [vmem:[#allocation3 + $0x28] sm:$0xff] %vm3498_vm15, %v6202_v42  ;;  %v1804_v47 = vld [vmem:[#allocation2 + $0xd8] sm:$0xf] }
 0x129   : > { %v4012_v39 = vrot.slane %v4011_v7, 4  ;;  %v1573_v15 = vrot.slane %v1571_v32, 4  ;;  %v1577_v62 = vshll.u32 %v1256_v55, 16  ;;  %v1582_v35 = vshrl.u32 %v1257_v45, 16  ;;  %3681 = vst.msk [vmem:[#allocation3 + $0x28] sm:$0xff] %vm3675_vm1, %v6223_v11  ;;  %v6323_v32 = vpop.permute.xlu1 %2405 }
 0x12a   : > { %3649 = vrot.lane.b32.xlu1 %v5439_v54, %s5479_s26  ;;  %4192 = vrot.lane.b32.xlu0 %v5178_v14, %s5484_s6  ;;  %v3727_v63 = vld [vmem:[#allocation2 + $0xdc] sm:$0x1]  ;;  %v4022_v19 = vrot.slane %v4021_v59, 4  ;;  %v1564_v18 = vor.u32 %v1563_v9, %v1560_v1  ;;  %v1585_v24 = vshll.u32 %v1257_v45, 16  ;;  %v5266_v46 = vpack.c.bf16 %v311_v37, %v311_v37  ;;  %4226 = vst.msk [vmem:[#allocation3 + $0x28] sm:$0xff] %vm4220_vm2, %v6226_v23  ;;  %v5441_v23 = vld [vmem:[#allocation2 + $0xd4] sm:$0xff]  }
 0x12b   : > { %v1259_v49 = vld [vmem:[#allocation2 + $0xdc] sm:$0x1]  ;;  %v4017_v42 = vsel %vm5602_vm7, %v4012_v39, %v6282_v57  ;;  %v4024_v20 = vshll.u32 %v3727_v63, 16  ;;  %v1574_v29 = vor.u32 %v1573_v15, %v1569_v4  ;;  %v1579_v11 = vrot.slane %v1577_v62, 5  ;;  %v1805_v57 = vld [vmem:[#allocation2 + $0xe0] sm:$0x8] }
 0x12c   : > { %v1565_v6 = vrot.slane %v1564_v18, 4  ;;  %v1584_v52 = vrot.slane %v1582_v35, 4  ;;  %v1587_v16 = vrot.slane %v1585_v24, 5  ;;  %v1591_v36 = vshll.u32 %v1258_v28, 16  ;;  %553 = vst.msk [vmem:[#allocation2 + $0xe8] sm:$0xf] %vm332_vm0, %v5266_v46 }
 0x12d   : > { %v4026_v58 = vrot.slane %v4024_v20, 5  ;;  %v1575_v5 = vrot.slane %v1574_v29, 4  ;;  %v1595_v12 = vshrl.u32 %v1258_v28, 16  ;;  %v1601_v10 = vshll.u32 %v1259_v49, 16  ;;  %v1806_v60 = vld [vmem:[#allocation2 + $0xe4] sm:$0xf] }
 0x12e   : > { %1177 = vrot.lane.b32.xlu1 %v5440_v3, %s5477_s24  ;;  %v1570_v61 = vsel %vm5602_vm7, %v1565_v6, %v1569_v4  ;;  %v1588_v27 = vor.u32 %v1587_v16, %v1584_v52  ;;  %v1593_v40 = vrot.slane %v1591_v36, 5  ;;  %v2079_v8 = vshrl.u32 %v1802_v30, 16  ;;  %v2492_v9 = vld [vmem:[#allocation2 + $0xd4] sm:$0xf]  ;;  %v6329_v4 = vpop.permute.xlu0 %3462  ;;  %v2493_v29 = vld [vmem:[#allocation2 + $0xd8] sm:$0xf] }
 0x12f   : > { %v4027_v55 = vsel %vm5602_vm7, %v4022_v19, %v4026_v58  ;;  %v1580_v56 = vsel %vm5602_vm7, %v1575_v5, %v1579_v11  ;;  %v1597_v34 = vrot.slane %v1595_v12, 4  ;;  %v1603_v21 = vrot.slane %v1601_v10, 5  ;;  %v576_v11 = vld [vmem:[#allocation2 + $0x60] sm:$0x8]  ;;  %v2494_v36 = vld [vmem:[#allocation2 + $0xdc] sm:$0x1] }
 0x130   : > { %v5179_v54 = vcombine.low %v4017_v42, %v4027_v55  ;;  %v5052_v0 = vcombine.low %v1570_v61, %v1580_v56  ;;  %v1589_v50 = vrot.slane %v1588_v27, 4  ;;  %v5068_v25 = vrot.slane %v2079_v8, 11  ;;  %v577_v10 = vld [vmem:[#allocation2 + $0x64] sm:$0xf]  ;;  %v6339_v61 = vpop.permute.xlu1 %2950 }
 0x131   : > { %v1598_v43 = vor.u32 %v1597_v34, %v1593_v40  ;;  %v2084_v45 = vshrl.u32 %v1803_v44, 16  ;;  %v2087_v53 = vshll.u32 %v1803_v44, 16  ;;  %v2093_v7 = vshrl.u32 %v1804_v47, 16  ;;  %v4242_v1 = vld [vmem:[#allocation3 + $0x28] sm:$0xff] }
 0x132   : > { %4194 = vrot.lane.b32.xlu0 %v5179_v54, %s5484_s6  ;;  %1179 = vrot.lane.b32.xlu1 %v5441_v23, %s5477_s24  ;;  %v1594_v37 = vsel %vm5602_vm7, %v1589_v50, %v1593_v40  ;;  %v2096_v14 = vshll.u32 %v1804_v47, 16  ;;  %v2101_v3 = vshrl.u32 %v1805_v57, 16  ;;  %v2106_v59 = vshrl.u32 %v1806_v60, 16  ;;  %v6344_v8 = vpop.permute.xlu0 %3639  ;;  %v578_v57 = vld [vmem:[#allocation2 + $0x68] sm:$0xf]  ;;  %v5442_v54 = vld [vmem:[#allocation2 + $0xd4] sm:$0xff]  }
 0x133   : > { %v1599_v39 = vrot.slane %v1598_v43, 4  ;;  %v2086_v15 = vrot.slane %v2084_v45, 7  ;;  %v2095_v62 = vrot.slane %v2093_v7, 7  ;;  %v1807_v28 = vld [vmem:[#allocation2 + $0xe8] sm:$0xf]  ;;  %v2109_v35 = vshll.u32 %v1806_v60, 16  ;;  %5337 = vmatmul.mubr.msk.bf16.gmra.mrb[8].mxu0 %vm4273_vm5, %v4242_v1 }
 0x134   : > { %v5069_v63 = vrot.slane %v2101_v3, 11  ;;  %v2108_v19 = vrot.slane %v2106_v59, 7  ;;  %v2115_v18 = vshrl.u32 %v1807_v28, 16  ;;  %v2118_v49 = vshll.u32 %v1807_v28, 16  ;;  %v396_v43 = vld [vmem:[#allocation2 + $0xec] sm:$0x1] }
 0x135   : > { %v1604_v24 = vsel %vm5602_vm7, %v1599_v39, %v1603_v21  ;;  %v2089_v46 = vor.u32 %v2087_v53, %v2086_v15  ;;  %v2091_v42 = vrot.slane %v2086_v15, 4  ;;  %v2098_v20 = vor.u32 %v2096_v14, %v2095_v62  ;;  %v2496_v39 = vld [vmem:[#allocation2 + $0xe8] sm:$0xf] }
 0x136   : > { %1725 = vrot.lane.b32.xlu0 %v5052_v0, %s5480_s27  ;;  %v5053_v30 = vcombine.low %v1594_v37, %v1604_v24  ;;  %v2111_v6 = vor.u32 %v2109_v35, %v2108_v19  ;;  %v2113_v52 = vrot.slane %v2108_v19, 4  ;;  %v2117_v16 = vrot.slane %v2115_v18, 7  ;;  %v2495_v37 = vld [vmem:[#allocation2 + $0xe4] sm:$0xf]  ;;  %v6352_v19 = vpop.permute.xlu1 %3464 }
 0x137   : > { %v2090_v58 = vsel %vm5627_vm8, %v5068_v25, %v2089_v46  ;;  %v2099_v23 = vsel %vm5627_vm8, %v2091_v42, %v2098_v20  ;;  %v2793_v5 = vshrl.u32 %v2492_v9, 16  ;;  %v2796_v12 = vshll.u32 %v2492_v9, 16  ;;  %v5443_v15 = vld [vmem:[#allocation2 + $0xe4] sm:$0xff]   ;;  %v3038_v42 = vld [vmem:[#allocation2 + $0xe0] sm:$0x8] }
 0x138   : > { %1727 = vrot.lane.b32.xlu1 %v5053_v30, %s5480_s27  ;;  %v5084_v27 = vcombine.low %v2090_v58, %v2099_v23  ;;  %v2112_v40 = vsel %vm5627_vm8, %v5069_v63, %v2111_v6  ;;  %v2120_v44 = vor.u32 %v2118_v49, %v2117_v16  ;;  %v2802_v47 = vshll.u32 %v2493_v29, 16 }
 0x139   : > { %v2795_v55 = vrot.slane %v2793_v5, 4  ;;  %v2798_v56 = vrot.slane %v2796_v12, 5  ;;  %v2806_v34 = vshrl.u32 %v2493_v29, 16  ;;  %v2812_v21 = vshll.u32 %v2494_v36, 16 }
 0x13a   : > { %2238 = vrot.lane.b32.xlu0 %v5084_v27, %s5481_s28  ;;  %v2121_v60 = vsel %vm5627_vm8, %v2113_v52, %v2120_v44  ;;  %v2804_v0 = vrot.slane %v2802_v47, 5  ;;  %v741_v50 = vshrl.u32 %v576_v11, 16  ;;  %v746_v25 = vshrl.u32 %v577_v10, 16  ;;  %v6355_v20 = vpop.permute.xlu0 %4184  ;;  %v3039_v52 = vld [vmem:[#allocation2 + $0xe4] sm:$0xf] }
 0x13b   : > { %v5085_v45 = vcombine.low %v2112_v40, %v2121_v60  ;;  %v2799_v53 = vor.u32 %v2798_v56, %v2795_v55  ;;  %v2808_v7 = vrot.slane %v2806_v34, 4  ;;  %v2814_v1 = vrot.slane %v2812_v21, 5  ;;  %v3040_v27 = vld [vmem:[#allocation2 + $0xe8] sm:$0xf]  ;;  %v579_v34 = vld [vmem:[#allocation2 + $0x70] sm:$0x8] }
 0x13c   : > { %v4998_v14 = vrot.slane %v741_v50, 11  ;;  %v748_v3 = vrot.slane %v746_v25, 7  ;;  %v749_v59 = vshll.u32 %v577_v10, 16  ;;  %v755_v9 = vshrl.u32 %v578_v57, 16  ;;  %v580_v21 = vld [vmem:[#allocation2 + $0x74] sm:$0xf]  ;;  %v6366_v50 = vpop.permute.xlu1 %3641 }
 0x13d   : > { %2240 = vrot.lane.b32.xlu1 %v5085_v45, %s5481_s28  ;;  %v2800_v62 = vrot.slane %v2799_v53, 4  ;;  %v2809_v28 = vor.u32 %v2808_v7, %v2804_v0  ;;  %v758_v35 = vshll.u32 %v578_v57, 16  ;;  %v397_v63 = vsel %vm5565_vm3, 0, %v396_v43  ;;  %v581_v7 = vld [vmem:[#allocation2 + $0x78] sm:$0xf] }
 0x13e   : > { %2415 = vrot.lane.b32.xlu0 %v5442_v54, %s5478_s25  ;;  %v751_v18 = vor.u32 %v749_v59, %v748_v3  ;;  %v753_v49 = vrot.slane %v748_v3, 4  ;;  %v757_v24 = vrot.slane %v755_v9, 7  ;;  %398 = vst [vmem:[#allocation2 + $0xec] sm:$0x1] %v397_v63  ;;  %v2817_v46 = vshrl.u32 %v2495_v37, 16 }
 0x13f   : > { %v2805_v29 = vsel %vm5602_vm7, %v2800_v62, %v2804_v0  ;;  %v2810_v11 = vrot.slane %v2809_v28, 4  ;;  %v2820_v30 = vshll.u32 %v2495_v37, 16  ;;  %v2826_v6 = vshll.u32 %v2496_v39, 16 }
 0x140   : > { %v752_v16 = vsel %vm5627_vm8, %v4998_v14, %v751_v18  ;;  %v760_v36 = vor.u32 %v758_v35, %v757_v24  ;;  %v2819_v58 = vrot.slane %v2817_v46, 4  ;;  %v2830_v23 = vshrl.u32 %v2496_v39, 16  ;;  %v312_v35 = vld [vmem:[%s5575_s23 + $0xe0] sm:$0xff]  ;;  %v313_v46 = vld [vmem:[%s5575_s23 + $0xe8] sm:$0xff] }
 0x141   : > { %2417 = vrot.lane.b32.xlu1 %v5443_v15, %s5478_s25  ;;  %v2815_v5 = vsel %vm5602_vm7, %v2810_v11, %v2814_v1  ;;  %v2822_v12 = vrot.slane %v2820_v30, 5  ;;  %v2828_v10 = vrot.slane %v2826_v6, 5  ;;  %v3315_v40 = vshrl.u32 %v3038_v42, 16  ;;  %v3041_v42 = vld [vmem:[#allocation2 + $0xf0] sm:$0x8] }
 0x142   : > { %v5116_v44 = vcombine.low %v2805_v29, %v2815_v5  ;;  %v761_v47 = vsel %vm5627_vm8, %v753_v49, %v760_v36  ;;  %v2832_v55 = vrot.slane %v2830_v23, 4  ;;  %v3320_v56 = vshrl.u32 %v3039_v52, 16  ;;  %v3728_v6 = vld [vmem:[#allocation2 + $0xe4] sm:$0xf] }
 0x143   : > { %v5014_v57 = vcombine.low %v752_v16, %v761_v47  ;;  %v2823_v60 = vor.u32 %v2822_v12, %v2819_v58  ;;  %v5132_v54 = vrot.slane %v3315_v40, 11  ;;  %v3323_v0 = vshll.u32 %v3039_v52, 16  ;;  %v3729_v40 = vld [vmem:[#allocation2 + $0xe8] sm:$0xf] }
 0x144   : > { %2960 = vrot.lane.b32.xlu0 %v5116_v44, %s5483_s30  ;;  %v2833_v25 = vor.u32 %v2832_v55, %v2828_v10  ;;  %v3322_v43 = vrot.slane %v3320_v56, 7  ;;  %v3329_v45 = vshrl.u32 %v3040_v27, 16  ;;  %v3332_v53 = vshll.u32 %v3040_v27, 16  ;;  %v6369_v1 = vpop.permute.xlu0 %4186  ;;  %v399_v56 = vld [vmem:[#allocation2 + $0xfc] sm:$0x1] }
 0x145   : > { %1031 = vst.msk [vmem:[#allocation3 + $0x30] sm:$0xff] %vm1024_vm9, %v5014_v57  ;;  %v2497_v37 = vld [vmem:[#allocation2 + $0xec] sm:$0x1]  ;;  %v2824_v14 = vrot.slane %v2823_v60, 4  ;;  %v763_v3 = vshrl.u32 %v579_v34, 16  ;;  %v768_v59 = vshrl.u32 %v580_v21, 16  ;;  %v5267_v58 = vpack.c.bf16 %v312_v35, %v312_v35 }
 0x146   : > { %v771_v9 = vshll.u32 %v580_v21, 16  ;;  %1208 = vst.msk [vmem:[#allocation3 + $0x30] sm:$0xff] %vm1201_vm10, %v6242_v17  ;;  %v2834_v39 = vrot.slane %v2833_v25, 4  ;;  %v2836_v15 = vshll.u32 %v2497_v37, 16  ;;  %v3325_v62 = vor.u32 %v3323_v0, %v3322_v43  ;;  %v1260_v34 = vld [vmem:[#allocation2 + $0xe4] sm:$0xf] }
 0x147   : > { %v3327_v28 = vrot.slane %v3322_v43, 4  ;;  %v2829_v63 = vsel %vm5602_vm7, %v2824_v14, %v2828_v10  ;;  %v3331_v18 = vrot.slane %v3329_v45, 7  ;;  %v4999_v49 = vrot.slane %v763_v3, 11  ;;  %1756 = vst.msk [vmem:[#allocation3 + $0x30] sm:$0xff] %vm1749_vm11, %v6250_v33  ;;  %v6386_v33 = vpop.permute.xlu1 %1169  ;;  %v6409_v45 = vld [vmem:[#allocation2 + $0xe8] sm:$0xf] }
 0x148   : > { %v770_v24 = vrot.slane %v768_v59, 7  ;;  %v2838_v29 = vrot.slane %v2836_v15, 5  ;;  %v3326_v17 = vsel %vm5627_vm8, %v5132_v54, %v3325_v62  ;;  %v777_v11 = vshrl.u32 %v581_v7, 16  ;;  %2269 = vst.msk [vmem:[#allocation3 + $0x30] sm:$0xff] %vm2262_vm12, %v6266_v22  ;;  %v6388_v23 = vpop.permute.xlu0 %1717  ;;  %v3730_v22 = vld [vmem:[#allocation2 + $0xec] sm:$0x1] }
 0x149   : > { %v780_v30 = vshll.u32 %v581_v7, 16  ;;  %v3334_v52 = vor.u32 %v3332_v53, %v3331_v18  ;;  %2446 = vst.msk [vmem:[#allocation3 + $0x30] sm:$0xff] %vm2439_vm13, %v6292_v48  ;;  %v5268_v10 = vpack.c.bf16 %v313_v46, %v313_v46  ;;  %v3337_v27 = vshrl.u32 %v3041_v42, 16  ;;  %v6406_v54 = vld [vmem:[#allocation2 + $0xf0] sm:$0x8]  ;;  %v5444_v53 = vld [vmem:[#allocation2 + $0xe4] sm:$0xff]  }
 0x14a   : > { %v773_v16 = vor.u32 %v771_v9, %v770_v24  ;;  %v775_v36 = vrot.slane %v770_v24, 4  ;;  %v2839_v5 = vsel %vm5602_vm7, %v2834_v39, %v2838_v29  ;;  %v779_v12 = vrot.slane %v777_v11, 7  ;;  %2991 = vst.msk [vmem:[#allocation3 + $0x30] sm:$0xff] %vm2984_vm14, %v6314_v38  ;;  %v6418_v14 = vld [vmem:[#allocation2 + $0xec] sm:$0x1]  ;;  %v314_v62 = vld [vmem:[%s5575_s23 + $0xf0] sm:$0xff] }
 0x14b   : > { %v5117_v44 = vcombine.low %v2829_v63, %v2839_v5  ;;  %v3335_v47 = vsel %vm5627_vm8, %v3327_v28, %v3334_v52  ;;  %554 = vst.msk [vmem:[#allocation2 + $0xf4] sm:$0xf] %vm332_vm0, %v5267_v58  ;;  %v4029_v55 = vshrl.u32 %v3728_v6, 16  ;;  %555 = vst.msk [vmem:[#allocation2 + $0xf8] sm:$0xf] %vm332_vm0, %v5268_v10  ;;  %v6402_v38 = vrot.slane %v3337_v27, 11  ;;  %v6422_v28 = vpop.permute.xlu1 %1171 }
 0x14c   : > { %v774_v48 = vsel %vm5627_vm8, %v4999_v49, %v773_v16  ;;  %3505 = vst.msk [vmem:[#allocation3 + $0x30] sm:$0xff] %vm3498_vm15, %v6329_v4  ;;  %v5148_v21 = vcombine.low %v3326_v17, %v3335_v47  ;;  %v782_v57 = vor.u32 %v780_v30, %v779_v12  ;;  %v4032_v60 = vshll.u32 %v3728_v6, 16  ;;  %v6424_v35 = vpop.permute.xlu0 %2230 }
 0x14d   : > { %3682 = vst.msk [vmem:[#allocation3 + $0x30] sm:$0xff] %vm3675_vm1, %v6344_v8  ;;  %2962 = vrot.lane.b32.xlu1 %v5117_v44, %s5483_s30  ;;  %v4031_v0 = vrot.slane %v4029_v55, 4  ;;  %v4038_v25 = vshll.u32 %v3729_v40, 16  ;;  %v4042_v43 = vshrl.u32 %v3729_v40, 16  ;;  %v4048_v4 = vshll.u32 %v3730_v22, 16 }
 0x14e   : > { %4227 = vst.msk [vmem:[#allocation3 + $0x30] sm:$0xff] %vm4220_vm2, %v6355_v20  ;;  %3474 = vrot.lane.b32.xlu0 %v5148_v21, %s5482_s29  ;;  %v783_v8 = vsel %vm5627_vm8, %v775_v36, %v782_v57  ;;  %v4034_v7 = vrot.slane %v4032_v60, 5  ;;  %v400_v37 = vsel %vm5565_vm3, 0, %v399_v56  ;;  %v1606_v3 = vshrl.u32 %v1260_v34, 16  ;;  %v315_v20 = vld [vmem:[%s5575_s23 + $0xf8] sm:$0xff] }
 0x14f   : > { %v5015_v59 = vcombine.low %v774_v48, %v783_v8  ;;  %v4040_v9 = vrot.slane %v4038_v25, 5  ;;  %v4044_v39 = vrot.slane %v4042_v43, 4  ;;  %v4050_v15 = vrot.slane %v4048_v4, 5  ;;  %401 = vst [vmem:[#allocation2 + $0xfc] sm:$0x1] %v400_v37  ;;  %v6444_v55 = vpop.permute.xlu1 %1719 }
 0x150   : > { %v4035_v63 = vor.u32 %v4034_v7, %v4031_v0  ;;  %v1608_v18 = vrot.slane %v1606_v3, 4  ;;  %v1609_v49 = vshll.u32 %v1260_v34, 16  ;;  %v1615_v24 = vshll.u32 %v6409_v45, 16  ;;  %v6446_v56 = vpop.permute.xlu0 %2407 }
 0x151   : > { %1032 = vst.msk [vmem:[#allocation3 + $0x38] sm:$0xff] %vm1024_vm9, %v5015_v59  ;;  %v4045_v46 = vor.u32 %v4044_v39, %v4040_v9  ;;  %v1619_v42 = vshrl.u32 %v6409_v45, 16  ;;  %v1625_v29 = vshll.u32 %v6418_v14, 16  ;;  %v2123_v17 = vshrl.u32 %v6406_v54, 16 }
 0x152   : > { %1209 = vst.msk [vmem:[#allocation3 + $0x38] sm:$0xff] %vm1201_vm10, %v6264_v41  ;;  %v3042_v11 = vld [vmem:[#allocation2 + $0xf4] sm:$0xf]  ;;  %3651 = vrot.lane.b32.xlu0 %v5444_v53, %s5479_s26  ;;  %v4036_v30 = vrot.slane %v4035_v63, 4  ;;  %v1611_v6 = vrot.slane %v1609_v49, 5  ;;  %v5269_v52 = vpack.c.bf16 %v314_v62, %v314_v62  ;;  %v5270_v16 = vpack.c.bf16 %v315_v20, %v315_v20 }
 0x153   : > { %v3043_v36 = vld [vmem:[#allocation2 + $0xf8] sm:$0xf]  ;;  %v3342_v58 = vshrl.u32 %v3042_v11, 16  ;;  %v3345_v5 = vshll.u32 %v3042_v11, 16  ;;  %1757 = vst.msk [vmem:[#allocation3 + $0x38] sm:$0xff] %vm1749_vm11, %v6284_v13  ;;  %v4046_v40 = vrot.slane %v4045_v46, 4 }
 0x154   : > { %v3351_v12 = vshrl.u32 %v3043_v36, 16  ;;  %v3354_v10 = vshll.u32 %v3043_v36, 16  ;;  %v4041_v27 = vsel %vm5602_vm7, %v4036_v30, %v4040_v9  ;;  %2270 = vst.msk [vmem:[#allocation3 + $0x38] sm:$0xff] %vm2262_vm12, %v6311_v31  ;;  %v3731_v41 = vld [vmem:[#allocation2 + $0xf4] sm:$0xf]  ;;  %v1612_v13 = vor.u32 %v1611_v6, %v1608_v18 }
 0x155   : > { %556 = vst.msk [vmem:[#allocation2 + $0x104] sm:$0xf] %vm332_vm0, %v5269_v52  ;;  %557 = vst.msk [vmem:[#allocation2 + $0x108] sm:$0xf] %vm332_vm0, %v5270_v16  ;;  %v3344_v22 = vrot.slane %v3342_v58, 7  ;;  %v4053_v47 = vshrl.u32 %v3731_v41, 16  ;;  %v4051_v31 = vsel %vm5602_vm7, %v4046_v40, %v4050_v15 }
 0x156   : > { %v3732_v44 = vld [vmem:[#allocation2 + $0xf8] sm:$0xf]  ;;  %v4056_v48 = vshll.u32 %v3731_v41, 16  ;;  %2447 = vst.msk [vmem:[#allocation3 + $0x38] sm:$0xff] %vm2439_vm13, %v6323_v32  ;;  %v3353_v34 = vrot.slane %v3351_v12, 7  ;;  %v5180_v43 = vcombine.low %v4041_v27, %v4051_v31  ;;  %v4243_v7 = vld [vmem:[#allocation3 + $0x30] sm:$0xff] }
 0x157   : > { %v3733_v21 = vld [vmem:[#allocation2 + $0xfc] sm:$0x1]  ;;  %v4062_v57 = vshll.u32 %v3732_v44, 16  ;;  %v4066_v60 = vshrl.u32 %v3732_v44, 16  ;;  %2992 = vst.msk [vmem:[#allocation3 + $0x38] sm:$0xff] %vm2984_vm14, %v6339_v61  ;;  %v3347_v0 = vor.u32 %v3345_v5, %v3344_v22  ;;  %v3349_v25 = vrot.slane %v3344_v22, 4  ;;  %5340 = vmatprep.mubr.msk.bf16.mxu0 %vm4273_vm5, %v4243_v7 }
 0x158   : > { %v4055_v4 = vrot.slane %v4053_v47, 4  ;;  %3506 = vst.msk [vmem:[#allocation3 + $0x38] sm:$0xff] %vm3498_vm15, %v6352_v19  ;;  %v3356_v32 = vor.u32 %v3354_v10, %v3353_v34  ;;  %v4058_v45 = vrot.slane %v4056_v48, 5  ;;  %4196 = vrot.lane.b32.xlu0 %v5180_v43, %s5484_s6  ;;  %v4072_v61 = vshll.u32 %v3733_v21, 16  ;;  %v1263_v9 = vld [vmem:[#allocation2 + $0xf4] sm:$0xf] }
 0x159   : > { %v4064_v8 = vrot.slane %v4062_v57, 5  ;;  %v4068_v53 = vrot.slane %v4066_v60, 4  ;;  %3683 = vst.msk [vmem:[#allocation3 + $0x38] sm:$0xff] %vm3675_vm1, %v6366_v50  ;;  %v3348_v37 = vsel %vm5627_vm8, %v6402_v38, %v3347_v0  ;;  %v1613_v3 = vrot.slane %v1612_v13, 4  ;;  %v1264_v62 = vld [vmem:[#allocation2 + $0xf8] sm:$0xf] }
 0x15a   : > { %v1617_v59 = vrot.slane %v1615_v24, 5  ;;  %4228 = vst.msk [vmem:[#allocation3 + $0x38] sm:$0xff] %vm4220_vm2, %v6369_v1  ;;  %v3357_v19 = vsel %vm5627_vm8, %v3349_v25, %v3356_v32  ;;  %v4059_v50 = vor.u32 %v4058_v45, %v4055_v4  ;;  %v1621_v15 = vrot.slane %v1619_v42, 4  ;;  %v1265_v20 = vld [vmem:[#allocation2 + $0xfc] sm:$0x1]  ;;  %v6471_v1 = vpop.permute.xlu0 %2952  ;;  %v5445_v46 = vld [vmem:[#allocation2 + $0xf4] sm:$0xff]  }
 0x15b   : > { %v4069_v39 = vor.u32 %v4068_v53, %v4064_v8  ;;  %v5149_v38 = vcombine.low %v3348_v37, %v3357_v19  ;;  %v4074_v63 = vrot.slane %v4072_v61, 5  ;;  %v1627_v49 = vrot.slane %v1625_v29, 5  ;;  %v1809_v42 = vld [vmem:[#allocation2 + $0xf4] sm:$0xf]  ;;  %v1810_v12 = vld [vmem:[#allocation2 + $0xf8] sm:$0xf] }
 0x15c   : > { %v1618_v18 = vsel %vm5602_vm7, %v1613_v3, %v1617_v59  ;;  %v6469_v24 = vpop.permute.xlu1 %2232  ;;  %v4060_v11 = vrot.slane %v4059_v50, 4  ;;  %v1622_v6 = vor.u32 %v1621_v15, %v1617_v59  ;;  %v1630_v52 = vshrl.u32 %v1263_v9, 16  ;;  %v1811_v10 = vld [vmem:[#allocation2 + $0x100] sm:$0x8]  ;;  %v1812_v57 = vld [vmem:[#allocation2 + $0x104] sm:$0xf] }
 0x15d   : > { %v4070_v30 = vrot.slane %v4069_v39, 4  ;;  %3476 = vrot.lane.b32.xlu1 %v5149_v38, %s5482_s29  ;;  %v1633_v16 = vshll.u32 %v1263_v9, 16  ;;  %v1639_v36 = vshll.u32 %v1264_v62, 16  ;;  %v1643_v58 = vshrl.u32 %v1264_v62, 16  ;;  %v5446_v0 = vld [vmem:[#allocation2 + $0xe4] sm:$0xff]  }
 0x15e   : > { %v1649_v5 = vshll.u32 %v1265_v20, 16  ;;  %v4065_v14 = vsel %vm5602_vm7, %v4060_v11, %v4064_v8  ;;  %v1623_v27 = vrot.slane %v1622_v6, 4  ;;  %v1632_v40 = vrot.slane %v1630_v52, 4  ;;  %v1813_v37 = vld [vmem:[#allocation2 + $0x108] sm:$0xf] }
 0x15f   : > { %v4075_v29 = vsel %vm5602_vm7, %v4070_v30, %v4074_v63  ;;  %v1635_v22 = vrot.slane %v1633_v16, 5  ;;  %v1641_v44 = vrot.slane %v1639_v36, 5  ;;  %v1645_v47 = vrot.slane %v1643_v58, 4  ;;  %v6486_v45 = vpop.permute.xlu0 %3466  ;;  %v583_v19 = vld [vmem:[#allocation2 + $0x84] sm:$0xf]  ;;  %v5447_v63 = vld [vmem:[#allocation2 + $0xf4] sm:$0xff]  }
 0x160   : > { %v5181_v41 = vcombine.low %v4065_v14, %v4075_v29  ;;  %v6478_v48 = vpop.permute.xlu1 %2409  ;;  %v1628_v13 = vsel %vm5602_vm7, %v1623_v27, %v1627_v49  ;;  %v1651_v34 = vrot.slane %v1649_v5, 5  ;;  %v5070_v31 = vrot.slane %v2123_v17, 11  ;;  %v582_v17 = vld [vmem:[#allocation2 + $0x80] sm:$0x8]  ;;  %v584_v38 = vld [vmem:[#allocation2 + $0x88] sm:$0xf] }
 0x161   : > { %v2128_v21 = vshrl.u32 %v1809_v42, 16  ;;  %v4244_v60 = vld [vmem:[#allocation3 + $0x38] sm:$0xff]  ;;  %3653 = vrot.lane.b32.xlu1 %v5445_v46, %s5479_s26  ;;  %v5054_v25 = vcombine.low %v1618_v18, %v1628_v13  ;;  %v1636_v43 = vor.u32 %v1635_v22, %v1632_v40  ;;  %v1646_v4 = vor.u32 %v1645_v47, %v1641_v44 }
 0x162   : > { %4198 = vrot.lane.b32.xlu0 %v5181_v41, %s5484_s6  ;;  %v2131_v32 = vshll.u32 %v1809_v42, 16  ;;  %v2137_v53 = vshrl.u32 %v1810_v12, 16  ;;  %v2140_v7 = vshll.u32 %v1810_v12, 16  ;;  %v2145_v54 = vshrl.u32 %v1811_v10, 16  ;;  %5341 = vmatmul.mubr.msk.bf16.gmra.mrb[12].mxu0 %vm4273_vm5, %v4244_v60  ;;  %v2498_v12 = vld [vmem:[#allocation2 + $0xf4] sm:$0xf] }
 0x163   : > { %v2130_v8 = vrot.slane %v2128_v21, 7  ;;  %v1637_v61 = vrot.slane %v1636_v43, 4  ;;  %v1647_v3 = vrot.slane %v1646_v4, 4  ;;  %v2150_v59 = vshrl.u32 %v1812_v57, 16  ;;  %v6499_v10 = vpop.permute.xlu0 %3643  ;;  %v2499_v41 = vld [vmem:[#allocation2 + $0xf8] sm:$0xf] }
 0x164   : > { %v2153_v9 = vshll.u32 %v1812_v57, 16  ;;  %v6489_v50 = vpop.permute.xlu1 %2954  ;;  %v2139_v62 = vrot.slane %v2137_v53, 7  ;;  %v5071_v20 = vrot.slane %v2145_v54, 11  ;;  %v2159_v11 = vshrl.u32 %v1813_v37, 16  ;;  %v5448_v43 = vld [vmem:[#allocation2 + $0xf4] sm:$0xff]  }
 0x165   : > { %v2133_v39 = vor.u32 %v2131_v32, %v2130_v8  ;;  %v2135_v15 = vrot.slane %v2130_v8, 4  ;;  %1181 = vrot.lane.b32.xlu1 %v5446_v0, %s5477_s24  ;;  %v1642_v18 = vsel %vm5602_vm7, %v1637_v61, %v1641_v44  ;;  %v1652_v49 = vsel %vm5602_vm7, %v1647_v3, %v1651_v34  ;;  %v402_v0 = vld [vmem:[#allocation2 + $0x10c] sm:$0x1]  ;;  %v2500_v4 = vld [vmem:[#allocation2 + $0xfc] sm:$0x1] }
 0x166   : > { %1729 = vrot.lane.b32.xlu0 %v5054_v25, %s5480_s27  ;;  %v2152_v46 = vrot.slane %v2150_v59, 7  ;;  %v5055_v30 = vcombine.low %v1642_v18, %v1652_v49  ;;  %v2142_v52 = vor.u32 %v2140_v7, %v2139_v62  ;;  %v2162_v42 = vshll.u32 %v1813_v37, 16  ;;  %v2501_v61 = vld [vmem:[#allocation2 + $0x104] sm:$0xf]  ;;  %v585_v18 = vld [vmem:[#allocation2 + $0x90] sm:$0x8] }
 0x167   : > { %v2134_v6 = vsel %vm5627_vm8, %v5070_v31, %v2133_v39  ;;  %v2161_v58 = vrot.slane %v2159_v11, 7  ;;  %v785_v5 = vshrl.u32 %v582_v17, 16  ;;  %v790_v29 = vshrl.u32 %v583_v19, 16  ;;  %v2502_v39 = vld [vmem:[#allocation2 + $0x108] sm:$0xf] }
 0x168   : > { %v2155_v16 = vor.u32 %v2153_v9, %v2152_v46  ;;  %v2157_v36 = vrot.slane %v2152_v46, 4  ;;  %v2143_v14 = vsel %vm5627_vm8, %v2135_v15, %v2142_v52  ;;  %v793_v27 = vshll.u32 %v583_v19, 16  ;;  %v6506_v34 = vpop.permute.xlu1 %3468 }
 0x169   : > { %v799_v40 = vshrl.u32 %v584_v38, 16  ;;  %1183 = vrot.lane.b32.xlu1 %v5447_v63, %s5477_s24  ;;  %v5086_v22 = vcombine.low %v2134_v6, %v2143_v14  ;;  %v2164_v47 = vor.u32 %v2162_v42, %v2161_v58  ;;  %v5000_v13 = vrot.slane %v785_v5, 11  ;;  %v586_v6 = vld [vmem:[#allocation2 + $0x94] sm:$0xf]  ;;  %v587_v5 = vld [vmem:[#allocation2 + $0x98] sm:$0xf] }
 0x16a   : > { %v2156_v44 = vsel %vm5627_vm8, %v5071_v20, %v2155_v16  ;;  %v792_v31 = vrot.slane %v790_v29, 7  ;;  %v802_v57 = vshll.u32 %v584_v38, 16  ;;  %v2841_v60 = vshrl.u32 %v2498_v12, 16  ;;  %v5449_v14 = vld [vmem:[#allocation2 + $0x104] sm:$0xff]  }
 0x16b   : > { %v801_v21 = vrot.slane %v799_v40, 7  ;;  %2242 = vrot.lane.b32.xlu0 %v5086_v22, %s5481_s28  ;;  %v2165_v25 = vsel %vm5627_vm8, %v2157_v36, %v2164_v47  ;;  %v2844_v32 = vshll.u32 %v2498_v12, 16  ;;  %v2850_v8 = vshll.u32 %v2499_v41, 16  ;;  %v3044_v12 = vld [vmem:[#allocation2 + $0x100] sm:$0x8] }
 0x16c   : > { %v2854_v53 = vshrl.u32 %v2499_v41, 16  ;;  %v5087_v7 = vcombine.low %v2156_v44, %v2165_v25  ;;  %v795_v37 = vor.u32 %v793_v27, %v792_v31  ;;  %v797_v54 = vrot.slane %v792_v31, 4  ;;  %v6521_v52 = vpop.permute.xlu1 %3645  ;;  %v3045_v31 = vld [vmem:[#allocation2 + $0x104] sm:$0xf] }
 0x16d   : > { %v804_v17 = vor.u32 %v802_v57, %v801_v21  ;;  %1731 = vrot.lane.b32.xlu1 %v5055_v30, %s5480_s27  ;;  %v2843_v3 = vrot.slane %v2841_v60, 4  ;;  %v2846_v59 = vrot.slane %v2844_v32, 5  ;;  %v2852_v9 = vrot.slane %v2850_v8, 5  ;;  %v6512_v15 = vpop.permute.xlu0 %4188 }
 0x16e   : > { %v2856_v19 = vrot.slane %v2854_v53, 4  ;;  %v796_v62 = vsel %vm5627_vm8, %v5000_v13, %v795_v37  ;;  %v2860_v38 = vshll.u32 %v2500_v4, 16  ;;  %v403_v63 = vsel %vm5565_vm3, 0, %v402_v0 }
 0x16f   : > { %v805_v20 = vsel %vm5627_vm8, %v797_v54, %v804_v17  ;;  %2419 = vrot.lane.b32.xlu0 %v5448_v43, %s5478_s25  ;;  %v2847_v46 = vor.u32 %v2846_v59, %v2843_v3  ;;  %404 = vst [vmem:[#allocation2 + $0x10c] sm:$0x1] %v403_v63  ;;  %v2865_v30 = vshrl.u32 %v2501_v61, 16  ;;  %v2868_v16 = vshll.u32 %v2501_v61, 16  ;;  %v3047_v17 = vld [vmem:[#allocation2 + $0x110] sm:$0x8] }
 0x170   : > { %v5016_v49 = vcombine.low %v796_v62, %v805_v20  ;;  %v2857_v11 = vor.u32 %v2856_v19, %v2852_v9  ;;  %v2862_v42 = vrot.slane %v2860_v38, 5  ;;  %v2874_v36 = vshll.u32 %v2502_v39, 16  ;;  %v3048_v38 = vld [vmem:[#allocation2 + $0x114] sm:$0xf] }
 0x171   : > { %v2878_v58 = vshrl.u32 %v2502_v39, 16  ;;  %2244 = vrot.lane.b32.xlu1 %v5087_v7, %s5481_s28  ;;  %v2848_v29 = vrot.slane %v2847_v46, 4  ;;  %v2867_v40 = vrot.slane %v2865_v30, 4  ;;  %v807_v41 = vshrl.u32 %v585_v18, 16  ;;  %v3046_v7 = vld [vmem:[#allocation2 + $0x108] sm:$0xf] }
 0x172   : > { %1033 = vst.msk [vmem:[#allocation3 + $0x40] sm:$0xff] %vm1024_vm9, %v5016_v49  ;;  %v2858_v27 = vrot.slane %v2857_v11, 4  ;;  %v2870_v22 = vrot.slane %v2868_v16, 5  ;;  %v2876_v44 = vrot.slane %v2874_v36, 5  ;;  %v812_v13 = vshrl.u32 %v586_v6, 16 }
 0x173   : > { %1210 = vst.msk [vmem:[#allocation3 + $0x40] sm:$0xff] %vm1201_vm10, %v6386_v33  ;;  %v2880_v47 = vrot.slane %v2878_v58, 4  ;;  %v2853_v21 = vsel %vm5602_vm7, %v2848_v29, %v2852_v9  ;;  %v5001_v60 = vrot.slane %v807_v41, 11  ;;  %v815_v0 = vshll.u32 %v586_v6, 16  ;;  %v6533_v25 = vpop.permute.xlu0 %4190  ;;  %v3049_v46 = vld [vmem:[#allocation2 + $0x118] sm:$0xf] }
 0x174   : > { %v2863_v57 = vsel %vm5602_vm7, %v2858_v27, %v2862_v42  ;;  %1758 = vst.msk [vmem:[#allocation3 + $0x40] sm:$0xff] %vm1749_vm11, %v6388_v23  ;;  %v2871_v33 = vor.u32 %v2870_v22, %v2867_v40  ;;  %v814_v32 = vrot.slane %v812_v13, 7  ;;  %v821_v8 = vshrl.u32 %v587_v5, 16  ;;  %v6540_v23 = vpop.permute.xlu1 %1173  ;;  %v3734_v29 = vld [vmem:[#allocation2 + $0x104] sm:$0xf] }
 0x175   : > { %v5118_v43 = vcombine.low %v2853_v21, %v2863_v57  ;;  %v2881_v4 = vor.u32 %v2880_v47, %v2876_v44  ;;  %2271 = vst.msk [vmem:[#allocation3 + $0x40] sm:$0xff] %vm2262_vm12, %v6424_v35  ;;  %2421 = vrot.lane.b32.xlu1 %v5449_v14, %s5478_s25  ;;  %v824_v53 = vshll.u32 %v587_v5, 16  ;;  %v3359_v37 = vshrl.u32 %v3044_v12, 16  ;;  %v3735_v27 = vld [vmem:[#allocation2 + $0x108] sm:$0xf] }
 0x176   : > { %v3364_v54 = vshrl.u32 %v3045_v31, 16  ;;  %2448 = vst.msk [vmem:[#allocation3 + $0x40] sm:$0xff] %vm2439_vm13, %v6446_v56  ;;  %v2503_v61 = vld [vmem:[#allocation2 + $0x10c] sm:$0x1]  ;;  %v2872_v3 = vrot.slane %v2871_v33, 4  ;;  %v817_v9 = vor.u32 %v815_v0, %v814_v32  ;;  %v819_v35 = vrot.slane %v814_v32, 4 }
 0x177   : > { %2964 = vrot.lane.b32.xlu0 %v5118_v43, %s5483_s30  ;;  %v2882_v59 = vrot.slane %v2881_v4, 4  ;;  %2993 = vst.msk [vmem:[#allocation3 + $0x40] sm:$0xff] %vm2984_vm14, %v6471_v1  ;;  %v2884_v19 = vshll.u32 %v2503_v61, 16  ;;  %v823_v39 = vrot.slane %v821_v8, 7  ;;  %v5134_v62 = vrot.slane %v3359_v37, 11  ;;  %v6553_v1 = vpop.permute.xlu0 %1721 }
 0x178   : > { %v3366_v20 = vrot.slane %v3364_v54, 7  ;;  %3507 = vst.msk [vmem:[#allocation3 + $0x40] sm:$0xff] %vm3498_vm15, %v6486_v45  ;;  %v2877_v56 = vsel %vm5602_vm7, %v2872_v3, %v2876_v44  ;;  %v818_v63 = vsel %vm5627_vm8, %v5001_v60, %v817_v9  ;;  %v3367_v18 = vshll.u32 %v3045_v31, 16  ;;  %v6561_v40 = vpop.permute.xlu1 %1175  ;;  %v405_v57 = vld [vmem:[#allocation2 + $0x11c] sm:$0x1] }
 0x179   : > { %v3373_v49 = vshrl.u32 %v3046_v7, 16  ;;  %3684 = vst.msk [vmem:[#allocation3 + $0x40] sm:$0xff] %vm3675_vm1, %v6499_v10  ;;  %v2886_v11 = vrot.slane %v2884_v19, 5  ;;  %v826_v30 = vor.u32 %v824_v53, %v823_v39  ;;  %v3376_v42 = vshll.u32 %v3046_v7, 16  ;;  %v3736_v0 = vld [vmem:[#allocation2 + $0x10c] sm:$0x1] }
 0x17a   : > { %v3371_v6 = vrot.slane %v3366_v20, 4  ;;  %4229 = vst.msk [vmem:[#allocation3 + $0x40] sm:$0xff] %vm4220_vm2, %v6512_v15  ;;  %v3369_v45 = vor.u32 %v3367_v18, %v3366_v20  ;;  %v3381_v36 = vshrl.u32 %v3047_v17, 16  ;;  %v3386_v58 = vshrl.u32 %v3048_v38, 16  ;;  %v3737_v54 = vld [vmem:[#allocation2 + $0x114] sm:$0xf] }
 0x17b   : > { %v3375_v16 = vrot.slane %v3373_v49, 7  ;;  %v2887_v5 = vsel %vm5602_vm7, %v2882_v59, %v2886_v11  ;;  %v827_v12 = vsel %vm5627_vm8, %v819_v35, %v826_v30  ;;  %v3389_v10 = vshll.u32 %v3048_v38, 16  ;;  %v3738_v17 = vld [vmem:[#allocation2 + $0x118] sm:$0xf]  ;;  %v5450_v39 = vld [vmem:[#allocation2 + $0x104] sm:$0xff]  }
 0x17c   : > { %v3395_v14 = vshrl.u32 %v3049_v46, 16  ;;  %v5119_v41 = vcombine.low %v2877_v56, %v2887_v5  ;;  %v5017_v22 = vcombine.low %v818_v63, %v827_v12  ;;  %v3370_v15 = vsel %vm5627_vm8, %v5134_v62, %v3369_v45  ;;  %v6569_v32 = vpop.permute.xlu0 %2234  ;;  %v588_v20 = vld [vmem:[#allocation2 + $0xa0] sm:$0x8]  ;;  %v6584_v38 = vpop.permute.xlu1 %1723 }
 0x17d   : > { %v3378_v44 = vor.u32 %v3376_v42, %v3375_v16  ;;  %v5135_v47 = vrot.slane %v3381_v36, 11  ;;  %v3388_v13 = vrot.slane %v3386_v58, 7  ;;  %v3398_v21 = vshll.u32 %v3049_v46, 16  ;;  %v589_v46 = vld [vmem:[#allocation2 + $0xa4] sm:$0xf]  ;;  %v5451_v42 = vld [vmem:[#allocation2 + $0x114] sm:$0xff]  }
 0x17e   : > { %v3397_v31 = vrot.slane %v3395_v14, 7  ;;  %2966 = vrot.lane.b32.xlu1 %v5119_v41, %s5483_s30  ;;  %1034 = vst.msk [vmem:[#allocation3 + $0x48] sm:$0xff] %vm1024_vm9, %v5017_v22  ;;  %v4077_v43 = vshrl.u32 %v3734_v29, 16  ;;  %v4080_v33 = vshll.u32 %v3734_v29, 16  ;;  %v4086_v4 = vshll.u32 %v3735_v27, 16 }
 0x17f   : > { %v3379_v60 = vsel %vm5627_vm8, %v3371_v6, %v3378_v44  ;;  %1211 = vst.msk [vmem:[#allocation3 + $0x48] sm:$0xff] %vm1201_vm10, %v6422_v28  ;;  %v3391_v53 = vor.u32 %v3389_v10, %v3388_v13  ;;  %v3393_v7 = vrot.slane %v3388_v13, 4  ;;  %v4090_v9 = vshrl.u32 %v3735_v27, 16  ;;  %v592_v29 = vld [vmem:[#allocation2 + $0xb4] sm:$0xf] }
 0x180   : > { %v5150_v8 = vcombine.low %v3370_v15, %v3379_v60  ;;  %v3400_v37 = vor.u32 %v3398_v21, %v3397_v31  ;;  %1759 = vst.msk [vmem:[#allocation3 + $0x48] sm:$0xff] %vm1749_vm11, %v6444_v55  ;;  %v4079_v61 = vrot.slane %v4077_v43, 4  ;;  %v4082_v3 = vrot.slane %v4080_v33, 5  ;;  %v6594_v5 = vpop.permute.xlu0 %2411 }
 0x181   : > { %v4088_v59 = vrot.slane %v4086_v4, 5  ;;  %v4245_v35 = vld [vmem:[#allocation3 + $0x40] sm:$0xff]  ;;  %v3392_v19 = vsel %vm5627_vm8, %v5135_v47, %v3391_v53  ;;  %2272 = vst.msk [vmem:[#allocation3 + $0x48] sm:$0xff] %vm2262_vm12, %v6469_v24  ;;  %v4096_v62 = vshll.u32 %v3736_v0, 16  ;;  %v406_v55 = vsel %vm5565_vm3, 0, %v405_v57 }
 0x182   : > { %3478 = vrot.lane.b32.xlu0 %v5150_v8, %s5482_s29  ;;  %v3401_v28 = vsel %vm5627_vm8, %v3393_v7, %v3400_v37  ;;  %5344 = vmatprep.mubr.msk.bf16.mxu1 %vm4273_vm5, %v4245_v35  ;;  %v4083_v63 = vor.u32 %v4082_v3, %v4079_v61  ;;  %v4092_v18 = vrot.slane %v4090_v9, 4  ;;  %407 = vst [vmem:[#allocation2 + $0x11c] sm:$0x1] %v406_v55  ;;  %v4101_v49 = vshrl.u32 %v3737_v54, 16  ;;  %v593_v57 = vld [vmem:[#allocation2 + $0xb8] sm:$0xf] }
 0x183   : > { %v5151_v56 = vcombine.low %v3392_v19, %v3401_v28  ;;  %2449 = vst.msk [vmem:[#allocation3 + $0x48] sm:$0xff] %vm2439_vm13, %v6478_v48  ;;  %v4098_v11 = vrot.slane %v4096_v62, 5  ;;  %v4104_v24 = vshll.u32 %v3737_v54, 16  ;;  %v4110_v30 = vshll.u32 %v3738_v17, 16  ;;  %v591_v48 = vld [vmem:[#allocation2 + $0xb0] sm:$0x8] }
 0x184   : > { %v4114_v6 = vshrl.u32 %v3738_v17, 16  ;;  %2994 = vst.msk [vmem:[#allocation3 + $0x48] sm:$0xff] %vm2984_vm14, %v6489_v50  ;;  %v4084_v45 = vrot.slane %v4083_v63, 4  ;;  %v4093_v16 = vor.u32 %v4092_v18, %v4088_v59  ;;  %v4103_v36 = vrot.slane %v4101_v49, 4  ;;  %v594_v53 = vld [vmem:[#allocation2 + $0xc0] sm:$0x8]  ;;  %v6608_v61 = vpop.permute.xlu0 %2956 }
 0x185   : > { %3480 = vrot.lane.b32.xlu1 %v5151_v56, %s5482_s29  ;;  %3508 = vst.msk [vmem:[#allocation3 + $0x48] sm:$0xff] %vm3498_vm15, %v6506_v34  ;;  %v829_v58 = vshrl.u32 %v588_v20, 16  ;;  %v4106_v12 = vrot.slane %v4104_v24, 5  ;;  %v4112_v10 = vrot.slane %v4110_v30, 5  ;;  %v834_v50 = vshrl.u32 %v589_v46, 16 }
 0x186   : > { %3655 = vrot.lane.b32.xlu0 %v5450_v39, %s5479_s26  ;;  %v4116_v14 = vrot.slane %v4114_v6, 4  ;;  %3685 = vst.msk [vmem:[#allocation3 + $0x48] sm:$0xff] %vm3675_vm1, %v6521_v52  ;;  %v4089_v27 = vsel %vm5602_vm7, %v4084_v45, %v4088_v59  ;;  %v4094_v41 = vrot.slane %v4093_v16, 4  ;;  %v837_v34 = vshll.u32 %v589_v46, 16  ;;  %v595_v3 = vld [vmem:[#allocation2 + $0xc4] sm:$0xf] }
 0x187   : > { %v5002_v22 = vrot.slane %v829_v58, 11  ;;  %4230 = vst.msk [vmem:[#allocation3 + $0x48] sm:$0xff] %vm4220_vm2, %v6533_v25  ;;  %v4107_v15 = vor.u32 %v4106_v12, %v4103_v36  ;;  %v836_v47 = vrot.slane %v834_v50, 7  ;;  %v843_v13 = vshrl.u32 %v590_v2, 16  ;;  %v6603_v31 = vpop.permute.xlu1 %2236  ;;  %v596_v56 = vld [vmem:[#allocation2 + $0xc8] sm:$0xf] }
 0x188   : > { %v4117_v44 = vor.u32 %v4116_v14, %v4112_v10  ;;  %v4099_v52 = vsel %vm5602_vm7, %v4094_v41, %v4098_v11  ;;  %v846_v21 = vshll.u32 %v590_v2, 16  ;;  %v851_v60 = vshrl.u32 %v591_v48, 16  ;;  %v597_v24 = vld [vmem:[#allocation2 + $0xd0] sm:$0x8]  ;;  %v598_v45 = vld [vmem:[#allocation2 + $0xd4] sm:$0xf] }
 0x189   : > { %3657 = vrot.lane.b32.xlu1 %v5451_v42, %s5479_s26  ;;  %v856_v0 = vshrl.u32 %v592_v29, 16  ;;  %v5182_v43 = vcombine.low %v4089_v27, %v4099_v52  ;;  %v3739_v33 = vld [vmem:[#allocation2 + $0x11c] sm:$0x1]  ;;  %v4108_v4 = vrot.slane %v4107_v15, 4  ;;  %v839_v25 = vor.u32 %v837_v34, %v836_v47  ;;  %v599_v16 = vld [vmem:[#allocation2 + $0xd8] sm:$0xf] }
 0x18a   : > { %v4118_v8 = vrot.slane %v4117_v44, 4  ;;  %v4120_v7 = vshll.u32 %v3739_v33, 16  ;;  %v841_v37 = vrot.slane %v836_v47, 4  ;;  %v845_v54 = vrot.slane %v843_v13, 7  ;;  %v600_v15 = vld [vmem:[#allocation2 + $0xe0] sm:$0x8] }
 0x18b   : > { %v5003_v17 = vrot.slane %v851_v60, 11  ;;  %4200 = vrot.lane.b32.xlu0 %v5182_v43, %s5484_s6  ;;  %v4113_v59 = vsel %vm5602_vm7, %v4108_v4, %v4112_v10  ;;  %v840_v9 = vsel %vm5627_vm8, %v5002_v22, %v839_v25  ;;  %v858_v35 = vrot.slane %v856_v0, 7  ;;  %v6615_v20 = vpop.permute.xlu1 %2413  ;;  %v602_v4 = vld [vmem:[#allocation2 + $0xe8] sm:$0xf] }
 0x18c   : > { %v859_v19 = vshll.u32 %v592_v29, 16  ;;  %v4122_v28 = vrot.slane %v4120_v7, 5  ;;  %v848_v39 = vor.u32 %v846_v21, %v845_v54  ;;  %v865_v62 = vshrl.u32 %v593_v57, 16  ;;  %v603_v7 = vld [vmem:[#allocation2 + $0xf0] sm:$0x8] }
 0x18d   : > { %v868_v55 = vshll.u32 %v593_v57, 16  ;;  %v863_v18 = vrot.slane %v858_v35, 4  ;;  %v873_v46 = vshrl.u32 %v594_v53, 16  ;;  %v878_v11 = vshrl.u32 %v595_v3, 16  ;;  %v601_v57 = vld [vmem:[#allocation2 + $0xe4] sm:$0xf] }
 0x18e   : > { %v861_v63 = vor.u32 %v859_v19, %v858_v35  ;;  %v4246_v49 = vld [vmem:[#allocation3 + $0x48] sm:$0xff]  ;;  %v4123_v30 = vsel %vm5602_vm7, %v4118_v8, %v4122_v28  ;;  %v849_v6 = vsel %vm5627_vm8, %v841_v37, %v848_v39  ;;  %v867_v2 = vrot.slane %v865_v62, 7  ;;  %v605_v62 = vld [vmem:[#allocation2 + $0xf8] sm:$0xf] }
 0x18f   : > { %5345 = vmatmul.mubr.msk.bf16.vlgmr.msra.gmra.mrb[0].mxu1 %vm4273_vm5, %v4246_v49  ;;  %v881_v42 = vshll.u32 %v595_v3, 16  ;;  %v5183_v36 = vcombine.low %v4113_v59, %v4123_v30  ;;  %v5018_v58 = vcombine.low %v840_v9, %v849_v6  ;;  %v5004_v12 = vrot.slane %v873_v46, 11  ;;  %v3471_v14 = vpop.permute.xlu0 %3470  ;;  %v604_v3 = vld [vmem:[#allocation2 + $0xf4] sm:$0xf] }
 0x190   : > { %v862_v48 = vsel %vm5627_vm8, %v5003_v17, %v861_v63  ;;  %v870_v10 = vor.u32 %v868_v55, %v867_v2  ;;  %v880_v50 = vrot.slane %v878_v11, 7  ;;  %v887_v51 = vshrl.u32 %v596_v56, 16  ;;  %v2959_v47 = vpop.permute.xlu1 %2958 }
 0x191   : > { %v890_v29 = vshll.u32 %v596_v56, 16  ;;  %4202 = vrot.lane.b32.xlu1 %v5183_v36, %s5484_s6  ;;  %1035 = vst.msk [vmem:[#allocation3 + $0x50] sm:$0xff] %vm1024_vm9, %v5018_v58  ;;  %v895_v27 = vshrl.u32 %v597_v24, 16  ;;  %v900_v41 = vshrl.u32 %v598_v45, 16  ;;  %v903_v22 = vshll.u32 %v598_v45, 16 }
 0x192   : > { %v909_v34 = vshrl.u32 %v599_v16, 16  ;;  %1212 = vst.msk [vmem:[#allocation3 + $0x50] sm:$0xff] %vm1201_vm10, %v6540_v23  ;;  %v871_v44 = vsel %vm5627_vm8, %v863_v18, %v870_v10  ;;  %v883_v13 = vor.u32 %v881_v42, %v880_v50  ;;  %v885_v52 = vrot.slane %v880_v50, 4 }
 0x193   : > { %v889_v21 = vrot.slane %v887_v51, 7  ;;  %v5019_v60 = vcombine.low %v862_v48, %v871_v44  ;;  %1760 = vst.msk [vmem:[#allocation3 + $0x50] sm:$0xff] %vm1749_vm11, %v6553_v1  ;;  %v5005_v0 = vrot.slane %v895_v27, 11  ;;  %v902_v43 = vrot.slane %v900_v41, 7 }
 0x194   : > { %v911_v33 = vrot.slane %v909_v34, 7  ;;  %2273 = vst.msk [vmem:[#allocation3 + $0x50] sm:$0xff] %vm2262_vm12, %v6569_v32  ;;  %v884_v23 = vsel %vm5627_vm8, %v5004_v12, %v883_v13  ;;  %v912_v25 = vshll.u32 %v599_v16, 16  ;;  %v917_v53 = vshrl.u32 %v600_v15, 16  ;;  %v3648_v32 = vpop.permute.xlu0 %3647 }
 0x195   : > { %v892_v8 = vor.u32 %v890_v29, %v889_v21  ;;  %1036 = vst.msk [vmem:[#allocation3 + $0x58] sm:$0xff] %vm1024_vm9, %v5019_v60  ;;  %v905_v1 = vor.u32 %v903_v22, %v902_v43  ;;  %v907_v37 = vrot.slane %v902_v43, 4  ;;  %v922_v54 = vshrl.u32 %v601_v57, 16 }
 0x196   : > { %2450 = vst.msk [vmem:[#allocation3 + $0x50] sm:$0xff] %vm2439_vm13, %v6594_v5  ;;  %v925_v17 = vshll.u32 %v601_v57, 16  ;;  %v914_v9 = vor.u32 %v912_v25, %v911_v33  ;;  %v5006_v35 = vrot.slane %v917_v53, 11  ;;  %v931_v19 = vshrl.u32 %v602_v4, 16 }
 0x197   : > { %1213 = vst.msk [vmem:[#allocation3 + $0x58] sm:$0xff] %vm1201_vm10, %v6561_v40  ;;  %v893_v59 = vsel %vm5627_vm8, %v885_v52, %v892_v8  ;;  %v906_v28 = vsel %vm5627_vm8, %v5005_v0, %v905_v1  ;;  %v924_v40 = vrot.slane %v922_v54, 7  ;;  %v934_v39 = vshll.u32 %v602_v4, 16 }
 0x198   : > { %2995 = vst.msk [vmem:[#allocation3 + $0x50] sm:$0xff] %vm2984_vm14, %v6608_v61  ;;  %v5020_v5 = vcombine.low %v884_v23, %v893_v59  ;;  %v3473_v61 = vpop.permute.xlu1 %3472  ;;  %v915_v55 = vsel %vm5627_vm8, %v907_v37, %v914_v9  ;;  %v933_v56 = vrot.slane %v931_v19, 7  ;;  %v944_v63 = vshrl.u32 %v604_v3, 16 }
 0x199   : > { %1761 = vst.msk [vmem:[#allocation3 + $0x58] sm:$0xff] %vm1749_vm11, %v6584_v38  ;;  %v939_v38 = vshrl.u32 %v603_v7, 16  ;;  %v5021_v18 = vcombine.low %v906_v28, %v915_v55  ;;  %v927_v49 = vor.u32 %v925_v17, %v924_v40  ;;  %v929_v46 = vrot.slane %v924_v40, 4 }
 0x19a   : > { %3509 = vst.msk [vmem:[#allocation3 + $0x50] sm:$0xff] %vm3498_vm15, %v3471_v14  ;;  %v947_v11 = vshll.u32 %v604_v3, 16  ;;  %v946_v30 = vrot.slane %v944_v63, 7  ;;  %v953_v6 = vshrl.u32 %v605_v62, 16  ;;  %vm4789_vm0 = vcmask 60416  }
 0x19b   : > { %2274 = vst.msk [vmem:[#allocation3 + $0x58] sm:$0xff] %vm2262_vm12, %v6603_v31  ;;  %v936_v31 = vor.u32 %v934_v39, %v933_v56  ;;  %v5007_v24 = vrot.slane %v939_v38, 11  ;;  %v928_v2 = vsel %vm5627_vm8, %v5006_v35, %v927_v49  ;;  %vm4487_vm3 = vcmask 64512  }
 0x19c   : > { %3686 = vst.msk [vmem:[#allocation3 + $0x50] sm:$0xff] %vm3675_vm1, %v3648_v32  ;;  %v3650_v42 = vpop.permute.xlu1 %3649  ;;  %v4193_v45 = vpop.permute.xlu0 %4192  ;;  %v949_v36 = vor.u32 %v947_v11, %v946_v30  ;;  %v951_v58 = vrot.slane %v946_v30, 4  ;;  %v955_v48 = vrot.slane %v953_v6, 7  ;;  %vm4557_vm6 = vcmask 57344  }
 0x19d   : > { %2451 = vst.msk [vmem:[#allocation3 + $0x58] sm:$0xff] %vm2439_vm13, %v6615_v20  ;;  %v956_v20 = vshll.u32 %v605_v62, 16  ;;  %v937_v16 = vsel %vm5627_vm8, %v929_v46, %v936_v31 }
 0x19e   : > { %1037 = vst.msk [vmem:[#allocation3 + $0x60] sm:$0xff] %vm1024_vm9, %v5020_v5  ;;  %1038 = vst.msk [vmem:[#allocation3 + $0x68] sm:$0xff] %vm1024_vm9, %v5021_v18  ;;  %v5022_v12 = vcombine.low %v928_v2, %v937_v16  ;;  %v950_v10 = vsel %vm5627_vm8, %v5007_v24, %v949_v36 }
 0x19f   : > { %2996 = vst.msk [vmem:[#allocation3 + $0x58] sm:$0xff] %vm2984_vm14, %v2959_v47  ;;  %v958_v14 = vor.u32 %v956_v20, %v955_v48 }
 0x1a0   : > { %3510 = vst.msk [vmem:[#allocation3 + $0x58] sm:$0xff] %vm3498_vm15, %v3473_v61  ;;  %v1178_v50 = vpop.permute.xlu1 %1177 }
 0x1a1   : > { %3687 = vst.msk [vmem:[#allocation3 + $0x58] sm:$0xff] %vm3675_vm1, %v3650_v42  ;;  %v959_v51 = vsel %vm5627_vm8, %v951_v58, %v958_v14 }
 0x1a2   : > { %4231 = vst.msk [vmem:[#allocation3 + $0x50] sm:$0xff] %vm4220_vm2, %v4193_v45  ;;  %v5023_v29 = vcombine.low %v950_v10, %v959_v51 }
 0x1a3   : > { %1039 = vst.msk [vmem:[#allocation3 + $0x70] sm:$0xff] %vm1024_vm9, %v5022_v12 }
 0x1a4   : > { %1214 = vst.msk [vmem:[#allocation3 + $0x60] sm:$0xff] %vm1201_vm10, %v1178_v50  ;;  %v4195_v27 = vpop.permute.xlu0 %4194  ;;  %v1180_v41 = vpop.permute.xlu1 %1179 }
 0x1a5   : > { %1040 = vst.msk [vmem:[#allocation3 + $0x78] sm:$0xff] %vm1024_vm9, %v5023_v29 }
 0x1a6   : > { %4232 = vst.msk [vmem:[#allocation3 + $0x58] sm:$0xff] %vm4220_vm2, %v4195_v27 }
 0x1a7   : > { %1215 = vst.msk [vmem:[#allocation3 + $0x68] sm:$0xff] %vm1201_vm10, %v1180_v41 }
 0x1a8   : > { %v1726_v34 = vpop.permute.xlu0 %1725 }
 0x1a9   : > { %v4247_v22 = vld [vmem:[#allocation3 + $0x50] sm:$0xff]  ;;  %1762 = vst.msk [vmem:[#allocation3 + $0x60] sm:$0xff] %vm1749_vm11, %v1726_v34 }
 0x1aa   : > { %5348 = vmatprep.mubr.msk.bf16.mxu1 %vm4273_vm5, %v4247_v22  ;;  %v1728_v15 = vpop.permute.xlu1 %1727 }
 0x1ab   : > { %1763 = vst.msk [vmem:[#allocation3 + $0x68] sm:$0xff] %vm1749_vm11, %v1728_v15 }
 0x1ac   : > { %v2239_v26 = vpop.permute.xlu0 %2238 }
 0x1ad   : > { %v4248_v44 = vld [vmem:[#allocation3 + $0x58] sm:$0xff]  ;;  %2275 = vst.msk [vmem:[#allocation3 + $0x60] sm:$0xff] %vm2262_vm12, %v2239_v26 }
 0x1ae   : > { %5349 = vmatmul.mubr.msk.bf16.gmra.mrb[4].mxu1 %vm4273_vm5, %v4248_v44 }
 0x1af   : > { %v2241_v47 = vpop.permute.xlu1 %2240 }
 0x1b0   : > { %2276 = vst.msk [vmem:[#allocation3 + $0x68] sm:$0xff] %vm2262_vm12, %v2241_v47  ;;  %v2416_v13 = vpop.permute.xlu0 %2415 }
 0x1b1   : > { %2452 = vst.msk [vmem:[#allocation3 + $0x60] sm:$0xff] %vm2439_vm13, %v2416_v13 }
 0x1b3   : > { %v2418_v52 = vpop.permute.xlu1 %2417 }
 0x1b4   : > { %2453 = vst.msk [vmem:[#allocation3 + $0x68] sm:$0xff] %vm2439_vm13, %v2418_v52 }
 0x1b6   : > { %v2961_v21 = vpop.permute.xlu0 %2960 }
 0x1b7   : > { %2997 = vst.msk [vmem:[#allocation3 + $0x60] sm:$0xff] %vm2984_vm14, %v2961_v21 }
 0x1bf   : > { %v2963_v57 = vpop.permute.xlu1 %2962 }
 0x1c0   : > { %2998 = vst.msk [vmem:[#allocation3 + $0x68] sm:$0xff] %vm2984_vm14, %v2963_v57  ;;  %v3475_v60 = vpop.permute.xlu0 %3474 }
 0x1c1   : > { %3511 = vst.msk [vmem:[#allocation3 + $0x60] sm:$0xff] %vm3498_vm15, %v3475_v60 }
 0x1c4   : > { %v3652_v0 = vpop.permute.xlu0 %3651 }
 0x1c5   : > { %3688 = vst.msk [vmem:[#allocation3 + $0x60] sm:$0xff] %vm3675_vm1, %v3652_v0 }
 0x1c6   : > { %v5330_v43 = vpop.f32.mrb[0].mxu0 }
 0x1c7   : > { %v5273_v33 = vpack.c.bf16 %v5330_v43, %v5330_v43  ;;  %v4360_v4 = vpop.f32.mrb[1].mxu0  ;;  %v4561_v53 = vmul.f32 %v5330_v43, %v5330_v43  ;;  %v4491_v9 = vsel %vm4487_vm3, %v5330_v43, 0.0 }
 0x1c8   : > { %v4559_v23 = vmul.f32 %v4360_v4, %v4360_v4  ;;  %v5271_v8 = vpack.c.bf16 %v4360_v4, %v4360_v4  ;;  %v5331_v25 = vpop.f32.mrb[2].mxu0  ;;  %v4488_v37 = vsel %vm4487_vm3, %v4360_v4, 0.0 }
 0x1c9   : > { %4792 = vst.msk [vmem:[%s6692_s16 + $0x8] sm:$0xf] %vm4789_vm0, %v5273_v33  ;;  %v5274_v7 = vpack.c.bf16 %v5331_v25, %v5331_v25  ;;  %v4363_v1 = vpop.f32.mrb[3].mxu0  ;;  %v4562_v19 = vmul.f32 %v5331_v25, %v5331_v25  ;;  %v4594_v39 = vsel %vm4487_vm3, %v4561_v53, 0.0  ;;  %v4493_v62 = vsel %vm4487_vm3, %v5331_v25, 0.0 }
 0x1ca   : > { %4790 = vst.msk [vmem:[%s6692_s16] sm:$0xf] %vm4789_vm0, %v5271_v8  ;;  %v4489_v54 = vsel %vm4487_vm3, %v4363_v1, 0.0  ;;  %v4560_v17 = vmul.f32 %v4363_v1, %v4363_v1  ;;  %v5272_v3 = vpack.c.bf16 %v4363_v1, %v4363_v1  ;;  %v4197_v32 = vpop.permute.xlu0 %4196  ;;  %v4591_v35 = vsel %vm4487_vm3, %v4559_v23, 0.0 }
 0x1cb   : > { %4793 = vst.msk [vmem:[%s6692_s16 + $0xc] sm:$0xf] %vm4789_vm0, %v5274_v7  ;;  %v4490_v59 = vadd.f32 %v4489_v54, %v4488_v37  ;;  %v4596_v38 = vsel %vm4487_vm3, %v4562_v19, 0.0 }
 0x1cc   : > { %4233 = vst.msk [vmem:[#allocation3 + $0x60] sm:$0xff] %vm4220_vm2, %v4197_v32  ;;  %v4592_v5 = vsel %vm4487_vm3, %v4560_v17, 0.0 }
 0x1cd   : > { %4791 = vst.msk [vmem:[%s6692_s16 + $0x4] sm:$0xf] %vm4789_vm0, %v5272_v3  ;;  %v4492_v28 = vadd.f32 %v4491_v9, %v4490_v59  ;;  %v4593_v40 = vadd.f32 %v4592_v5, %v4591_v35 }
 0x1cf   : > { %v3477_v61 = vpop.permute.xlu1 %3476  ;;  %v4595_v55 = vadd.f32 %v4594_v39, %v4593_v40  ;;  %v4494_v56 = vadd.f32 %v4493_v62, %v4492_v28 }
 0x1d0   : > { %3512 = vst.msk [vmem:[#allocation3 + $0x68] sm:$0xff] %vm3498_vm15, %v3477_v61 }
 0x1d1   : > { %v4597_v63 = vadd.f32 %v4596_v38, %v4595_v55 }
 0x1d3   : > { %v3654_v18 = vpop.permute.xlu1 %3653  ;;  %v4249_v46 = vld [vmem:[#allocation3 + $0x60] sm:$0xff] }
 0x1d4   : > { %v4199_v49 = vpop.permute.xlu0 %4198  ;;  %3689 = vst.msk [vmem:[#allocation3 + $0x68] sm:$0xff] %vm3675_vm1, %v3654_v18  ;;  %5352 = vmatprep.mubr.msk.bf16.mxu1 %vm4273_vm5, %v4249_v46  ;;  %v5334_v11 = vpop.f32.mrb[4].mxu0 }
 0x1d5   : > { %4234 = vst.msk [vmem:[#allocation3 + $0x68] sm:$0xff] %vm4220_vm2, %v4199_v49  ;;  %v5277_v31 = vpack.c.bf16 %v5334_v11, %v5334_v11  ;;  %v4376_v24 = vpop.f32.mrb[5].mxu0  ;;  %v4565_v36 = vmul.f32 %v5334_v11, %v5334_v11  ;;  %v4499_v22 = vsel %vm4487_vm3, %v5334_v11, 0.0 }
 0x1d6   : > { %v4495_v2 = vsel %vm4487_vm3, %v4376_v24, 0.0  ;;  %v4563_v20 = vmul.f32 %v4376_v24, %v4376_v24  ;;  %v5275_v42 = vpack.c.bf16 %v4376_v24, %v4376_v24  ;;  %v5335_v16 = vpop.f32.mrb[6].mxu0 }
 0x1d7   : > { %v1182_v30 = vpop.permute.xlu1 %1181  ;;  %4796 = vst.msk [vmem:[%s6692_s16 + $0x18] sm:$0xf] %vm4789_vm0, %v5277_v31  ;;  %v4496_v45 = vadd.f32 %v4495_v2, %v4494_v56  ;;  %v5278_v48 = vpack.c.bf16 %v5335_v16, %v5335_v16  ;;  %v4379_v12 = vpop.f32.mrb[7].mxu0  ;;  %v4566_v34 = vmul.f32 %v5335_v16, %v5335_v16  ;;  %v4602_v13 = vsel %vm4487_vm3, %v4565_v36, 0.0 }
 0x1d8   : > { %v1730_v6 = vpop.permute.xlu0 %1729  ;;  %1216 = vst.msk [vmem:[#allocation3 + $0x70] sm:$0xff] %vm1201_vm10, %v1182_v30  ;;  %v4598_v58 = vsel %vm4487_vm3, %v4563_v20, 0.0  ;;  %v4497_v14 = vsel %vm4487_vm3, %v4379_v12, 0.0  ;;  %v4564_v50 = vmul.f32 %v4379_v12, %v4379_v12  ;;  %v5276_v51 = vpack.c.bf16 %v4379_v12, %v4379_v12 }
 0x1d9   : > { %1764 = vst.msk [vmem:[#allocation3 + $0x70] sm:$0xff] %vm1749_vm11, %v1730_v6  ;;  %v4599_v10 = vadd.f32 %v4598_v58, %v4597_v63  ;;  %v4498_v27 = vadd.f32 %v4497_v14, %v4496_v45  ;;  %v4501_v52 = vsel %vm4487_vm3, %v5335_v16, 0.0  ;;  %v4604_v0 = vsel %vm4487_vm3, %v4566_v34, 0.0 }
 0x1da   : > { %4794 = vst.msk [vmem:[%s6692_s16 + $0x10] sm:$0xf] %vm4789_vm0, %v5275_v42  ;;  %4797 = vst.msk [vmem:[%s6692_s16 + $0x1c] sm:$0xf] %vm4789_vm0, %v5278_v48  ;;  %v4600_v15 = vsel %vm4487_vm3, %v4564_v50, 0.0 }
 0x1db   : > { %v1184_v29 = vpop.permute.xlu1 %1183  ;;  %4795 = vst.msk [vmem:[%s6692_s16 + $0x14] sm:$0xf] %vm4789_vm0, %v5276_v51  ;;  %v4500_v44 = vadd.f32 %v4499_v22, %v4498_v27  ;;  %v4601_v47 = vadd.f32 %v4600_v15, %v4599_v10 }
 0x1dc   : > { %1217 = vst.msk [vmem:[#allocation3 + $0x78] sm:$0xff] %vm1201_vm10, %v1184_v29  ;;  %v4250_v41 = vld [vmem:[#allocation3 + $0x68] sm:$0xff] }
 0x1dd   : > { %5353 = vmatmul.mubr.msk.bf16.gmra.mrb[8].mxu1 %vm4273_vm5, %v4250_v41  ;;  %v2243_v26 = vpop.permute.xlu0 %2242  ;;  %v4603_v57 = vadd.f32 %v4602_v13, %v4601_v47  ;;  %v4502_v60 = vadd.f32 %v4501_v52, %v4500_v44 }
 0x1de   : > { %2277 = vst.msk [vmem:[#allocation3 + $0x70] sm:$0xff] %vm2262_vm12, %v2243_v26 }
 0x1df   : > { %v1732_v21 = vpop.permute.xlu1 %1731  ;;  %v4605_v33 = vadd.f32 %v4604_v0, %v4603_v57 }
 0x1e0   : > { %1765 = vst.msk [vmem:[#allocation3 + $0x78] sm:$0xff] %vm1749_vm11, %v1732_v21 }
 0x1e1   : > { %v2420_v43 = vpop.permute.xlu0 %2419 }
 0x1e2   : > { %2454 = vst.msk [vmem:[#allocation3 + $0x70] sm:$0xff] %vm2439_vm13, %v2420_v43 }
 0x1e3   : > { %v2245_v4 = vpop.permute.xlu1 %2244 }
 0x1e4   : > { %2278 = vst.msk [vmem:[#allocation3 + $0x78] sm:$0xff] %vm2262_vm12, %v2245_v4 }
 0x1e7   : > { %v2422_v23 = vpop.permute.xlu1 %2421 }
 0x1e8   : > { %2455 = vst.msk [vmem:[#allocation3 + $0x78] sm:$0xff] %vm2439_vm13, %v2422_v23 }
 0x1e9   : > { %v2965_v8 = vpop.permute.xlu0 %2964 }
 0x1ea   : > { %2999 = vst.msk [vmem:[#allocation3 + $0x70] sm:$0xff] %vm2984_vm14, %v2965_v8 }
 0x1f0   : > { %v2967_v25 = vpop.permute.xlu1 %2966 }
 0x1f1   : > { %3000 = vst.msk [vmem:[#allocation3 + $0x78] sm:$0xff] %vm2984_vm14, %v2967_v25 }
 0x1f4   : > { %v3479_v53 = vpop.permute.xlu0 %3478 }
 0x1f5   : > { %3513 = vst.msk [vmem:[#allocation3 + $0x70] sm:$0xff] %vm3498_vm15, %v3479_v53 }
 0x1f7   : > { %v3481_v7 = vpop.permute.xlu1 %3480 }
 0x1f8   : > { %3514 = vst.msk [vmem:[#allocation3 + $0x78] sm:$0xff] %vm3498_vm15, %v3481_v7  ;;  %v3656_v1 = vpop.permute.xlu0 %3655 }
 0x1f9   : > { %3690 = vst.msk [vmem:[#allocation3 + $0x70] sm:$0xff] %vm3675_vm1, %v3656_v1 }
 0x1fb   : > { %v3658_v37 = vpop.permute.xlu1 %3657 }
 0x1fc   : > { %3691 = vst.msk [vmem:[#allocation3 + $0x78] sm:$0xff] %vm3675_vm1, %v3658_v37 }
 0x1fd   : > { %v4201_v54 = vpop.permute.xlu0 %4200 }
 0x1fe   : > { %4235 = vst.msk [vmem:[#allocation3 + $0x70] sm:$0xff] %vm4220_vm2, %v4201_v54 }
 0x203   : > { %v4203_v17 = vpop.permute.xlu1 %4202 }
 0x204   : > { %4236 = vst.msk [vmem:[#allocation3 + $0x78] sm:$0xff] %vm4220_vm2, %v4203_v17 }
 0x205   : > { %v4251_v3 = vld [vmem:[#allocation3 + $0x70] sm:$0xff] }
 0x206   : > { %5356 = vmatprep.mubr.msk.bf16.mxu1 %vm4273_vm5, %v4251_v3  ;;  %v5338_v32 = vpop.f32.mrb[8].mxu0 }
 0x207   : > { %v5281_v59 = vpack.c.bf16 %v5338_v32, %v5338_v32  ;;  %v4392_v9 = vpop.f32.mrb[9].mxu0  ;;  %v4569_v40 = vmul.f32 %v5338_v32, %v5338_v32  ;;  %v4507_v11 = vsel %vm4487_vm3, %v5338_v32, 0.0 }
 0x208   : > { %v4503_v35 = vsel %vm4487_vm3, %v4392_v9, 0.0  ;;  %v4567_v19 = vmul.f32 %v4392_v9, %v4392_v9  ;;  %v5279_v5 = vpack.c.bf16 %v4392_v9, %v4392_v9  ;;  %v5339_v28 = vpop.f32.mrb[10].mxu0 }
 0x209   : > { %4800 = vst.msk [vmem:[%s6692_s16 + $0x28] sm:$0xf] %vm4789_vm0, %v5281_v59  ;;  %v4504_v39 = vadd.f32 %v4503_v35, %v4502_v60  ;;  %v4395_v62 = vpop.f32.mrb[11].mxu0  ;;  %v5282_v55 = vpack.c.bf16 %v5339_v28, %v5339_v28  ;;  %v4570_v31 = vmul.f32 %v5339_v28, %v5339_v28  ;;  %v4610_v2 = vsel %vm4487_vm3, %v4569_v40, 0.0 }
 0x20a   : > { %v4606_v61 = vsel %vm4487_vm3, %v4567_v19, 0.0  ;;  %4798 = vst.msk [vmem:[%s6692_s16 + $0x20] sm:$0xf] %vm4789_vm0, %v5279_v5  ;;  %v4505_v56 = vsel %vm4487_vm3, %v4395_v62, 0.0  ;;  %v4568_v38 = vmul.f32 %v4395_v62, %v4395_v62  ;;  %v5280_v46 = vpack.c.bf16 %v4395_v62, %v4395_v62 }
 0x20b   : > { %v4252_v63 = vld [vmem:[#allocation3 + $0x78] sm:$0xff]  ;;  %v4607_v18 = vadd.f32 %v4606_v61, %v4605_v33  ;;  %v4506_v49 = vadd.f32 %v4505_v56, %v4504_v39  ;;  %4801 = vst.msk [vmem:[%s6692_s16 + $0x2c] sm:$0xf] %vm4789_vm0, %v5282_v55  ;;  %v4509_v20 = vsel %vm4487_vm3, %v5339_v28, 0.0  ;;  %v4612_v16 = vsel %vm4487_vm3, %v4570_v31, 0.0 }
 0x20c   : > { %5357 = vmatmul.mubr.msk.bf16.gmra.mrb[12].mxu1 %vm4273_vm5, %v4252_v63  ;;  %v4608_v24 = vsel %vm4487_vm3, %v4568_v38, 0.0  ;;  %4799 = vst.msk [vmem:[%s6692_s16 + $0x24] sm:$0xf] %vm4789_vm0, %v5280_v46 }
 0x20d   : > { %v4508_v30 = vadd.f32 %v4507_v11, %v4506_v49  ;;  %v4609_v6 = vadd.f32 %v4608_v24, %v4607_v18 }
 0x20f   : > { %v4611_v42 = vadd.f32 %v4610_v2, %v4609_v6  ;;  %v4510_v45 = vadd.f32 %v4509_v20, %v4508_v30 }
 0x211   : > { %v4613_v36 = vadd.f32 %v4612_v16, %v4611_v42 }
 0x235   : > { %v5342_v58 = vpop.f32.mrb[12].mxu0 }
 0x236   : > { %v5285_v48 = vpack.c.bf16 %v5342_v58, %v5342_v58  ;;  %v4408_v12 = vpop.f32.mrb[13].mxu0  ;;  %v4573_v29 = vmul.f32 %v5342_v58, %v5342_v58  ;;  %v4515_v52 = vsel %vm4487_vm3, %v5342_v58, 0.0 }
 0x237   : > { %v4511_v10 = vsel %vm4487_vm3, %v4408_v12, 0.0  ;;  %v4571_v14 = vmul.f32 %v4408_v12, %v4408_v12  ;;  %v5283_v50 = vpack.c.bf16 %v4408_v12, %v4408_v12  ;;  %v5343_v51 = vpop.f32.mrb[14].mxu0 }
 0x238   : > { %4804 = vst.msk [vmem:[%s6692_s16 + $0x38] sm:$0xf] %vm4789_vm0, %v5285_v48  ;;  %v4512_v27 = vadd.f32 %v4511_v10, %v4510_v45  ;;  %v4411_v41 = vpop.f32.mrb[15].mxu0  ;;  %v5286_v34 = vpack.c.bf16 %v5343_v51, %v5343_v51  ;;  %v4574_v21 = vmul.f32 %v5343_v51, %v5343_v51  ;;  %v4618_v43 = vsel %vm4487_vm3, %v4573_v29, 0.0 }
 0x239   : > { %v4614_v22 = vsel %vm4487_vm3, %v4571_v14, 0.0  ;;  %4802 = vst.msk [vmem:[%s6692_s16 + $0x30] sm:$0xf] %vm4789_vm0, %v5283_v50  ;;  %v4513_v15 = vsel %vm4487_vm3, %v4411_v41, 0.0  ;;  %v4572_v26 = vmul.f32 %v4411_v41, %v4411_v41  ;;  %v5284_v13 = vpack.c.bf16 %v4411_v41, %v4411_v41 }
 0x23a   : > { %v4615_v44 = vadd.f32 %v4614_v22, %v4613_v36  ;;  %v4514_v47 = vadd.f32 %v4513_v15, %v4512_v27  ;;  %4805 = vst.msk [vmem:[%s6692_s16 + $0x3c] sm:$0xf] %vm4789_vm0, %v5286_v34  ;;  %v4517_v33 = vsel %vm4487_vm3, %v5343_v51, 0.0  ;;  %v4620_v8 = vsel %vm4487_vm3, %v4574_v21, 0.0 }
 0x23b   : > { %v4616_v57 = vsel %vm4487_vm3, %v4572_v26, 0.0  ;;  %4803 = vst.msk [vmem:[%s6692_s16 + $0x34] sm:$0xf] %vm4789_vm0, %v5284_v13 }
 0x23c   : > { %v4516_v60 = vadd.f32 %v4515_v52, %v4514_v47  ;;  %v4617_v0 = vadd.f32 %v4616_v57, %v4615_v44 }
 0x23e   : > { %v4619_v4 = vadd.f32 %v4618_v43, %v4617_v0  ;;  %v4518_v23 = vadd.f32 %v4517_v33, %v4516_v60 }
 0x240   : > { %v4621_v25 = vadd.f32 %v4620_v8, %v4619_v4 }
 0x262   : > { %v5346_v53 = vpop.f32.mrb[0].mxu1 }
 0x263   : > { %v5289_v7 = vpack.c.bf16 %v5346_v53, %v5346_v53  ;;  %v4424_v1 = vpop.f32.mrb[1].mxu1  ;;  %v4577_v32 = vmul.f32 %v5346_v53, %v5346_v53  ;;  %v4523_v61 = vsel %vm4487_vm3, %v5346_v53, 0.0 }
 0x264   : > { %v4519_v37 = vsel %vm4487_vm3, %v4424_v1, 0.0  ;;  %v4575_v54 = vmul.f32 %v4424_v1, %v4424_v1  ;;  %v5287_v17 = vpack.c.bf16 %v4424_v1, %v4424_v1  ;;  %v5347_v3 = vpop.f32.mrb[2].mxu1 }
 0x265   : > { %4808 = vst.msk [vmem:[%s6692_s16 + $0x48] sm:$0xf] %vm4789_vm0, %v5289_v7  ;;  %v4520_v59 = vadd.f32 %v4519_v37, %v4518_v23  ;;  %v4427_v9 = vpop.f32.mrb[3].mxu1  ;;  %v5290_v19 = vpack.c.bf16 %v5347_v3, %v5347_v3  ;;  %v4578_v55 = vmul.f32 %v5347_v3, %v5347_v3  ;;  %v4626_v18 = vsel %vm4487_vm3, %v4577_v32, 0.0 }
 0x266   : > { %v4622_v35 = vsel %vm4487_vm3, %v4575_v54, 0.0  ;;  %4806 = vst.msk [vmem:[%s6692_s16 + $0x40] sm:$0xf] %vm4789_vm0, %v5287_v17  ;;  %v4521_v5 = vsel %vm4487_vm3, %v4427_v9, 0.0  ;;  %v4576_v28 = vmul.f32 %v4427_v9, %v4427_v9  ;;  %v5288_v62 = vpack.c.bf16 %v4427_v9, %v4427_v9 }
 0x267   : > { %v4623_v40 = vadd.f32 %v4622_v35, %v4621_v25  ;;  %v4522_v39 = vadd.f32 %v4521_v5, %v4520_v59  ;;  %4809 = vst.msk [vmem:[%s6692_s16 + $0x4c] sm:$0xf] %vm4789_vm0, %v5290_v19  ;;  %v4525_v49 = vsel %vm4487_vm3, %v5347_v3, 0.0  ;;  %v4628_v31 = vsel %vm4487_vm3, %v4578_v55, 0.0 }
 0x268   : > { %v4624_v56 = vsel %vm4487_vm3, %v4576_v28, 0.0  ;;  %4807 = vst.msk [vmem:[%s6692_s16 + $0x44] sm:$0xf] %vm4789_vm0, %v5288_v62 }
 0x269   : > { %v4524_v38 = vadd.f32 %v4523_v61, %v4522_v39  ;;  %v4625_v63 = vadd.f32 %v4624_v56, %v4623_v40 }
 0x26b   : > { %v4627_v46 = vadd.f32 %v4626_v18, %v4625_v63  ;;  %v4526_v11 = vadd.f32 %v4525_v49, %v4524_v38 }
 0x26d   : > { %v4629_v24 = vadd.f32 %v4628_v31, %v4627_v46 }
 0x281   : > { %v5350_v30 = vpop.f32.mrb[4].mxu1 }
 0x282   : > { %v5293_v6 = vpack.c.bf16 %v5350_v30, %v5350_v30  ;;  %v4440_v2 = vpop.f32.mrb[5].mxu1  ;;  %v4581_v36 = vmul.f32 %v5350_v30, %v5350_v30  ;;  %v4531_v41 = vsel %vm4487_vm3, %v5350_v30, 0.0 }
 0x283   : > { %v4527_v20 = vsel %vm4487_vm3, %v4440_v2, 0.0  ;;  %v4579_v42 = vmul.f32 %v4440_v2, %v4440_v2  ;;  %v5291_v45 = vpack.c.bf16 %v4440_v2, %v4440_v2  ;;  %v5351_v16 = vpop.f32.mrb[6].mxu1 }
 0x284   : > { %4812 = vst.msk [vmem:[%s6692_s16 + $0x58] sm:$0xf] %vm4789_vm0, %v5293_v6  ;;  %v4528_v58 = vadd.f32 %v4527_v20, %v4526_v11  ;;  %v4443_v48 = vpop.f32.mrb[7].mxu1  ;;  %v5294_v10 = vpack.c.bf16 %v5351_v16, %v5351_v16  ;;  %v4582_v22 = vmul.f32 %v5351_v16, %v5351_v16  ;;  %v4634_v44 = vsel %vm4487_vm3, %v4581_v36, 0.0 }
 0x285   : > { %v4630_v12 = vsel %vm4487_vm3, %v4579_v42, 0.0  ;;  %4810 = vst.msk [vmem:[%s6692_s16 + $0x50] sm:$0xf] %vm4789_vm0, %v5291_v45  ;;  %v4529_v14 = vsel %vm4487_vm3, %v4443_v48, 0.0  ;;  %v4580_v50 = vmul.f32 %v4443_v48, %v4443_v48  ;;  %v5292_v27 = vpack.c.bf16 %v4443_v48, %v4443_v48 }
 0x286   : > { %v4631_v51 = vadd.f32 %v4630_v12, %v4629_v24  ;;  %v4530_v29 = vadd.f32 %v4529_v14, %v4528_v58  ;;  %4813 = vst.msk [vmem:[%s6692_s16 + $0x5c] sm:$0xf] %vm4789_vm0, %v5294_v10  ;;  %v4533_v47 = vsel %vm4487_vm3, %v5351_v16, 0.0  ;;  %v4636_v21 = vsel %vm4487_vm3, %v4582_v22, 0.0 }
 0x287   : > { %v4632_v34 = vsel %vm4487_vm3, %v4580_v50, 0.0  ;;  %4811 = vst.msk [vmem:[%s6692_s16 + $0x54] sm:$0xf] %vm4789_vm0, %v5292_v27 }
 0x288   : > { %v4532_v15 = vadd.f32 %v4531_v41, %v4530_v29  ;;  %v4633_v26 = vadd.f32 %v4632_v34, %v4631_v51 }
 0x28a   : > { %v4635_v13 = vadd.f32 %v4634_v44, %v4633_v26  ;;  %v4534_v52 = vadd.f32 %v4533_v47, %v4532_v15 }
 0x28c   : > { %v4637_v57 = vadd.f32 %v4636_v21, %v4635_v13 }
 0x2b0   : > { %v5354_v60 = vpop.f32.mrb[8].mxu1 }
 0x2b1   : > { %v5297_v0 = vpack.c.bf16 %v5354_v60, %v5354_v60  ;;  %v4456_v43 = vpop.f32.mrb[9].mxu1  ;;  %v4585_v25 = vmul.f32 %v5354_v60, %v5354_v60  ;;  %v4539_v9 = vsel %vm4487_vm3, %v5354_v60, 0.0 }
 0x2b2   : > { %v4535_v33 = vsel %vm4487_vm3, %v4456_v43, 0.0  ;;  %v4583_v4 = vmul.f32 %v4456_v43, %v4456_v43  ;;  %v5295_v23 = vpack.c.bf16 %v4456_v43, %v4456_v43  ;;  %v5355_v8 = vpop.f32.mrb[10].mxu1 }
 0x2b3   : > { %4816 = vst.msk [vmem:[%s6692_s16 + $0x68] sm:$0xf] %vm4789_vm0, %v5297_v0  ;;  %v4536_v53 = vadd.f32 %v4535_v33, %v4534_v52  ;;  %v4459_v7 = vpop.f32.mrb[11].mxu1  ;;  %v5298_v37 = vpack.c.bf16 %v5355_v8, %v5355_v8  ;;  %v4586_v35 = vmul.f32 %v5355_v8, %v5355_v8  ;;  %v4642_v40 = vsel %vm4487_vm3, %v4585_v25, 0.0 }
 0x2b4   : > { %v4638_v1 = vsel %vm4487_vm3, %v4583_v4, 0.0  ;;  %4814 = vst.msk [vmem:[%s6692_s16 + $0x60] sm:$0xf] %vm4789_vm0, %v5295_v23  ;;  %v4537_v54 = vsel %vm4487_vm3, %v4459_v7, 0.0  ;;  %v4584_v17 = vmul.f32 %v4459_v7, %v4459_v7  ;;  %v5296_v59 = vpack.c.bf16 %v4459_v7, %v4459_v7 }
 0x2b5   : > { %v4639_v3 = vadd.f32 %v4638_v1, %v4637_v57  ;;  %v4538_v32 = vadd.f32 %v4537_v54, %v4536_v53  ;;  %4817 = vst.msk [vmem:[%s6692_s16 + $0x6c] sm:$0xf] %vm4789_vm0, %v5298_v37  ;;  %v4541_v39 = vsel %vm4487_vm3, %v5355_v8, 0.0  ;;  %v4644_v55 = vsel %vm4487_vm3, %v4586_v35, 0.0 }
 0x2b6   : > { %v4640_v19 = vsel %vm4487_vm3, %v4584_v17, 0.0  ;;  %4815 = vst.msk [vmem:[%s6692_s16 + $0x64] sm:$0xf] %vm4789_vm0, %v5296_v59 }
 0x2b7   : > { %v4540_v5 = vadd.f32 %v4539_v9, %v4538_v32  ;;  %v4641_v28 = vadd.f32 %v4640_v19, %v4639_v3 }
 0x2b9   : > { %v4643_v62 = vadd.f32 %v4642_v40, %v4641_v28  ;;  %v4542_v61 = vadd.f32 %v4541_v39, %v4540_v5 }
 0x2bb   : > { %v4645_v56 = vadd.f32 %v4644_v55, %v4643_v62 }
 0x2df   : > { %v5358_v38 = vpop.f32.mrb[12].mxu1 }
 0x2e0   : > { %v5301_v63 = vpack.c.bf16 %v5358_v38, %v5358_v38  ;;  %v4472_v18 = vpop.f32.mrb[13].mxu1  ;;  %v4589_v24 = vmul.f32 %v5358_v38, %v5358_v38  ;;  %v4547_v48 = vsel %vm4487_vm3, %v5358_v38, 0.0 }
 0x2e1   : > { %v4543_v49 = vsel %vm4487_vm3, %v4472_v18, 0.0  ;;  %v4587_v46 = vmul.f32 %v4472_v18, %v4472_v18  ;;  %v5299_v11 = vpack.c.bf16 %v4472_v18, %v4472_v18  ;;  %v5359_v31 = vpop.f32.mrb[14].mxu1 }
 0x2e2   : > { %4820 = vst.msk [vmem:[%s6692_s16 + $0x78] sm:$0xf] %vm4789_vm0, %v5301_v63  ;;  %v4544_v30 = vadd.f32 %v4543_v49, %v4542_v61  ;;  %v4475_v6 = vpop.f32.mrb[15].mxu1  ;;  %v5302_v20 = vpack.c.bf16 %v5359_v31, %v5359_v31  ;;  %v4590_v12 = vmul.f32 %v5359_v31, %v5359_v31  ;;  %v4650_v51 = vsel %vm4487_vm3, %v4589_v24, 0.0 }
 0x2e3   : > { %v4646_v2 = vsel %vm4487_vm3, %v4587_v46, 0.0  ;;  %4818 = vst.msk [vmem:[%s6692_s16 + $0x70] sm:$0xf] %vm4789_vm0, %v5299_v11  ;;  %v4545_v42 = vsel %vm4487_vm3, %v4475_v6, 0.0  ;;  %v4588_v45 = vmul.f32 %v4475_v6, %v4475_v6  ;;  %v5300_v58 = vpack.c.bf16 %v4475_v6, %v4475_v6 }
 0x2e4   : > { %v4647_v16 = vadd.f32 %v4646_v2, %v4645_v56  ;;  %v4546_v36 = vadd.f32 %v4545_v42, %v4544_v30  ;;  %4821 = vst.msk [vmem:[%s6692_s16 + $0x7c] sm:$0xf] %vm4789_vm0, %v5302_v20  ;;  %v4549_v29 = vsel %vm4487_vm3, %v5359_v31, 0.0  ;;  %v4652_v22 = vsel %vm4487_vm3, %v4590_v12, 0.0 }
 0x2e5   : > { %v4648_v10 = vsel %vm4487_vm3, %v4588_v45, 0.0  ;;  %4819 = vst.msk [vmem:[%s6692_s16 + $0x74] sm:$0xf] %vm4789_vm0, %v5300_v58 }
 0x2e6   : > { %v4548_v14 = vadd.f32 %v4547_v48, %v4546_v36  ;;  %v4649_v50 = vadd.f32 %v4648_v10, %v4647_v16 }
 0x2e8   : > { %v4550_v27 = vadd.f32 %v4549_v29, %v4548_v14  ;;  %v4651_v41 = vadd.f32 %v4650_v51, %v4649_v50 }
 0x2ea   : > { %v4551_v34 = vrot.slane %v4550_v27, 4  ;;  %v4653_v15 = vadd.f32 %v4652_v22, %v4651_v41 }
 0x2ec   : > { %v4552_v26 = vadd.f32 %v4551_v34, %v4550_v27  ;;  %v4654_v44 = vrot.slane %v4653_v15, 4 }
 0x2ee   : > { %v4553_v47 = vrot.slane %v4552_v26, 2  ;;  %v4655_v13 = vadd.f32 %v4654_v44, %v4653_v15 }
 0x2f0   : > { %v4554_v52 = vadd.f32 %v4553_v47, %v4552_v26  ;;  %v4656_v21 = vrot.slane %v4655_v13, 2 }
 0x2f2   : > { %v4555_v57 = vrot.slane %v4554_v52, 1  ;;  %v4657_v60 = vadd.f32 %v4656_v21, %v4655_v13 }
 0x2f4   : > { %v4556_v0 = vadd.f32 %v4555_v57, %v4554_v52  ;;  %v4658_v43 = vrot.slane %v4657_v60, 1 }
 0x2f6   : > { %4558 = vst.msk [vmem:[%s282_s22] sm:$0x1] %vm4557_vm6, %v4556_v0  ;;  %v4659_v33 = vadd.f32 %v4658_v43, %v4657_v60 }
 0x2f8   : > { %4660 = vst.msk [vmem:[%s282_s22 + $0x1] sm:$0x1] %vm4557_vm6, %v4659_v33 }
 0x2f9 PF: > { %s16_s0 = sadd.s32 1, %s5474_s0   ;;  %s6871_s18 = smov %s5470_s19 }
 0x2fa   : > { %p13_p5 = scmp.ge.s32.totalorder %s16_s0, 4   ;;  %s6872_s19 = smov %s6874_s1 }
 0x2fc   :  { %15 = sbr.rel (!%p13_p5) target bundleno = 2 (0x2), region = 81 }

</bundles_post_ra>
